<compile_context>
chip_gen: v5e
topology: v5e:2x2
jax: 0.10.0
libtpu: 0.0.40
codegen_flags: <defaults>
</compile_context>

<pallas_src>
import functools

import jax
import jax.numpy as jnp
from jax.experimental import pallas as pl
from jax.experimental.pallas import tpu as pltpu

BN_EPS = 1e-5
LEAKY_SLOPE = 0.2
TILE_M_MAX = 512                        # rows per M-tile (fits v7x VMEM budget)
VMEM_LIMIT_BYTES = 48 * 1024 * 1024     # headroom under v7x's 64 MiB VMEM


def _round_up(x, m):
    return ((x + m - 1) // m) * m


def _pad_and_tile(M):
    """Pick an M tile (multiple of 8) and the padded M it divides."""
    tile = min(TILE_M_MAX, _round_up(M, 8))
    return _round_up(M, tile), tile


# ----------------------------- kernels --------------------------------------

def _matmul_act_kernel(x_ref, w_ref, o_ref, *, act):
    """bf16 matmul (f32 acc) + optional fused LeakyReLU (no-BN layers)."""
    y = jnp.dot(x_ref[...], w_ref[...], preferred_element_type=jnp.float32)
    if act == "leaky":
        y = jnp.where(y >= 0, y, LEAKY_SLOPE * y)
    o_ref[...] = y.astype(o_ref.dtype)


def _matmul_stats_kernel(x_ref, w_ref, y_ref, stats_ref):
    """bf16 matmul (f32 acc) + per-tile per-channel sum / sum-of-squares."""
    y = jnp.dot(x_ref[...], w_ref[...], preferred_element_type=jnp.float32)
    y_ref[...] = y
    stats_ref[0, 0:1, :] = jnp.sum(y, axis=0, keepdims=True)
    stats_ref[0, 1:2, :] = jnp.sum(y * y, axis=0, keepdims=True)


def _bn_act_kernel(y_ref, s_ref, t_ref, o_ref):
    """Folded BatchNorm (y*s + t) + LeakyReLU, tiled over rows."""
    y = y_ref[...] * s_ref[...] + t_ref[...]
    o_ref[...] = jnp.where(y >= 0, y, LEAKY_SLOPE * y).astype(o_ref.dtype)


def _final_projection_kernel(w_ref, x_ref, o_ref):
    """(1, K) @ (K, N) -> (1, N): batch lands on the lane dimension."""
    o_ref[...] = jnp.dot(w_ref[...], x_ref[...], preferred_element_type=jnp.float32)


# --------------------------- pallas_call wrappers ----------------------------

def _tiled_matmul_act(patches, w_mat, tile, act):
    M_pad, K = patches.shape
    Cout = w_mat.shape[1]
    grid = (M_pad // tile,)
    return pl.pallas_call(
        functools.partial(_matmul_act_kernel, act=act),
        grid=grid,
        in_specs=[pl.BlockSpec((tile, K), lambda i: (i, 0)),
                  pl.BlockSpec((K, Cout), lambda i: (0, 0))],
        out_specs=pl.BlockSpec((tile, Cout), lambda i: (i, 0)),
        out_shape=jax.ShapeDtypeStruct((M_pad, Cout), jnp.float32),
        compiler_params=pltpu.CompilerParams(
            dimension_semantics=("parallel",),
            vmem_limit_bytes=VMEM_LIMIT_BYTES),
    )(patches, w_mat)


def _tiled_matmul_stats(patches, w_mat, tile):
    M_pad, K = patches.shape
    Cout = w_mat.shape[1]
    grid = (M_pad // tile,)
    return pl.pallas_call(
        _matmul_stats_kernel,
        grid=grid,
        in_specs=[pl.BlockSpec((tile, K), lambda i: (i, 0)),
                  pl.BlockSpec((K, Cout), lambda i: (0, 0))],
        out_specs=(pl.BlockSpec((tile, Cout), lambda i: (i, 0)),
                   pl.BlockSpec((1, 2, Cout), lambda i: (i, 0, 0))),
        out_shape=(jax.ShapeDtypeStruct((M_pad, Cout), jnp.float32),
                   jax.ShapeDtypeStruct((grid[0], 2, Cout), jnp.float32)),
        compiler_params=pltpu.CompilerParams(
            dimension_semantics=("parallel",),
            vmem_limit_bytes=VMEM_LIMIT_BYTES),
    )(patches, w_mat)


def _tiled_bn_act(y, scale, shift, tile):
    M_pad, Cout = y.shape
    grid = (M_pad // tile,)
    return pl.pallas_call(
        _bn_act_kernel,
        grid=grid,
        in_specs=[pl.BlockSpec((tile, Cout), lambda i: (i, 0)),
                  pl.BlockSpec((1, Cout), lambda i: (0, 0)),
                  pl.BlockSpec((1, Cout), lambda i: (0, 0))],
        out_specs=pl.BlockSpec((tile, Cout), lambda i: (i, 0)),
        out_shape=jax.ShapeDtypeStruct((M_pad, Cout), jnp.float32),
        compiler_params=pltpu.CompilerParams(
            dimension_semantics=("parallel",),
            vmem_limit_bytes=VMEM_LIMIT_BYTES),
    )(y, scale.reshape(1, Cout), shift.reshape(1, Cout))


def _final_projection(feat_nhwc, w):
    """Conv2d(512 -> 1, k = spatial extent) == per-sample dot product."""
    N = feat_nhwc.shape[0]
    K = w.shape[0] * w.shape[1] * w.shape[2]
    x_t = feat_nhwc.reshape(N, K).T.astype(jnp.bfloat16)   # (K, N)
    w_row = w.reshape(K, 1).T.astype(jnp.bfloat16)          # (1, K)
    out = pl.pallas_call(
        _final_projection_kernel,
        in_specs=[pl.BlockSpec((1, K), lambda: (0, 0)),
                  pl.BlockSpec((K, N), lambda: (0, 0))],
        out_specs=pl.BlockSpec((1, N), lambda: (0, 0)),
        out_shape=jax.ShapeDtypeStruct((1, N), jnp.float32),
        compiler_params=pltpu.CompilerParams(
            vmem_limit_bytes=VMEM_LIMIT_BYTES),
    )(w_row, x_t)
    return out.T.reshape(N, 1, 1, 1)   # already NCHW (N, 1, 1, 1)


# ------------------------------- layers --------------------------------------

def _im2col(x_nhwc, k, stride, pad):
    # TODO(synk): build the k*k patches in-kernel from a haloed input tile
    # (manual DMA / P4) to remove the k^2/stride^2 HBM traffic amplification.
    N, H, W, C = x_nhwc.shape
    Ho = (H + 2 * pad - k) // stride + 1
    Wo = (W + 2 * pad - k) // stride + 1
    xp = jnp.pad(x_nhwc, ((0, 0), (pad, pad), (pad, pad), (0, 0)))
    cols = []
    for i in range(k):
        for j in range(k):
            hi = i + (Ho - 1) * stride + 1
            wj = j + (Wo - 1) * stride + 1
            cols.append(xp[:, i:hi:stride, j:wj:stride, :])
    patches = jnp.stack(cols, axis=-2)                 # (N, Ho, Wo, k*k, C)
    patches = patches.reshape(N * Ho * Wo, k * k * C)  # rows enumerate (n,ho,wo)
    return patches, Ho, Wo


def _conv_layer(x_nhwc, w, gamma=None, beta=None, *, k, stride, pad, use_bn, act):
    """Conv2d(bias=False) [+ training-mode BatchNorm2d] [+ LeakyReLU]."""
    N = x_nhwc.shape[0]
    Cout = w.shape[-1]
    patches, Ho, Wo = _im2col(x_nhwc, k, stride, pad)
    M, K = patches.shape
    M_pad, tile = _pad_and_tile(M)
    # zero-pad rows (zeros contribute nothing to the BN sums; we divide by M)
    patches = jnp.pad(patches, ((0, M_pad - M), (0, 0))).astype(jnp.bfloat16)
    w_mat = w.reshape(K, Cout).astype(jnp.bfloat16)

    if not use_bn:
        y = _tiled_matmul_act(patches, w_mat, tile, act)
    else:
        y, stats = _tiled_matmul_stats(patches, w_mat, tile)
        col_sum = jnp.sum(stats[:, 0, :], axis=0)
        col_sqsum = jnp.sum(stats[:, 1, :], axis=0)
        mean = col_sum / M
        var = jnp.maximum(col_sqsum / M - mean * mean, 0.0)   # biased batch var
        scale = gamma * jax.lax.rsqrt(var + BN_EPS)            # fold BN into s,t
        shift = beta - mean * scale
        y = _tiled_bn_act(y, scale, shift, tile)

    return y[:M].reshape(N, Ho, Wo, Cout)


# ------------------------------ full model -----------------------------------

def init_params(key, nc, image_size):
    """Deterministic synthetic parameters (shapes match the PyTorch module)."""
    k_dyn = image_size // 16
    keys = jax.random.split(key, 5)

    def w(k_, kh, cin, cout):   # stored as (kh, kw, cin, cout)
        return 0.02 * jax.random.normal(k_, (kh, kh, cin, cout), jnp.float32)

    return {
        # main_to_l
        "w1": w(keys[0], 4, nc, 64),
        "w2": w(keys[1], 4, 64, 128),
        "g2": jnp.ones((128,), jnp.float32), "b2": jnp.zeros((128,), jnp.float32),
        "w3": w(keys[2], 4, 128, 256),
        "g3": jnp.ones((256,), jnp.float32), "b3": jnp.zeros((256,), jnp.float32),
        # main_after_l
        "w4": w(keys[3], 4, 256, 512),
        "g4": jnp.ones((512,), jnp.float32), "b4": jnp.zeros((512,), jnp.float32),
        "w5": w(keys[4], k_dyn, 512, 1),
    }


def discriminator_wgan_forward(params, x_nchw):
    """Returns (lth, out) exactly like DiscriminatorWGAN.forward, in NCHW."""
    x = jnp.transpose(x_nchw, (0, 2, 3, 1)).astype(jnp.float32)  # NCHW -> NHWC

    # main_to_l
    h = _conv_layer(x, params["w1"], k=4, stride=2, pad=1, use_bn=False, act="leaky")
    h = _conv_layer(h, params["w2"], params["g2"], params["b2"],
                    k=4, stride=2, pad=1, use_bn=True, act="leaky")
    lth = _conv_layer(h, params["w3"], params["g3"], params["b3"],
                      k=4, stride=2, pad=1, use_bn=True, act="leaky")

    # main_after_l
    h = _conv_layer(lth, params["w4"], params["g4"], params["b4"],
                    k=4, stride=2, pad=1, use_bn=True, act="leaky")
    out = _final_projection(h, params["w5"])   # WGAN critic: NO sigmoid

    return jnp.transpose(lth, (0, 3, 1, 2)), out


if __name__ == "__main__":
    cfg = {"nc": 3, "image_size": 16}   # kernel_size_dyn = 16 // 16 = 1
    batch = 2

    key = jax.random.PRNGKey(0)
    pkey, xkey = jax.random.split(key)
    params = init_params(pkey, cfg["nc"], cfg["image_size"])
    x = jax.random.normal(
        xkey, (batch, cfg["nc"], cfg["image_size"], cfg["image_size"]), jnp.float32)

    lth, out = jax.jit(discriminator_wgan_forward)(params, x)
    jax.block_until_ready((lth, out))

    assert lth.shape == (batch, 256, cfg["image_size"] // 8, cfg["image_size"] // 8)
    assert out.shape == (batch, 1, 1, 1)
    assert bool(jnp.all(jnp.isfinite(lth))) and bool(jnp.all(jnp.isfinite(out)))
    print("KERNEL_OK")
</pallas_src>

<mosaic_0001>
module attributes {stable_mosaic.version = 11 : i64} {
  func.func @_matmul_act_kernel(%arg0: i32, %arg1: memref<128x48xbf16, #tpu.memory_space<vmem>>, %arg2: memref<48x64xbf16, #tpu.memory_space<vmem>>, %arg3: memref<128x64xf32, #tpu.memory_space<vmem>>) attributes {dimension_semantics = [#tpu.dimension_semantics<parallel>], iteration_bounds = array<i64: 1>, scalar_prefetch = 0 : i64, scratch_operands = 0 : i64, tpu.core_type = #tpu.core_type<tc>, window_params = [{transform_indices = @transform_0, window_bounds = array<i64: 128, 48>}, {pipeline_mode = #tpu.pipeline_mode<synchronous>, transform_indices = @transform_1, window_bounds = array<i64: 48, 64>}, {transform_indices = @transform_2, window_bounds = array<i64: 128, 64>}]} {
    %c0 = arith.constant 0 : index
    %c0_0 = arith.constant 0 : index
    %0 = vector.load %arg1[%c0, %c0_0] : memref<128x48xbf16, #tpu.memory_space<vmem>>, vector<128x48xbf16>
    %c0_1 = arith.constant 0 : index
    %c0_2 = arith.constant 0 : index
    %1 = vector.load %arg2[%c0_1, %c0_2] : memref<48x64xbf16, #tpu.memory_space<vmem>>, vector<48x64xbf16>
    %cst = arith.constant dense<0.000000e+00> : vector<128x64xf32>
    %2 = tpu.matmul %0, %1, %cst {dimension_numbers = #tpu.dot_dimension_numbers<[1], [0], [0], [1], [0, 0, 1, 1], [], []>} : vector<128x48xbf16>, vector<48x64xbf16>, vector<128x64xf32> -> vector<128x64xf32>
    %cst_3 = arith.constant 0.000000e+00 : f32
    %3 = vector.broadcast %cst_3 : f32 to vector<128x64xf32>
    %4 = arith.cmpf oge, %2, %3 : vector<128x64xf32>
    %cst_4 = arith.constant 2.000000e-01 : f32
    %5 = vector.broadcast %cst_4 : f32 to vector<128x64xf32>
    %6 = arith.mulf %5, %2 : vector<128x64xf32>
    %7 = arith.select %4, %2, %6 : vector<128x64xi1>, vector<128x64xf32>
    %c0_5 = arith.constant 0 : index
    %c0_6 = arith.constant 0 : index
    %8 = vector.load %arg3[%c0_5, %c0_6] : memref<128x64xf32, #tpu.memory_space<vmem>>, vector<128x64xf32>
    tpu.vector_store %arg3[%c0_5, %c0_6], %7 {strides = array<i32>} : memref<128x64xf32, #tpu.memory_space<vmem>>, vector<128x64xf32>,
    return
  }
  func.func @transform_0(%arg0: i32) -> (i32, i32) {
    %c0_i32 = arith.constant 0 : i32
    %c0_i32_0 = arith.constant 0 : i32
    return %arg0, %c0_i32 : i32, i32
  }
  func.func @transform_1(%arg0: i32) -> (i32, i32) {
    %c0_i32 = arith.constant 0 : i32
    %c0_i32_0 = arith.constant 0 : i32
    %c0_i32_1 = arith.constant 0 : i32
    return %c0_i32, %c0_i32_0 : i32, i32
  }
  func.func @transform_2(%arg0: i32) -> (i32, i32) {
    %c0_i32 = arith.constant 0 : i32
    %c0_i32_0 = arith.constant 0 : i32
    return %arg0, %c0_i32 : i32, i32
  }
}

module attributes {stable_mosaic.version = 11 : i64} {
  func.func @_matmul_stats_kernel(%arg0: i32, %arg1: memref<32x1024xbf16, #tpu.memory_space<vmem>>, %arg2: memref<1024x128xbf16, #tpu.memory_space<vmem>>, %arg3: memref<32x128xf32, #tpu.memory_space<vmem>>, %arg4: memref<1x2x128xf32, #tpu.memory_space<vmem>>) attributes {dimension_semantics = [#tpu.dimension_semantics<parallel>], iteration_bounds = array<i64: 1>, scalar_prefetch = 0 : i64, scratch_operands = 0 : i64, tpu.core_type = #tpu.core_type<tc>, window_params = [{transform_indices = @transform_0, window_bounds = array<i64: 32, 1024>}, {pipeline_mode = #tpu.pipeline_mode<synchronous>, transform_indices = @transform_1, window_bounds = array<i64: 1024, 128>}, {transform_indices = @transform_2, window_bounds = array<i64: 32, 128>}, {transform_indices = @transform_3, window_bounds = array<i64: 1, 2, 128>}]} {
    %c0 = arith.constant 0 : index
    %c0_0 = arith.constant 0 : index
    %0 = vector.load %arg1[%c0, %c0_0] : memref<32x1024xbf16, #tpu.memory_space<vmem>>, vector<32x1024xbf16>
    %c0_1 = arith.constant 0 : index
    %c0_2 = arith.constant 0 : index
    %1 = vector.load %arg2[%c0_1, %c0_2] : memref<1024x128xbf16, #tpu.memory_space<vmem>>, vector<1024x128xbf16>
    %cst = arith.constant dense<0.000000e+00> : vector<32x128xf32>
    %2 = tpu.matmul %0, %1, %cst {dimension_numbers = #tpu.dot_dimension_numbers<[1], [0], [0], [1], [0, 0, 1, 1], [], []>} : vector<32x1024xbf16>, vector<1024x128xbf16>, vector<32x128xf32> -> vector<32x128xf32>
    %c0_3 = arith.constant 0 : index
    %c0_4 = arith.constant 0 : index
    %3 = vector.load %arg3[%c0_3, %c0_4] : memref<32x128xf32, #tpu.memory_space<vmem>>, vector<32x128xf32>
    tpu.vector_store %arg3[%c0_3, %c0_4], %2 {strides = array<i32>} : memref<32x128xf32, #tpu.memory_space<vmem>>, vector<32x128xf32>,
    %cst_5 = arith.constant dense<0.000000e+00> : vector<128xf32>
    %4 = vector.multi_reduction <add>, %2, %cst_5 [0] : vector<32x128xf32> to vector<128xf32>
    %5 = vector.shape_cast %4 : vector<128xf32> to vector<1x128xf32>
    %c0_6 = arith.constant 0 : index
    %c0_7 = arith.constant 0 : index
    %c0_8 = arith.constant 0 : index
    %6 = vector.load %arg4[%c0_6, %c0_7, %c0_8] : memref<1x2x128xf32, #tpu.memory_space<vmem>>, vector<1x1x128xf32>
    %7 = vector.shape_cast %6 : vector<1x1x128xf32> to vector<1x128xf32>
    %8 = vector.shape_cast %5 : vector<1x128xf32> to vector<1x1x128xf32>
    tpu.vector_store %arg4[%c0_6, %c0_7, %c0_8], %8 {strides = array<i32>} : memref<1x2x128xf32, #tpu.memory_space<vmem>>, vector<1x1x128xf32>,
    %9 = arith.mulf %2, %2 : vector<32x128xf32>
    %cst_9 = arith.constant dense<0.000000e+00> : vector<128xf32>
    %10 = vector.multi_reduction <add>, %9, %cst_9 [0] : vector<32x128xf32> to vector<128xf32>
    %11 = vector.shape_cast %10 : vector<128xf32> to vector<1x128xf32>
    %c0_10 = arith.constant 0 : index
    %c1 = arith.constant 1 : index
    %c0_11 = arith.constant 0 : index
    %12 = vector.load %arg4[%c0_10, %c1, %c0_11] : memref<1x2x128xf32, #tpu.memory_space<vmem>>, vector<1x1x128xf32>
    %13 = vector.shape_cast %12 : vector<1x1x128xf32> to vector<1x128xf32>
    %14 = vector.shape_cast %11 : vector<1x128xf32> to vector<1x1x128xf32>
    tpu.vector_store %arg4[%c0_10, %c1, %c0_11], %14 {strides = array<i32>} : memref<1x2x128xf32, #tpu.memory_space<vmem>>, vector<1x1x128xf32>,
    return
  }
  func.func @transform_0(%arg0: i32) -> (i32, i32) {
    %c0_i32 = arith.constant 0 : i32
    %c0_i32_0 = arith.constant 0 : i32
    return %arg0, %c0_i32 : i32, i32
  }
  func.func @transform_1(%arg0: i32) -> (i32, i32) {
    %c0_i32 = arith.constant 0 : i32
    %c0_i32_0 = arith.constant 0 : i32
    %c0_i32_1 = arith.constant 0 : i32
    return %c0_i32, %c0_i32_0 : i32, i32
  }
  func.func @transform_2(%arg0: i32) -> (i32, i32) {
    %c0_i32 = arith.constant 0 : i32
    %c0_i32_0 = arith.constant 0 : i32
    return %arg0, %c0_i32 : i32, i32
  }
  func.func @transform_3(%arg0: i32) -> (i32, i32, i32) {
    %c0_i32 = arith.constant 0 : i32
    %c0_i32_0 = arith.constant 0 : i32
    %c0_i32_1 = arith.constant 0 : i32
    return %arg0, %c0_i32, %c0_i32_0 : i32, i32, i32
  }
}

module attributes {stable_mosaic.version = 11 : i64} {
  func.func @_bn_act_kernel(%arg0: i32, %arg1: memref<32x128xf32, #tpu.memory_space<vmem>>, %arg2: memref<1x128xf32, #tpu.memory_space<vmem>>, %arg3: memref<1x128xf32, #tpu.memory_space<vmem>>, %arg4: memref<32x128xf32, #tpu.memory_space<vmem>>) attributes {dimension_semantics = [#tpu.dimension_semantics<parallel>], iteration_bounds = array<i64: 1>, scalar_prefetch = 0 : i64, scratch_operands = 0 : i64, tpu.core_type = #tpu.core_type<tc>, window_params = [{transform_indices = @transform_0, window_bounds = array<i64: 32, 128>}, {pipeline_mode = #tpu.pipeline_mode<synchronous>, transform_indices = @transform_1, window_bounds = array<i64: 1, 128>}, {pipeline_mode = #tpu.pipeline_mode<synchronous>, transform_indices = @transform_2, window_bounds = array<i64: 1, 128>}, {transform_indices = @transform_3, window_bounds = array<i64: 32, 128>}]} {
    %c0 = arith.constant 0 : index
    %c0_0 = arith.constant 0 : index
    %0 = vector.load %arg1[%c0, %c0_0] : memref<32x128xf32, #tpu.memory_space<vmem>>, vector<32x128xf32>
    %c0_1 = arith.constant 0 : index
    %c0_2 = arith.constant 0 : index
    %1 = vector.load %arg2[%c0_1, %c0_2] : memref<1x128xf32, #tpu.memory_space<vmem>>, vector<1x128xf32>
    %2 = vector.broadcast %1 : vector<1x128xf32> to vector<32x128xf32>
    %3 = arith.mulf %0, %2 : vector<32x128xf32>
    %c0_3 = arith.constant 0 : index
    %c0_4 = arith.constant 0 : index
    %4 = vector.load %arg3[%c0_3, %c0_4] : memref<1x128xf32, #tpu.memory_space<vmem>>, vector<1x128xf32>
    %5 = vector.broadcast %4 : vector<1x128xf32> to vector<32x128xf32>
    %6 = arith.addf %3, %5 : vector<32x128xf32>
    %cst = arith.constant 0.000000e+00 : f32
    %7 = vector.broadcast %cst : f32 to vector<32x128xf32>
    %8 = arith.cmpf oge, %6, %7 : vector<32x128xf32>
    %cst_5 = arith.constant 2.000000e-01 : f32
    %9 = vector.broadcast %cst_5 : f32 to vector<32x128xf32>
    %10 = arith.mulf %9, %6 : vector<32x128xf32>
    %11 = arith.select %8, %6, %10 : vector<32x128xi1>, vector<32x128xf32>
    %c0_6 = arith.constant 0 : index
    %c0_7 = arith.constant 0 : index
    %12 = vector.load %arg4[%c0_6, %c0_7] : memref<32x128xf32, #tpu.memory_space<vmem>>, vector<32x128xf32>
    tpu.vector_store %arg4[%c0_6, %c0_7], %11 {strides = array<i32>} : memref<32x128xf32, #tpu.memory_space<vmem>>, vector<32x128xf32>,
    return
  }
  func.func @transform_0(%arg0: i32) -> (i32, i32) {
    %c0_i32 = arith.constant 0 : i32
    %c0_i32_0 = arith.constant 0 : i32
    return %arg0, %c0_i32 : i32, i32
  }
  func.func @transform_1(%arg0: i32) -> (i32, i32) {
    %c0_i32 = arith.constant 0 : i32
    %c0_i32_0 = arith.constant 0 : i32
    %c0_i32_1 = arith.constant 0 : i32
    return %c0_i32, %c0_i32_0 : i32, i32
  }
  func.func @transform_2(%arg0: i32) -> (i32, i32) {
    %c0_i32 = arith.constant 0 : i32
    %c0_i32_0 = arith.constant 0 : i32
    %c0_i32_1 = arith.constant 0 : i32
    return %c0_i32, %c0_i32_0 : i32, i32
  }
  func.func @transform_3(%arg0: i32) -> (i32, i32) {
    %c0_i32 = arith.constant 0 : i32
    %c0_i32_0 = arith.constant 0 : i32
    return %arg0, %c0_i32 : i32, i32
  }
}

module attributes {stable_mosaic.version = 11 : i64} {
  func.func @_bn_act_kernel(%arg0: i32, %arg1: memref<8x256xf32, #tpu.memory_space<vmem>>, %arg2: memref<1x256xf32, #tpu.memory_space<vmem>>, %arg3: memref<1x256xf32, #tpu.memory_space<vmem>>, %arg4: memref<8x256xf32, #tpu.memory_space<vmem>>) attributes {dimension_semantics = [#tpu.dimension_semantics<parallel>], iteration_bounds = array<i64: 1>, scalar_prefetch = 0 : i64, scratch_operands = 0 : i64, tpu.core_type = #tpu.core_type<tc>, window_params = [{transform_indices = @transform_0, window_bounds = array<i64: 8, 256>}, {pipeline_mode = #tpu.pipeline_mode<synchronous>, transform_indices = @transform_1, window_bounds = array<i64: 1, 256>}, {pipeline_mode = #tpu.pipeline_mode<synchronous>, transform_indices = @transform_2, window_bounds = array<i64: 1, 256>}, {transform_indices = @transform_3, window_bounds = array<i64: 8, 256>}]} {
    %c0 = arith.constant 0 : index
    %c0_0 = arith.constant 0 : index
    %0 = vector.load %arg1[%c0, %c0_0] : memref<8x256xf32, #tpu.memory_space<vmem>>, vector<8x256xf32>
    %c0_1 = arith.constant 0 : index
    %c0_2 = arith.constant 0 : index
    %1 = vector.load %arg2[%c0_1, %c0_2] : memref<1x256xf32, #tpu.memory_space<vmem>>, vector<1x256xf32>
    %2 = vector.broadcast %1 : vector<1x256xf32> to vector<8x256xf32>
    %3 = arith.mulf %0, %2 : vector<8x256xf32>
    %c0_3 = arith.constant 0 : index
    %c0_4 = arith.constant 0 : index
    %4 = vector.load %arg3[%c0_3, %c0_4] : memref<1x256xf32, #tpu.memory_space<vmem>>, vector<1x256xf32>
    %5 = vector.broadcast %4 : vector<1x256xf32> to vector<8x256xf32>
    %6 = arith.addf %3, %5 : vector<8x256xf32>
    %cst = arith.constant 0.000000e+00 : f32
    %7 = vector.broadcast %cst : f32 to vector<8x256xf32>
    %8 = arith.cmpf oge, %6, %7 : vector<8x256xf32>
    %cst_5 = arith.constant 2.000000e-01 : f32
    %9 = vector.broadcast %cst_5 : f32 to vector<8x256xf32>
    %10 = arith.mulf %9, %6 : vector<8x256xf32>
    %11 = arith.select %8, %6, %10 : vector<8x256xi1>, vector<8x256xf32>
    %c0_6 = arith.constant 0 : index
    %c0_7 = arith.constant 0 : index
    %12 = vector.load %arg4[%c0_6, %c0_7] : memref<8x256xf32, #tpu.memory_space<vmem>>, vector<8x256xf32>
    tpu.vector_store %arg4[%c0_6, %c0_7], %11 {strides = array<i32>} : memref<8x256xf32, #tpu.memory_space<vmem>>, vector<8x256xf32>,
    return
  }
  func.func @transform_0(%arg0: i32) -> (i32, i32) {
    %c0_i32 = arith.constant 0 : i32
    %c0_i32_0 = arith.constant 0 : i32
    return %arg0, %c0_i32 : i32, i32
  }
  func.func @transform_1(%arg0: i32) -> (i32, i32) {
    %c0_i32 = arith.constant 0 : i32
    %c0_i32_0 = arith.constant 0 : i32
    %c0_i32_1 = arith.constant 0 : i32
    return %c0_i32, %c0_i32_0 : i32, i32
  }
  func.func @transform_2(%arg0: i32) -> (i32, i32) {
    %c0_i32 = arith.constant 0 : i32
    %c0_i32_0 = arith.constant 0 : i32
    %c0_i32_1 = arith.constant 0 : i32
    return %c0_i32, %c0_i32_0 : i32, i32
  }
  func.func @transform_3(%arg0: i32) -> (i32, i32) {
    %c0_i32 = arith.constant 0 : i32
    %c0_i32_0 = arith.constant 0 : i32
    return %arg0, %c0_i32 : i32, i32
  }
}

module attributes {stable_mosaic.version = 11 : i64} {
  func.func @_matmul_stats_kernel(%arg0: i32, %arg1: memref<8x2048xbf16, #tpu.memory_space<vmem>>, %arg2: memref<2048x256xbf16, #tpu.memory_space<vmem>>, %arg3: memref<8x256xf32, #tpu.memory_space<vmem>>, %arg4: memref<1x2x256xf32, #tpu.memory_space<vmem>>) attributes {dimension_semantics = [#tpu.dimension_semantics<parallel>], iteration_bounds = array<i64: 1>, scalar_prefetch = 0 : i64, scratch_operands = 0 : i64, tpu.core_type = #tpu.core_type<tc>, window_params = [{transform_indices = @transform_0, window_bounds = array<i64: 8, 2048>}, {pipeline_mode = #tpu.pipeline_mode<synchronous>, transform_indices = @transform_1, window_bounds = array<i64: 2048, 256>}, {transform_indices = @transform_2, window_bounds = array<i64: 8, 256>}, {transform_indices = @transform_3, window_bounds = array<i64: 1, 2, 256>}]} {
    %c0 = arith.constant 0 : index
    %c0_0 = arith.constant 0 : index
    %0 = vector.load %arg1[%c0, %c0_0] : memref<8x2048xbf16, #tpu.memory_space<vmem>>, vector<8x2048xbf16>
    %c0_1 = arith.constant 0 : index
    %c0_2 = arith.constant 0 : index
    %1 = vector.load %arg2[%c0_1, %c0_2] : memref<2048x256xbf16, #tpu.memory_space<vmem>>, vector<2048x256xbf16>
    %cst = arith.constant dense<0.000000e+00> : vector<8x256xf32>
    %2 = tpu.matmul %0, %1, %cst {dimension_numbers = #tpu.dot_dimension_numbers<[1], [0], [0], [1], [0, 0, 1, 1], [], []>} : vector<8x2048xbf16>, vector<2048x256xbf16>, vector<8x256xf32> -> vector<8x256xf32>
    %c0_3 = arith.constant 0 : index
    %c0_4 = arith.constant 0 : index
    %3 = vector.load %arg3[%c0_3, %c0_4] : memref<8x256xf32, #tpu.memory_space<vmem>>, vector<8x256xf32>
    tpu.vector_store %arg3[%c0_3, %c0_4], %2 {strides = array<i32>} : memref<8x256xf32, #tpu.memory_space<vmem>>, vector<8x256xf32>,
    %cst_5 = arith.constant dense<0.000000e+00> : vector<256xf32>
    %4 = vector.multi_reduction <add>, %2, %cst_5 [0] : vector<8x256xf32> to vector<256xf32>
    %5 = vector.shape_cast %4 : vector<256xf32> to vector<1x256xf32>
    %c0_6 = arith.constant 0 : index
    %c0_7 = arith.constant 0 : index
    %c0_8 = arith.constant 0 : index
    %6 = vector.load %arg4[%c0_6, %c0_7, %c0_8] : memref<1x2x256xf32, #tpu.memory_space<vmem>>, vector<1x1x256xf32>
    %7 = vector.shape_cast %6 : vector<1x1x256xf32> to vector<1x256xf32>
    %8 = vector.shape_cast %5 : vector<1x256xf32> to vector<1x1x256xf32>
    tpu.vector_store %arg4[%c0_6, %c0_7, %c0_8], %8 {strides = array<i32>} : memref<1x2x256xf32, #tpu.memory_space<vmem>>, vector<1x1x256xf32>,
    %9 = arith.mulf %2, %2 : vector<8x256xf32>
    %cst_9 = arith.constant dense<0.000000e+00> : vector<256xf32>
    %10 = vector.multi_reduction <add>, %9, %cst_9 [0] : vector<8x256xf32> to vector<256xf32>
    %11 = vector.shape_cast %10 : vector<256xf32> to vector<1x256xf32>
    %c0_10 = arith.constant 0 : index
    %c1 = arith.constant 1 : index
    %c0_11 = arith.constant 0 : index
    %12 = vector.load %arg4[%c0_10, %c1, %c0_11] : memref<1x2x256xf32, #tpu.memory_space<vmem>>, vector<1x1x256xf32>
    %13 = vector.shape_cast %12 : vector<1x1x256xf32> to vector<1x256xf32>
    %14 = vector.shape_cast %11 : vector<1x256xf32> to vector<1x1x256xf32>
    tpu.vector_store %arg4[%c0_10, %c1, %c0_11], %14 {strides = array<i32>} : memref<1x2x256xf32, #tpu.memory_space<vmem>>, vector<1x1x256xf32>,
    return
  }
  func.func @transform_0(%arg0: i32) -> (i32, i32) {
    %c0_i32 = arith.constant 0 : i32
    %c0_i32_0 = arith.constant 0 : i32
    return %arg0, %c0_i32 : i32, i32
  }
  func.func @transform_1(%arg0: i32) -> (i32, i32) {
    %c0_i32 = arith.constant 0 : i32
    %c0_i32_0 = arith.constant 0 : i32
    %c0_i32_1 = arith.constant 0 : i32
    return %c0_i32, %c0_i32_0 : i32, i32
  }
  func.func @transform_2(%arg0: i32) -> (i32, i32) {
    %c0_i32 = arith.constant 0 : i32
    %c0_i32_0 = arith.constant 0 : i32
    return %arg0, %c0_i32 : i32, i32
  }
  func.func @transform_3(%arg0: i32) -> (i32, i32, i32) {
    %c0_i32 = arith.constant 0 : i32
    %c0_i32_0 = arith.constant 0 : i32
    %c0_i32_1 = arith.constant 0 : i32
    return %arg0, %c0_i32, %c0_i32_0 : i32, i32, i32
  }
}

module attributes {stable_mosaic.version = 11 : i64} {
  func.func @_matmul_stats_kernel(%arg0: i32, %arg1: memref<8x4096xbf16, #tpu.memory_space<vmem>>, %arg2: memref<4096x512xbf16, #tpu.memory_space<vmem>>, %arg3: memref<8x512xf32, #tpu.memory_space<vmem>>, %arg4: memref<1x2x512xf32, #tpu.memory_space<vmem>>) attributes {dimension_semantics = [#tpu.dimension_semantics<parallel>], iteration_bounds = array<i64: 1>, scalar_prefetch = 0 : i64, scratch_operands = 0 : i64, tpu.core_type = #tpu.core_type<tc>, window_params = [{transform_indices = @transform_0, window_bounds = array<i64: 8, 4096>}, {pipeline_mode = #tpu.pipeline_mode<synchronous>, transform_indices = @transform_1, window_bounds = array<i64: 4096, 512>}, {transform_indices = @transform_2, window_bounds = array<i64: 8, 512>}, {transform_indices = @transform_3, window_bounds = array<i64: 1, 2, 512>}]} {
    %c0 = arith.constant 0 : index
    %c0_0 = arith.constant 0 : index
    %0 = vector.load %arg1[%c0, %c0_0] : memref<8x4096xbf16, #tpu.memory_space<vmem>>, vector<8x4096xbf16>
    %c0_1 = arith.constant 0 : index
    %c0_2 = arith.constant 0 : index
    %1 = vector.load %arg2[%c0_1, %c0_2] : memref<4096x512xbf16, #tpu.memory_space<vmem>>, vector<4096x512xbf16>
    %cst = arith.constant dense<0.000000e+00> : vector<8x512xf32>
    %2 = tpu.matmul %0, %1, %cst {dimension_numbers = #tpu.dot_dimension_numbers<[1], [0], [0], [1], [0, 0, 1, 1], [], []>} : vector<8x4096xbf16>, vector<4096x512xbf16>, vector<8x512xf32> -> vector<8x512xf32>
    %c0_3 = arith.constant 0 : index
    %c0_4 = arith.constant 0 : index
    %3 = vector.load %arg3[%c0_3, %c0_4] : memref<8x512xf32, #tpu.memory_space<vmem>>, vector<8x512xf32>
    tpu.vector_store %arg3[%c0_3, %c0_4], %2 {strides = array<i32>} : memref<8x512xf32, #tpu.memory_space<vmem>>, vector<8x512xf32>,
    %cst_5 = arith.constant dense<0.000000e+00> : vector<512xf32>
    %4 = vector.multi_reduction <add>, %2, %cst_5 [0] : vector<8x512xf32> to vector<512xf32>
    %5 = vector.shape_cast %4 : vector<512xf32> to vector<1x512xf32>
    %c0_6 = arith.constant 0 : index
    %c0_7 = arith.constant 0 : index
    %c0_8 = arith.constant 0 : index
    %6 = vector.load %arg4[%c0_6, %c0_7, %c0_8] : memref<1x2x512xf32, #tpu.memory_space<vmem>>, vector<1x1x512xf32>
    %7 = vector.shape_cast %6 : vector<1x1x512xf32> to vector<1x512xf32>
    %8 = vector.shape_cast %5 : vector<1x512xf32> to vector<1x1x512xf32>
    tpu.vector_store %arg4[%c0_6, %c0_7, %c0_8], %8 {strides = array<i32>} : memref<1x2x512xf32, #tpu.memory_space<vmem>>, vector<1x1x512xf32>,
    %9 = arith.mulf %2, %2 : vector<8x512xf32>
    %cst_9 = arith.constant dense<0.000000e+00> : vector<512xf32>
    %10 = vector.multi_reduction <add>, %9, %cst_9 [0] : vector<8x512xf32> to vector<512xf32>
    %11 = vector.shape_cast %10 : vector<512xf32> to vector<1x512xf32>
    %c0_10 = arith.constant 0 : index
    %c1 = arith.constant 1 : index
    %c0_11 = arith.constant 0 : index
    %12 = vector.load %arg4[%c0_10, %c1, %c0_11] : memref<1x2x512xf32, #tpu.memory_space<vmem>>, vector<1x1x512xf32>
    %13 = vector.shape_cast %12 : vector<1x1x512xf32> to vector<1x512xf32>
    %14 = vector.shape_cast %11 : vector<1x512xf32> to vector<1x1x512xf32>
    tpu.vector_store %arg4[%c0_10, %c1, %c0_11], %14 {strides = array<i32>} : memref<1x2x512xf32, #tpu.memory_space<vmem>>, vector<1x1x512xf32>,
    return
  }
  func.func @transform_0(%arg0: i32) -> (i32, i32) {
    %c0_i32 = arith.constant 0 : i32
    %c0_i32_0 = arith.constant 0 : i32
    return %arg0, %c0_i32 : i32, i32
  }
  func.func @transform_1(%arg0: i32) -> (i32, i32) {
    %c0_i32 = arith.constant 0 : i32
    %c0_i32_0 = arith.constant 0 : i32
    %c0_i32_1 = arith.constant 0 : i32
    return %c0_i32, %c0_i32_0 : i32, i32
  }
  func.func @transform_2(%arg0: i32) -> (i32, i32) {
    %c0_i32 = arith.constant 0 : i32
    %c0_i32_0 = arith.constant 0 : i32
    return %arg0, %c0_i32 : i32, i32
  }
  func.func @transform_3(%arg0: i32) -> (i32, i32, i32) {
    %c0_i32 = arith.constant 0 : i32
    %c0_i32_0 = arith.constant 0 : i32
    %c0_i32_1 = arith.constant 0 : i32
    return %arg0, %c0_i32, %c0_i32_0 : i32, i32, i32
  }
}

module attributes {stable_mosaic.version = 11 : i64} {
  func.func @_bn_act_kernel(%arg0: i32, %arg1: memref<8x512xf32, #tpu.memory_space<vmem>>, %arg2: memref<1x512xf32, #tpu.memory_space<vmem>>, %arg3: memref<1x512xf32, #tpu.memory_space<vmem>>, %arg4: memref<8x512xf32, #tpu.memory_space<vmem>>) attributes {dimension_semantics = [#tpu.dimension_semantics<parallel>], iteration_bounds = array<i64: 1>, scalar_prefetch = 0 : i64, scratch_operands = 0 : i64, tpu.core_type = #tpu.core_type<tc>, window_params = [{transform_indices = @transform_0, window_bounds = array<i64: 8, 512>}, {pipeline_mode = #tpu.pipeline_mode<synchronous>, transform_indices = @transform_1, window_bounds = array<i64: 1, 512>}, {pipeline_mode = #tpu.pipeline_mode<synchronous>, transform_indices = @transform_2, window_bounds = array<i64: 1, 512>}, {transform_indices = @transform_3, window_bounds = array<i64: 8, 512>}]} {
    %c0 = arith.constant 0 : index
    %c0_0 = arith.constant 0 : index
    %0 = vector.load %arg1[%c0, %c0_0] : memref<8x512xf32, #tpu.memory_space<vmem>>, vector<8x512xf32>
    %c0_1 = arith.constant 0 : index
    %c0_2 = arith.constant 0 : index
    %1 = vector.load %arg2[%c0_1, %c0_2] : memref<1x512xf32, #tpu.memory_space<vmem>>, vector<1x512xf32>
    %2 = vector.broadcast %1 : vector<1x512xf32> to vector<8x512xf32>
    %3 = arith.mulf %0, %2 : vector<8x512xf32>
    %c0_3 = arith.constant 0 : index
    %c0_4 = arith.constant 0 : index
    %4 = vector.load %arg3[%c0_3, %c0_4] : memref<1x512xf32, #tpu.memory_space<vmem>>, vector<1x512xf32>
    %5 = vector.broadcast %4 : vector<1x512xf32> to vector<8x512xf32>
    %6 = arith.addf %3, %5 : vector<8x512xf32>
    %cst = arith.constant 0.000000e+00 : f32
    %7 = vector.broadcast %cst : f32 to vector<8x512xf32>
    %8 = arith.cmpf oge, %6, %7 : vector<8x512xf32>
    %cst_5 = arith.constant 2.000000e-01 : f32
    %9 = vector.broadcast %cst_5 : f32 to vector<8x512xf32>
    %10 = arith.mulf %9, %6 : vector<8x512xf32>
    %11 = arith.select %8, %6, %10 : vector<8x512xi1>, vector<8x512xf32>
    %c0_6 = arith.constant 0 : index
    %c0_7 = arith.constant 0 : index
    %12 = vector.load %arg4[%c0_6, %c0_7] : memref<8x512xf32, #tpu.memory_space<vmem>>, vector<8x512xf32>
    tpu.vector_store %arg4[%c0_6, %c0_7], %11 {strides = array<i32>} : memref<8x512xf32, #tpu.memory_space<vmem>>, vector<8x512xf32>,
    return
  }
  func.func @transform_0(%arg0: i32) -> (i32, i32) {
    %c0_i32 = arith.constant 0 : i32
    %c0_i32_0 = arith.constant 0 : i32
    return %arg0, %c0_i32 : i32, i32
  }
  func.func @transform_1(%arg0: i32) -> (i32, i32) {
    %c0_i32 = arith.constant 0 : i32
    %c0_i32_0 = arith.constant 0 : i32
    %c0_i32_1 = arith.constant 0 : i32
    return %c0_i32, %c0_i32_0 : i32, i32
  }
  func.func @transform_2(%arg0: i32) -> (i32, i32) {
    %c0_i32 = arith.constant 0 : i32
    %c0_i32_0 = arith.constant 0 : i32
    %c0_i32_1 = arith.constant 0 : i32
    return %c0_i32, %c0_i32_0 : i32, i32
  }
  func.func @transform_3(%arg0: i32) -> (i32, i32) {
    %c0_i32 = arith.constant 0 : i32
    %c0_i32_0 = arith.constant 0 : i32
    return %arg0, %c0_i32 : i32, i32
  }
}

module attributes {stable_mosaic.version = 11 : i64} {
  func.func @_final_projection_kernel(%arg0: memref<1x512xbf16, #tpu.memory_space<vmem>>, %arg1: memref<512x2xbf16, #tpu.memory_space<vmem>>, %arg2: memref<1x2xf32, #tpu.memory_space<vmem>>) attributes {dimension_semantics = [], scalar_prefetch = 0 : i64, scratch_operands = 0 : i64, tpu.core_type = #tpu.core_type<tc>} {
    %c0 = arith.constant 0 : index
    %c0_0 = arith.constant 0 : index
    %0 = vector.load %arg0[%c0, %c0_0] : memref<1x512xbf16, #tpu.memory_space<vmem>>, vector<1x512xbf16>
    %c0_1 = arith.constant 0 : index
    %c0_2 = arith.constant 0 : index
    %1 = vector.load %arg1[%c0_1, %c0_2] : memref<512x2xbf16, #tpu.memory_space<vmem>>, vector<512x2xbf16>
    %cst = arith.constant dense<0.000000e+00> : vector<1x2xf32>
    %2 = tpu.matmul %0, %1, %cst {dimension_numbers = #tpu.dot_dimension_numbers<[1], [0], [0], [1], [0, 0, 1, 1], [], []>} : vector<1x512xbf16>, vector<512x2xbf16>, vector<1x2xf32> -> vector<1x2xf32>
    %c0_3 = arith.constant 0 : index
    %c0_4 = arith.constant 0 : index
    %3 = vector.load %arg2[%c0_3, %c0_4] : memref<1x2xf32, #tpu.memory_space<vmem>>, vector<1x2xf32>
    tpu.vector_store %arg2[%c0_3, %c0_4], %2 {strides = array<i32>} : memref<1x2xf32, #tpu.memory_space<vmem>>, vector<1x2xf32>,
    return
  }
}

</mosaic_0001>

<bundles_post_ra>
// kernel: discriminator_wgan_forward.8
= control target key start
LH: loop header
LB: loop body
LE: loop exit
PB: predicated region body
PF: predicated region fallthrough
CT: control target
= control target key end

     0   :  { %vm92_vm0 = vcmask 392192   ;;  %vm214_vm1 = vcmask 523264   ;;  %s427_s1 = inlined_call_operand.vmem [shape: bf16[48,64], index: 1, kind: input, shape index: {}]   ;;  %s428_s0 = inlined_call_operand.vmem [shape: bf16[128,48], index: 0, kind: input, shape index: {}]   ;;  %s429_s2 = inlined_call_operand.vmem [shape: f32[128,64], index: 2, kind: output, shape index: {}]  }
   0x1   :  { %v297_v0 = vld [vmem:[%s427_s1 + $0x10] sm:$0xff]  ;;  %v296_v1 = vld [vmem:[%s427_s1 + $0x8] sm:$0xff]  ;;  %v295_v2 = vld [vmem:[%s427_s1] sm:$0xff] }
   0x2   :  { %122 = vmatpush.bf16.msra.mxu0 %v297_v0  ;;  %298 = vmatpush.bf16.msra.mxu1 %v297_v0  ;;  %v287_v3 = vld [vmem:[%s428_s0] sm:$0xff]  ;;  %v289_v4 = vld [vmem:[%s428_s0 + $0x10] sm:$0xff]  ;;  %v288_v7 = vld [vmem:[%s428_s0 + $0x8] sm:$0xff] }
   0x3   :  { %299 = vmatpush.bf16.msra.mxu2 %v297_v0  ;;  %300 = vmatpush.bf16.msra.mxu3 %v297_v0  ;;  %v291_v5 = vld [vmem:[%s428_s0 + $0x20] sm:$0xff]  ;;  %v293_v6 = vld [vmem:[%s428_s0 + $0x30] sm:$0xff]  ;;  %v290_v8 = vld [vmem:[%s428_s0 + $0x18] sm:$0xff] }
   0x4   :  { %v292_v9 = vld [vmem:[%s428_s0 + $0x28] sm:$0xff]  ;;  %v294_v10 = vld [vmem:[%s428_s0 + $0x38] sm:$0xff] }
   0x6   :  { %123 = vmatpush.bf16.msra.mxu0 %v296_v1  ;;  %301 = vmatpush.bf16.msra.mxu1 %v296_v1 }
   0x7   :  { %302 = vmatpush.bf16.msra.mxu2 %v296_v1  ;;  %303 = vmatpush.bf16.msra.mxu3 %v296_v1 }
   0xa   :  { %124 = vmatpush.bf16.msra.mxu0 %v295_v2  ;;  %304 = vmatpush.bf16.msra.mxu1 %v295_v2 }
   0xb   :  { %305 = vmatpush.bf16.msra.mxu2 %v295_v2  ;;  %306 = vmatpush.bf16.msra.mxu3 %v295_v2 }
   0xd   :  { %279 = vmatmul.msk.bf16.vlgmr.msra.gmra.mxu0 %vm92_vm0, %v287_v3  ;;  %281 = vmatmul.msk.bf16.vlgmr.msra.gmra.mxu1 %vm92_vm0, %v289_v4 }
   0xe   :  { %283 = vmatmul.msk.bf16.vlgmr.msra.gmra.mxu2 %vm92_vm0, %v291_v5  ;;  %285 = vmatmul.msk.bf16.vlgmr.msra.gmra.mxu3 %vm92_vm0, %v293_v6 }
  0x1d   :  { %280 = vmatmul.msk.bf16.gmra.mxu0 %vm92_vm0, %v288_v7  ;;  %282 = vmatmul.msk.bf16.gmra.mxu1 %vm92_vm0, %v290_v8 }
  0x1e   :  { %284 = vmatmul.msk.bf16.gmra.mxu2 %vm92_vm0, %v292_v9  ;;  %286 = vmatmul.msk.bf16.gmra.mxu3 %vm92_vm0, %v294_v10 }
  0x8a   :  { %v126_v11 = vpop.f32.mrf.mxu0  ;;  %v136_v12 = vpop.f32.mrf.mxu1 }
  0x8b   :  { %vm166_vm2 = vcmp.ge.f32.partialorder %v126_v11, 0.0  ;;  %v182_v13 = vmul.f32 0.2, %v126_v11  ;;  %vm170_vm3 = vcmp.ge.f32.partialorder %v136_v12, 0.0  ;;  %v186_v14 = vmul.f32 0.2, %v136_v12 }
  0x8d   :  { %v198_v15 = vsel %vm166_vm2, %v126_v11, %v182_v13  ;;  %v202_v16 = vsel %vm170_vm3, %v136_v12, %v186_v14 }
  0x8e   :  { %215 = vst.msk [vmem:[%s429_s2] sm:$0xff] %vm214_vm1, %v198_v15 }
  0x8f   :  { %219 = vst.msk [vmem:[%s429_s2 + $0x20] sm:$0xff] %vm214_vm1, %v202_v16 }
  0x91   :  { %v146_v17 = vpop.f32.mrf.mxu2  ;;  %v156_v18 = vpop.f32.mrf.mxu3 }
  0x92   :  { %vm174_vm4 = vcmp.ge.f32.partialorder %v146_v17, 0.0  ;;  %v190_v19 = vmul.f32 0.2, %v146_v17  ;;  %vm178_vm5 = vcmp.ge.f32.partialorder %v156_v18, 0.0  ;;  %v194_v20 = vmul.f32 0.2, %v156_v18  ;;  %v128_v21 = vpop.f32.mrf.mxu0  ;;  %v138_v22 = vpop.f32.mrf.mxu1 }
  0x93   :  { %vm167_vm6 = vcmp.ge.f32.partialorder %v128_v21, 0.0  ;;  %v183_v23 = vmul.f32 0.2, %v128_v21  ;;  %vm171_vm7 = vcmp.ge.f32.partialorder %v138_v22, 0.0  ;;  %v187_v24 = vmul.f32 0.2, %v138_v22 }
  0x94   :  { %v206_v25 = vsel %vm174_vm4, %v146_v17, %v190_v19  ;;  %v210_v26 = vsel %vm178_vm5, %v156_v18, %v194_v20 }
  0x95   :  { %223 = vst.msk [vmem:[%s429_s2 + $0x40] sm:$0xff] %vm214_vm1, %v206_v25  ;;  %v199_v27 = vsel %vm167_vm6, %v128_v21, %v183_v23  ;;  %v203_v28 = vsel %vm171_vm7, %v138_v22, %v187_v24 }
  0x96   :  { %227 = vst.msk [vmem:[%s429_s2 + $0x60] sm:$0xff] %vm214_vm1, %v210_v26 }
  0x97   :  { %216 = vst.msk [vmem:[%s429_s2 + $0x8] sm:$0xff] %vm214_vm1, %v199_v27 }
  0x98   :  { %220 = vst.msk [vmem:[%s429_s2 + $0x28] sm:$0xff] %vm214_vm1, %v203_v28 }
  0x99   :  { %v148_v29 = vpop.f32.mrf.mxu2  ;;  %v158_v30 = vpop.f32.mrf.mxu3 }
  0x9a   :  { %vm175_vm8 = vcmp.ge.f32.partialorder %v148_v29, 0.0  ;;  %v191_v31 = vmul.f32 0.2, %v148_v29  ;;  %vm179_vm9 = vcmp.ge.f32.partialorder %v158_v30, 0.0  ;;  %v195_v32 = vmul.f32 0.2, %v158_v30  ;;  %v131_v33 = vpop.f32.mrf.mxu0  ;;  %v141_v34 = vpop.f32.mrf.mxu1 }
  0x9b   :  { %vm168_vm10 = vcmp.ge.f32.partialorder %v131_v33, 0.0  ;;  %v184_v35 = vmul.f32 0.2, %v131_v33  ;;  %vm172_vm11 = vcmp.ge.f32.partialorder %v141_v34, 0.0  ;;  %v188_v36 = vmul.f32 0.2, %v141_v34 }
  0x9c   :  { %v207_v37 = vsel %vm175_vm8, %v148_v29, %v191_v31  ;;  %v211_v38 = vsel %vm179_vm9, %v158_v30, %v195_v32 }
  0x9d   :  { %224 = vst.msk [vmem:[%s429_s2 + $0x48] sm:$0xff] %vm214_vm1, %v207_v37  ;;  %v200_v39 = vsel %vm168_vm10, %v131_v33, %v184_v35  ;;  %v204_v40 = vsel %vm172_vm11, %v141_v34, %v188_v36 }
  0x9e   :  { %228 = vst.msk [vmem:[%s429_s2 + $0x68] sm:$0xff] %vm214_vm1, %v211_v38 }
  0x9f   :  { %217 = vst.msk [vmem:[%s429_s2 + $0x10] sm:$0xff] %vm214_vm1, %v200_v39 }
  0xa0   :  { %221 = vst.msk [vmem:[%s429_s2 + $0x30] sm:$0xff] %vm214_vm1, %v204_v40 }
  0xa1   :  { %v151_v41 = vpop.f32.mrf.mxu2  ;;  %v161_v42 = vpop.f32.mrf.mxu3 }
  0xa2   :  { %vm176_vm12 = vcmp.ge.f32.partialorder %v151_v41, 0.0  ;;  %v192_v43 = vmul.f32 0.2, %v151_v41  ;;  %vm180_vm13 = vcmp.ge.f32.partialorder %v161_v42, 0.0  ;;  %v196_v44 = vmul.f32 0.2, %v161_v42  ;;  %v133_v45 = vpop.f32.mrf.mxu0  ;;  %v143_v46 = vpop.f32.mrf.mxu1 }
  0xa3   :  { %vm169_vm14 = vcmp.ge.f32.partialorder %v133_v45, 0.0  ;;  %v185_v47 = vmul.f32 0.2, %v133_v45  ;;  %vm173_vm15 = vcmp.ge.f32.partialorder %v143_v46, 0.0  ;;  %v189_v48 = vmul.f32 0.2, %v143_v46 }
  0xa4   :  { %v208_v49 = vsel %vm176_vm12, %v151_v41, %v192_v43  ;;  %v212_v50 = vsel %vm180_vm13, %v161_v42, %v196_v44 }
  0xa5   :  { %225 = vst.msk [vmem:[%s429_s2 + $0x50] sm:$0xff] %vm214_vm1, %v208_v49  ;;  %v201_v51 = vsel %vm169_vm14, %v133_v45, %v185_v47  ;;  %v205_v52 = vsel %vm173_vm15, %v143_v46, %v189_v48 }
  0xa6   :  { %229 = vst.msk [vmem:[%s429_s2 + $0x70] sm:$0xff] %vm214_vm1, %v212_v50 }
  0xa7   :  { %218 = vst.msk [vmem:[%s429_s2 + $0x18] sm:$0xff] %vm214_vm1, %v201_v51 }
  0xa8   :  { %222 = vst.msk [vmem:[%s429_s2 + $0x38] sm:$0xff] %vm214_vm1, %v205_v52 }
  0xa9   :  { %v153_v53 = vpop.f32.mrf.mxu2  ;;  %v163_v54 = vpop.f32.mrf.mxu3 }
  0xaa   :  { %vm177_vm0 = vcmp.ge.f32.partialorder %v153_v53, 0.0  ;;  %v193_v55 = vmul.f32 0.2, %v153_v53  ;;  %vm181_vm2 = vcmp.ge.f32.partialorder %v163_v54, 0.0  ;;  %v197_v56 = vmul.f32 0.2, %v163_v54 }
  0xac   :  { %v209_v57 = vsel %vm177_vm0, %v153_v53, %v193_v55  ;;  %v213_v58 = vsel %vm181_vm2, %v163_v54, %v197_v56 }
  0xad   :  { %226 = vst.msk [vmem:[%s429_s2 + $0x58] sm:$0xff] %vm214_vm1, %v209_v57 }
  0xae   :  { %230 = vst.msk [vmem:[%s429_s2 + $0x78] sm:$0xff] %vm214_vm1, %v213_v58 }

// kernel: discriminator_wgan_forward.10
= control target key start
LH: loop header
LB: loop body
LE: loop exit
PB: predicated region body
PF: predicated region fallthrough
CT: control target
= control target key end

     0   :  { %s106_s0 = inlined_call_operand.vmem [shape: f32[32,128], index: 0, kind: input, shape index: {}]   ;;  %s107_s1 = inlined_call_operand.vmem [shape: f32[1,128], index: 1, kind: input, shape index: {}]   ;;  %s108_s2 = inlined_call_operand.vmem [shape: f32[1,128], index: 2, kind: input, shape index: {}]   ;;  %s109_s3 = inlined_call_operand.vmem [shape: f32[32,128], index: 3, kind: output, shape index: {}]  }
   0x1   :  { %v14_v0 = vld [vmem:[%s106_s0] sm:$0xff]  ;;  %v15_v3 = vld [vmem:[%s106_s0 + $0x8] sm:$0xff]  ;;  %v16_v6 = vld [vmem:[%s106_s0 + $0x10] sm:$0xff] }
   0x2   :  { %v54_v1 = vld [vmem:[%s107_s1] ss:$0 sm:$0xff]  ;;  %v17_v7 = vld [vmem:[%s106_s0 + $0x18] sm:$0xff] }
   0x3   :  { %v55_v2 = vld [vmem:[%s108_s2] ss:$0 sm:$0xff]  ;;  %v22_v4 = vmul.f32 %v54_v1, %v14_v0  ;;  %v23_v5 = vmul.f32 %v54_v1, %v15_v3  ;;  %v24_v8 = vmul.f32 %v54_v1, %v16_v6  ;;  %v25_v9 = vmul.f32 %v54_v1, %v17_v7 }
   0x5   :  { %v30_v10 = vadd.f32 %v55_v2, %v22_v4  ;;  %v31_v11 = vadd.f32 %v55_v2, %v23_v5  ;;  %v32_v12 = vadd.f32 %v55_v2, %v24_v8  ;;  %v33_v13 = vadd.f32 %v55_v2, %v25_v9 }
   0x7   :  { %vm34_vm0 = vcmp.ge.f32.partialorder %v30_v10, 0.0  ;;  %v38_v14 = vmul.f32 0.2, %v30_v10  ;;  %vm35_vm1 = vcmp.ge.f32.partialorder %v31_v11, 0.0  ;;  %v39_v15 = vmul.f32 0.2, %v31_v11 }
   0x8   :  { %vm36_vm2 = vcmp.ge.f32.partialorder %v32_v12, 0.0  ;;  %v40_v16 = vmul.f32 0.2, %v32_v12  ;;  %vm37_vm3 = vcmp.ge.f32.partialorder %v33_v13, 0.0  ;;  %v41_v17 = vmul.f32 0.2, %v33_v13 }
   0x9   :  { %v42_v18 = vsel %vm34_vm0, %v30_v10, %v38_v14  ;;  %v43_v19 = vsel %vm35_vm1, %v31_v11, %v39_v15 }
   0xa   :  { %46 = vst [vmem:[%s109_s3] sm:$0xff] %v42_v18  ;;  %v44_v20 = vsel %vm36_vm2, %v32_v12, %v40_v16  ;;  %v45_v21 = vsel %vm37_vm3, %v33_v13, %v41_v17 }
   0xb   :  { %47 = vst [vmem:[%s109_s3 + $0x8] sm:$0xff] %v43_v19 }
   0xc   :  { %48 = vst [vmem:[%s109_s3 + $0x10] sm:$0xff] %v44_v20 }
   0xd   :  { %49 = vst [vmem:[%s109_s3 + $0x18] sm:$0xff] %v45_v21 }

// kernel: discriminator_wgan_forward.9
= control target key start
LH: loop header
LB: loop body
LE: loop exit
PB: predicated region body
PF: predicated region fallthrough
CT: control target
= control target key end

     0   :  { %s1535_s1 = inlined_call_operand.vmem [shape: bf16[1024,128], index: 1, kind: input, shape index: {}]   ;;  %s1536_s0 = inlined_call_operand.vmem [shape: bf16[32,1024], index: 0, kind: input, shape index: {}]   ;;  %s1537_s2 = inlined_call_operand.vmem [shape: f32[32,128], index: 2, kind: output, shape index: {0}]   ;;  %s1538_s3 = inlined_call_operand.vmem [shape: f32[1,2,128], index: 3, kind: output, shape index: {1}]  }
   0x1   :  { %v1152_v0 = vld [vmem:[%s1535_s1 + $0x38] sm:$0xff]  ;;  %v1151_v4 = vld [vmem:[%s1535_s1 + $0x30] sm:$0xff]  ;;  %v1150_v8 = vld [vmem:[%s1535_s1 + $0x28] sm:$0xff] }
   0x2   :  { %v1160_v1 = vld [vmem:[%s1535_s1 + $0x78] sm:$0xff]  ;;  %621 = vmatpush.bf16.msra.mxu0 %v1152_v0  ;;  %v1159_v5 = vld [vmem:[%s1535_s1 + $0x70] sm:$0xff]  ;;  %v1158_v9 = vld [vmem:[%s1535_s1 + $0x68] sm:$0xff] }
   0x3   :  { %v1168_v2 = vld [vmem:[%s1535_s1 + $0xb8] sm:$0xff]  ;;  %640 = vmatpush.bf16.msra.mxu1 %v1160_v1  ;;  %v1167_v6 = vld [vmem:[%s1535_s1 + $0xb0] sm:$0xff]  ;;  %v1166_v10 = vld [vmem:[%s1535_s1 + $0xa8] sm:$0xff] }
   0x4   :  { %v1176_v3 = vld [vmem:[%s1535_s1 + $0xf8] sm:$0xff]  ;;  %659 = vmatpush.bf16.msra.mxu2 %v1168_v2  ;;  %v1175_v7 = vld [vmem:[%s1535_s1 + $0xf0] sm:$0xff]  ;;  %v1174_v11 = vld [vmem:[%s1535_s1 + $0xe8] sm:$0xff] }
   0x5   :  { %678 = vmatpush.bf16.msra.mxu3 %v1176_v3  ;;  %v1149_v12 = vld [vmem:[%s1535_s1 + $0x20] sm:$0xff]  ;;  %v1148_v16 = vld [vmem:[%s1535_s1 + $0x18] sm:$0xff]  ;;  %v1147_v20 = vld [vmem:[%s1535_s1 + $0x10] sm:$0xff] }
   0x6   :  { %622 = vmatpush.bf16.msra.mxu0 %v1151_v4  ;;  %v1157_v13 = vld [vmem:[%s1535_s1 + $0x60] sm:$0xff]  ;;  %v1156_v17 = vld [vmem:[%s1535_s1 + $0x58] sm:$0xff]  ;;  %v1155_v21 = vld [vmem:[%s1535_s1 + $0x50] sm:$0xff] }
   0x7   :  { %641 = vmatpush.bf16.msra.mxu1 %v1159_v5  ;;  %v1165_v14 = vld [vmem:[%s1535_s1 + $0xa0] sm:$0xff]  ;;  %v1164_v18 = vld [vmem:[%s1535_s1 + $0x98] sm:$0xff]  ;;  %v1163_v22 = vld [vmem:[%s1535_s1 + $0x90] sm:$0xff] }
   0x8   :  { %660 = vmatpush.bf16.msra.mxu2 %v1167_v6  ;;  %v1173_v15 = vld [vmem:[%s1535_s1 + $0xe0] sm:$0xff]  ;;  %v1172_v19 = vld [vmem:[%s1535_s1 + $0xd8] sm:$0xff]  ;;  %v1171_v23 = vld [vmem:[%s1535_s1 + $0xd0] sm:$0xff] }
   0x9   :  { %679 = vmatpush.bf16.msra.mxu3 %v1175_v7  ;;  %v1146_v24 = vld [vmem:[%s1535_s1 + $0x8] sm:$0xff]  ;;  %v1145_v28 = vld [vmem:[%s1535_s1] sm:$0xff]  ;;  %v1200_v40 = vld [vmem:[%s1535_s1 + $0x1b8] sm:$0xff] }
   0xa   :  { %623 = vmatpush.bf16.msra.mxu0 %v1150_v8  ;;  %v1154_v25 = vld [vmem:[%s1535_s1 + $0x48] sm:$0xff]  ;;  %v1153_v29 = vld [vmem:[%s1535_s1 + $0x40] sm:$0xff]  ;;  %v1184_v41 = vld [vmem:[%s1535_s1 + $0x138] sm:$0xff] }
   0xb   :  { %642 = vmatpush.bf16.msra.mxu1 %v1158_v9  ;;  %v1162_v26 = vld [vmem:[%s1535_s1 + $0x88] sm:$0xff]  ;;  %v1161_v30 = vld [vmem:[%s1535_s1 + $0x80] sm:$0xff]  ;;  %v1192_v46 = vld [vmem:[%s1535_s1 + $0x178] sm:$0xff] }
   0xc   :  { %661 = vmatpush.bf16.msra.mxu2 %v1166_v10  ;;  %v1170_v27 = vld [vmem:[%s1535_s1 + $0xc8] sm:$0xff]  ;;  %v1169_v31 = vld [vmem:[%s1535_s1 + $0xc0] sm:$0xff]  ;;  %v1208_v47 = vld [vmem:[%s1535_s1 + $0x1f8] sm:$0xff] }
   0xd   :  { %680 = vmatpush.bf16.msra.mxu3 %v1174_v11  ;;  %v811_v32 = vld [vmem:[%s1536_s0] sm:$0xf]  ;;  %v1129_v34 = vld [vmem:[%s1536_s0 + $0x4] sm:$0xf]  ;;  %v819_v36 = vld [vmem:[%s1536_s0 + $0x8] sm:$0xf] }
   0xe   :  { %624 = vmatpush.bf16.msra.mxu0 %v1149_v12  ;;  %v1133_v33 = vld [vmem:[%s1536_s0 + $0x1c] sm:$0xf0]  ;;  %v813_v35 = vld [vmem:[%s1536_s0 + $0x20] sm:$0xf0]  ;;  %v1134_v37 = vld [vmem:[%s1536_s0 + $0x24] sm:$0xf0] }
   0xf   :  { %643 = vmatpush.bf16.msra.mxu1 %v1157_v13  ;;  %v1130_v38 = vld [vmem:[%s1536_s0 + $0xc] sm:$0xf]  ;;  %v812_v42 = vor.u32 %v1133_v33, %v811_v32  ;;  %v816_v43 = vor.u32 %v1129_v34, %v813_v35  ;;  %v820_v44 = vor.u32 %v1134_v37, %v819_v36  ;;  %v1199_v48 = vld [vmem:[%s1535_s1 + $0x1b0] sm:$0xff]  ;;  %v1197_v56 = vld [vmem:[%s1535_s1 + $0x1a0] sm:$0xff] }
  0x10   :  { %662 = vmatpush.bf16.msra.mxu2 %v1165_v14  ;;  %v821_v39 = vld [vmem:[%s1536_s0 + $0x28] sm:$0xf0]  ;;  %v1183_v49 = vld [vmem:[%s1535_s1 + $0x130] sm:$0xff]  ;;  %v1181_v57 = vld [vmem:[%s1535_s1 + $0x120] sm:$0xff] }
  0x11   :  { %681 = vmatpush.bf16.msra.mxu3 %v1173_v15  ;;  %v824_v45 = vor.u32 %v1130_v38, %v821_v39  ;;  %v1191_v50 = vld [vmem:[%s1535_s1 + $0x170] sm:$0xff]  ;;  %v1198_v52 = vld [vmem:[%s1535_s1 + $0x1a8] sm:$0xff]  ;;  %v1189_v58 = vld [vmem:[%s1535_s1 + $0x160] sm:$0xff] }
  0x12   :  { %625 = vmatpush.bf16.msra.mxu0 %v1148_v16  ;;  %v1207_v51 = vld [vmem:[%s1535_s1 + $0x1f0] sm:$0xff]  ;;  %v1182_v53 = vld [vmem:[%s1535_s1 + $0x128] sm:$0xff]  ;;  %v1205_v59 = vld [vmem:[%s1535_s1 + $0x1e0] sm:$0xff] }
  0x13   :  { %644 = vmatpush.bf16.msra.mxu1 %v1156_v17  ;;  %v1190_v54 = vld [vmem:[%s1535_s1 + $0x168] sm:$0xff]  ;;  %v843_v60 = vld [vmem:[%s1536_s0 + $0x40] sm:$0xf]  ;;  %v1137_v62 = vld [vmem:[%s1536_s0 + $0x44] sm:$0xf] }
  0x14   :  { %663 = vmatpush.bf16.msra.mxu2 %v1164_v18  ;;  %v1206_v55 = vld [vmem:[%s1535_s1 + $0x1e8] sm:$0xff]  ;;  %v1141_v61 = vld [vmem:[%s1536_s0 + $0x5c] sm:$0xf0]  ;;  %v845_v63 = vld [vmem:[%s1536_s0 + $0x60] sm:$0xf0] }
  0x15   :  { %682 = vmatpush.bf16.msra.mxu3 %v1172_v19  ;;  %v851_v0 = vld [vmem:[%s1536_s0 + $0x48] sm:$0xf]  ;;  %v1138_v2 = vld [vmem:[%s1536_s0 + $0x4c] sm:$0xf]  ;;  %v1196_v4 = vld [vmem:[%s1535_s1 + $0x198] sm:$0xff]  ;;  %v844_v6 = vor.u32 %v1141_v61, %v843_v60  ;;  %v848_v7 = vor.u32 %v1137_v62, %v845_v63 }
  0x16   :  { %626 = vmatpush.bf16.msra.mxu0 %v1147_v20  ;;  %v1142_v1 = vld [vmem:[%s1536_s0 + $0x64] sm:$0xf0]  ;;  %v853_v3 = vld [vmem:[%s1536_s0 + $0x68] sm:$0xf0]  ;;  %v1180_v5 = vld [vmem:[%s1535_s1 + $0x118] sm:$0xff] }
  0x17   :  { %645 = vmatpush.bf16.msra.mxu1 %v1155_v21  ;;  %v852_v8 = vor.u32 %v1142_v1, %v851_v0  ;;  %v856_v9 = vor.u32 %v1138_v2, %v853_v3  ;;  %v1188_v10 = vld [vmem:[%s1535_s1 + $0x158] sm:$0xff]  ;;  %v1195_v12 = vld [vmem:[%s1535_s1 + $0x190] sm:$0xff]  ;;  %v1194_v16 = vld [vmem:[%s1535_s1 + $0x188] sm:$0xff] }
  0x18   :  { %664 = vmatpush.bf16.msra.mxu2 %v1163_v22  ;;  %v1204_v11 = vld [vmem:[%s1535_s1 + $0x1d8] sm:$0xff]  ;;  %v1179_v13 = vld [vmem:[%s1535_s1 + $0x110] sm:$0xff]  ;;  %v1178_v17 = vld [vmem:[%s1535_s1 + $0x108] sm:$0xff] }
  0x19   :  { %683 = vmatpush.bf16.msra.mxu3 %v1171_v23  ;;  %v1187_v14 = vld [vmem:[%s1535_s1 + $0x150] sm:$0xff]  ;;  %v1186_v18 = vld [vmem:[%s1535_s1 + $0x148] sm:$0xff]  ;;  %v1193_v20 = vld [vmem:[%s1535_s1 + $0x180] sm:$0xff] }
  0x1a   :  { %627 = vmatpush.bf16.msra.mxu0 %v1146_v24  ;;  %v1203_v15 = vld [vmem:[%s1535_s1 + $0x1d0] sm:$0xff]  ;;  %v1202_v19 = vld [vmem:[%s1535_s1 + $0x1c8] sm:$0xff]  ;;  %v1177_v21 = vld [vmem:[%s1535_s1 + $0x100] sm:$0xff] }
  0x1b   :  { %646 = vmatpush.bf16.msra.mxu1 %v1154_v25  ;;  %v1185_v22 = vld [vmem:[%s1535_s1 + $0x140] sm:$0xff]  ;;  %v827_v24 = vld [vmem:[%s1536_s0 + $0x10] sm:$0xf]  ;;  %v1139_v38 = vld [vmem:[%s1536_s0 + $0x54] sm:$0xf] }
  0x1c   :  { %665 = vmatpush.bf16.msra.mxu2 %v1162_v26  ;;  %v1201_v23 = vld [vmem:[%s1535_s1 + $0x1c0] sm:$0xff]  ;;  %v1135_v25 = vld [vmem:[%s1536_s0 + $0x2c] sm:$0xf0]  ;;  %v1131_v26 = vld [vmem:[%s1536_s0 + $0x14] sm:$0xf] }
  0x1d   :  { %684 = vmatpush.bf16.msra.mxu3 %v1170_v27  ;;  %v829_v27 = vld [vmem:[%s1536_s0 + $0x30] sm:$0xf0]  ;;  %v828_v32 = vor.u32 %v1135_v25, %v827_v24  ;;  %v859_v36 = vld [vmem:[%s1536_s0 + $0x50] sm:$0xf] }
  0x1e   :  { %628 = vmatpush.bf16.msra.mxu0 %v1145_v28  ;;  %v835_v28 = vld [vmem:[%s1536_s0 + $0x18] sm:$0xf]  ;;  %v832_v33 = vor.u32 %v1131_v26, %v829_v27  ;;  %v1143_v37 = vld [vmem:[%s1536_s0 + $0x6c] sm:$0xf0]  ;;  %v861_v39 = vld [vmem:[%s1536_s0 + $0x70] sm:$0xf0] }
  0x1f   :  { %647 = vmatpush.bf16.msra.mxu1 %v1153_v29  ;;  %v1136_v29 = vld [vmem:[%s1536_s0 + $0x34] sm:$0xf0] }
  0x20   :  { %666 = vmatpush.bf16.msra.mxu2 %v1161_v30  ;;  %v1132_v30 = vld [vmem:[%s1536_s0 + $0x1c] sm:$0xf]  ;;  %v836_v34 = vor.u32 %v1136_v29, %v835_v28 }
  0x21   :  { %685 = vmatpush.bf16.msra.mxu3 %v1169_v31  ;;  %629 = vmatmul.bf16.vlgmr.msra.gmra.mxu0 %v812_v42  ;;  %v837_v31 = vld [vmem:[%s1536_s0 + $0x38] sm:$0xf0] }
  0x22   :  { %697 = vmatpush.bf16.msrb.mxu0 %v1184_v41  ;;  %648 = vmatmul.bf16.vlgmr.msra.gmra.mxu1 %v816_v43  ;;  %v840_v35 = vor.u32 %v1132_v30, %v837_v31  ;;  %v1144_v41 = vld [vmem:[%s1536_s0 + $0x74] sm:$0xf0]  ;;  %v1140_v42 = vld [vmem:[%s1536_s0 + $0x5c] sm:$0xf] }
  0x23   :  { %667 = vmatmul.bf16.vlgmr.msra.gmra.mxu2 %v820_v44  ;;  %716 = vmatpush.bf16.msrb.mxu1 %v1192_v46  ;;  %v869_v43 = vld [vmem:[%s1536_s0 + $0x78] sm:$0xf0]  ;;  %v860_v44 = vor.u32 %v1143_v37, %v859_v36 }
  0x24   :  { %735 = vmatpush.bf16.msrb.mxu2 %v1200_v40  ;;  %686 = vmatmul.bf16.vlgmr.msra.gmra.mxu3 %v824_v45  ;;  %v867_v40 = vld [vmem:[%s1536_s0 + $0x58] sm:$0xf]  ;;  %v864_v45 = vor.u32 %v1139_v38, %v861_v39 }
  0x25   :  { %754 = vmatpush.bf16.msrb.mxu3 %v1208_v47  ;;  %v868_v46 = vor.u32 %v1144_v41, %v867_v40  ;;  %v872_v47 = vor.u32 %v1140_v42, %v869_v43 }
  0x26   :  { %698 = vmatpush.bf16.msrb.mxu0 %v1183_v49 }
  0x27   :  { %717 = vmatpush.bf16.msrb.mxu1 %v1191_v50 }
  0x28   :  { %736 = vmatpush.bf16.msrb.mxu2 %v1199_v48 }
  0x29   :  { %755 = vmatpush.bf16.msrb.mxu3 %v1207_v51 }
  0x2a   :  { %699 = vmatpush.bf16.msrb.mxu0 %v1182_v53 }
  0x2b   :  { %718 = vmatpush.bf16.msrb.mxu1 %v1190_v54 }
  0x2c   :  { %737 = vmatpush.bf16.msrb.mxu2 %v1198_v52 }
  0x2d   :  { %756 = vmatpush.bf16.msrb.mxu3 %v1206_v55 }
  0x2e   :  { %700 = vmatpush.bf16.msrb.mxu0 %v1181_v57 }
  0x2f   :  { %719 = vmatpush.bf16.msrb.mxu1 %v1189_v58 }
  0x30   :  { %738 = vmatpush.bf16.msrb.mxu2 %v1197_v56 }
  0x31   :  { %757 = vmatpush.bf16.msrb.mxu3 %v1205_v59  ;;  %634 = vmatmul.bf16.gmra.mxu0 %v844_v6 }
  0x32   :  { %701 = vmatpush.bf16.msrb.mxu0 %v1180_v5  ;;  %653 = vmatmul.bf16.gmra.mxu1 %v848_v7 }
  0x33   :  { %672 = vmatmul.bf16.gmra.mxu2 %v852_v8  ;;  %720 = vmatpush.bf16.msrb.mxu1 %v1188_v10 }
  0x34   :  { %739 = vmatpush.bf16.msrb.mxu2 %v1196_v4  ;;  %691 = vmatmul.bf16.gmra.mxu3 %v856_v9 }
  0x35   :  { %758 = vmatpush.bf16.msrb.mxu3 %v1204_v11 }
  0x36   :  { %702 = vmatpush.bf16.msrb.mxu0 %v1179_v13 }
  0x37   :  { %721 = vmatpush.bf16.msrb.mxu1 %v1187_v14 }
  0x38   :  { %740 = vmatpush.bf16.msrb.mxu2 %v1195_v12 }
  0x39   :  { %759 = vmatpush.bf16.msrb.mxu3 %v1203_v15 }
  0x3a   :  { %703 = vmatpush.bf16.msrb.mxu0 %v1178_v17 }
  0x3b   :  { %722 = vmatpush.bf16.msrb.mxu1 %v1186_v18 }
  0x3c   :  { %741 = vmatpush.bf16.msrb.mxu2 %v1194_v16 }
  0x3d   :  { %760 = vmatpush.bf16.msrb.mxu3 %v1202_v19 }
  0x3e   :  { %704 = vmatpush.bf16.msrb.mxu0 %v1177_v21 }
  0x3f   :  { %723 = vmatpush.bf16.msrb.mxu1 %v1185_v22 }
  0x40   :  { %742 = vmatpush.bf16.msrb.mxu2 %v1193_v20 }
  0x41   :  { %761 = vmatpush.bf16.msrb.mxu3 %v1201_v23  ;;  %705 = vmatmul.bf16.vlgmr.msrb.gmra.mxu0 %v828_v32 }
  0x42   :  { %724 = vmatmul.bf16.vlgmr.msrb.gmra.mxu1 %v832_v33 }
  0x43   :  { %743 = vmatmul.bf16.vlgmr.msrb.gmra.mxu2 %v836_v34 }
  0x44   :  { %762 = vmatmul.bf16.vlgmr.msrb.gmra.mxu3 %v840_v35 }
  0x51   :  { %710 = vmatmul.bf16.gmra.mxu0 %v860_v44 }
  0x52   :  { %729 = vmatmul.bf16.gmra.mxu1 %v864_v45 }
  0x53   :  { %748 = vmatmul.bf16.gmra.mxu2 %v868_v46 }
  0x54   :  { %767 = vmatmul.bf16.gmra.mxu3 %v872_v47 }
  0x9e   :  { %v630_v48 = vpop.f32.mrf.mxu0 }
  0x9f   :  { %v649_v49 = vpop.f32.mrf.mxu1 }
  0xa0   :  { %v650_v62 = vadd.f32 %v649_v49, %v630_v48 }
  0xa6   :  { %v668_v50 = vpop.f32.mrf.mxu2  ;;  %v632_v52 = vpop.f32.mrf.mxu0 }
  0xa7   :  { %v687_v51 = vpop.f32.mrf.mxu3  ;;  %v651_v53 = vpop.f32.mrf.mxu1  ;;  %v669_v63 = vadd.f32 %v668_v50, %v650_v62 }
  0xa8   :  { %v652_v5 = vadd.f32 %v651_v53, %v632_v52 }
  0xa9   :  { %v688_v2 = vadd.f32 %v687_v51, %v669_v63 }
  0xae   :  { %v670_v54 = vpop.f32.mrf.mxu2  ;;  %v635_v56 = vpop.f32.mrf.mxu0 }
  0xaf   :  { %v689_v55 = vpop.f32.mrf.mxu3  ;;  %v654_v57 = vpop.f32.mrf.mxu1  ;;  %v671_v7 = vadd.f32 %v670_v54, %v652_v5 }
  0xb0   :  { %v655_v15 = vadd.f32 %v654_v57, %v635_v56 }
  0xb1   :  { %v690_v10 = vadd.f32 %v689_v55, %v671_v7 }
  0xb6   :  { %v673_v58 = vpop.f32.mrf.mxu2  ;;  %v637_v60 = vpop.f32.mrf.mxu0 }
  0xb7   :  { %v692_v59 = vpop.f32.mrf.mxu3  ;;  %v656_v61 = vpop.f32.mrf.mxu1  ;;  %v674_v18 = vadd.f32 %v673_v58, %v655_v15 }
  0xb8   :  { %v657_v25 = vadd.f32 %v656_v61, %v637_v60 }
  0xb9   :  { %v693_v21 = vadd.f32 %v692_v59, %v674_v18 }
  0xbe   :  { %v675_v0 = vpop.f32.mrf.mxu2  ;;  %v706_v3 = vpop.f32.mrf.mxu0 }
  0xbf   :  { %v694_v1 = vpop.f32.mrf.mxu3  ;;  %v725_v4 = vpop.f32.mrf.mxu1  ;;  %v707_v6 = vadd.f32 %v706_v3, %v688_v2  ;;  %v676_v29 = vadd.f32 %v675_v0, %v657_v25 }
  0xc1   :  { %v726_v8 = vadd.f32 %v725_v4, %v707_v6  ;;  %v695_v32 = vadd.f32 %v694_v1, %v676_v29 }
  0xc6   :  { %v744_v9 = vpop.f32.mrf.mxu2  ;;  %v708_v13 = vpop.f32.mrf.mxu0 }
  0xc7   :  { %v745_v11 = vadd.f32 %v744_v9, %v726_v8  ;;  %v763_v12 = vpop.f32.mrf.mxu3  ;;  %v727_v14 = vpop.f32.mrf.mxu1  ;;  %v709_v17 = vadd.f32 %v708_v13, %v690_v10 }
  0xc9   :  { %v764_v16 = vadd.f32 %v763_v12, %v745_v11  ;;  %v728_v19 = vadd.f32 %v727_v14, %v709_v17 }
  0xcb   :  { %773 = vst [vmem:[%s1537_s2] sm:$0xff] %v764_v16  ;;  %v787_v42 = vmul.f32 %v764_v16, %v764_v16 }
  0xce   :  { %v746_v20 = vpop.f32.mrf.mxu2  ;;  %v711_v24 = vpop.f32.mrf.mxu0 }
  0xcf   :  { %v747_v22 = vadd.f32 %v746_v20, %v728_v19  ;;  %v765_v23 = vpop.f32.mrf.mxu3  ;;  %v712_v27 = vadd.f32 %v711_v24, %v693_v21  ;;  %v730_v28 = vpop.f32.mrf.mxu1 }
  0xd1   :  { %v766_v26 = vadd.f32 %v765_v23, %v747_v22  ;;  %v731_v30 = vadd.f32 %v730_v28, %v712_v27 }
  0xd3   :  { %774 = vst [vmem:[%s1537_s2 + $0x8] sm:$0xff] %v766_v26  ;;  %v788_v39 = vmul.f32 %v766_v26, %v766_v26  ;;  %v777_v43 = vadd.f32 %v766_v26, %v764_v16 }
  0xd5   :  { %v791_v47 = vadd.f32 %v788_v39, %v787_v42 }
  0xd6   :  { %v749_v31 = vpop.f32.mrf.mxu2  ;;  %v713_v35 = vpop.f32.mrf.mxu0 }
  0xd7   :  { %v750_v33 = vadd.f32 %v749_v31, %v731_v30  ;;  %v768_v34 = vpop.f32.mrf.mxu3  ;;  %v714_v37 = vadd.f32 %v713_v35, %v695_v32  ;;  %v732_v38 = vpop.f32.mrf.mxu1 }
  0xd9   :  { %v769_v36 = vadd.f32 %v768_v34, %v750_v33  ;;  %v733_v40 = vadd.f32 %v732_v38, %v714_v37 }
  0xdb   :  { %775 = vst [vmem:[%s1537_s2 + $0x10] sm:$0xff] %v769_v36  ;;  %v789_v44 = vmul.f32 %v769_v36, %v769_v36  ;;  %v778_v48 = vadd.f32 %v777_v43, %v769_v36 }
  0xdd   :  { %v792_v50 = vadd.f32 %v791_v47, %v789_v44 }
  0xde   :  { %v751_v41 = vpop.f32.mrf.mxu2 }
  0xdf   :  { %v752_v45 = vadd.f32 %v751_v41, %v733_v40  ;;  %v770_v46 = vpop.f32.mrf.mxu3 }
  0xe1   :  { %v771_v49 = vadd.f32 %v770_v46, %v752_v45 }
  0xe3   :  { %776 = vst [vmem:[%s1537_s2 + $0x18] sm:$0xff] %v771_v49  ;;  %v779_v51 = vadd.f32 %v778_v48, %v771_v49  ;;  %v790_v52 = vmul.f32 %v771_v49, %v771_v49 }
  0xe5   :  { %v780_v53 = vrot.slane %v779_v51, 4  ;;  %v793_v54 = vadd.f32 %v792_v50, %v790_v52 }
  0xe7   :  { %v781_v55 = vadd.f32 %v780_v53, %v779_v51  ;;  %v794_v56 = vrot.slane %v793_v54, 4 }
  0xe9   :  { %v782_v57 = vrot.slane %v781_v55, 2  ;;  %v795_v58 = vadd.f32 %v794_v56, %v793_v54 }
  0xeb   :  { %v783_v59 = vadd.f32 %v782_v57, %v781_v55  ;;  %v796_v60 = vrot.slane %v795_v58, 2 }
  0xed   :  { %v784_v61 = vrot.slane %v783_v59, 1  ;;  %v797_v62 = vadd.f32 %v796_v60, %v795_v58 }
  0xef   :  { %v785_v63 = vadd.f32 %v784_v61, %v783_v59  ;;  %v798_v0 = vrot.slane %v797_v62, 1 }
  0xf1   :  { %786 = vst [vmem:[%s1538_s3] sm:$0x1] %v785_v63  ;;  %v799_v1 = vadd.f32 %v798_v0, %v797_v62 }
  0xf3   :  { %800 = vst [vmem:[%s1538_s3 + $0x1] sm:$0x1] %v799_v1 }

// kernel: discriminator_wgan_forward.12
= control target key start
LH: loop header
LB: loop body
LE: loop exit
PB: predicated region body
PF: predicated region fallthrough
CT: control target
= control target key end

     0   :  { %s82_s0 = inlined_call_operand.vmem [shape: f32[8,256], index: 0, kind: input, shape index: {}]   ;;  %s83_s1 = inlined_call_operand.vmem [shape: f32[1,256], index: 1, kind: input, shape index: {}]   ;;  %s84_s2 = inlined_call_operand.vmem [shape: f32[1,256], index: 2, kind: input, shape index: {}]   ;;  %s85_s3 = inlined_call_operand.vmem [shape: f32[8,256], index: 3, kind: output, shape index: {}]  }
   0x1   :  { %v14_v0 = vld [vmem:[%s82_s0] sm:$0xff]  ;;  %v15_v5 = vld [vmem:[%s82_s0 + $0x8] sm:$0xff] }
   0x2   :  { %v16_v1 = vld [vmem:[%s83_s1] sm:$0x3] }
   0x3   :  { %v24_v2 = vld [vmem:[%s84_s2] sm:$0x3]  ;;  %v18_v3 = vperm.slane %v16_v1, 0  ;;  %v19_v6 = vperm.slane %v16_v1, 1 }
   0x4   :  { %v26_v4 = vperm.slane %v24_v2, 0  ;;  %v27_v7 = vperm.slane %v24_v2, 1 }
   0x5   :  { %v22_v8 = vmul.f32 %v18_v3, %v14_v0  ;;  %v23_v9 = vmul.f32 %v19_v6, %v15_v5 }
   0x7   :  { %v30_v10 = vadd.f32 %v26_v4, %v22_v8  ;;  %v31_v11 = vadd.f32 %v27_v7, %v23_v9 }
   0x9   :  { %vm32_vm0 = vcmp.ge.f32.partialorder %v30_v10, 0.0  ;;  %v34_v12 = vmul.f32 0.2, %v30_v10  ;;  %vm33_vm1 = vcmp.ge.f32.partialorder %v31_v11, 0.0  ;;  %v35_v13 = vmul.f32 0.2, %v31_v11 }
   0xb   :  { %v36_v14 = vsel %vm32_vm0, %v30_v10, %v34_v12  ;;  %v37_v15 = vsel %vm33_vm1, %v31_v11, %v35_v13 }
   0xc   :  { %38 = vst [vmem:[%s85_s3] sm:$0xff] %v36_v14 }
   0xd   :  { %39 = vst [vmem:[%s85_s3 + $0x8] sm:$0xff] %v37_v15 }

// kernel: discriminator_wgan_forward.14
= control target key start
LH: loop header
LB: loop body
LE: loop exit
PB: predicated region body
PF: predicated region fallthrough
CT: control target
= control target key end

     0   :  { %s116_s0 = inlined_call_operand.vmem [shape: f32[8,512], index: 0, kind: input, shape index: {}]   ;;  %s117_s1 = inlined_call_operand.vmem [shape: f32[1,512], index: 1, kind: input, shape index: {}]   ;;  %s118_s2 = inlined_call_operand.vmem [shape: f32[1,512], index: 2, kind: input, shape index: {}]   ;;  %s119_s3 = inlined_call_operand.vmem [shape: f32[8,512], index: 3, kind: output, shape index: {}]  }
   0x1   :  { %v14_v0 = vld [vmem:[%s116_s0] sm:$0xff]  ;;  %v15_v5 = vld [vmem:[%s116_s0 + $0x8] sm:$0xff]  ;;  %v16_v8 = vld [vmem:[%s116_s0 + $0x10] sm:$0xff] }
   0x2   :  { %v18_v1 = vld [vmem:[%s117_s1] sm:$0xf]  ;;  %v17_v11 = vld [vmem:[%s116_s0 + $0x18] sm:$0xff] }
   0x3   :  { %v32_v2 = vld [vmem:[%s118_s2] sm:$0xf]  ;;  %v20_v3 = vperm.slane %v18_v1, 0  ;;  %v21_v6 = vperm.slane %v18_v1, 1  ;;  %v22_v9 = vperm.slane %v18_v1, 2  ;;  %v23_v12 = vperm.slane %v18_v1, 3 }
   0x4   :  { %v34_v4 = vperm.slane %v32_v2, 0  ;;  %v35_v7 = vperm.slane %v32_v2, 1  ;;  %v36_v10 = vperm.slane %v32_v2, 2  ;;  %v37_v13 = vperm.slane %v32_v2, 3 }
   0x5   :  { %v28_v14 = vmul.f32 %v20_v3, %v14_v0  ;;  %v29_v15 = vmul.f32 %v21_v6, %v15_v5  ;;  %v30_v16 = vmul.f32 %v22_v9, %v16_v8  ;;  %v31_v17 = vmul.f32 %v23_v12, %v17_v11 }
   0x7   :  { %v42_v18 = vadd.f32 %v34_v4, %v28_v14  ;;  %v43_v19 = vadd.f32 %v35_v7, %v29_v15  ;;  %v44_v20 = vadd.f32 %v36_v10, %v30_v16  ;;  %v45_v21 = vadd.f32 %v37_v13, %v31_v17 }
   0x9   :  { %vm46_vm0 = vcmp.ge.f32.partialorder %v42_v18, 0.0  ;;  %v50_v22 = vmul.f32 0.2, %v42_v18  ;;  %vm47_vm1 = vcmp.ge.f32.partialorder %v43_v19, 0.0  ;;  %v51_v23 = vmul.f32 0.2, %v43_v19 }
   0xa   :  { %vm48_vm2 = vcmp.ge.f32.partialorder %v44_v20, 0.0  ;;  %v52_v24 = vmul.f32 0.2, %v44_v20  ;;  %vm49_vm3 = vcmp.ge.f32.partialorder %v45_v21, 0.0  ;;  %v53_v25 = vmul.f32 0.2, %v45_v21 }
   0xb   :  { %v54_v26 = vsel %vm46_vm0, %v42_v18, %v50_v22  ;;  %v55_v27 = vsel %vm47_vm1, %v43_v19, %v51_v23 }
   0xc   :  { %58 = vst [vmem:[%s119_s3] sm:$0xff] %v54_v26  ;;  %v56_v28 = vsel %vm48_vm2, %v44_v20, %v52_v24  ;;  %v57_v29 = vsel %vm49_vm3, %v45_v21, %v53_v25 }
   0xd   :  { %59 = vst [vmem:[%s119_s3 + $0x8] sm:$0xff] %v55_v27 }
   0xe   :  { %60 = vst [vmem:[%s119_s3 + $0x10] sm:$0xff] %v56_v28 }
   0xf   :  { %61 = vst [vmem:[%s119_s3 + $0x18] sm:$0xff] %v57_v29 }

// kernel: discriminator_wgan_forward.11
= control target key start
LH: loop header
LB: loop body
LE: loop exit
PB: predicated region body
PF: predicated region fallthrough
CT: control target
= control target key end

     0   :  { %vm2046_vm0 = vcmask 1040384   ;;  %s5053_s1 = inlined_call_operand.vmem [shape: bf16[2048,256], index: 1, kind: input, shape index: {}]   ;;  %s5054_s0 = inlined_call_operand.vmem [shape: bf16[8,2048], index: 0, kind: input, shape index: {}]   ;;  %s5055_s2 = inlined_call_operand.vmem [shape: f32[8,256], index: 2, kind: output, shape index: {0}]   ;;  %s5056_s3 = inlined_call_operand.vmem [shape: f32[1,2,256], index: 3, kind: output, shape index: {1}]  }
   0x1   :  { %v2141_v0 = vld [vmem:[%s5053_s1 + $0x70] sm:$0xf]  ;;  %v3123_v1 = vld [vmem:[%s5053_s1 + $0x74] sm:$0xf0]  ;;  %v2133_v11 = vld [vmem:[%s5053_s1 + $0x60] sm:$0xf] }
   0x2   :  { %v2205_v2 = vld [vmem:[%s5053_s1 + $0xf0] sm:$0xf]  ;;  %v2142_v3 = vor.u32 %v3123_v1, %v2141_v0  ;;  %v3139_v4 = vld [vmem:[%s5053_s1 + $0xf4] sm:$0xf0]  ;;  %v3121_v13 = vld [vmem:[%s5053_s1 + $0x64] sm:$0xf0] }
   0x3   :  { %v2269_v5 = vld [vmem:[%s5053_s1 + $0x170] sm:$0xf]  ;;  %v3155_v6 = vld [vmem:[%s5053_s1 + $0x174] sm:$0xf0]  ;;  %v2206_v7 = vor.u32 %v3139_v4, %v2205_v2  ;;  %v2197_v14 = vld [vmem:[%s5053_s1 + $0xe0] sm:$0xf]  ;;  %v2134_v16 = vor.u32 %v3121_v13, %v2133_v11 }
   0x4   :  { %v2270_v8 = vor.u32 %v3155_v6, %v2269_v5  ;;  %v2333_v9 = vld [vmem:[%s5053_s1 + $0x1f0] sm:$0xf]  ;;  %v3171_v10 = vld [vmem:[%s5053_s1 + $0x1f4] sm:$0xf0]  ;;  %1613 = vmatpush.bf16.msra.mxu0 %v2142_v3  ;;  %v3137_v15 = vld [vmem:[%s5053_s1 + $0xe4] sm:$0xf0] }
   0x5   :  { %v2334_v12 = vor.u32 %v3171_v10, %v2333_v9  ;;  %1626 = vmatpush.bf16.msra.mxu1 %v2206_v7  ;;  %v2198_v17 = vor.u32 %v3137_v15, %v2197_v14  ;;  %v2261_v18 = vld [vmem:[%s5053_s1 + $0x160] sm:$0xf]  ;;  %v3153_v19 = vld [vmem:[%s5053_s1 + $0x164] sm:$0xf0]  ;;  %v2125_v23 = vld [vmem:[%s5053_s1 + $0x50] sm:$0xf] }
   0x6   :  { %1639 = vmatpush.bf16.msra.mxu2 %v2270_v8  ;;  %v2325_v20 = vld [vmem:[%s5053_s1 + $0x1e0] sm:$0xf]  ;;  %v2262_v21 = vor.u32 %v3153_v19, %v2261_v18  ;;  %v3169_v22 = vld [vmem:[%s5053_s1 + $0x1e4] sm:$0xf0]  ;;  %v3119_v24 = vld [vmem:[%s5053_s1 + $0x54] sm:$0xf0] }
   0x7   :  { %1652 = vmatpush.bf16.msra.mxu3 %v2334_v12  ;;  %v2326_v25 = vor.u32 %v3169_v22, %v2325_v20  ;;  %v2189_v26 = vld [vmem:[%s5053_s1 + $0xd0] sm:$0xf]  ;;  %v3135_v27 = vld [vmem:[%s5053_s1 + $0xd4] sm:$0xf0]  ;;  %v2126_v29 = vor.u32 %v3119_v24, %v2125_v23  ;;  %v2117_v35 = vld [vmem:[%s5053_s1 + $0x40] sm:$0xf] }
   0x8   :  { %v2253_v28 = vld [vmem:[%s5053_s1 + $0x150] sm:$0xf]  ;;  %1614 = vmatpush.bf16.msra.mxu0 %v2134_v16  ;;  %v3151_v30 = vld [vmem:[%s5053_s1 + $0x154] sm:$0xf0]  ;;  %v2190_v33 = vor.u32 %v3135_v27, %v2189_v26  ;;  %v3117_v36 = vld [vmem:[%s5053_s1 + $0x44] sm:$0xf0] }
   0x9   :  { %v2317_v31 = vld [vmem:[%s5053_s1 + $0x1d0] sm:$0xf]  ;;  %v3167_v32 = vld [vmem:[%s5053_s1 + $0x1d4] sm:$0xf0]  ;;  %1627 = vmatpush.bf16.msra.mxu1 %v2198_v17  ;;  %v2254_v34 = vor.u32 %v3151_v30, %v2253_v28  ;;  %v2181_v37 = vld [vmem:[%s5053_s1 + $0xc0] sm:$0xf]  ;;  %v2118_v44 = vor.u32 %v3117_v36, %v2117_v35 }
   0xa   :  { %1640 = vmatpush.bf16.msra.mxu2 %v2262_v21  ;;  %v2318_v38 = vor.u32 %v3167_v32, %v2317_v31  ;;  %v3133_v39 = vld [vmem:[%s5053_s1 + $0xc4] sm:$0xf0]  ;;  %v2245_v40 = vld [vmem:[%s5053_s1 + $0x140] sm:$0xf]  ;;  %v2109_v47 = vld [vmem:[%s5053_s1 + $0x30] sm:$0xf] }
   0xb   :  { %1653 = vmatpush.bf16.msra.mxu3 %v2326_v25  ;;  %v3149_v41 = vld [vmem:[%s5053_s1 + $0x144] sm:$0xf0]  ;;  %v2309_v42 = vld [vmem:[%s5053_s1 + $0x1c0] sm:$0xf]  ;;  %v2182_v45 = vor.u32 %v3133_v39, %v2181_v37  ;;  %v3115_v48 = vld [vmem:[%s5053_s1 + $0x34] sm:$0xf0] }
   0xc   :  { %v3165_v43 = vld [vmem:[%s5053_s1 + $0x1c4] sm:$0xf0]  ;;  %1615 = vmatpush.bf16.msra.mxu0 %v2126_v29  ;;  %v2246_v46 = vor.u32 %v3149_v41, %v2245_v40  ;;  %v2173_v49 = vld [vmem:[%s5053_s1 + $0xb0] sm:$0xf]  ;;  %v3131_v51 = vld [vmem:[%s5053_s1 + $0xb4] sm:$0xf0]  ;;  %v2110_v56 = vor.u32 %v3115_v48, %v2109_v47 }
   0xd   :  { %1628 = vmatpush.bf16.msra.mxu1 %v2190_v33  ;;  %v2310_v50 = vor.u32 %v3165_v43, %v2309_v42  ;;  %v2237_v52 = vld [vmem:[%s5053_s1 + $0x130] sm:$0xf]  ;;  %v3147_v53 = vld [vmem:[%s5053_s1 + $0x134] sm:$0xf0]  ;;  %v2174_v57 = vor.u32 %v3131_v51, %v2173_v49  ;;  %v2101_v59 = vld [vmem:[%s5053_s1 + $0x20] sm:$0xf] }
   0xe   :  { %1641 = vmatpush.bf16.msra.mxu2 %v2254_v34  ;;  %v2301_v54 = vld [vmem:[%s5053_s1 + $0x1b0] sm:$0xf]  ;;  %v3163_v55 = vld [vmem:[%s5053_s1 + $0x1b4] sm:$0xf0]  ;;  %v2238_v58 = vor.u32 %v3147_v53, %v2237_v52  ;;  %v3113_v60 = vld [vmem:[%s5053_s1 + $0x24] sm:$0xf0] }
   0xf   :  { %1654 = vmatpush.bf16.msra.mxu3 %v2318_v38  ;;  %v2165_v61 = vld [vmem:[%s5053_s1 + $0xa0] sm:$0xf]  ;;  %v2302_v62 = vor.u32 %v3163_v55, %v2301_v54  ;;  %v3129_v63 = vld [vmem:[%s5053_s1 + $0xa4] sm:$0xf0]  ;;  %v2102_v4 = vor.u32 %v3113_v60, %v2101_v59  ;;  %v2093_v7 = vld [vmem:[%s5053_s1 + $0x10] sm:$0xf] }
  0x10   :  { %1616 = vmatpush.bf16.msra.mxu0 %v2118_v44  ;;  %v2229_v0 = vld [vmem:[%s5053_s1 + $0x120] sm:$0xf]  ;;  %v3145_v1 = vld [vmem:[%s5053_s1 + $0x124] sm:$0xf0]  ;;  %v2166_v5 = vor.u32 %v3129_v63, %v2165_v61  ;;  %v3111_v8 = vld [vmem:[%s5053_s1 + $0x14] sm:$0xf0] }
  0x11   :  { %1629 = vmatpush.bf16.msra.mxu1 %v2182_v45  ;;  %v2293_v2 = vld [vmem:[%s5053_s1 + $0x1a0] sm:$0xf]  ;;  %v3161_v3 = vld [vmem:[%s5053_s1 + $0x1a4] sm:$0xf0]  ;;  %v2230_v6 = vor.u32 %v3145_v1, %v2229_v0  ;;  %v2157_v9 = vld [vmem:[%s5053_s1 + $0x90] sm:$0xf]  ;;  %v2094_v16 = vor.u32 %v3111_v8, %v2093_v7 }
  0x12   :  { %1642 = vmatpush.bf16.msra.mxu2 %v2246_v46  ;;  %v2294_v10 = vor.u32 %v3161_v3, %v2293_v2  ;;  %v3127_v11 = vld [vmem:[%s5053_s1 + $0x94] sm:$0xf0]  ;;  %v2221_v12 = vld [vmem:[%s5053_s1 + $0x110] sm:$0xf]  ;;  %v2085_v17 = vld [vmem:[%s5053_s1] sm:$0xf] }
  0x13   :  { %1655 = vmatpush.bf16.msra.mxu3 %v2310_v50  ;;  %v3143_v13 = vld [vmem:[%s5053_s1 + $0x114] sm:$0xf0]  ;;  %v2285_v14 = vld [vmem:[%s5053_s1 + $0x190] sm:$0xf]  ;;  %v3109_v18 = vld [vmem:[%s5053_s1 + $0x4] sm:$0xf0]  ;;  %v2158_v19 = vor.u32 %v3127_v11, %v2157_v9 }
  0x14   :  { %1617 = vmatpush.bf16.msra.mxu0 %v2110_v56  ;;  %v3159_v15 = vld [vmem:[%s5053_s1 + $0x194] sm:$0xf0]  ;;  %v2222_v20 = vor.u32 %v3143_v13, %v2221_v12  ;;  %v2149_v21 = vld [vmem:[%s5053_s1 + $0x80] sm:$0xf]  ;;  %v3125_v22 = vld [vmem:[%s5053_s1 + $0x84] sm:$0xf0]  ;;  %v2086_v31 = vor.u32 %v3109_v18, %v2085_v17 }
  0x15   :  { %1630 = vmatpush.bf16.msra.mxu1 %v2174_v57  ;;  %v2213_v23 = vld [vmem:[%s5053_s1 + $0x100] sm:$0xf]  ;;  %v2286_v24 = vor.u32 %v3159_v15, %v2285_v14  ;;  %v3141_v25 = vld [vmem:[%s5053_s1 + $0x104] sm:$0xf0]  ;;  %v2397_v28 = vld [vmem:[%s5053_s1 + $0x270] sm:$0xf]  ;;  %v2150_v35 = vor.u32 %v3125_v22, %v2149_v21 }
  0x16   :  { %1643 = vmatpush.bf16.msra.mxu2 %v2238_v58  ;;  %v2277_v26 = vld [vmem:[%s5053_s1 + $0x180] sm:$0xf]  ;;  %v3157_v27 = vld [vmem:[%s5053_s1 + $0x184] sm:$0xf0]  ;;  %v3187_v29 = vld [vmem:[%s5053_s1 + $0x274] sm:$0xf0]  ;;  %v2214_v36 = vor.u32 %v3141_v25, %v2213_v23 }
  0x17   :  { %1656 = vmatpush.bf16.msra.mxu3 %v2302_v62  ;;  %v2461_v30 = vld [vmem:[%s5053_s1 + $0x2f0] sm:$0xf]  ;;  %v3203_v32 = vld [vmem:[%s5053_s1 + $0x2f4] sm:$0xf0]  ;;  %v2278_v39 = vor.u32 %v3157_v27, %v2277_v26  ;;  %v2398_v40 = vor.u32 %v3187_v29, %v2397_v28  ;;  %v2389_v43 = vld [vmem:[%s5053_s1 + $0x260] sm:$0xf] }
  0x18   :  { %1618 = vmatpush.bf16.msra.mxu0 %v2102_v4  ;;  %v2525_v33 = vld [vmem:[%s5053_s1 + $0x370] sm:$0xf]  ;;  %v3219_v34 = vld [vmem:[%s5053_s1 + $0x374] sm:$0xf0]  ;;  %v2462_v41 = vor.u32 %v3203_v32, %v2461_v30  ;;  %v3185_v44 = vld [vmem:[%s5053_s1 + $0x264] sm:$0xf0] }
  0x19   :  { %1631 = vmatpush.bf16.msra.mxu1 %v2166_v5  ;;  %v2589_v37 = vld [vmem:[%s5053_s1 + $0x3f0] sm:$0xf]  ;;  %v3235_v38 = vld [vmem:[%s5053_s1 + $0x3f4] sm:$0xf0]  ;;  %v2526_v42 = vor.u32 %v3219_v34, %v2525_v33  ;;  %v2453_v45 = vld [vmem:[%s5053_s1 + $0x2e0] sm:$0xf]  ;;  %v2390_v52 = vor.u32 %v3185_v44, %v2389_v43 }
  0x1a   :  { %1644 = vmatpush.bf16.msra.mxu2 %v2230_v6  ;;  %v2590_v46 = vor.u32 %v3235_v38, %v2589_v37  ;;  %v3201_v47 = vld [vmem:[%s5053_s1 + $0x2e4] sm:$0xf0]  ;;  %v2517_v48 = vld [vmem:[%s5053_s1 + $0x360] sm:$0xf]  ;;  %v2381_v53 = vld [vmem:[%s5053_s1 + $0x250] sm:$0xf] }
  0x1b   :  { %1657 = vmatpush.bf16.msra.mxu3 %v2294_v10  ;;  %v3217_v49 = vld [vmem:[%s5053_s1 + $0x364] sm:$0xf0]  ;;  %v2581_v50 = vld [vmem:[%s5053_s1 + $0x3e0] sm:$0xf]  ;;  %v2454_v54 = vor.u32 %v3201_v47, %v2453_v45  ;;  %v3183_v56 = vld [vmem:[%s5053_s1 + $0x254] sm:$0xf0] }
  0x1c   :  { %1619 = vmatpush.bf16.msra.mxu0 %v2094_v16  ;;  %v3233_v51 = vld [vmem:[%s5053_s1 + $0x3e4] sm:$0xf0]  ;;  %v2518_v55 = vor.u32 %v3217_v49, %v2517_v48  ;;  %v2445_v57 = vld [vmem:[%s5053_s1 + $0x2d0] sm:$0xf]  ;;  %v3199_v60 = vld [vmem:[%s5053_s1 + $0x2d4] sm:$0xf0]  ;;  %v2382_v3 = vor.u32 %v3183_v56, %v2381_v53 }
  0x1d   :  { %1632 = vmatpush.bf16.msra.mxu1 %v2158_v19  ;;  %v14_v58 = vld [vmem:[%s5054_s0 + $0x8] sm:$0xff]  ;;  %v2582_v59 = vor.u32 %v3233_v51, %v2581_v50  ;;  %v2509_v61 = vld [vmem:[%s5053_s1 + $0x350] sm:$0xf]  ;;  %v3215_v62 = vld [vmem:[%s5053_s1 + $0x354] sm:$0xf0]  ;;  %v2446_v7 = vor.u32 %v3199_v60, %v2445_v57 }
  0x1e   :  { %1645 = vmatpush.bf16.msra.mxu2 %v2222_v20  ;;  %v287_v63 = vunpack.c.l.b16 %v14_v58  ;;  %v288_v0 = vunpack.c.h.b16 %v14_v58  ;;  %v2573_v1 = vld [vmem:[%s5053_s1 + $0x3d0] sm:$0xf]  ;;  %v3231_v2 = vld [vmem:[%s5053_s1 + $0x3d4] sm:$0xf0]  ;;  %v13_v5 = vld [vmem:[%s5054_s0] sm:$0xff]  ;;  %v2510_v8 = vor.u32 %v3215_v62, %v2509_v61 }
  0x1f   :  { %1658 = vmatpush.bf16.msra.mxu3 %v2286_v24  ;;  %v2373_v9 = vld [vmem:[%s5053_s1 + $0x240] sm:$0xf]  ;;  %v3181_v10 = vld [vmem:[%s5053_s1 + $0x244] sm:$0xf0]  ;;  %v285_v12 = vunpack.c.l.b16 %v13_v5  ;;  %v286_v13 = vunpack.c.h.b16 %v13_v5  ;;  %v2574_v14 = vor.u32 %v3231_v2, %v2573_v1  ;;  %v2365_v25 = vld [vmem:[%s5053_s1 + $0x230] sm:$0xf] }
  0x20   :  { %1620 = vmatpush.bf16.msra.mxu0 %v2086_v31  ;;  %v3651_v4 = vpack.c.b16 %v287_v63, %v287_v63  ;;  %v3656_v6 = vpack.c.b16 %v288_v0, %v288_v0  ;;  %v2437_v11 = vld [vmem:[%s5053_s1 + $0x2c0] sm:$0xf]  ;;  %v3197_v15 = vld [vmem:[%s5053_s1 + $0x2c4] sm:$0xf0]  ;;  %v2374_v22 = vor.u32 %v3181_v10, %v2373_v9  ;;  %v3179_v26 = vld [vmem:[%s5053_s1 + $0x234] sm:$0xf0] }
  0x21   :  { %1633 = vmatpush.bf16.msra.mxu1 %v2150_v35  ;;  %v2501_v16 = vld [vmem:[%s5053_s1 + $0x340] sm:$0xf]  ;;  %v3213_v17 = vld [vmem:[%s5053_s1 + $0x344] sm:$0xf0]  ;;  %v3683_v20 = vpack.c.b16 %v285_v12, %v285_v12  ;;  %v3686_v21 = vpack.c.b16 %v286_v13, %v286_v13  ;;  %v2438_v23 = vor.u32 %v3197_v15, %v2437_v11  ;;  %v2429_v27 = vld [vmem:[%s5053_s1 + $0x2b0] sm:$0xf]  ;;  %v2366_v34 = vor.u32 %v3179_v26, %v2365_v25 }
  0x22   :  { %1646 = vmatpush.bf16.msra.mxu2 %v2214_v36  ;;  %v2565_v18 = vld [vmem:[%s5053_s1 + $0x3c0] sm:$0xf]  ;;  %v3229_v19 = vld [vmem:[%s5053_s1 + $0x3c4] sm:$0xf0]  ;;  %v2502_v24 = vor.u32 %v3213_v17, %v2501_v16  ;;  %v3195_v29 = vld [vmem:[%s5053_s1 + $0x2b4] sm:$0xf0] }
  0x23   :  { %1659 = vmatpush.bf16.msra.mxu3 %v2278_v39  ;;  %v2566_v28 = vor.u32 %v3229_v19, %v2565_v18  ;;  %v2493_v30 = vld [vmem:[%s5053_s1 + $0x330] sm:$0xf]  ;;  %v3211_v31 = vld [vmem:[%s5053_s1 + $0x334] sm:$0xf0]  ;;  %1621 = vmatmul.bf16.vlgmr.msra.gmra.mxu0 %v3683_v20  ;;  %v2430_v35 = vor.u32 %v3195_v29, %v2429_v27  ;;  %v2357_v37 = vld [vmem:[%s5053_s1 + $0x220] sm:$0xf] }
  0x24   :  { %1665 = vmatpush.bf16.msrb.mxu0 %v2398_v40  ;;  %v2557_v32 = vld [vmem:[%s5053_s1 + $0x3b0] sm:$0xf]  ;;  %v3227_v33 = vld [vmem:[%s5053_s1 + $0x3b4] sm:$0xf0]  ;;  %1634 = vmatmul.bf16.vlgmr.msra.gmra.mxu1 %v3686_v21  ;;  %v2494_v36 = vor.u32 %v3211_v31, %v2493_v30  ;;  %v3177_v38 = vld [vmem:[%s5053_s1 + $0x224] sm:$0xf0] }
  0x25   :  { %1678 = vmatpush.bf16.msrb.mxu1 %v2462_v41  ;;  %1647 = vmatmul.bf16.vlgmr.msra.gmra.mxu2 %v3651_v4  ;;  %v2421_v39 = vld [vmem:[%s5053_s1 + $0x2a0] sm:$0xf]  ;;  %v2558_v40 = vor.u32 %v3227_v33, %v2557_v32  ;;  %v3193_v41 = vld [vmem:[%s5053_s1 + $0x2a4] sm:$0xf0]  ;;  %v2349_v49 = vld [vmem:[%s5053_s1 + $0x210] sm:$0xf] }
  0x26   :  { %1691 = vmatpush.bf16.msrb.mxu2 %v2526_v42  ;;  %1660 = vmatmul.bf16.vlgmr.msra.gmra.mxu3 %v3656_v6  ;;  %v2485_v42 = vld [vmem:[%s5053_s1 + $0x320] sm:$0xf]  ;;  %v3209_v43 = vld [vmem:[%s5053_s1 + $0x324] sm:$0xf0]  ;;  %v2422_v47 = vor.u32 %v3193_v41, %v2421_v39  ;;  %v3175_v50 = vld [vmem:[%s5053_s1 + $0x214] sm:$0xf0] }
  0x27   :  { %1704 = vmatpush.bf16.msrb.mxu3 %v2590_v46  ;;  %v2549_v44 = vld [vmem:[%s5053_s1 + $0x3a0] sm:$0xf]  ;;  %v3225_v45 = vld [vmem:[%s5053_s1 + $0x3a4] sm:$0xf0]  ;;  %v2358_v46 = vor.u32 %v3177_v38, %v2357_v37  ;;  %v2486_v48 = vor.u32 %v3209_v43, %v2485_v42  ;;  %v2413_v51 = vld [vmem:[%s5053_s1 + $0x290] sm:$0xf] }
  0x28   :  { %1666 = vmatpush.bf16.msrb.mxu0 %v2390_v52  ;;  %v2550_v52 = vor.u32 %v3225_v45, %v2549_v44  ;;  %v3191_v53 = vld [vmem:[%s5053_s1 + $0x294] sm:$0xf0]  ;;  %v2541_v56 = vld [vmem:[%s5053_s1 + $0x390] sm:$0xf]  ;;  %v2341_v58 = vld [vmem:[%s5053_s1 + $0x200] sm:$0xf] }
  0x29   :  { %1679 = vmatpush.bf16.msrb.mxu1 %v2454_v54  ;;  %v2477_v54 = vld [vmem:[%s5053_s1 + $0x310] sm:$0xf]  ;;  %v3223_v57 = vld [vmem:[%s5053_s1 + $0x394] sm:$0xf0]  ;;  %v3173_v60 = vld [vmem:[%s5053_s1 + $0x204] sm:$0xf0]  ;;  %v2414_v63 = vor.u32 %v3191_v53, %v2413_v51 }
  0x2a   :  { %1692 = vmatpush.bf16.msrb.mxu2 %v2518_v55  ;;  %v3207_v55 = vld [vmem:[%s5053_s1 + $0x314] sm:$0xf0]  ;;  %v2405_v61 = vld [vmem:[%s5053_s1 + $0x280] sm:$0xf]  ;;  %v3189_v62 = vld [vmem:[%s5053_s1 + $0x284] sm:$0xf0]  ;;  %v2542_v5 = vor.u32 %v3223_v57, %v2541_v56  ;;  %v2342_v13 = vor.u32 %v3173_v60, %v2341_v58 }
  0x2b   :  { %1705 = vmatpush.bf16.msrb.mxu3 %v2582_v59  ;;  %v2350_v59 = vor.u32 %v3175_v50, %v2349_v49  ;;  %v2478_v0 = vor.u32 %v3207_v55, %v2477_v54  ;;  %v2469_v1 = vld [vmem:[%s5053_s1 + $0x300] sm:$0xf]  ;;  %v3205_v2 = vld [vmem:[%s5053_s1 + $0x304] sm:$0xf0]  ;;  %v15_v9 = vld [vmem:[%s5054_s0 + $0x10] sm:$0xff]  ;;  %v2406_v18 = vor.u32 %v3189_v62, %v2405_v61 }
  0x2c   :  { %1667 = vmatpush.bf16.msrb.mxu0 %v2382_v3  ;;  %v16_v3 = vld [vmem:[%s5054_s0 + $0x18] sm:$0xff]  ;;  %v2653_v10 = vld [vmem:[%s5053_s1 + $0x470] sm:$0xf]  ;;  %v2470_v19 = vor.u32 %v3205_v2, %v2469_v1  ;;  %v2645_v31 = vld [vmem:[%s5053_s1 + $0x460] sm:$0xf] }
  0x2d   :  { %1680 = vmatpush.bf16.msrb.mxu1 %v2446_v7  ;;  %v2533_v7 = vld [vmem:[%s5053_s1 + $0x380] sm:$0xf]  ;;  %v3251_v11 = vld [vmem:[%s5053_s1 + $0x474] sm:$0xf0]  ;;  %v2717_v12 = vld [vmem:[%s5053_s1 + $0x4f0] sm:$0xf]  ;;  %v291_v17 = vunpack.c.l.b16 %v16_v3  ;;  %v292_v25 = vunpack.c.h.b16 %v16_v3 }
  0x2e   :  { %1693 = vmatpush.bf16.msrb.mxu2 %v2510_v8  ;;  %v3221_v8 = vld [vmem:[%s5053_s1 + $0x384] sm:$0xf0]  ;;  %v2781_v15 = vld [vmem:[%s5053_s1 + $0x570] sm:$0xf]  ;;  %v3283_v16 = vld [vmem:[%s5053_s1 + $0x574] sm:$0xf0]  ;;  %v2654_v27 = vor.u32 %v3251_v11, %v2653_v10 }
  0x2f   :  { %1706 = vmatpush.bf16.msrb.mxu3 %v2574_v14  ;;  %v3267_v14 = vld [vmem:[%s5053_s1 + $0x4f4] sm:$0xf0]  ;;  %v2534_v26 = vor.u32 %v3221_v8, %v2533_v7  ;;  %v2782_v30 = vor.u32 %v3283_v16, %v2781_v15  ;;  %v3249_v32 = vld [vmem:[%s5053_s1 + $0x464] sm:$0xf0]  ;;  %v2709_v33 = vld [vmem:[%s5053_s1 + $0x4e0] sm:$0xf]  ;;  %v3834_v38 = vpack.c.b16 %v291_v17, %v291_v17  ;;  %v3844_v42 = vpack.c.b16 %v292_v25, %v292_v25 }
  0x30   :  { %1668 = vmatpush.bf16.msrb.mxu0 %v2374_v22  ;;  %v2845_v22 = vld [vmem:[%s5053_s1 + $0x5f0] sm:$0xf]  ;;  %v2718_v29 = vor.u32 %v3267_v14, %v2717_v12  ;;  %v3281_v37 = vld [vmem:[%s5053_s1 + $0x564] sm:$0xf0]  ;;  %v2837_v39 = vld [vmem:[%s5053_s1 + $0x5e0] sm:$0xf]  ;;  %v2646_v43 = vor.u32 %v3249_v32, %v2645_v31 }
  0x31   :  { %1681 = vmatpush.bf16.msrb.mxu1 %v2438_v23  ;;  %v3299_v23 = vld [vmem:[%s5053_s1 + $0x5f4] sm:$0xf0]  ;;  %v2701_v49 = vld [vmem:[%s5053_s1 + $0x4d0] sm:$0xf]  ;;  %v3245_v60 = vld [vmem:[%s5053_s1 + $0x444] sm:$0xf0] }
  0x32   :  { %1694 = vmatpush.bf16.msrb.mxu2 %v2502_v24  ;;  %v289_v24 = vunpack.c.l.b16 %v15_v9  ;;  %v3263_v51 = vld [vmem:[%s5053_s1 + $0x4d4] sm:$0xf0]  ;;  %v2829_v54 = vld [vmem:[%s5053_s1 + $0x5d0] sm:$0xf]  ;;  %v2693_v61 = vld [vmem:[%s5053_s1 + $0x4c0] sm:$0xf] }
  0x33   :  { %1707 = vmatpush.bf16.msrb.mxu3 %v2566_v28  ;;  %v290_v28 = vunpack.c.h.b16 %v15_v9  ;;  %v3279_v53 = vld [vmem:[%s5053_s1 + $0x554] sm:$0xf0]  ;;  %v2702_v57 = vor.u32 %v3263_v51, %v2701_v49  ;;  %v3277_v1 = vld [vmem:[%s5053_s1 + $0x544] sm:$0xf0]  ;;  %v2821_v2 = vld [vmem:[%s5053_s1 + $0x5c0] sm:$0xf] }
  0x34   :  { %1669 = vmatpush.bf16.msrb.mxu0 %v2366_v34  ;;  %v2846_v34 = vor.u32 %v3299_v23, %v2845_v22  ;;  %v3842_v41 = vpack.c.b16 %v289_v24, %v289_v24  ;;  %v3295_v55 = vld [vmem:[%s5053_s1 + $0x5d4] sm:$0xf0]  ;;  %v3293_v3 = vld [vmem:[%s5053_s1 + $0x5c4] sm:$0xf0]  ;;  %v2621_v9 = vld [vmem:[%s5053_s1 + $0x430] sm:$0xf] }
  0x35   :  { %1682 = vmatpush.bf16.msrb.mxu1 %v2430_v35  ;;  %v3265_v35 = vld [vmem:[%s5053_s1 + $0x4e4] sm:$0xf0]  ;;  %v3846_v44 = vpack.c.b16 %v290_v28, %v290_v28  ;;  %v2830_v62 = vor.u32 %v3295_v55, %v2829_v54  ;;  %v3243_v10 = vld [vmem:[%s5053_s1 + $0x434] sm:$0xf0]  ;;  %v2685_v11 = vld [vmem:[%s5053_s1 + $0x4b0] sm:$0xf]  ;;  %v2822_v12 = vor.u32 %v3293_v3, %v2821_v2 }
  0x36   :  { %1695 = vmatpush.bf16.msrb.mxu2 %v2494_v36  ;;  %v2773_v36 = vld [vmem:[%s5053_s1 + $0x560] sm:$0xf]  ;;  %v2710_v45 = vor.u32 %v3265_v35, %v2709_v33  ;;  %v2749_v14 = vld [vmem:[%s5053_s1 + $0x530] sm:$0xf]  ;;  %v3275_v15 = vld [vmem:[%s5053_s1 + $0x534] sm:$0xf0] }
  0x37   :  { %1708 = vmatpush.bf16.msrb.mxu3 %v2558_v40  ;;  %v3297_v40 = vld [vmem:[%s5053_s1 + $0x5e4] sm:$0xf0]  ;;  %v2813_v16 = vld [vmem:[%s5053_s1 + $0x5b0] sm:$0xf]  ;;  %v3291_v17 = vld [vmem:[%s5053_s1 + $0x5b4] sm:$0xf0]  ;;  %v2750_v22 = vor.u32 %v3275_v15, %v2749_v14 }
  0x38   :  { %1670 = vmatpush.bf16.msrb.mxu0 %v2358_v46  ;;  %v2774_v46 = vor.u32 %v3281_v37, %v2773_v36  ;;  %v2838_v50 = vor.u32 %v3297_v40, %v2837_v39  ;;  %v2613_v23 = vld [vmem:[%s5053_s1 + $0x420] sm:$0xf]  ;;  %v3241_v24 = vld [vmem:[%s5053_s1 + $0x424] sm:$0xf0]  ;;  %v2605_v35 = vld [vmem:[%s5053_s1 + $0x410] sm:$0xf] }
  0x39   :  { %1683 = vmatpush.bf16.msrb.mxu1 %v2422_v47  ;;  %v2637_v47 = vld [vmem:[%s5053_s1 + $0x450] sm:$0xf]  ;;  %v2677_v25 = vld [vmem:[%s5053_s1 + $0x4a0] sm:$0xf]  ;;  %v3289_v31 = vld [vmem:[%s5053_s1 + $0x5a4] sm:$0xf0]  ;;  %v2614_v32 = vor.u32 %v3241_v24, %v2613_v23 }
  0x3a   :  { %1696 = vmatpush.bf16.msrb.mxu2 %v2486_v48  ;;  %v3247_v48 = vld [vmem:[%s5053_s1 + $0x454] sm:$0xf0]  ;;  %v2741_v28 = vld [vmem:[%s5053_s1 + $0x520] sm:$0xf]  ;;  %v2669_v37 = vld [vmem:[%s5053_s1 + $0x490] sm:$0xf] }
  0x3b   :  { %1709 = vmatpush.bf16.msrb.mxu3 %v2550_v52  ;;  %v2765_v52 = vld [vmem:[%s5053_s1 + $0x550] sm:$0xf]  ;;  %v2638_v56 = vor.u32 %v3247_v48, %v2637_v47  ;;  %v3239_v36 = vld [vmem:[%s5053_s1 + $0x414] sm:$0xf0]  ;;  %v2597_v48 = vld [vmem:[%s5053_s1 + $0x400] sm:$0xf] }
  0x3c   :  { %1671 = vmatpush.bf16.msrb.mxu0 %v2350_v59  ;;  %v2766_v58 = vor.u32 %v3279_v53, %v2765_v52  ;;  %v2629_v59 = vld [vmem:[%s5053_s1 + $0x440] sm:$0xf]  ;;  %v3255_v40 = vld [vmem:[%s5053_s1 + $0x494] sm:$0xf0]  ;;  %v2606_v49 = vor.u32 %v3239_v36, %v2605_v35  ;;  %v3253_v52 = vld [vmem:[%s5053_s1 + $0x484] sm:$0xf0] }
  0x3d   :  { %1684 = vmatpush.bf16.msrb.mxu1 %v2414_v63  ;;  %v3261_v63 = vld [vmem:[%s5053_s1 + $0x4c4] sm:$0xf0]  ;;  %v3287_v47 = vld [vmem:[%s5053_s1 + $0x594] sm:$0xf0]  ;;  %v2661_v51 = vld [vmem:[%s5053_s1 + $0x480] sm:$0xf]  ;;  %v2670_v53 = vor.u32 %v3255_v40, %v2669_v37 }
  0x3e   :  { %1697 = vmatpush.bf16.msrb.mxu2 %v2478_v0  ;;  %v2757_v0 = vld [vmem:[%s5053_s1 + $0x540] sm:$0xf]  ;;  %v2694_v7 = vor.u32 %v3261_v63, %v2693_v61  ;;  %v18_v61 = vld [vmem:[%s5054_s0 + $0x28] sm:$0xff]  ;;  %v3315_v63 = vld [vmem:[%s5053_s1 + $0x674] sm:$0xf0] }
  0x3f   :  { %1710 = vmatpush.bf16.msrb.mxu3 %v2542_v5  ;;  %v2630_v5 = vor.u32 %v3245_v60, %v2629_v59  ;;  %v2758_v8 = vor.u32 %v3277_v1, %v2757_v0  ;;  %v2725_v55 = vld [vmem:[%s5053_s1 + $0x500] sm:$0xf]  ;;  %v3285_v60 = vld [vmem:[%s5053_s1 + $0x584] sm:$0xf0]  ;;  %v2973_v0 = vld [vmem:[%s5053_s1 + $0x6f0] sm:$0xf] }
  0x40   :  { %1672 = vmatpush.bf16.msrb.mxu0 %v2342_v13  ;;  %v3259_v13 = vld [vmem:[%s5053_s1 + $0x4b4] sm:$0xf0]  ;;  %v2789_v59 = vld [vmem:[%s5053_s1 + $0x580] sm:$0xf]  ;;  %v3037_v3 = vld [vmem:[%s5053_s1 + $0x770] sm:$0xf] }
  0x41   :  { %1685 = vmatpush.bf16.msrb.mxu1 %v2406_v18  ;;  %v2622_v18 = vor.u32 %v3243_v10, %v2621_v9  ;;  %v3331_v2 = vld [vmem:[%s5053_s1 + $0x6f4] sm:$0xf0]  ;;  %v3101_v10 = vld [vmem:[%s5053_s1 + $0x7f0] sm:$0xf]  ;;  %v2790_v14 = vor.u32 %v3285_v60, %v2789_v59  ;;  %v2965_v23 = vld [vmem:[%s5053_s1 + $0x6e0] sm:$0xf] }
  0x42   :  { %1698 = vmatpush.bf16.msrb.mxu2 %v2470_v19  ;;  %v2686_v19 = vor.u32 %v3259_v13, %v2685_v11  ;;  %v3363_v11 = vld [vmem:[%s5053_s1 + $0x7f4] sm:$0xf0]  ;;  %v2893_v37 = vld [vmem:[%s5053_s1 + $0x650] sm:$0xf]  ;;  %v3341_v59 = vld [vmem:[%s5053_s1 + $0x744] sm:$0xf0] }
  0x43   :  { %1711 = vmatpush.bf16.msrb.mxu3 %v2534_v26  ;;  %1673 = vmatmul.bf16.vlgmr.msrb.gmra.mxu0 %v3842_v41  ;;  %v2814_v26 = vor.u32 %v3291_v17, %v2813_v16  ;;  %v296_v16 = vunpack.c.h.b16 %v18_v61  ;;  %v2974_v17 = vor.u32 %v3331_v2, %v2973_v0  ;;  %v3102_v24 = vor.u32 %v3363_v11, %v3101_v10  ;;  %v2957_v40 = vld [vmem:[%s5053_s1 + $0x6d0] sm:$0xf]  ;;  %v3077_v60 = vld [vmem:[%s5053_s1 + $0x7c0] sm:$0xf]  ;;  %v3307_v2 = vld [vmem:[%s5053_s1 + $0x634] sm:$0xf0] }
  0x44   :  { %1717 = vmatpush.bf16.msra.mxu0 %v2654_v27  ;;  %1686 = vmatmul.bf16.vlgmr.msrb.gmra.mxu1 %v3846_v44  ;;  %v3257_v27 = vld [vmem:[%s5053_s1 + $0x4a4] sm:$0xf0]  ;;  %v3069_v10 = vld [vmem:[%s5053_s1 + $0x7b0] sm:$0xf]  ;;  %v3355_v11 = vld [vmem:[%s5053_s1 + $0x7b4] sm:$0xf0] }
  0x45   :  { %1730 = vmatpush.bf16.msra.mxu1 %v2718_v29  ;;  %1699 = vmatmul.bf16.vlgmr.msrb.gmra.mxu2 %v3834_v38  ;;  %v3273_v29 = vld [vmem:[%s5053_s1 + $0x524] sm:$0xf0]  ;;  %v2678_v33 = vor.u32 %v3257_v27, %v2677_v25  ;;  %v3029_v27 = vld [vmem:[%s5053_s1 + $0x760] sm:$0xf] }
  0x46   :  { %1743 = vmatpush.bf16.msra.mxu2 %v2782_v30  ;;  %1712 = vmatmul.bf16.vlgmr.msrb.gmra.mxu3 %v3844_v42  ;;  %v2805_v30 = vld [vmem:[%s5053_s1 + $0x5a0] sm:$0xf] }
  0x47   :  { %1756 = vmatpush.bf16.msra.mxu3 %v2846_v34  ;;  %v2742_v34 = vor.u32 %v3273_v29, %v2741_v28  ;;  %v2806_v39 = vor.u32 %v3289_v31, %v2805_v30  ;;  %v3345_v28 = vld [vmem:[%s5053_s1 + $0x764] sm:$0xf0]  ;;  %v3093_v31 = vld [vmem:[%s5053_s1 + $0x7e0] sm:$0xf] }
  0x48   :  { %1718 = vmatpush.bf16.msra.mxu0 %v2646_v43  ;;  %v2733_v43 = vld [vmem:[%s5053_s1 + $0x510] sm:$0xf]  ;;  %v3030_v36 = vor.u32 %v3345_v28, %v3029_v27 }
  0x49   :  { %1731 = vmatpush.bf16.msra.mxu1 %v2710_v45  ;;  %v3271_v45 = vld [vmem:[%s5053_s1 + $0x514] sm:$0xf0] }
  0x4a   :  { %1744 = vmatpush.bf16.msra.mxu2 %v2774_v46  ;;  %v2797_v46 = vld [vmem:[%s5053_s1 + $0x590] sm:$0xf]  ;;  %v2734_v54 = vor.u32 %v3271_v45, %v2733_v43  ;;  %v3327_v45 = vld [vmem:[%s5053_s1 + $0x6d4] sm:$0xf0] }
  0x4b   :  { %1757 = vmatpush.bf16.msra.mxu3 %v2838_v50  ;;  %v3237_v50 = vld [vmem:[%s5053_s1 + $0x404] sm:$0xf0] }
  0x4c   :  { %1719 = vmatpush.bf16.msra.mxu0 %v2638_v56  ;;  %v3269_v56 = vld [vmem:[%s5053_s1 + $0x504] sm:$0xf0]  ;;  %v2598_v1 = vor.u32 %v3237_v50, %v2597_v48  ;;  %v3085_v48 = vld [vmem:[%s5053_s1 + $0x7d0] sm:$0xf] }
  0x4d   :  { %1732 = vmatpush.bf16.msra.mxu1 %v2702_v57  ;;  %v17_v57 = vld [vmem:[%s5054_s0 + $0x20] sm:$0xff]  ;;  %v2726_v9 = vor.u32 %v3269_v56, %v2725_v55 }
  0x4e   :  { %1745 = vmatpush.bf16.msra.mxu2 %v2766_v58  ;;  %v2798_v58 = vor.u32 %v3287_v47, %v2797_v46  ;;  %v294_v13 = vunpack.c.h.b16 %v17_v57  ;;  %v3021_v46 = vld [vmem:[%s5053_s1 + $0x750] sm:$0xf]  ;;  %v3343_v47 = vld [vmem:[%s5053_s1 + $0x754] sm:$0xf0]  ;;  %v2949_v55 = vld [vmem:[%s5053_s1 + $0x6c0] sm:$0xf] }
  0x4f   :  { %1758 = vmatpush.bf16.msra.mxu3 %v2830_v62  ;;  %v2909_v62 = vld [vmem:[%s5053_s1 + $0x670] sm:$0xf] }
  0x50   :  { %1720 = vmatpush.bf16.msra.mxu0 %v2630_v5  ;;  %v3347_v5 = vld [vmem:[%s5053_s1 + $0x774] sm:$0xf0]  ;;  %v2910_v15 = vor.u32 %v3315_v63, %v2909_v62  ;;  %v4048_v30 = vpack.c.b16 %v294_v13, %v294_v13 }
  0x51   :  { %1733 = vmatpush.bf16.msra.mxu1 %v2694_v7  ;;  %v293_v7 = vunpack.c.l.b16 %v17_v57  ;;  %v3325_v57 = vld [vmem:[%s5053_s1 + $0x6c4] sm:$0xf0] }
  0x52   :  { %1746 = vmatpush.bf16.msra.mxu2 %v2758_v8  ;;  %v2662_v8 = vor.u32 %v3253_v52, %v2661_v51  ;;  %v2958_v51 = vor.u32 %v3327_v45, %v2957_v40  ;;  %v3022_v52 = vor.u32 %v3343_v47, %v3021_v46  ;;  %v2950_v63 = vor.u32 %v3325_v57, %v2949_v55  ;;  %v3335_v40 = vld [vmem:[%s5053_s1 + $0x714] sm:$0xf0]  ;;  %v2853_v46 = vld [vmem:[%s5053_s1 + $0x600] sm:$0xf]  ;;  %v19_v55 = vld [vmem:[%s5054_s0 + $0x30] sm:$0xff] }
  0x53   :  { %1759 = vmatpush.bf16.msra.mxu3 %v2822_v12  ;;  %v295_v12 = vunpack.c.l.b16 %v18_v61  ;;  %v4035_v25 = vpack.c.b16 %v293_v7, %v293_v7  ;;  %v3357_v61 = vld [vmem:[%s5053_s1 + $0x7c4] sm:$0xf0]  ;;  %v3323_v7 = vld [vmem:[%s5053_s1 + $0x6b4] sm:$0xf0]  ;;  %v3045_v57 = vld [vmem:[%s5053_s1 + $0x780] sm:$0xf] }
  0x54   :  { %1721 = vmatpush.bf16.msra.mxu0 %v2622_v18  ;;  %v3038_v18 = vor.u32 %v3347_v5, %v3037_v3  ;;  %v2941_v3 = vld [vmem:[%s5053_s1 + $0x6b0] sm:$0xf]  ;;  %v3078_v5 = vor.u32 %v3357_v61, %v3077_v60  ;;  %v3351_v45 = vld [vmem:[%s5053_s1 + $0x794] sm:$0xf0]  ;;  %v3122_v60 = vld [vmem:[%s5053_s1 + $0x74] sm:$0xf] }
  0x55   :  { %1734 = vmatpush.bf16.msra.mxu1 %v2686_v19  ;;  %v2901_v19 = vld [vmem:[%s5053_s1 + $0x660] sm:$0xf]  ;;  %v4046_v29 = vpack.c.b16 %v295_v12, %v295_v12  ;;  %v2942_v13 = vor.u32 %v3323_v7, %v2941_v3  ;;  %v2143_v61 = vld [vmem:[%s5053_s1 + $0x78] sm:$0xf0]  ;;  %v297_v3 = vunpack.c.l.b16 %v19_v55 }
  0x56   :  { %1747 = vmatpush.bf16.msra.mxu2 %v2750_v22  ;;  %v3313_v22 = vld [vmem:[%s5053_s1 + $0x664] sm:$0xf0] }
  0x57   :  { %1760 = vmatpush.bf16.msra.mxu3 %v2814_v26  ;;  %v3329_v26 = vld [vmem:[%s5053_s1 + $0x6e4] sm:$0xf0] }
  0x58   :  { %1722 = vmatpush.bf16.msra.mxu0 %v2614_v32  ;;  %v3361_v32 = vld [vmem:[%s5053_s1 + $0x7e4] sm:$0xf0]  ;;  %v2966_v35 = vor.u32 %v3329_v26, %v2965_v23 }
  0x59   :  { %1735 = vmatpush.bf16.msra.mxu1 %v2678_v33  ;;  %v4056_v33 = vpack.c.b16 %v296_v16, %v296_v16  ;;  %v3094_v43 = vor.u32 %v3361_v32, %v3093_v31  ;;  %v3305_v16 = vld [vmem:[%s5053_s1 + $0x624] sm:$0xf0]  ;;  %v2861_v32 = vld [vmem:[%s5053_s1 + $0x610] sm:$0xf] }
  0x5a   :  { %1748 = vmatpush.bf16.msra.mxu2 %v2742_v34  ;;  %v2902_v34 = vor.u32 %v3313_v22, %v2901_v19  ;;  %v3321_v19 = vld [vmem:[%s5053_s1 + $0x6a4] sm:$0xf0]  ;;  %v2997_v22 = vld [vmem:[%s5053_s1 + $0x720] sm:$0xf] }
  0x5b   :  { %1761 = vmatpush.bf16.msra.mxu3 %v2806_v39  ;;  %v3311_v39 = vld [vmem:[%s5053_s1 + $0x654] sm:$0xf0]  ;;  %v3337_v23 = vld [vmem:[%s5053_s1 + $0x724] sm:$0xf0] }
  0x5c   :  { %1723 = vmatpush.bf16.msra.mxu0 %v2606_v49  ;;  %v3359_v49 = vld [vmem:[%s5053_s1 + $0x7d4] sm:$0xf0]  ;;  %v2894_v50 = vor.u32 %v3311_v39, %v2893_v37  ;;  %v3353_v26 = vld [vmem:[%s5053_s1 + $0x7a4] sm:$0xf0]  ;;  %v2998_v31 = vor.u32 %v3337_v23, %v2997_v22  ;;  %v2989_v39 = vld [vmem:[%s5053_s1 + $0x710] sm:$0xf]  ;;  %v4245_v23 = vpack.c.b16 %v297_v3, %v297_v3 }
  0x5d   :  { %1736 = vmatpush.bf16.msra.mxu1 %v2670_v53  ;;  %v2885_v53 = vld [vmem:[%s5053_s1 + $0x640] sm:$0xf]  ;;  %v3086_v56 = vor.u32 %v3359_v49, %v3085_v48  ;;  %v3319_v37 = vld [vmem:[%s5053_s1 + $0x694] sm:$0xf0]  ;;  %v3301_v48 = vld [vmem:[%s5053_s1 + $0x604] sm:$0xf0] }
  0x5e   :  { %1749 = vmatpush.bf16.msra.mxu2 %v2734_v54  ;;  %v3309_v54 = vld [vmem:[%s5053_s1 + $0x644] sm:$0xf0]  ;;  %v2917_v49 = vld [vmem:[%s5053_s1 + $0x680] sm:$0xf]  ;;  %v3114_v3 = vld [vmem:[%s5053_s1 + $0x34] sm:$0xf] }
  0x5f   :  { %1762 = vmatpush.bf16.msra.mxu3 %v2798_v58  ;;  %v3013_v58 = vld [vmem:[%s5053_s1 + $0x740] sm:$0xf]  ;;  %v2886_v62 = vor.u32 %v3309_v54, %v2885_v53  ;;  %v3333_v54 = vld [vmem:[%s5053_s1 + $0x704] sm:$0xf0] }
  0x60   :  { %1724 = vmatpush.bf16.msra.mxu0 %v2598_v1  ;;  %v3014_v0 = vor.u32 %v3341_v59, %v3013_v58  ;;  %v2877_v1 = vld [vmem:[%s5053_s1 + $0x630] sm:$0xf]  ;;  %v2981_v53 = vld [vmem:[%s5053_s1 + $0x700] sm:$0xf]  ;;  %v3349_v58 = vld [vmem:[%s5053_s1 + $0x784] sm:$0xf0] }
  0x61   :  { %1737 = vmatpush.bf16.msra.mxu1 %v2662_v8  ;;  %v3005_v8 = vld [vmem:[%s5053_s1 + $0x730] sm:$0xf]  ;;  %v2878_v12 = vor.u32 %v3307_v2, %v2877_v1  ;;  %v20_v59 = vld [vmem:[%s5054_s0 + $0x38] sm:$0xff]  ;;  %v3154_v1 = vld [vmem:[%s5053_s1 + $0x174] sm:$0xf]  ;;  %v2982_v7 = vor.u32 %v3333_v54, %v2981_v53 }
  0x62   :  { %1750 = vmatpush.bf16.msra.mxu2 %v2726_v9  ;;  %v3339_v9 = vld [vmem:[%s5053_s1 + $0x734] sm:$0xf0]  ;;  %v2271_v2 = vld [vmem:[%s5053_s1 + $0x178] sm:$0xf0] }
  0x63   :  { %1763 = vmatpush.bf16.msra.mxu3 %v2790_v14  ;;  %1725 = vmatmul.bf16.vlgmr.msra.gmra.mxu0 %v4035_v25  ;;  %v3006_v14 = vor.u32 %v3339_v9, %v3005_v8  ;;  %v3170_v8 = vld [vmem:[%s5053_s1 + $0x1f4] sm:$0xf]  ;;  %v2335_v9 = vld [vmem:[%s5053_s1 + $0x1f8] sm:$0xf0] }
  0x64   :  { %1769 = vmatpush.bf16.msrb.mxu0 %v2910_v15  ;;  %1738 = vmatmul.bf16.vlgmr.msra.gmra.mxu1 %v4048_v30  ;;  %v2869_v15 = vld [vmem:[%s5053_s1 + $0x620] sm:$0xf]  ;;  %v2338_v22 = vor.u32 %v3170_v8, %v2335_v9  ;;  %v2175_v9 = vld [vmem:[%s5053_s1 + $0xb8] sm:$0xf0] }
  0x65   :  { %1782 = vmatpush.bf16.msrb.mxu1 %v2974_v17  ;;  %1751 = vmatmul.bf16.vlgmr.msra.gmra.mxu2 %v4046_v29  ;;  %v2933_v17 = vld [vmem:[%s5053_s1 + $0x6a0] sm:$0xf]  ;;  %v2870_v27 = vor.u32 %v3305_v16, %v2869_v15  ;;  %v2274_v16 = vor.u32 %v3154_v1, %v2271_v2 }
  0x66   :  { %1795 = vmatpush.bf16.msrb.mxu2 %v3038_v18  ;;  %1764 = vmatmul.bf16.vlgmr.msra.gmra.mxu3 %v4056_v33  ;;  %v3070_v18 = vor.u32 %v3355_v11, %v3069_v10  ;;  %v2934_v28 = vor.u32 %v3321_v19, %v2933_v17  ;;  %v299_v10 = vunpack.c.l.b16 %v20_v59  ;;  %v298_v11 = vunpack.c.h.b16 %v19_v55  ;;  %v3120_v17 = vld [vmem:[%s5053_s1 + $0x64] sm:$0xf] }
  0x67   :  { %1808 = vmatpush.bf16.msrb.mxu3 %v3102_v24  ;;  %v3061_v24 = vld [vmem:[%s5053_s1 + $0x7a0] sm:$0xf]  ;;  %v3136_v19 = vld [vmem:[%s5053_s1 + $0xe4] sm:$0xf] }
  0x68   :  { %1770 = vmatpush.bf16.msrb.mxu0 %v2902_v34  ;;  %v3303_v34 = vld [vmem:[%s5053_s1 + $0x614] sm:$0xf0]  ;;  %v3116_v55 = vld [vmem:[%s5053_s1 + $0x44] sm:$0xf] }
  0x69   :  { %1783 = vmatpush.bf16.msrb.mxu1 %v2966_v35  ;;  %v2925_v35 = vld [vmem:[%s5053_s1 + $0x690] sm:$0xf]  ;;  %v2862_v47 = vor.u32 %v3303_v34, %v2861_v32  ;;  %v3168_v32 = vld [vmem:[%s5053_s1 + $0x1e4] sm:$0xf]  ;;  %v2327_v34 = vld [vmem:[%s5053_s1 + $0x1e8] sm:$0xf0] }
  0x6a   :  { %1796 = vmatpush.bf16.msrb.mxu2 %v3030_v36  ;;  %v3062_v36 = vor.u32 %v3353_v26, %v3061_v24  ;;  %v2199_v24 = vld [vmem:[%s5053_s1 + $0xe8] sm:$0xf0]  ;;  %v3152_v26 = vld [vmem:[%s5053_s1 + $0x164] sm:$0xf] }
  0x6b   :  { %1809 = vmatpush.bf16.msrb.mxu3 %v3094_v43  ;;  %v3053_v43 = vld [vmem:[%s5053_s1 + $0x790] sm:$0xf] }
  0x6c   :  { %1771 = vmatpush.bf16.msrb.mxu0 %v2894_v50  ;;  %v3317_v50 = vld [vmem:[%s5053_s1 + $0x684] sm:$0xf0] }
  0x6d   :  { %1784 = vmatpush.bf16.msrb.mxu1 %v2958_v51  ;;  %v2926_v51 = vor.u32 %v3319_v37, %v2925_v35  ;;  %v2202_v37 = vor.u32 %v3136_v19, %v2199_v24  ;;  %v3128_v19 = vld [vmem:[%s5053_s1 + $0xa4] sm:$0xf]  ;;  %v2167_v24 = vld [vmem:[%s5053_s1 + $0xa8] sm:$0xf0] }
  0x6e   :  { %1797 = vmatpush.bf16.msrb.mxu2 %v3022_v52  ;;  %v2990_v52 = vor.u32 %v3335_v40, %v2989_v39  ;;  %v3118_v40 = vld [vmem:[%s5053_s1 + $0x54] sm:$0xf] }
  0x6f   :  { %1810 = vmatpush.bf16.msrb.mxu3 %v3086_v56  ;;  %v3054_v56 = vor.u32 %v3351_v45, %v3053_v43  ;;  %v2127_v43 = vld [vmem:[%s5053_s1 + $0x58] sm:$0xf0]  ;;  %v3134_v45 = vld [vmem:[%s5053_s1 + $0xd4] sm:$0xf] }
  0x70   :  { %1772 = vmatpush.bf16.msrb.mxu0 %v2886_v62  ;;  %v3138_v62 = vld [vmem:[%s5053_s1 + $0xf4] sm:$0xf] }
  0x71   :  { %1785 = vmatpush.bf16.msrb.mxu1 %v2950_v63  ;;  %v2854_v63 = vor.u32 %v3301_v48, %v2853_v46  ;;  %v2330_v46 = vor.u32 %v3168_v32, %v2327_v34  ;;  %v3150_v48 = vld [vmem:[%s5053_s1 + $0x154] sm:$0xf]  ;;  %v3160_v32 = vld [vmem:[%s5053_s1 + $0x1a4] sm:$0xf]  ;;  %v2295_v34 = vld [vmem:[%s5053_s1 + $0x1a8] sm:$0xf0] }
  0x72   :  { %1798 = vmatpush.bf16.msrb.mxu2 %v3014_v0  ;;  %v2207_v0 = vld [vmem:[%s5053_s1 + $0xf8] sm:$0xf0] }
  0x73   :  { %1811 = vmatpush.bf16.msrb.mxu3 %v3078_v5  ;;  %v2918_v5 = vor.u32 %v3317_v50, %v2917_v49  ;;  %v2210_v15 = vor.u32 %v3138_v62, %v2207_v0  ;;  %v2255_v49 = vld [vmem:[%s5053_s1 + $0x158] sm:$0xf0]  ;;  %v3166_v50 = vld [vmem:[%s5053_s1 + $0x1d4] sm:$0xf]  ;;  %v3164_v62 = vld [vmem:[%s5053_s1 + $0x1c4] sm:$0xf] }
  0x74   :  { %1773 = vmatpush.bf16.msrb.mxu0 %v2878_v12  ;;  %v3046_v12 = vor.u32 %v3349_v58, %v3045_v57  ;;  %v2258_v54 = vor.u32 %v3150_v48, %v2255_v49  ;;  %v3132_v57 = vld [vmem:[%s5053_s1 + $0xc4] sm:$0xf]  ;;  %v3142_v48 = vld [vmem:[%s5053_s1 + $0x114] sm:$0xf]  ;;  %v2223_v49 = vld [vmem:[%s5053_s1 + $0x118] sm:$0xf0] }
  0x75   :  { %1786 = vmatpush.bf16.msrb.mxu1 %v2942_v13  ;;  %v2146_v13 = vor.u32 %v3122_v60, %v2143_v61  ;;  %v3148_v60 = vld [vmem:[%s5053_s1 + $0x144] sm:$0xf]  ;;  %v2247_v61 = vld [vmem:[%s5053_s1 + $0x148] sm:$0xf0] }
  0x76   :  { %1799 = vmatpush.bf16.msrb.mxu2 %v3006_v14  ;;  %v300_v14 = vunpack.c.h.b16 %v20_v59  ;;  %v2183_v59 = vld [vmem:[%s5053_s1 + $0xc8] sm:$0xf0]  ;;  %v2250_v2 = vor.u32 %v3148_v60, %v2247_v61 }
  0x77   :  { %1812 = vmatpush.bf16.msrb.mxu3 %v3070_v18  ;;  %v2135_v18 = vld [vmem:[%s5053_s1 + $0x68] sm:$0xf0]  ;;  %v2186_v1 = vor.u32 %v3132_v57, %v2183_v59  ;;  %v3124_v57 = vld [vmem:[%s5053_s1 + $0x84] sm:$0xf] }
  0x78   :  { %1774 = vmatpush.bf16.msrb.mxu0 %v2870_v27  ;;  %v2263_v27 = vld [vmem:[%s5053_s1 + $0x168] sm:$0xf0]  ;;  %v4266_v35 = vpack.c.b16 %v300_v14, %v300_v14  ;;  %v3140_v59 = vld [vmem:[%s5053_s1 + $0x104] sm:$0xf] }
  0x79   :  { %1787 = vmatpush.bf16.msrb.mxu1 %v2934_v28  ;;  %v4256_v28 = vpack.c.b16 %v299_v10, %v299_v10  ;;  %v2266_v39 = vor.u32 %v3152_v26, %v2263_v27  ;;  %v3146_v10 = vld [vmem:[%s5053_s1 + $0x134] sm:$0xf]  ;;  %v3144_v26 = vld [vmem:[%s5053_s1 + $0x124] sm:$0xf]  ;;  %v2231_v27 = vld [vmem:[%s5053_s1 + $0x128] sm:$0xf0] }
  0x7a   :  { %1800 = vmatpush.bf16.msrb.mxu2 %v2998_v31  ;;  %v4258_v31 = vpack.c.b16 %v298_v11, %v298_v11  ;;  %v2239_v11 = vld [vmem:[%s5053_s1 + $0x138] sm:$0xf0]  ;;  %v2215_v61 = vld [vmem:[%s5053_s1 + $0x108] sm:$0xf0] }
  0x7b   :  { %1813 = vmatpush.bf16.msrb.mxu3 %v3062_v36  ;;  %v2138_v36 = vor.u32 %v3120_v17, %v2135_v18  ;;  %v3112_v17 = vld [vmem:[%s5053_s1 + $0x24] sm:$0xf]  ;;  %v2103_v18 = vld [vmem:[%s5053_s1 + $0x28] sm:$0xf0] }
  0x7c   :  { %1775 = vmatpush.bf16.msrb.mxu0 %v2862_v47  ;;  %v2191_v47 = vld [vmem:[%s5053_s1 + $0xd8] sm:$0xf0] }
  0x7d   :  { %1788 = vmatpush.bf16.msrb.mxu1 %v2926_v51  ;;  %v2319_v51 = vld [vmem:[%s5053_s1 + $0x1d8] sm:$0xf0]  ;;  %v2194_v53 = vor.u32 %v3134_v45, %v2191_v47  ;;  %v3126_v45 = vld [vmem:[%s5053_s1 + $0x94] sm:$0xf] }
  0x7e   :  { %1801 = vmatpush.bf16.msrb.mxu2 %v2990_v52  ;;  %v2130_v52 = vor.u32 %v3118_v40, %v2127_v43  ;;  %v2322_v58 = vor.u32 %v3166_v50, %v2319_v51  ;;  %v3110_v40 = vld [vmem:[%s5053_s1 + $0x14] sm:$0xf]  ;;  %v2095_v43 = vld [vmem:[%s5053_s1 + $0x18] sm:$0xf0] }
  0x7f   :  { %1814 = vmatpush.bf16.msrb.mxu3 %v3054_v56  ;;  %v2119_v56 = vld [vmem:[%s5053_s1 + $0x48] sm:$0xf0]  ;;  %v2159_v47 = vld [vmem:[%s5053_s1 + $0x98] sm:$0xf0]  ;;  %v3158_v50 = vld [vmem:[%s5053_s1 + $0x194] sm:$0xf] }
  0x80   :  { %1776 = vmatpush.bf16.msrb.mxu0 %v2854_v63  ;;  %v2311_v63 = vld [vmem:[%s5053_s1 + $0x1c8] sm:$0xf0]  ;;  %v2122_v0 = vor.u32 %v3116_v55, %v2119_v56  ;;  %v2287_v51 = vld [vmem:[%s5053_s1 + $0x198] sm:$0xf0]  ;;  %v2162_v55 = vor.u32 %v3126_v45, %v2159_v47  ;;  %v2226_v56 = vor.u32 %v3142_v48, %v2223_v49  ;;  %v3198_v45 = vld [vmem:[%s5053_s1 + $0x2d4] sm:$0xf] }
  0x81   :  { %1789 = vmatpush.bf16.msrb.mxu1 %v2918_v5  ;;  %v2111_v5 = vld [vmem:[%s5053_s1 + $0x38] sm:$0xf0]  ;;  %v2314_v8 = vor.u32 %v3164_v62, %v2311_v63  ;;  %v2290_v60 = vor.u32 %v3158_v50, %v2287_v51  ;;  %v3156_v62 = vld [vmem:[%s5053_s1 + $0x184] sm:$0xf]  ;;  %v2279_v63 = vld [vmem:[%s5053_s1 + $0x188] sm:$0xf0] }
  0x82   :  { %1802 = vmatpush.bf16.msrb.mxu2 %v2982_v7  ;;  %v3130_v7 = vld [vmem:[%s5053_s1 + $0xb4] sm:$0xf]  ;;  %v2114_v14 = vor.u32 %v3114_v3, %v2111_v5  ;;  %v2463_v5 = vld [vmem:[%s5053_s1 + $0x2f8] sm:$0xf0] }
  0x83   :  { %1815 = vmatpush.bf16.msrb.mxu3 %v3046_v12  ;;  %1777 = vmatmul.bf16.vlgmr.msrb.gmra.mxu0 %v4245_v23  ;;  %v3162_v12 = vld [vmem:[%s5053_s1 + $0x1b4] sm:$0xf]  ;;  %v2447_v47 = vld [vmem:[%s5053_s1 + $0x2d8] sm:$0xf0] }
  0x84   :  { %1821 = vmatpush.bf16.msra.mxu0 %v2146_v13  ;;  %1790 = vmatmul.bf16.vlgmr.msrb.gmra.mxu1 %v4258_v31  ;;  %v2303_v13 = vld [vmem:[%s5053_s1 + $0x1b8] sm:$0xf0]  ;;  %v3214_v48 = vld [vmem:[%s5053_s1 + $0x354] sm:$0xf] }
  0x85   :  { %1834 = vmatpush.bf16.msra.mxu1 %v2210_v15  ;;  %1803 = vmatmul.bf16.vlgmr.msrb.gmra.mxu2 %v4256_v28  ;;  %v2178_v15 = vor.u32 %v3130_v7, %v2175_v9  ;;  %v3218_v7 = vld [vmem:[%s5053_s1 + $0x374] sm:$0xf]  ;;  %v2511_v49 = vld [vmem:[%s5053_s1 + $0x358] sm:$0xf0] }
  0x86   :  { %1847 = vmatpush.bf16.msra.mxu2 %v2274_v16  ;;  %1816 = vmatmul.bf16.vlgmr.msrb.gmra.mxu3 %v4266_v35  ;;  %v2242_v16 = vor.u32 %v3146_v10, %v2239_v11  ;;  %v2218_v10 = vor.u32 %v3140_v59, %v2215_v61  ;;  %v3234_v11 = vld [vmem:[%s5053_s1 + $0x3f4] sm:$0xf]  ;;  %v2575_v51 = vld [vmem:[%s5053_s1 + $0x3d8] sm:$0xf0]  ;;  %v2567_v59 = vld [vmem:[%s5053_s1 + $0x3c8] sm:$0xf0] }
  0x87   :  { %1860 = vmatpush.bf16.msra.mxu3 %v2338_v22  ;;  %v2306_v22 = vor.u32 %v3162_v12, %v2303_v13  ;;  %v2591_v12 = vld [vmem:[%s5053_s1 + $0x3f8] sm:$0xf0]  ;;  %v2282_v13 = vor.u32 %v3156_v62, %v2279_v63  ;;  %v3230_v50 = vld [vmem:[%s5053_s1 + $0x3d4] sm:$0xf] }
  0x88   :  { %1822 = vmatpush.bf16.msra.mxu0 %v2138_v36  ;;  %v2106_v36 = vor.u32 %v3112_v17, %v2103_v18  ;;  %v3184_v17 = vld [vmem:[%s5053_s1 + $0x264] sm:$0xf]  ;;  %v2391_v18 = vld [vmem:[%s5053_s1 + $0x268] sm:$0xf0]  ;;  %v3178_v63 = vld [vmem:[%s5053_s1 + $0x234] sm:$0xf] }
  0x89   :  { %1835 = vmatpush.bf16.msra.mxu1 %v2202_v37  ;;  %v2170_v37 = vor.u32 %v3128_v19, %v2167_v24  ;;  %v3200_v19 = vld [vmem:[%s5053_s1 + $0x2e4] sm:$0xf]  ;;  %v2455_v24 = vld [vmem:[%s5053_s1 + $0x2e8] sm:$0xf0] }
  0x8a   :  { %1848 = vmatpush.bf16.msra.mxu2 %v2266_v39  ;;  %v2234_v39 = vor.u32 %v3144_v26, %v2231_v27  ;;  %v3216_v26 = vld [vmem:[%s5053_s1 + $0x364] sm:$0xf]  ;;  %v2519_v27 = vld [vmem:[%s5053_s1 + $0x368] sm:$0xf0] }
  0x8b   :  { %1861 = vmatpush.bf16.msra.mxu3 %v2330_v46  ;;  %v2298_v46 = vor.u32 %v3160_v32, %v2295_v34  ;;  %v3232_v32 = vld [vmem:[%s5053_s1 + $0x3e4] sm:$0xf]  ;;  %v2583_v34 = vld [vmem:[%s5053_s1 + $0x3e8] sm:$0xf0] }
  0x8c   :  { %1823 = vmatpush.bf16.msra.mxu0 %v2130_v52  ;;  %v2098_v52 = vor.u32 %v3110_v40, %v2095_v43  ;;  %v3182_v40 = vld [vmem:[%s5053_s1 + $0x254] sm:$0xf]  ;;  %v2383_v43 = vld [vmem:[%s5053_s1 + $0x258] sm:$0xf0] }
  0x8d   :  { %1836 = vmatpush.bf16.msra.mxu1 %v2194_v53  ;;  %v3108_v53 = vld [vmem:[%s5053_s1 + $0x4] sm:$0xf] }
  0x8e   :  { %1849 = vmatpush.bf16.msra.mxu2 %v2258_v54  ;;  %v2087_v54 = vld [vmem:[%s5053_s1 + $0x8] sm:$0xf0] }
  0x8f   :  { %1862 = vmatpush.bf16.msra.mxu3 %v2322_v58  ;;  %v2151_v58 = vld [vmem:[%s5053_s1 + $0x88] sm:$0xf0]  ;;  %v2090_v3 = vor.u32 %v3108_v53, %v2087_v54  ;;  %v2450_v53 = vor.u32 %v3198_v45, %v2447_v47  ;;  %v3180_v54 = vld [vmem:[%s5053_s1 + $0x244] sm:$0xf]  ;;  %v3206_v47 = vld [vmem:[%s5053_s1 + $0x314] sm:$0xf] }
  0x90   :  { %1824 = vmatpush.bf16.msra.mxu0 %v2122_v0  ;;  %v3186_v0 = vld [vmem:[%s5053_s1 + $0x274] sm:$0xf]  ;;  %v2154_v9 = vor.u32 %v3124_v57, %v2151_v58  ;;  %v2503_v57 = vld [vmem:[%s5053_s1 + $0x348] sm:$0xf0]  ;;  %v3228_v58 = vld [vmem:[%s5053_s1 + $0x3c4] sm:$0xf] }
  0x91   :  { %1837 = vmatpush.bf16.msra.mxu1 %v2186_v1  ;;  %v2399_v1 = vld [vmem:[%s5053_s1 + $0x278] sm:$0xf0] }
  0x92   :  { %1850 = vmatpush.bf16.msra.mxu2 %v2250_v2  ;;  %v3202_v2 = vld [vmem:[%s5053_s1 + $0x2f4] sm:$0xf] }
  0x93   :  { %1863 = vmatpush.bf16.msra.mxu3 %v2314_v8  ;;  %v2527_v8 = vld [vmem:[%s5053_s1 + $0x378] sm:$0xf0] }
  0x94   :  { %1825 = vmatpush.bf16.msra.mxu0 %v2114_v14  ;;  %v2402_v14 = vor.u32 %v3186_v0, %v2399_v1  ;;  %v2367_v0 = vld [vmem:[%s5053_s1 + $0x238] sm:$0xf0]  ;;  %v3194_v1 = vld [vmem:[%s5053_s1 + $0x2b4] sm:$0xf] }
  0x95   :  { %1838 = vmatpush.bf16.msra.mxu1 %v2178_v15  ;;  %v2466_v15 = vor.u32 %v3202_v2, %v2463_v5  ;;  %v2570_v2 = vor.u32 %v3228_v58, %v2567_v59  ;;  %v3210_v5 = vld [vmem:[%s5053_s1 + $0x334] sm:$0xf]  ;;  %v3220_v58 = vld [vmem:[%s5053_s1 + $0x384] sm:$0xf]  ;;  %v2535_v59 = vld [vmem:[%s5053_s1 + $0x388] sm:$0xf0] }
  0x96   :  { %1851 = vmatpush.bf16.msra.mxu2 %v2242_v16  ;;  %v2530_v16 = vor.u32 %v3218_v7, %v2527_v8  ;;  %v2495_v7 = vld [vmem:[%s5053_s1 + $0x338] sm:$0xf0]  ;;  %v3226_v8 = vld [vmem:[%s5053_s1 + $0x3b4] sm:$0xf] }
  0x97   :  { %1864 = vmatpush.bf16.msra.mxu3 %v2306_v22  ;;  %v2594_v22 = vor.u32 %v3234_v11, %v2591_v12  ;;  %v2498_v12 = vor.u32 %v3210_v5, %v2495_v7 }
  0x98   :  { %1826 = vmatpush.bf16.msra.mxu0 %v2106_v36  ;;  %v2394_v36 = vor.u32 %v3184_v17, %v2391_v18  ;;  %v2423_v17 = vld [vmem:[%s5053_s1 + $0x2a8] sm:$0xf0]  ;;  %v3208_v18 = vld [vmem:[%s5053_s1 + $0x324] sm:$0xf] }
  0x99   :  { %1839 = vmatpush.bf16.msra.mxu1 %v2170_v37  ;;  %v2458_v37 = vor.u32 %v3200_v19, %v2455_v24  ;;  %v2487_v19 = vld [vmem:[%s5053_s1 + $0x328] sm:$0xf0] }
  0x9a   :  { %1852 = vmatpush.bf16.msra.mxu2 %v2234_v39  ;;  %v2522_v39 = vor.u32 %v3216_v26, %v2519_v27  ;;  %v2551_v24 = vld [vmem:[%s5053_s1 + $0x3a8] sm:$0xf0] }
  0x9b   :  { %1865 = vmatpush.bf16.msra.mxu3 %v2298_v46  ;;  %v2586_v46 = vor.u32 %v3232_v32, %v2583_v34 }
  0x9c   :  { %1827 = vmatpush.bf16.msra.mxu0 %v2098_v52  ;;  %v2386_v52 = vor.u32 %v3182_v40, %v2383_v43  ;;  %v3190_v40 = vld [vmem:[%s5053_s1 + $0x294] sm:$0xf] }
  0x9d   :  { %1840 = vmatpush.bf16.msra.mxu1 %v2162_v55  ;;  %v2375_v55 = vld [vmem:[%s5053_s1 + $0x248] sm:$0xf0] }
  0x9e   :  { %1853 = vmatpush.bf16.msra.mxu2 %v2226_v56  ;;  %v3212_v56 = vld [vmem:[%s5053_s1 + $0x344] sm:$0xf] }
  0x9f   :  { %1866 = vmatpush.bf16.msra.mxu3 %v2290_v60  ;;  %v2378_v60 = vor.u32 %v3180_v54, %v2375_v55  ;;  %v2506_v62 = vor.u32 %v3212_v56, %v2503_v57  ;;  %v2471_v57 = vld [vmem:[%s5053_s1 + $0x308] sm:$0xf0] }
  0xa0   :  { %1828 = vmatpush.bf16.msra.mxu0 %v2090_v3  ;;  %v2431_v3 = vld [vmem:[%s5053_s1 + $0x2b8] sm:$0xf0]  ;;  %v4564_v26 = vpop.f32.mrf.mxu0 }
  0xa1   :  { %1841 = vmatpush.bf16.msra.mxu1 %v2154_v9  ;;  %v2559_v9 = vld [vmem:[%s5053_s1 + $0x3b8] sm:$0xf0]  ;;  %v2434_v11 = vor.u32 %v3194_v1, %v2431_v3  ;;  %v4566_v32 = vpop.f32.mrf.mxu1 }
  0xa2   :  { %1854 = vmatpush.bf16.msra.mxu2 %v2218_v10  ;;  %v2370_v10 = vor.u32 %v3178_v63, %v2367_v0  ;;  %v2719_v1 = vld [vmem:[%s5053_s1 + $0x4f8] sm:$0xf0] }
  0xa3   :  { %1867 = vmatpush.bf16.msra.mxu3 %v2282_v13  ;;  %1829 = vmatmul.bf16.vlgmr.msra.gmra.mxu0 %v3683_v20  ;;  %v2578_v20 = vor.u32 %v3230_v50, %v2575_v51  ;;  %v3176_v13 = vld [vmem:[%s5053_s1 + $0x224] sm:$0xf]  ;;  %v3222_v50 = vld [vmem:[%s5053_s1 + $0x394] sm:$0xf]  ;;  %v2543_v51 = vld [vmem:[%s5053_s1 + $0x398] sm:$0xf0] }
  0xa4   :  { %1873 = vmatpush.bf16.msrb.mxu0 %v2402_v14  ;;  %1842 = vmatmul.bf16.vlgmr.msra.gmra.mxu1 %v3686_v21  ;;  %v2439_v21 = vld [vmem:[%s5053_s1 + $0x2c8] sm:$0xf0]  ;;  %v2546_v56 = vor.u32 %v3222_v50, %v2543_v51  ;;  %v2783_v3 = vld [vmem:[%s5053_s1 + $0x578] sm:$0xf0] }
  0xa5   :  { %1886 = vmatpush.bf16.msrb.mxu1 %v2466_v15  ;;  %1855 = vmatmul.bf16.vlgmr.msra.gmra.mxu2 %v3651_v4  ;;  %v2514_v4 = vor.u32 %v3214_v48, %v2511_v49  ;;  %v2359_v14 = vld [vmem:[%s5053_s1 + $0x228] sm:$0xf0]  ;;  %v3192_v15 = vld [vmem:[%s5053_s1 + $0x2a4] sm:$0xf]  ;;  %v2479_v48 = vld [vmem:[%s5053_s1 + $0x318] sm:$0xf0] }
  0xa6   :  { %1899 = vmatpush.bf16.msrb.mxu2 %v2530_v16  ;;  %1868 = vmatmul.bf16.vlgmr.msra.gmra.mxu3 %v3656_v6  ;;  %v3196_v6 = vld [vmem:[%s5053_s1 + $0x2c4] sm:$0xf]  ;;  %v2562_v16 = vor.u32 %v3226_v8, %v2559_v9  ;;  %v2362_v27 = vor.u32 %v3176_v13, %v2359_v14  ;;  %v2426_v34 = vor.u32 %v3192_v15, %v2423_v17  ;;  %v3298_v9 = vld [vmem:[%s5053_s1 + $0x5f4] sm:$0xf]  ;;  %v2703_v51 = vld [vmem:[%s5053_s1 + $0x4d8] sm:$0xf0] }
  0xa7   :  { %1912 = vmatpush.bf16.msrb.mxu3 %v2594_v22  ;;  %v2442_v61 = vor.u32 %v3196_v6, %v2439_v21  ;;  %v3224_v22 = vld [vmem:[%s5053_s1 + $0x3a4] sm:$0xf]  ;;  %v2482_v55 = vor.u32 %v3206_v47, %v2479_v48  ;;  %v2639_v47 = vld [vmem:[%s5053_s1 + $0x458] sm:$0xf0]  ;;  %v3262_v48 = vld [vmem:[%s5053_s1 + $0x4d4] sm:$0xf] }
  0xa8   :  { %1874 = vmatpush.bf16.msrb.mxu0 %v2394_v36  ;;  %v2490_v36 = vor.u32 %v3208_v18, %v2487_v19  ;;  %v4577_v43 = vpop.f32.mrf.mxu2  ;;  %v2554_v45 = vor.u32 %v3224_v22, %v2551_v24  ;;  %v3188_v6 = vld [vmem:[%s5053_s1 + $0x284] sm:$0xf]  ;;  %v1624_v63 = vpop.f32.mrf.mxu0  ;;  %v2647_v18 = vld [vmem:[%s5053_s1 + $0x468] sm:$0xf0] }
  0xa9   :  { %1887 = vmatpush.bf16.msrb.mxu1 %v2458_v37  ;;  %v3174_v37 = vld [vmem:[%s5053_s1 + $0x214] sm:$0xf]  ;;  %v4588_v49 = vpop.f32.mrf.mxu3  ;;  %v3204_v21 = vld [vmem:[%s5053_s1 + $0x304] sm:$0xf]  ;;  %v1637_v5 = vpop.f32.mrf.mxu1  ;;  %v2711_v24 = vld [vmem:[%s5053_s1 + $0x4e8] sm:$0xf0] }
  0xaa   :  { %1900 = vmatpush.bf16.msrb.mxu2 %v2522_v39  ;;  %v2351_v39 = vld [vmem:[%s5053_s1 + $0x218] sm:$0xf0]  ;;  %v2474_v8 = vor.u32 %v3204_v21, %v2471_v57  ;;  %v3248_v17 = vld [vmem:[%s5053_s1 + $0x464] sm:$0xf]  ;;  %v2759_v57 = vld [vmem:[%s5053_s1 + $0x548] sm:$0xf0] }
  0xab   :  { %1913 = vmatpush.bf16.msrb.mxu3 %v2586_v46  ;;  %v2415_v46 = vld [vmem:[%s5053_s1 + $0x298] sm:$0xf0]  ;;  %v3264_v19 = vld [vmem:[%s5053_s1 + $0x4e4] sm:$0xf] }
  0xac   :  { %1875 = vmatpush.bf16.msrb.mxu0 %v2386_v52  ;;  %v2354_v52 = vor.u32 %v3174_v37, %v2351_v39  ;;  %v2418_v54 = vor.u32 %v3190_v40, %v2415_v46  ;;  %v2839_v37 = vld [vmem:[%s5053_s1 + $0x5e8] sm:$0xf0]  ;;  %v2650_v39 = vor.u32 %v3248_v17, %v2647_v18  ;;  %v2714_v40 = vor.u32 %v3264_v19, %v2711_v24  ;;  %v3246_v46 = vld [vmem:[%s5053_s1 + $0x454] sm:$0xf]  ;;  %v3256_v17 = vld [vmem:[%s5053_s1 + $0x4a4] sm:$0xf] }
  0xad   :  { %1888 = vmatpush.bf16.msrb.mxu1 %v2450_v53  ;;  %v3172_v53 = vld [vmem:[%s5053_s1 + $0x204] sm:$0xf] }
  0xae   :  { %1901 = vmatpush.bf16.msrb.mxu2 %v2514_v4  ;;  %v2343_v4 = vld [vmem:[%s5053_s1 + $0x208] sm:$0xf0]  ;;  %v3272_v24 = vld [vmem:[%s5053_s1 + $0x524] sm:$0xf] }
  0xaf   :  { %1914 = vmatpush.bf16.msrb.mxu3 %v2578_v20  ;;  %v2407_v20 = vld [vmem:[%s5053_s1 + $0x288] sm:$0xf0]  ;;  %v2346_v0 = vor.u32 %v3172_v53, %v2343_v4  ;;  %v2767_v53 = vld [vmem:[%s5053_s1 + $0x558] sm:$0xf0] }
  0xb0   :  { %1876 = vmatpush.bf16.msrb.mxu0 %v2378_v60  ;;  %v3250_v60 = vld [vmem:[%s5053_s1 + $0x474] sm:$0xf]  ;;  %v2410_v7 = vor.u32 %v3188_v6, %v2407_v20  ;;  %v2831_v4 = vld [vmem:[%s5053_s1 + $0x5d8] sm:$0xf0]  ;;  %v3260_v20 = vld [vmem:[%s5053_s1 + $0x4c4] sm:$0xf] }
  0xb1   :  { %1889 = vmatpush.bf16.msrb.mxu1 %v2442_v61  ;;  %v2655_v61 = vld [vmem:[%s5053_s1 + $0x478] sm:$0xf0]  ;;  %v1663_v14 = vpop.f32.mrf.mxu3 }
  0xb2   :  { %1902 = vmatpush.bf16.msrb.mxu2 %v2506_v62  ;;  %v3266_v62 = vld [vmem:[%s5053_s1 + $0x4f4] sm:$0xf]  ;;  %v2658_v13 = vor.u32 %v3250_v60, %v2655_v61 }
  0xb3   :  { %1915 = vmatpush.bf16.msrb.mxu3 %v2570_v2  ;;  %v3282_v2 = vld [vmem:[%s5053_s1 + $0x574] sm:$0xf]  ;;  %v2722_v15 = vor.u32 %v3266_v62, %v2719_v1  ;;  %v2623_v1 = vld [vmem:[%s5053_s1 + $0x438] sm:$0xf0] }
  0xb4   :  { %1877 = vmatpush.bf16.msrb.mxu0 %v2370_v10  ;;  %v2847_v10 = vld [vmem:[%s5053_s1 + $0x5f8] sm:$0xf0] }
  0xb5   :  { %1890 = vmatpush.bf16.msrb.mxu1 %v2434_v11  ;;  %v1650_v11 = vpop.f32.mrf.mxu2  ;;  %v2850_v22 = vor.u32 %v3298_v9, %v2847_v10  ;;  %v2751_v9 = vld [vmem:[%s5053_s1 + $0x538] sm:$0xf0]  ;;  %v3290_v10 = vld [vmem:[%s5053_s1 + $0x5b4] sm:$0xf] }
  0xb6   :  { %1903 = vmatpush.bf16.msrb.mxu2 %v2498_v12  ;;  %v2538_v12 = vor.u32 %v3220_v58, %v2535_v59  ;;  %v3292_v58 = vld [vmem:[%s5053_s1 + $0x5c4] sm:$0xf]  ;;  %v2823_v59 = vld [vmem:[%s5053_s1 + $0x5c8] sm:$0xf0]  ;;  %v2815_v11 = vld [vmem:[%s5053_s1 + $0x5b8] sm:$0xf0] }
  0xb7   :  { %1916 = vmatpush.bf16.msrb.mxu3 %v2562_v16  ;;  %v2786_v16 = vor.u32 %v3282_v2, %v2783_v3  ;;  %v3258_v2 = vld [vmem:[%s5053_s1 + $0x4b4] sm:$0xf]  ;;  %v2826_v5 = vor.u32 %v3292_v58, %v2823_v59  ;;  %v2818_v19 = vor.u32 %v3290_v10, %v2815_v11  ;;  %v3039_v10 = vld [vmem:[%s5053_s1 + $0x778] sm:$0xf0] }
  0xb8   :  { %1878 = vmatpush.bf16.msrb.mxu0 %v2362_v27  ;;  %v3280_v27 = vld [vmem:[%s5053_s1 + $0x564] sm:$0xf] }
  0xb9   :  { %1891 = vmatpush.bf16.msrb.mxu1 %v2426_v34  ;;  %v2775_v34 = vld [vmem:[%s5053_s1 + $0x568] sm:$0xf0] }
  0xba   :  { %1904 = vmatpush.bf16.msrb.mxu2 %v2490_v36  ;;  %v3296_v36 = vld [vmem:[%s5053_s1 + $0x5e4] sm:$0xf] }
  0xbb   :  { %1917 = vmatpush.bf16.msrb.mxu3 %v2554_v45  ;;  %v2778_v45 = vor.u32 %v3280_v27, %v2775_v34  ;;  %v2842_v50 = vor.u32 %v3296_v36, %v2839_v37  ;;  %v2743_v27 = vld [vmem:[%s5053_s1 + $0x528] sm:$0xf0]  ;;  %v3288_v36 = vld [vmem:[%s5053_s1 + $0x5a4] sm:$0xf] }
  0xbc   :  { %1879 = vmatpush.bf16.msrb.mxu0 %v2354_v52  ;;  %v3278_v52 = vld [vmem:[%s5053_s1 + $0x554] sm:$0xf]  ;;  %v2807_v37 = vld [vmem:[%s5053_s1 + $0x5a8] sm:$0xf0] }
  0xbd   :  { %1892 = vmatpush.bf16.msrb.mxu1 %v2418_v54  ;;  %v2642_v54 = vor.u32 %v3246_v46, %v2639_v47  ;;  %v2770_v6 = vor.u32 %v3278_v52, %v2767_v53  ;;  %v2746_v46 = vor.u32 %v3272_v24, %v2743_v27  ;;  %v3238_v47 = vld [vmem:[%s5053_s1 + $0x414] sm:$0xf]  ;;  %v2810_v52 = vor.u32 %v3288_v36, %v2807_v37  ;;  %v2671_v53 = vld [vmem:[%s5053_s1 + $0x498] sm:$0xf0]  ;;  %v2903_v24 = vld [vmem:[%s5053_s1 + $0x668] sm:$0xf0] }
  0xbe   :  { %1905 = vmatpush.bf16.msrb.mxu2 %v2482_v55  ;;  %v2706_v55 = vor.u32 %v3262_v48, %v2703_v51  ;;  %v2607_v48 = vld [vmem:[%s5053_s1 + $0x418] sm:$0xf0]  ;;  %v3328_v27 = vld [vmem:[%s5053_s1 + $0x6e4] sm:$0xf]  ;;  %v2967_v37 = vld [vmem:[%s5053_s1 + $0x6e8] sm:$0xf0] }
  0xbf   :  { %1918 = vmatpush.bf16.msrb.mxu3 %v2546_v56  ;;  %v3276_v56 = vld [vmem:[%s5053_s1 + $0x544] sm:$0xf] }
  0xc0   :  { %1880 = vmatpush.bf16.msrb.mxu0 %v2346_v0  ;;  %v4720_v61 = vpop.f32.mrf.mxu0  ;;  %v2762_v63 = vor.u32 %v3276_v56, %v2759_v57  ;;  %v3242_v0 = vld [vmem:[%s5053_s1 + $0x434] sm:$0xf]  ;;  %v2663_v56 = vld [vmem:[%s5053_s1 + $0x488] sm:$0xf0]  ;;  %v3268_v57 = vld [vmem:[%s5053_s1 + $0x504] sm:$0xf] }
  0xc1   :  { %1893 = vmatpush.bf16.msrb.mxu1 %v2410_v7  ;;  %v4731_v3 = vpop.f32.mrf.mxu1  ;;  %v2687_v7 = vld [vmem:[%s5053_s1 + $0x4b8] sm:$0xf0] }
  0xc2   :  { %1906 = vmatpush.bf16.msrb.mxu2 %v2474_v8  ;;  %v3274_v8 = vld [vmem:[%s5053_s1 + $0x534] sm:$0xf] }
  0xc3   :  { %1919 = vmatpush.bf16.msrb.mxu3 %v2538_v12  ;;  %1881 = vmatmul.bf16.vlgmr.msrb.gmra.mxu0 %v3842_v41  ;;  %v3244_v41 = vld [vmem:[%s5053_s1 + $0x444] sm:$0xf]  ;;  %v2626_v12 = vor.u32 %v3242_v0, %v2623_v1  ;;  %v2754_v14 = vor.u32 %v3274_v8, %v2751_v9  ;;  %v3314_v1 = vld [vmem:[%s5053_s1 + $0x674] sm:$0xf]  ;;  %v2975_v8 = vld [vmem:[%s5053_s1 + $0x6f8] sm:$0xf0] }
  0xc4   :  { %1925 = vmatpush.bf16.msra.mxu0 %v2658_v13  ;;  %1894 = vmatmul.bf16.vlgmr.msrb.gmra.mxu1 %v3846_v44  ;;  %v2695_v44 = vld [vmem:[%s5053_s1 + $0x4c8] sm:$0xf0]  ;;  %v2690_v13 = vor.u32 %v3258_v2, %v2687_v7  ;;  %v2911_v2 = vld [vmem:[%s5053_s1 + $0x678] sm:$0xf0]  ;;  %v3346_v9 = vld [vmem:[%s5053_s1 + $0x774] sm:$0xf] }
  0xc5   :  { %1938 = vmatpush.bf16.msra.mxu1 %v2722_v15  ;;  %1907 = vmatmul.bf16.vlgmr.msrb.gmra.mxu2 %v3834_v38  ;;  %v3294_v38 = vld [vmem:[%s5053_s1 + $0x5d4] sm:$0xf]  ;;  %v2698_v62 = vor.u32 %v3260_v20, %v2695_v44  ;;  %v3240_v15 = vld [vmem:[%s5053_s1 + $0x424] sm:$0xf] }
  0xc6   :  { %1951 = vmatpush.bf16.msra.mxu2 %v2786_v16  ;;  %1920 = vmatmul.bf16.vlgmr.msrb.gmra.mxu3 %v3844_v42  ;;  %v2631_v42 = vld [vmem:[%s5053_s1 + $0x448] sm:$0xf0]  ;;  %v2834_v21 = vor.u32 %v3294_v38, %v2831_v4  ;;  %v3270_v38 = vld [vmem:[%s5053_s1 + $0x514] sm:$0xf]  ;;  %v2735_v4 = vld [vmem:[%s5053_s1 + $0x518] sm:$0xf0] }
  0xc7   :  { %1964 = vmatpush.bf16.msra.mxu3 %v2850_v22  ;;  %v2634_v60 = vor.u32 %v3244_v41, %v2631_v42  ;;  %v2615_v16 = vld [vmem:[%s5053_s1 + $0x428] sm:$0xf0]  ;;  %v3236_v41 = vld [vmem:[%s5053_s1 + $0x404] sm:$0xf] }
  0xc8   :  { %1926 = vmatpush.bf16.msra.mxu0 %v2650_v39  ;;  %v4757_v18 = vpop.f32.mrf.mxu2  ;;  %v2679_v22 = vld [vmem:[%s5053_s1 + $0x4a8] sm:$0xf0]  ;;  %v2618_v39 = vor.u32 %v3240_v15, %v2615_v16  ;;  %v3252_v44 = vld [vmem:[%s5053_s1 + $0x484] sm:$0xf]  ;;  %v2914_v16 = vor.u32 %v3314_v1, %v2911_v2  ;;  %v3306_v2 = vld [vmem:[%s5053_s1 + $0x634] sm:$0xf] }
  0xc9   :  { %1939 = vmatpush.bf16.msra.mxu1 %v2714_v40  ;;  %v4768_v34 = vpop.f32.mrf.mxu3  ;;  %v1676_v40 = vpop.f32.mrf.mxu0  ;;  %v2599_v42 = vld [vmem:[%s5053_s1 + $0x408] sm:$0xf0]  ;;  %v2666_v11 = vor.u32 %v3252_v44, %v2663_v56  ;;  %v3340_v44 = vld [vmem:[%s5053_s1 + $0x744] sm:$0xf] }
  0xca   :  { %1952 = vmatpush.bf16.msra.mxu2 %v2778_v45  ;;  %v2682_v45 = vor.u32 %v3256_v17, %v2679_v22  ;;  %v1689_v51 = vpop.f32.mrf.mxu1  ;;  %v2602_v7 = vor.u32 %v3236_v41, %v2599_v42  ;;  %v3312_v22 = vld [vmem:[%s5053_s1 + $0x664] sm:$0xf]  ;;  %v3031_v40 = vld [vmem:[%s5053_s1 + $0x768] sm:$0xf0] }
  0xcb   :  { %1965 = vmatpush.bf16.msra.mxu3 %v2842_v50  ;;  %v3254_v50 = vld [vmem:[%s5053_s1 + $0x494] sm:$0xf]  ;;  %v3015_v56 = vld [vmem:[%s5053_s1 + $0x748] sm:$0xf0] }
  0xcc   :  { %1927 = vmatpush.bf16.msra.mxu0 %v2642_v54  ;;  %v3286_v54 = vld [vmem:[%s5053_s1 + $0x594] sm:$0xf]  ;;  %v2674_v20 = vor.u32 %v3254_v50, %v2671_v53  ;;  %v2970_v50 = vor.u32 %v3328_v27, %v2967_v37  ;;  %v2895_v53 = vld [vmem:[%s5053_s1 + $0x658] sm:$0xf0]  ;;  %v3018_v1 = vor.u32 %v3340_v44, %v3015_v56  ;;  %v2999_v37 = vld [vmem:[%s5053_s1 + $0x728] sm:$0xf0] }
  0xcd   :  { %1940 = vmatpush.bf16.msra.mxu1 %v2706_v55  ;;  %v2799_v55 = vld [vmem:[%s5053_s1 + $0x598] sm:$0xf0]  ;;  %v2983_v44 = vld [vmem:[%s5053_s1 + $0x708] sm:$0xf0] }
  0xce   :  { %1953 = vmatpush.bf16.msra.mxu2 %v2770_v6  ;;  %v2610_v6 = vor.u32 %v3238_v47, %v2607_v48  ;;  %v2802_v59 = vor.u32 %v3286_v54, %v2799_v55  ;;  %v2906_v47 = vor.u32 %v3312_v22, %v2903_v24  ;;  %v1636_v48 = vadd.f32 %v4566_v32, %v4564_v26  ;;  %v2959_v32 = vld [vmem:[%s5053_s1 + $0x6d8] sm:$0xf0]  ;;  %v3320_v22 = vld [vmem:[%s5053_s1 + $0x6a4] sm:$0xf] }
  0xcf   :  { %1966 = vmatpush.bf16.msra.mxu3 %v2834_v21  ;;  %v2738_v21 = vor.u32 %v3270_v38, %v2735_v4  ;;  %v3326_v38 = vld [vmem:[%s5053_s1 + $0x6d4] sm:$0xf]  ;;  %v3023_v54 = vld [vmem:[%s5053_s1 + $0x758] sm:$0xf0] }
  0xd0   :  { %1928 = vmatpush.bf16.msra.mxu0 %v2634_v60  ;;  %v1702_v58 = vpop.f32.mrf.mxu2  ;;  %v2727_v60 = vld [vmem:[%s5053_s1 + $0x508] sm:$0xf0]  ;;  %v3342_v4 = vld [vmem:[%s5053_s1 + $0x754] sm:$0xf]  ;;  %v3087_v55 = vld [vmem:[%s5053_s1 + $0x7d8] sm:$0xf0]  ;;  %v1649_v41 = vadd.f32 %v4577_v43, %v1636_v48  ;;  %v2962_v42 = vor.u32 %v3326_v38, %v2959_v32 }
  0xd1   :  { %1941 = vmatpush.bf16.msra.mxu1 %v2698_v62  ;;  %v3284_v62 = vld [vmem:[%s5053_s1 + $0x584] sm:$0xf]  ;;  %v1715_v0 = vpop.f32.mrf.mxu3  ;;  %v2951_v43 = vld [vmem:[%s5053_s1 + $0x6c8] sm:$0xf0]  ;;  %v2863_v38 = vld [vmem:[%s5053_s1 + $0x618] sm:$0xf0] }
  0xd2   :  { %1954 = vmatpush.bf16.msra.mxu2 %v2762_v63  ;;  %v2791_v63 = vld [vmem:[%s5053_s1 + $0x588] sm:$0xf0]  ;;  %v3356_v58 = vld [vmem:[%s5053_s1 + $0x7c4] sm:$0xf] }
  0xd3   :  { %1967 = vmatpush.bf16.msra.mxu3 %v2826_v5  ;;  %v3330_v5 = vld [vmem:[%s5053_s1 + $0x6f4] sm:$0xf]  ;;  %v2794_v15 = vor.u32 %v3284_v62, %v2791_v63  ;;  %v1662_v63 = vadd.f32 %v4588_v49, %v1649_v41  ;;  %v2943_v49 = vld [vmem:[%s5053_s1 + $0x6b8] sm:$0xf0] }
  0xd4   :  { %1929 = vmatpush.bf16.msra.mxu0 %v2626_v12  ;;  %v2730_v12 = vor.u32 %v3268_v57, %v2727_v60  ;;  %v2978_v17 = vor.u32 %v3330_v5, %v2975_v8  ;;  %v2879_v5 = vld [vmem:[%s5053_s1 + $0x638] sm:$0xf0] }
  0xd5   :  { %1942 = vmatpush.bf16.msra.mxu1 %v2690_v13  ;;  %v3362_v13 = vld [vmem:[%s5053_s1 + $0x7f4] sm:$0xf] }
  0xd6   :  { %1955 = vmatpush.bf16.msra.mxu2 %v2754_v14  ;;  %v3103_v14 = vld [vmem:[%s5053_s1 + $0x7f8] sm:$0xf0] }
  0xd7   :  { %1968 = vmatpush.bf16.msra.mxu3 %v2818_v19  ;;  %v3042_v19 = vor.u32 %v3346_v9, %v3039_v10  ;;  %v3106_v36 = vor.u32 %v3362_v13, %v3103_v14  ;;  %v3338_v9 = vld [vmem:[%s5053_s1 + $0x734] sm:$0xf]  ;;  %v3007_v10 = vld [vmem:[%s5053_s1 + $0x738] sm:$0xf0]  ;;  %v2882_v13 = vor.u32 %v3306_v2, %v2879_v5  ;;  %v1675_v14 = vadd.f32 %v4720_v61, %v1662_v63  ;;  %v2935_v61 = vld [vmem:[%s5053_s1 + $0x6a8] sm:$0xf0] }
  0xd8   :  { %1930 = vmatpush.bf16.msra.mxu0 %v2618_v39  ;;  %v3344_v39 = vld [vmem:[%s5053_s1 + $0x764] sm:$0xf] }
  0xd9   :  { %1943 = vmatpush.bf16.msra.mxu1 %v2682_v45  ;;  %v3360_v45 = vld [vmem:[%s5053_s1 + $0x7e4] sm:$0xf]  ;;  %v3034_v51 = vor.u32 %v3344_v39, %v3031_v40 }
  0xda   :  { %1956 = vmatpush.bf16.msra.mxu2 %v2746_v46  ;;  %v3095_v46 = vld [vmem:[%s5053_s1 + $0x7e8] sm:$0xf0]  ;;  %v3352_v40 = vld [vmem:[%s5053_s1 + $0x7a4] sm:$0xf] }
  0xdb   :  { %1969 = vmatpush.bf16.msra.mxu3 %v2810_v52  ;;  %v3310_v52 = vld [vmem:[%s5053_s1 + $0x654] sm:$0xf]  ;;  %v3098_v26 = vor.u32 %v3360_v45, %v3095_v46  ;;  %v3063_v45 = vld [vmem:[%s5053_s1 + $0x7a8] sm:$0xf0] }
  0xdc   :  { %1931 = vmatpush.bf16.msra.mxu0 %v2610_v6  ;;  %v2898_v6 = vor.u32 %v3310_v52, %v2895_v53  ;;  %v3302_v53 = vld [vmem:[%s5053_s1 + $0x614] sm:$0xf]  ;;  %v3066_v32 = vor.u32 %v3352_v40, %v3063_v45 }
  0xdd   :  { %1944 = vmatpush.bf16.msra.mxu1 %v2674_v20  ;;  %v2887_v20 = vld [vmem:[%s5053_s1 + $0x648] sm:$0xf0] }
  0xde   :  { %1957 = vmatpush.bf16.msra.mxu2 %v2738_v21 }
  0xdf   :  { %1970 = vmatpush.bf16.msra.mxu3 %v2802_v59  ;;  %v3079_v59 = vld [vmem:[%s5053_s1 + $0x7c8] sm:$0xf0] }
  0xe0   :  { %1932 = vmatpush.bf16.msra.mxu0 %v2602_v7  ;;  %v4921_v57 = vpop.f32.mrf.mxu0  ;;  %v3322_v7 = vld [vmem:[%s5053_s1 + $0x6b4] sm:$0xf]  ;;  %v3082_v8 = vor.u32 %v3356_v58, %v3079_v59  ;;  %v3348_v58 = vld [vmem:[%s5053_s1 + $0x784] sm:$0xf]  ;;  %v3047_v59 = vld [vmem:[%s5053_s1 + $0x788] sm:$0xf0] }
  0xe1   :  { %1945 = vmatpush.bf16.msra.mxu1 %v2666_v11  ;;  %v4929_v62 = vpop.f32.mrf.mxu1  ;;  %v3354_v11 = vld [vmem:[%s5053_s1 + $0x7b4] sm:$0xf]  ;;  %v3050_v5 = vor.u32 %v3348_v58, %v3047_v59 }
  0xe2   :  { %1958 = vmatpush.bf16.msra.mxu2 %v2730_v12  ;;  %v3071_v12 = vld [vmem:[%s5053_s1 + $0x7b8] sm:$0xf0] }
  0xe3   :  { %1971 = vmatpush.bf16.msra.mxu3 %v2794_v15  ;;  %1933 = vmatmul.bf16.vlgmr.msra.gmra.mxu0 %v4035_v25  ;;  %v3358_v25 = vld [vmem:[%s5053_s1 + $0x7d4] sm:$0xf]  ;;  %v2946_v15 = vor.u32 %v3322_v7, %v2943_v49  ;;  %v3074_v24 = vor.u32 %v3354_v11, %v3071_v12 }
  0xe4   :  { %1977 = vmatpush.bf16.msrb.mxu0 %v2914_v16  ;;  %1946 = vmatmul.bf16.vlgmr.msra.gmra.mxu1 %v4048_v30  ;;  %v3308_v30 = vld [vmem:[%s5053_s1 + $0x644] sm:$0xf]  ;;  %v3090_v21 = vor.u32 %v3358_v25, %v3087_v55  ;;  %v3010_v16 = vor.u32 %v3338_v9, %v3007_v10  ;;  %v3350_v25 = vld [vmem:[%s5053_s1 + $0x794] sm:$0xf]  ;;  %v3055_v55 = vld [vmem:[%s5053_s1 + $0x798] sm:$0xf0] }
  0xe5   :  { %1990 = vmatpush.bf16.msrb.mxu1 %v2978_v17  ;;  %1959 = vmatmul.bf16.vlgmr.msra.gmra.mxu2 %v4046_v29  ;;  %v3026_v29 = vor.u32 %v3342_v4, %v3023_v54  ;;  %v2890_v60 = vor.u32 %v3308_v30, %v2887_v20  ;;  %v3304_v17 = vld [vmem:[%s5053_s1 + $0x624] sm:$0xf]  ;;  %v3334_v4 = vld [vmem:[%s5053_s1 + $0x714] sm:$0xf]  ;;  %v2991_v54 = vld [vmem:[%s5053_s1 + $0x718] sm:$0xf0] }
  0xe6   :  { %2003 = vmatpush.bf16.msrb.mxu2 %v3042_v19  ;;  %1972 = vmatmul.bf16.vlgmr.msra.gmra.mxu3 %v4056_v33  ;;  %v3324_v33 = vld [vmem:[%s5053_s1 + $0x6c4] sm:$0xf]  ;;  %v2871_v19 = vld [vmem:[%s5053_s1 + $0x628] sm:$0xf0] }
  0xe7   :  { %2016 = vmatpush.bf16.msrb.mxu3 %v3106_v36  ;;  %v2954_v0 = vor.u32 %v3324_v33, %v2951_v43  ;;  %v3336_v36 = vld [vmem:[%s5053_s1 + $0x724] sm:$0xf]  ;;  %v2855_v20 = vld [vmem:[%s5053_s1 + $0x608] sm:$0xf0] }
  0xe8   :  { %1978 = vmatpush.bf16.msrb.mxu0 %v2906_v47  ;;  %v4966_v27 = vpop.f32.mrf.mxu2  ;;  %v1728_v46 = vpop.f32.mrf.mxu0  ;;  %v2874_v47 = vor.u32 %v3304_v17, %v2871_v19  ;;  %v3002_v52 = vor.u32 %v3336_v36, %v2999_v37  ;;  %v3300_v30 = vld [vmem:[%s5053_s1 + $0x604] sm:$0xf] }
  0xe9   :  { %1991 = vmatpush.bf16.msrb.mxu1 %v2970_v50  ;;  %v1765_v39 = vpop.f32.mrf.mxu3  ;;  %v1741_v48 = vpop.f32.mrf.mxu1  ;;  %v1688_v50 = vadd.f32 %v4731_v3, %v1675_v14  ;;  %v2927_v3 = vld [vmem:[%s5053_s1 + $0x698] sm:$0xf0]  ;;  %v3316_v33 = vld [vmem:[%s5053_s1 + $0x684] sm:$0xf]  ;;  %v2858_v63 = vor.u32 %v3300_v30, %v2855_v20 }
  0xea   :  { %2004 = vmatpush.bf16.msrb.mxu2 %v3034_v51  ;;  %v2938_v51 = vor.u32 %v3320_v22, %v2935_v61  ;;  %v3332_v43 = vld [vmem:[%s5053_s1 + $0x704] sm:$0xf] }
  0xeb   :  { %2017 = vmatpush.bf16.msrb.mxu3 %v3098_v26  ;;  %v3318_v26 = vld [vmem:[%s5053_s1 + $0x694] sm:$0xf]  ;;  %v1701_v41 = vadd.f32 %v4757_v18, %v1688_v50  ;;  %v2919_v18 = vld [vmem:[%s5053_s1 + $0x688] sm:$0xf0]  ;;  %v2986_v2 = vor.u32 %v3332_v43, %v2983_v44 }
  0xec   :  { %1979 = vmatpush.bf16.msrb.mxu0 %v2898_v6  ;;  %v2866_v6 = vor.u32 %v3302_v53, %v2863_v38 }
  0xed   :  { %1992 = vmatpush.bf16.msrb.mxu1 %v2962_v42  ;;  %v2930_v42 = vor.u32 %v3318_v26, %v2927_v3 }
  0xee   :  { %2005 = vmatpush.bf16.msrb.mxu2 %v3026_v29  ;;  %v2994_v29 = vor.u32 %v3334_v4, %v2991_v54 }
  0xef   :  { %2018 = vmatpush.bf16.msrb.mxu3 %v3090_v21  ;;  %v3058_v21 = vor.u32 %v3350_v25, %v3055_v55 }
  0xf0   :  { %1980 = vmatpush.bf16.msrb.mxu0 %v2890_v60  ;;  %v1754_v56 = vpop.f32.mrf.mxu2 }
  0xf1   :  { %1993 = vmatpush.bf16.msrb.mxu1 %v2954_v0  ;;  %v1767_v60 = vpop.f32.mrf.mxu3  ;;  %v1714_v0 = vadd.f32 %v4768_v34, %v1701_v41 }
  0xf2   :  { %2006 = vmatpush.bf16.msrb.mxu2 %v3018_v1  ;;  %v2922_v1 = vor.u32 %v3316_v33, %v2919_v18 }
  0xf3   :  { %2019 = vmatpush.bf16.msrb.mxu3 %v3082_v8  ;;  %v1727_v7 = vadd.f32 %v4921_v57, %v1714_v0 }
  0xf4   :  { %1981 = vmatpush.bf16.msrb.mxu0 %v2882_v13 }
  0xf5   :  { %1994 = vmatpush.bf16.msrb.mxu1 %v2946_v15  ;;  %v1740_v8 = vadd.f32 %v4929_v62, %v1727_v7 }
  0xf6   :  { %2007 = vmatpush.bf16.msrb.mxu2 %v3010_v16 }
  0xf7   :  { %2020 = vmatpush.bf16.msrb.mxu3 %v3074_v24  ;;  %v1753_v34 = vadd.f32 %v4966_v27, %v1740_v8 }
  0xf8   :  { %1982 = vmatpush.bf16.msrb.mxu0 %v2874_v47 }
  0xf9   :  { %1995 = vmatpush.bf16.msrb.mxu1 %v2938_v51  ;;  %v1766_v49 = vadd.f32 %v1765_v39, %v1753_v34 }
  0xfa   :  { %2008 = vmatpush.bf16.msrb.mxu2 %v3002_v52 }
  0xfb   :  { %2021 = vmatpush.bf16.msrb.mxu3 %v3066_v32 }
  0xfc   :  { %1983 = vmatpush.bf16.msrb.mxu0 %v2866_v6 }
  0xfd   :  { %1996 = vmatpush.bf16.msrb.mxu1 %v2930_v42 }
  0xfe   :  { %2009 = vmatpush.bf16.msrb.mxu2 %v2994_v29 }
  0xff   :  { %2022 = vmatpush.bf16.msrb.mxu3 %v3058_v21 }
 0x100   :  { %1984 = vmatpush.bf16.msrb.mxu0 %v2858_v63  ;;  %v1778_v9 = vpop.f32.mrf.mxu0 }
 0x101   :  { %1997 = vmatpush.bf16.msrb.mxu1 %v2922_v1  ;;  %v1791_v10 = vpop.f32.mrf.mxu1  ;;  %v1779_v57 = vadd.f32 %v1778_v9, %v1766_v49 }
 0x102   :  { %2010 = vmatpush.bf16.msrb.mxu2 %v2986_v2 }
 0x103   :  { %2023 = vmatpush.bf16.msrb.mxu3 %v3050_v5  ;;  %1985 = vmatmul.bf16.vlgmr.msrb.gmra.mxu0 %v4245_v23  ;;  %v1792_v11 = vadd.f32 %v1791_v10, %v1779_v57 }
 0x104   :  { %1998 = vmatmul.bf16.vlgmr.msrb.gmra.mxu1 %v4258_v31 }
 0x105   :  { %2011 = vmatmul.bf16.vlgmr.msrb.gmra.mxu2 %v4256_v28 }
 0x106   :  { %2024 = vmatmul.bf16.vlgmr.msrb.gmra.mxu3 %v4266_v35 }
 0x108   :  { %v1804_v12 = vpop.f32.mrf.mxu2  ;;  %v1780_v15 = vpop.f32.mrf.mxu0 }
 0x109   :  { %v1805_v13 = vadd.f32 %v1804_v12, %v1792_v11  ;;  %v1817_v14 = vpop.f32.mrf.mxu3  ;;  %v1793_v62 = vpop.f32.mrf.mxu1 }
 0x10b   :  { %v1818_v16 = vadd.f32 %v1817_v14, %v1805_v13 }
 0x10d   :  { %2029 = vst [vmem:[%s5055_s2] sm:$0xff] %v1818_v16  ;;  %v2054_v43 = vmul.f32 %v1818_v16, %v1818_v16  ;;  %v2031_v56 = vrot.slane %v1818_v16, 4 }
 0x10f   :  { %v2056_v58 = vrot.slane %v2054_v43, 4  ;;  %v2032_v63 = vadd.f32 %v2031_v56, %v1818_v16 }
 0x110   :  { %v1806_v23 = vpop.f32.mrf.mxu2 }
 0x111   :  { %v1819_v28 = vpop.f32.mrf.mxu3  ;;  %v2057_v7 = vadd.f32 %v2056_v58, %v2054_v43  ;;  %v2033_v34 = vrot.slane %v2032_v63, 2 }
 0x113   :  { %v2058_v10 = vrot.slane %v2057_v7, 2  ;;  %v2034_v13 = vadd.f32 %v2033_v34, %v2032_v63 }
 0x115   :  { %v2059_v16 = vadd.f32 %v2058_v10, %v2057_v7 }
 0x120   :  { %v1830_v31 = vpop.f32.mrf.mxu0 }
 0x121   :  { %v1843_v17 = vpop.f32.mrf.mxu1 }
 0x122   :  { %v1844_v35 = vadd.f32 %v1843_v17, %v1830_v31  ;;  %v2035_v31 = vrot.slane %v2034_v13, 1 }
 0x128   :  { %v1856_v19 = vpop.f32.mrf.mxu2  ;;  %v1832_v61 = vpop.f32.mrf.mxu0 }
 0x129   :  { %v1857_v22 = vadd.f32 %v1856_v19, %v1844_v35  ;;  %v1869_v24 = vpop.f32.mrf.mxu3  ;;  %v1845_v36 = vpop.f32.mrf.mxu1  ;;  %v2049_v35 = vlaneseq  ;;  %v2036_v61 = vadd.f32 %v2035_v31, %v2034_v13 }
 0x12b   :  { %v1870_v27 = vadd.f32 %v1869_v24, %v1857_v22  ;;  %v2060_v22 = vrot.slane %v2059_v16, 1  ;;  %vm2051_vm1 = vcmp.lt.s32.totalorder %v2049_v35, 256 }
 0x130   :  { %v1858_v37 = vpop.f32.mrf.mxu2 }
 0x131   :  { %v1871_v39 = vpop.f32.mrf.mxu3 }
 0x132   :  { %v2061_v39 = vadd.f32 %v2060_v22, %v2059_v16 }
 0x140   :  { %v1882_v40 = vpop.f32.mrf.mxu0 }
 0x141   :  { %v1895_v45 = vpop.f32.mrf.mxu1  ;;  %v1883_v26 = vadd.f32 %v1882_v40, %v1870_v27 }
 0x143   :  { %v1896_v54 = vadd.f32 %v1895_v45, %v1883_v26 }
 0x148   :  { %v1908_v46 = vpop.f32.mrf.mxu2  ;;  %v1884_v48 = vpop.f32.mrf.mxu0 }
 0x149   :  { %v1921_v47 = vpop.f32.mrf.mxu3  ;;  %v1897_v50 = vpop.f32.mrf.mxu1  ;;  %v1909_v55 = vadd.f32 %v1908_v46, %v1896_v54 }
 0x14b   :  { %v1922_v42 = vadd.f32 %v1921_v47, %v1909_v55 }
 0x150   :  { %v1910_v51 = vpop.f32.mrf.mxu2 }
 0x151   :  { %v1923_v52 = vpop.f32.mrf.mxu3 }
 0x160   :  { %v1934_v53 = vpop.f32.mrf.mxu0 }
 0x161   :  { %v1947_v38 = vpop.f32.mrf.mxu1  ;;  %v1935_v29 = vadd.f32 %v1934_v53, %v1922_v42 }
 0x163   :  { %v1948_v30 = vadd.f32 %v1947_v38, %v1935_v29 }
 0x168   :  { %v1960_v32 = vpop.f32.mrf.mxu2  ;;  %v1936_v4 = vpop.f32.mrf.mxu0 }
 0x169   :  { %v1973_v3 = vpop.f32.mrf.mxu3  ;;  %v1949_v25 = vpop.f32.mrf.mxu1  ;;  %v1961_v20 = vadd.f32 %v1960_v32, %v1948_v30 }
 0x16b   :  { %v1974_v33 = vadd.f32 %v1973_v3, %v1961_v20 }
 0x170   :  { %v1962_v6 = vpop.f32.mrf.mxu2 }
 0x171   :  { %v1975_v41 = vpop.f32.mrf.mxu3 }
 0x180   :  { %v1986_v21 = vpop.f32.mrf.mxu0 }
 0x181   :  { %v1999_v18 = vpop.f32.mrf.mxu1  ;;  %v1987_v44 = vadd.f32 %v1986_v21, %v1974_v33 }
 0x183   :  { %v2000_v59 = vadd.f32 %v1999_v18, %v1987_v44 }
 0x188   :  { %v2012_v60 = vpop.f32.mrf.mxu2  ;;  %v1988_v2 = vpop.f32.mrf.mxu0 }
 0x189   :  { %v2013_v0 = vadd.f32 %v2012_v60, %v2000_v59  ;;  %v2025_v1 = vpop.f32.mrf.mxu3  ;;  %v2001_v5 = vpop.f32.mrf.mxu1 }
 0x18b   :  { %v2026_v8 = vadd.f32 %v2025_v1, %v2013_v0 }
 0x18d   :  { %2030 = vst [vmem:[%s5055_s2 + $0x8] sm:$0xff] %v2026_v8  ;;  %v2037_v49 = vrot.slane %v2026_v8, 4  ;;  %v2055_v9 = vmul.f32 %v2026_v8, %v2026_v8 }
 0x18f   :  { %v2038_v57 = vadd.f32 %v2037_v49, %v2026_v8  ;;  %v2062_v11 = vrot.slane %v2055_v9, 4 }
 0x190   :  { %v2014_v12 = vpop.f32.mrf.mxu2 }
 0x191   :  { %v2039_v14 = vrot.slane %v2038_v57, 2  ;;  %v2063_v15 = vadd.f32 %v2062_v11, %v2055_v9  ;;  %v2027_v62 = vpop.f32.mrf.mxu3 }
 0x193   :  { %v2040_v23 = vadd.f32 %v2039_v14, %v2038_v57  ;;  %v2064_v28 = vrot.slane %v2063_v15, 2 }
 0x195   :  { %v2041_v17 = vrot.slane %v2040_v23, 1  ;;  %v2065_v19 = vadd.f32 %v2064_v28, %v2063_v15 }
 0x197   :  { %v2042_v24 = vadd.f32 %v2041_v17, %v2040_v23  ;;  %v2066_v27 = vrot.slane %v2065_v19, 1 }
 0x199   :  { %v2045_v36 = vrot.slane %v2042_v24, 7  ;;  %v2067_v37 = vadd.f32 %v2066_v27, %v2065_v19 }
 0x19b   :  { %v2047_v40 = vsel %vm2046_vm0, %v2036_v61, %v2045_v36  ;;  %v2070_v45 = vrot.slane %v2067_v37, 7 }
 0x19c   :  { %2053 = vst.msk [vmem:[%s5056_s3] ss:$2 sm:$0x3] %vm2051_vm1, %v2047_v40 }
 0x19d   :  { %v2071_v46 = vsel %vm2046_vm0, %v2061_v39, %v2070_v45 }
 0x19e   :  { %3107 = vst.msk [vmem:[%s5056_s3 + $0x1] ss:$2 sm:$0x3] %vm2051_vm1, %v2071_v46 }

// kernel: discriminator_wgan_forward.15
= control target key start
LH: loop header
LB: loop body
LE: loop exit
PB: predicated region body
PF: predicated region fallthrough
CT: control target
= control target key end

     0   :  { %s654_s0 = inlined_call_operand.vmem [shape: bf16[1,512], index: 0, kind: input, shape index: {}]   ;;  %s655_s1 = inlined_call_operand.vmem [shape: bf16[512,2], index: 1, kind: input, shape index: {}]   ;;  %s656_s2 = inlined_call_operand.hbm [shape: f32[1,2], index: 2, kind: output, shape index: {}]  }
   0x1   :  { %v484_v0 = vld [vmem:[%s655_s1 + $0x38] sm:$0xff]  ;;  %v483_v4 = vld [vmem:[%s655_s1 + $0x30] sm:$0xff]  ;;  %v482_v8 = vld [vmem:[%s655_s1 + $0x28] sm:$0xff] }
   0x2   :  { %v492_v1 = vld [vmem:[%s655_s1 + $0x78] sm:$0xff]  ;;  %279 = vmatpush.bf16.msra.mxu0 %v484_v0  ;;  %v491_v5 = vld [vmem:[%s655_s1 + $0x70] sm:$0xff]  ;;  %v490_v9 = vld [vmem:[%s655_s1 + $0x68] sm:$0xff] }
   0x3   :  { %v500_v2 = vld [vmem:[%s655_s1 + $0xb8] sm:$0xff]  ;;  %292 = vmatpush.bf16.msra.mxu1 %v492_v1  ;;  %v499_v6 = vld [vmem:[%s655_s1 + $0xb0] sm:$0xff]  ;;  %v498_v10 = vld [vmem:[%s655_s1 + $0xa8] sm:$0xff] }
   0x4   :  { %v508_v3 = vld [vmem:[%s655_s1 + $0xf8] sm:$0xff]  ;;  %305 = vmatpush.bf16.msra.mxu2 %v500_v2  ;;  %v507_v7 = vld [vmem:[%s655_s1 + $0xf0] sm:$0xff]  ;;  %v506_v11 = vld [vmem:[%s655_s1 + $0xe8] sm:$0xff] }
   0x5   :  { %318 = vmatpush.bf16.msra.mxu3 %v508_v3  ;;  %v481_v12 = vld [vmem:[%s655_s1 + $0x20] sm:$0xff] }
   0x6   :  { %280 = vmatpush.bf16.msra.mxu0 %v483_v4  ;;  %v489_v13 = vld [vmem:[%s655_s1 + $0x60] sm:$0xff] }
   0x7   :  { %293 = vmatpush.bf16.msra.mxu1 %v491_v5  ;;  %v12_v14 = vld [vmem:[%s654_s0] sm:$0xf] }
   0x8   :  { %306 = vmatpush.bf16.msra.mxu2 %v499_v6  ;;  %v497_v15 = vld [vmem:[%s655_s1 + $0xa0] sm:$0xff]  ;;  %78 = vst [vmem:[#allocation1] ss:$9 sm:$0xff] %v12_v14 }
   0x9   :  { %319 = vmatpush.bf16.msra.mxu3 %v507_v7  ;;  %v505_v16 = vld [vmem:[%s655_s1 + $0xe0] sm:$0xff] }
   0xa   :  { %281 = vmatpush.bf16.msra.mxu0 %v482_v8 }
   0xb   :  { %294 = vmatpush.bf16.msra.mxu1 %v490_v9 }
   0xc   :  { %307 = vmatpush.bf16.msra.mxu2 %v498_v10 }
   0xd   :  { %320 = vmatpush.bf16.msra.mxu3 %v506_v11 }
   0xe   :  { %7 = vsyncpa [#allocation3], 0  ;;  %282 = vmatpush.bf16.msra.mxu0 %v481_v12  ;;  %v480_v17 = vld [vmem:[%s655_s1 + $0x18] sm:$0xff]  ;;  %v479_v21 = vld [vmem:[%s655_s1 + $0x10] sm:$0xff]  ;;  %s536_s0 = smov [#allocation2]   ;;  %s340_s20 = sshll.u32 %s656_s2, 4  ;;  %s341_s20 = int_to_ptr.hbm [resolvable:$true] %s340_s20 }
   0xf   :  { %295 = vmatpush.bf16.msra.mxu1 %v489_v13  ;;  %v488_v18 = vld [vmem:[%s655_s1 + $0x58] sm:$0xff]  ;;  %v487_v22 = vld [vmem:[%s655_s1 + $0x50] sm:$0xff]  ;;  %v478_v25 = vld [vmem:[%s655_s1 + $0x8] sm:$0xff]  ;;  %s338_s18 = sshll.u32 %s536_s0, 4  ;;  %vm331_vm0 = vcmask 8192   ;;  %s339_s18 = int_to_ptr.vmem [resolvable:$true] %s338_s18 }
  0x10   :  { %308 = vmatpush.bf16.msra.mxu2 %v497_v15  ;;  %v496_v19 = vld [vmem:[%s655_s1 + $0x98] sm:$0xff]  ;;  %v495_v23 = vld [vmem:[%s655_s1 + $0x90] sm:$0xff]  ;;  %v486_v26 = vld [vmem:[%s655_s1 + $0x48] sm:$0xff] }
  0x11   :  { %321 = vmatpush.bf16.msra.mxu3 %v505_v16  ;;  %v504_v20 = vld [vmem:[%s655_s1 + $0xd8] sm:$0xff]  ;;  %v503_v24 = vld [vmem:[%s655_s1 + $0xd0] sm:$0xff]  ;;  %v494_v27 = vld [vmem:[%s655_s1 + $0x88] sm:$0xff] }
  0x12   :  { %283 = vmatpush.bf16.msra.mxu0 %v480_v17  ;;  %v502_v28 = vld [vmem:[%s655_s1 + $0xc8] sm:$0xff]  ;;  %v477_v29 = vld [vmem:[%s655_s1] sm:$0xff]  ;;  %v81_v35 = vld [vmem:[#allocation1 + $0x12] sm:$0xff] }
  0x13   :  { %296 = vmatpush.bf16.msra.mxu1 %v488_v18  ;;  %v485_v30 = vld [vmem:[%s655_s1 + $0x40] sm:$0xff]  ;;  %v80_v34 = vld [vmem:[#allocation1 + $0x9] sm:$0xff] }
  0x14   :  { %309 = vmatpush.bf16.msra.mxu2 %v496_v19  ;;  %v493_v31 = vld [vmem:[%s655_s1 + $0x80] sm:$0xff] }
  0x15   :  { %322 = vmatpush.bf16.msra.mxu3 %v504_v20  ;;  %v501_v32 = vld [vmem:[%s655_s1 + $0xc0] sm:$0xff] }
  0x16   :  { %284 = vmatpush.bf16.msra.mxu0 %v479_v21  ;;  %v79_v33 = vld [vmem:[#allocation1] sm:$0xff] }
  0x17   :  { %297 = vmatpush.bf16.msra.mxu1 %v487_v22  ;;  %v82_v36 = vld [vmem:[#allocation1 + $0x1b] sm:$0xff] }
  0x18   :  { %310 = vmatpush.bf16.msra.mxu2 %v495_v23 }
  0x19   :  { %323 = vmatpush.bf16.msra.mxu3 %v503_v24 }
  0x1a   :  { %285 = vmatpush.bf16.msra.mxu0 %v478_v25 }
  0x1b   :  { %298 = vmatpush.bf16.msra.mxu1 %v486_v26 }
  0x1c   :  { %311 = vmatpush.bf16.msra.mxu2 %v494_v27 }
  0x1d   :  { %324 = vmatpush.bf16.msra.mxu3 %v502_v28 }
  0x1e   :  { %286 = vmatpush.bf16.msra.mxu0 %v477_v29 }
  0x1f   :  { %299 = vmatpush.bf16.msra.mxu1 %v485_v30 }
  0x20   :  { %312 = vmatpush.bf16.msra.mxu2 %v493_v31 }
  0x21   :  { %325 = vmatpush.bf16.msra.mxu3 %v501_v32  ;;  %287 = vmatmul.bf16.vlgmr.msra.gmra.mxu0 %v79_v33 }
  0x22   :  { %300 = vmatmul.bf16.vlgmr.msra.gmra.mxu1 %v80_v34 }
  0x23   :  { %313 = vmatmul.bf16.vlgmr.msra.gmra.mxu2 %v81_v35 }
  0x24   :  { %326 = vmatmul.bf16.vlgmr.msra.gmra.mxu3 %v82_v36 }
  0x9e   :  { %v288_v37 = vpop.f32.mrf.mxu0 }
  0x9f   :  { %v301_v38 = vpop.f32.mrf.mxu1 }
  0xa0   :  { %v302_v39 = vadd.f32 %v301_v38, %v288_v37 }
  0xa6   :  { %v314_v40 = vpop.f32.mrf.mxu2  ;;  %v290_v43 = vpop.f32.mrf.mxu0 }
  0xa7   :  { %v327_v41 = vpop.f32.mrf.mxu3  ;;  %v315_v42 = vadd.f32 %v314_v40, %v302_v39  ;;  %v303_v44 = vpop.f32.mrf.mxu1 }
  0xa9   :  { %v328_v45 = vadd.f32 %v327_v41, %v315_v42 }
  0xab   :  { %332 = vst.msk [vmem:[#allocation2] sm:$0x1] %vm331_vm0, %v328_v45 }
  0xac   :  { %343 = dma.vmem_to_hbm [thread:$0]  %s339_s18, 16, %s341_s20, [#allocation3]  }
  0xae   :  { %v316_v46 = vpop.f32.mrf.mxu2 }
  0xaf   :  { %v329_v47 = vpop.f32.mrf.mxu3 }
  0xb0   :  { %534 = dma.done.wait [#allocation3], 16  }
  0xb1   :  { %535 = vsyncadd [#allocation3], 4294967280 }
  0xb2   :  { %348 = vsyncpa [#allocation3], 1 }

// kernel: discriminator_wgan_forward.13
= control target key start
LH: loop header
LB: loop body
LE: loop exit
PB: predicated region body
PF: predicated region fallthrough
CT: control target
= control target key end

     0   :  { %vm7984_vm0 = vcmask 1040384   ;;  %vm7986_vm1 = vcmask 1042434   ;;  %vm7988_vm2 = vcmask 1041408   ;;  %s19731_s1 = inlined_call_operand.vmem [shape: bf16[4096,512], index: 1, kind: input, shape index: {}]   ;;  %s19732_s0 = inlined_call_operand.vmem [shape: bf16[8,4096], index: 0, kind: input, shape index: {}]   ;;  %s19733_s2 = inlined_call_operand.vmem [shape: f32[8,512], index: 2, kind: output, shape index: {0}]   ;;  %s19734_s3 = inlined_call_operand.vmem [shape: f32[1,2,512], index: 3, kind: output, shape index: {1}]  }
   0x1   :  { %v8159_v0 = vld [vmem:[%s19731_s1 + $0xe0] sm:$0xf]  ;;  %v12172_v1 = vld [vmem:[%s19731_s1 + $0xec] sm:$0xf0] }
   0x2   :  { %v8287_v2 = vld [vmem:[%s19731_s1 + $0x1e0] sm:$0xf]  ;;  %v8160_v3 = vor.u32 %v12172_v1, %v8159_v0  ;;  %v12204_v4 = vld [vmem:[%s19731_s1 + $0x1ec] sm:$0xf0] }
   0x3   :  { %v8415_v5 = vld [vmem:[%s19731_s1 + $0x2e0] sm:$0xf]  ;;  %v12236_v6 = vld [vmem:[%s19731_s1 + $0x2ec] sm:$0xf0]  ;;  %v8288_v7 = vor.u32 %v12204_v4, %v8287_v2 }
   0x4   :  { %v8416_v8 = vor.u32 %v12236_v6, %v8415_v5  ;;  %v8543_v9 = vld [vmem:[%s19731_s1 + $0x3e0] sm:$0xf]  ;;  %v12268_v10 = vld [vmem:[%s19731_s1 + $0x3ec] sm:$0xf0]  ;;  %6285 = vmatpush.bf16.msra.mxu0 %v8160_v3 }
   0x5   :  { %v8143_v11 = vld [vmem:[%s19731_s1 + $0xc0] sm:$0xf]  ;;  %v8544_v12 = vor.u32 %v12268_v10, %v8543_v9  ;;  %v12168_v13 = vld [vmem:[%s19731_s1 + $0xcc] sm:$0xf0]  ;;  %6298 = vmatpush.bf16.msra.mxu1 %v8288_v7 }
   0x6   :  { %v8271_v14 = vld [vmem:[%s19731_s1 + $0x1c0] sm:$0xf]  ;;  %v12200_v15 = vld [vmem:[%s19731_s1 + $0x1cc] sm:$0xf0]  ;;  %6311 = vmatpush.bf16.msra.mxu2 %v8416_v8  ;;  %v8144_v16 = vor.u32 %v12168_v13, %v8143_v11 }
   0x7   :  { %v8272_v17 = vor.u32 %v12200_v15, %v8271_v14  ;;  %v8399_v18 = vld [vmem:[%s19731_s1 + $0x2c0] sm:$0xf]  ;;  %v12232_v19 = vld [vmem:[%s19731_s1 + $0x2cc] sm:$0xf0]  ;;  %6324 = vmatpush.bf16.msra.mxu3 %v8544_v12 }
   0x8   :  { %v8527_v20 = vld [vmem:[%s19731_s1 + $0x3c0] sm:$0xf]  ;;  %v8400_v21 = vor.u32 %v12232_v19, %v8399_v18  ;;  %v12264_v22 = vld [vmem:[%s19731_s1 + $0x3cc] sm:$0xf0]  ;;  %6286 = vmatpush.bf16.msra.mxu0 %v8144_v16 }
   0x9   :  { %v8127_v23 = vld [vmem:[%s19731_s1 + $0xa0] sm:$0xf]  ;;  %v12164_v24 = vld [vmem:[%s19731_s1 + $0xac] sm:$0xf0]  ;;  %v8528_v25 = vor.u32 %v12264_v22, %v8527_v20  ;;  %6299 = vmatpush.bf16.msra.mxu1 %v8272_v17 }
   0xa   :  { %v8255_v26 = vld [vmem:[%s19731_s1 + $0x1a0] sm:$0xf]  ;;  %v12196_v27 = vld [vmem:[%s19731_s1 + $0x1ac] sm:$0xf0]  ;;  %v8128_v29 = vor.u32 %v12164_v24, %v8127_v23  ;;  %6312 = vmatpush.bf16.msra.mxu2 %v8400_v21 }
   0xb   :  { %v8383_v28 = vld [vmem:[%s19731_s1 + $0x2a0] sm:$0xf]  ;;  %v12228_v30 = vld [vmem:[%s19731_s1 + $0x2ac] sm:$0xf0]  ;;  %v8256_v33 = vor.u32 %v12196_v27, %v8255_v26  ;;  %6325 = vmatpush.bf16.msra.mxu3 %v8528_v25 }
   0xc   :  { %v8511_v31 = vld [vmem:[%s19731_s1 + $0x3a0] sm:$0xf]  ;;  %v12260_v32 = vld [vmem:[%s19731_s1 + $0x3ac] sm:$0xf0]  ;;  %v8384_v34 = vor.u32 %v12228_v30, %v8383_v28  ;;  %6287 = vmatpush.bf16.msra.mxu0 %v8128_v29 }
   0xd   :  { %v8111_v35 = vld [vmem:[%s19731_s1 + $0x80] sm:$0xf]  ;;  %v12160_v36 = vld [vmem:[%s19731_s1 + $0x8c] sm:$0xf0]  ;;  %v8512_v38 = vor.u32 %v12260_v32, %v8511_v31  ;;  %6300 = vmatpush.bf16.msra.mxu1 %v8256_v33 }
   0xe   :  { %v8239_v37 = vld [vmem:[%s19731_s1 + $0x180] sm:$0xf]  ;;  %v12192_v39 = vld [vmem:[%s19731_s1 + $0x18c] sm:$0xf0]  ;;  %v8112_v44 = vor.u32 %v12160_v36, %v8111_v35  ;;  %6313 = vmatpush.bf16.msra.mxu2 %v8384_v34 }
   0xf   :  { %v8367_v40 = vld [vmem:[%s19731_s1 + $0x280] sm:$0xf]  ;;  %v12224_v41 = vld [vmem:[%s19731_s1 + $0x28c] sm:$0xf0]  ;;  %v8240_v45 = vor.u32 %v12192_v39, %v8239_v37  ;;  %6326 = vmatpush.bf16.msra.mxu3 %v8512_v38 }
  0x10   :  { %v8495_v42 = vld [vmem:[%s19731_s1 + $0x380] sm:$0xf]  ;;  %v12256_v43 = vld [vmem:[%s19731_s1 + $0x38c] sm:$0xf0]  ;;  %v8368_v46 = vor.u32 %v12224_v41, %v8367_v40  ;;  %6288 = vmatpush.bf16.msra.mxu0 %v8112_v44 }
  0x11   :  { %v8095_v47 = vld [vmem:[%s19731_s1 + $0x60] sm:$0xf]  ;;  %v12156_v48 = vld [vmem:[%s19731_s1 + $0x6c] sm:$0xf0]  ;;  %v8496_v50 = vor.u32 %v12256_v43, %v8495_v42  ;;  %6301 = vmatpush.bf16.msra.mxu1 %v8240_v45 }
  0x12   :  { %v8223_v49 = vld [vmem:[%s19731_s1 + $0x160] sm:$0xf]  ;;  %v12188_v51 = vld [vmem:[%s19731_s1 + $0x16c] sm:$0xf0]  ;;  %v8096_v56 = vor.u32 %v12156_v48, %v8095_v47  ;;  %6314 = vmatpush.bf16.msra.mxu2 %v8368_v46 }
  0x13   :  { %v8351_v52 = vld [vmem:[%s19731_s1 + $0x260] sm:$0xf]  ;;  %v12220_v53 = vld [vmem:[%s19731_s1 + $0x26c] sm:$0xf0]  ;;  %v8224_v57 = vor.u32 %v12188_v51, %v8223_v49  ;;  %6327 = vmatpush.bf16.msra.mxu3 %v8496_v50 }
  0x14   :  { %v8479_v54 = vld [vmem:[%s19731_s1 + $0x360] sm:$0xf]  ;;  %v12252_v55 = vld [vmem:[%s19731_s1 + $0x36c] sm:$0xf0]  ;;  %v8352_v58 = vor.u32 %v12220_v53, %v8351_v52  ;;  %6289 = vmatpush.bf16.msra.mxu0 %v8096_v56 }
  0x15   :  { %v8079_v59 = vld [vmem:[%s19731_s1 + $0x40] sm:$0xf]  ;;  %v12152_v60 = vld [vmem:[%s19731_s1 + $0x4c] sm:$0xf0]  ;;  %v8480_v62 = vor.u32 %v12252_v55, %v8479_v54  ;;  %6302 = vmatpush.bf16.msra.mxu1 %v8224_v57 }
  0x16   :  { %v8207_v61 = vld [vmem:[%s19731_s1 + $0x140] sm:$0xf]  ;;  %v12184_v63 = vld [vmem:[%s19731_s1 + $0x14c] sm:$0xf0]  ;;  %v8080_v4 = vor.u32 %v12152_v60, %v8079_v59  ;;  %6315 = vmatpush.bf16.msra.mxu2 %v8352_v58  ;;  %v14_v58 = vld [vmem:[%s19732_s0 + $0x8] sm:$0xff] }
  0x17   :  { %v8335_v0 = vld [vmem:[%s19731_s1 + $0x240] sm:$0xf]  ;;  %v12216_v1 = vld [vmem:[%s19731_s1 + $0x24c] sm:$0xf0]  ;;  %v8208_v5 = vor.u32 %v12184_v63, %v8207_v61  ;;  %6328 = vmatpush.bf16.msra.mxu3 %v8480_v62  ;;  %v1071_v63 = vunpack.c.l.b16 %v14_v58 }
  0x18   :  { %v8463_v2 = vld [vmem:[%s19731_s1 + $0x340] sm:$0xf]  ;;  %v12248_v3 = vld [vmem:[%s19731_s1 + $0x34c] sm:$0xf0]  ;;  %v8336_v6 = vor.u32 %v12216_v1, %v8335_v0  ;;  %6290 = vmatpush.bf16.msra.mxu0 %v8080_v4  ;;  %v1072_v0 = vunpack.c.h.b16 %v14_v58 }
  0x19   :  { %v8063_v7 = vld [vmem:[%s19731_s1 + $0x20] sm:$0xf]  ;;  %v12148_v8 = vld [vmem:[%s19731_s1 + $0x2c] sm:$0xf0]  ;;  %v8464_v10 = vor.u32 %v12248_v3, %v8463_v2  ;;  %6303 = vmatpush.bf16.msra.mxu1 %v8208_v5  ;;  %v13455_v4 = vpack.c.b16 %v1071_v63, %v1071_v63 }
  0x1a   :  { %v8191_v9 = vld [vmem:[%s19731_s1 + $0x120] sm:$0xf]  ;;  %v12180_v11 = vld [vmem:[%s19731_s1 + $0x12c] sm:$0xf0]  ;;  %v8064_v16 = vor.u32 %v12148_v8, %v8063_v7  ;;  %6316 = vmatpush.bf16.msra.mxu2 %v8336_v6  ;;  %v13460_v6 = vpack.c.b16 %v1072_v0, %v1072_v0 }
  0x1b   :  { %v8319_v12 = vld [vmem:[%s19731_s1 + $0x220] sm:$0xf]  ;;  %v12212_v13 = vld [vmem:[%s19731_s1 + $0x22c] sm:$0xf0]  ;;  %v8192_v19 = vor.u32 %v12180_v11, %v8191_v9  ;;  %6329 = vmatpush.bf16.msra.mxu3 %v8464_v10 }
  0x1c   :  { %v8447_v14 = vld [vmem:[%s19731_s1 + $0x320] sm:$0xf]  ;;  %v12244_v15 = vld [vmem:[%s19731_s1 + $0x32c] sm:$0xf0]  ;;  %v8320_v20 = vor.u32 %v12212_v13, %v8319_v12  ;;  %6291 = vmatpush.bf16.msra.mxu0 %v8064_v16 }
  0x1d   :  { %v8047_v17 = vld [vmem:[%s19731_s1] sm:$0xf]  ;;  %v12144_v18 = vld [vmem:[%s19731_s1 + $0xc] sm:$0xf0]  ;;  %v8448_v24 = vor.u32 %v12244_v15, %v8447_v14  ;;  %6304 = vmatpush.bf16.msra.mxu1 %v8192_v19 }
  0x1e   :  { %v8175_v21 = vld [vmem:[%s19731_s1 + $0x100] sm:$0xf]  ;;  %v12176_v22 = vld [vmem:[%s19731_s1 + $0x10c] sm:$0xf0]  ;;  %v8048_v31 = vor.u32 %v12144_v18, %v8047_v17  ;;  %6317 = vmatpush.bf16.msra.mxu2 %v8320_v20 }
  0x1f   :  { %v8303_v23 = vld [vmem:[%s19731_s1 + $0x200] sm:$0xf]  ;;  %v12208_v25 = vld [vmem:[%s19731_s1 + $0x20c] sm:$0xf0]  ;;  %v8176_v35 = vor.u32 %v12176_v22, %v8175_v21  ;;  %6330 = vmatpush.bf16.msra.mxu3 %v8448_v24 }
  0x20   :  { %v8431_v26 = vld [vmem:[%s19731_s1 + $0x300] sm:$0xf]  ;;  %v12240_v27 = vld [vmem:[%s19731_s1 + $0x30c] sm:$0xf0]  ;;  %v8304_v36 = vor.u32 %v12208_v25, %v8303_v23  ;;  %6292 = vmatpush.bf16.msra.mxu0 %v8048_v31 }
  0x21   :  { %v8671_v28 = vld [vmem:[%s19731_s1 + $0x4e0] sm:$0xf]  ;;  %v12300_v29 = vld [vmem:[%s19731_s1 + $0x4ec] sm:$0xf0]  ;;  %v8432_v39 = vor.u32 %v12240_v27, %v8431_v26  ;;  %6305 = vmatpush.bf16.msra.mxu1 %v8176_v35 }
  0x22   :  { %v8799_v30 = vld [vmem:[%s19731_s1 + $0x5e0] sm:$0xf]  ;;  %v12332_v32 = vld [vmem:[%s19731_s1 + $0x5ec] sm:$0xf0]  ;;  %v8672_v40 = vor.u32 %v12300_v29, %v8671_v28  ;;  %6318 = vmatpush.bf16.msra.mxu2 %v8304_v36 }
  0x23   :  { %v8927_v33 = vld [vmem:[%s19731_s1 + $0x6e0] sm:$0xf]  ;;  %v12364_v34 = vld [vmem:[%s19731_s1 + $0x6ec] sm:$0xf0]  ;;  %v8800_v41 = vor.u32 %v12332_v32, %v8799_v30  ;;  %6331 = vmatpush.bf16.msra.mxu3 %v8432_v39 }
  0x24   :  { %v9055_v37 = vld [vmem:[%s19731_s1 + $0x7e0] sm:$0xf]  ;;  %v12396_v38 = vld [vmem:[%s19731_s1 + $0x7ec] sm:$0xf0]  ;;  %v8928_v42 = vor.u32 %v12364_v34, %v8927_v33  ;;  %6337 = vmatpush.bf16.msrb.mxu0 %v8672_v40 }
  0x25   :  { %v8655_v43 = vld [vmem:[%s19731_s1 + $0x4c0] sm:$0xf]  ;;  %v12296_v44 = vld [vmem:[%s19731_s1 + $0x4cc] sm:$0xf0]  ;;  %v9056_v46 = vor.u32 %v12396_v38, %v9055_v37  ;;  %6350 = vmatpush.bf16.msrb.mxu1 %v8800_v41  ;;  %6319 = vmatmul.bf16.vlgmr.msra.gmra.mxu2 %v13455_v4 }
  0x26   :  { %v8783_v45 = vld [vmem:[%s19731_s1 + $0x5c0] sm:$0xf]  ;;  %v12328_v47 = vld [vmem:[%s19731_s1 + $0x5cc] sm:$0xf0]  ;;  %v8656_v52 = vor.u32 %v12296_v44, %v8655_v43  ;;  %6363 = vmatpush.bf16.msrb.mxu2 %v8928_v42  ;;  %6332 = vmatmul.bf16.vlgmr.msra.gmra.mxu3 %v13460_v6 }
  0x27   :  { %v8911_v48 = vld [vmem:[%s19731_s1 + $0x6c0] sm:$0xf]  ;;  %v12360_v49 = vld [vmem:[%s19731_s1 + $0x6cc] sm:$0xf0]  ;;  %v8784_v54 = vor.u32 %v12328_v47, %v8783_v45  ;;  %6376 = vmatpush.bf16.msrb.mxu3 %v9056_v46 }
  0x28   :  { %v9039_v50 = vld [vmem:[%s19731_s1 + $0x7c0] sm:$0xf]  ;;  %v12392_v51 = vld [vmem:[%s19731_s1 + $0x7cc] sm:$0xf0]  ;;  %v8912_v55 = vor.u32 %v12360_v49, %v8911_v48  ;;  %6338 = vmatpush.bf16.msrb.mxu0 %v8656_v52 }
  0x29   :  { %v8639_v53 = vld [vmem:[%s19731_s1 + $0x4a0] sm:$0xf]  ;;  %v12292_v56 = vld [vmem:[%s19731_s1 + $0x4ac] sm:$0xf0]  ;;  %v9040_v59 = vor.u32 %v12392_v51, %v9039_v50  ;;  %6351 = vmatpush.bf16.msrb.mxu1 %v8784_v54 }
  0x2a   :  { %v8767_v57 = vld [vmem:[%s19731_s1 + $0x5a0] sm:$0xf]  ;;  %v12324_v60 = vld [vmem:[%s19731_s1 + $0x5ac] sm:$0xf0]  ;;  %v8640_v3 = vor.u32 %v12292_v56, %v8639_v53  ;;  %6364 = vmatpush.bf16.msrb.mxu2 %v8912_v55 }
  0x2b   :  { %v8895_v61 = vld [vmem:[%s19731_s1 + $0x6a0] sm:$0xf]  ;;  %v12356_v62 = vld [vmem:[%s19731_s1 + $0x6ac] sm:$0xf0]  ;;  %v8768_v7 = vor.u32 %v12324_v60, %v8767_v57  ;;  %6377 = vmatpush.bf16.msrb.mxu3 %v9040_v59 }
  0x2c   :  { %v9023_v1 = vld [vmem:[%s19731_s1 + $0x7a0] sm:$0xf]  ;;  %v12388_v2 = vld [vmem:[%s19731_s1 + $0x7ac] sm:$0xf0]  ;;  %v8896_v8 = vor.u32 %v12356_v62, %v8895_v61  ;;  %6339 = vmatpush.bf16.msrb.mxu0 %v8640_v3  ;;  %v16_v3 = vld [vmem:[%s19732_s0 + $0x18] sm:$0xff] }
  0x2d   :  { %v13_v5 = vld [vmem:[%s19732_s0] sm:$0xff]  ;;  %v12288_v10 = vld [vmem:[%s19731_s1 + $0x48c] sm:$0xf0]  ;;  %v9024_v14 = vor.u32 %v12388_v2, %v9023_v1  ;;  %6352 = vmatpush.bf16.msrb.mxu1 %v8768_v7 }
  0x2e   :  { %v8623_v9 = vld [vmem:[%s19731_s1 + $0x480] sm:$0xf]  ;;  %v1069_v12 = vunpack.c.l.b16 %v13_v5  ;;  %v1070_v13 = vunpack.c.h.b16 %v13_v5  ;;  %v12320_v15 = vld [vmem:[%s19731_s1 + $0x58c] sm:$0xf0]  ;;  %6365 = vmatpush.bf16.msrb.mxu2 %v8896_v8 }
  0x2f   :  { %v8751_v11 = vld [vmem:[%s19731_s1 + $0x580] sm:$0xf]  ;;  %v12352_v17 = vld [vmem:[%s19731_s1 + $0x68c] sm:$0xf0]  ;;  %v8624_v22 = vor.u32 %v12288_v10, %v8623_v9  ;;  %6378 = vmatpush.bf16.msrb.mxu3 %v9024_v14 }
  0x30   :  { %v8879_v16 = vld [vmem:[%s19731_s1 + $0x680] sm:$0xf]  ;;  %v12384_v19 = vld [vmem:[%s19731_s1 + $0x78c] sm:$0xf0]  ;;  %v13487_v20 = vpack.c.b16 %v1069_v12, %v1069_v12  ;;  %v13490_v21 = vpack.c.b16 %v1070_v13, %v1070_v13  ;;  %v8752_v23 = vor.u32 %v12320_v15, %v8751_v11 }
  0x31   :  { %v9007_v18 = vld [vmem:[%s19731_s1 + $0x780] sm:$0xf]  ;;  %v8880_v24 = vor.u32 %v12352_v17, %v8879_v16  ;;  %v12284_v26 = vld [vmem:[%s19731_s1 + $0x46c] sm:$0xf0]  ;;  %6340 = vmatpush.bf16.msrb.mxu0 %v8624_v22  ;;  %v1075_v17 = vunpack.c.l.b16 %v16_v3 }
  0x32   :  { %v8607_v25 = vld [vmem:[%s19731_s1 + $0x460] sm:$0xf]  ;;  %v9008_v28 = vor.u32 %v12384_v19, %v9007_v18  ;;  %v12316_v29 = vld [vmem:[%s19731_s1 + $0x56c] sm:$0xf0]  ;;  %6293 = vmatmul.bf16.vlgmr.msra.gmra.mxu0 %v13487_v20  ;;  %6306 = vmatmul.bf16.vlgmr.msra.gmra.mxu1 %v13490_v21 }
  0x33   :  { %v8735_v27 = vld [vmem:[%s19731_s1 + $0x560] sm:$0xf]  ;;  %v12348_v31 = vld [vmem:[%s19731_s1 + $0x66c] sm:$0xf0]  ;;  %v8608_v34 = vor.u32 %v12284_v26, %v8607_v25  ;;  %6353 = vmatpush.bf16.msrb.mxu1 %v8752_v23  ;;  %6366 = vmatpush.bf16.msrb.mxu2 %v8880_v24  ;;  %v1076_v25 = vunpack.c.h.b16 %v16_v3 }
  0x34   :  { %v8863_v30 = vld [vmem:[%s19731_s1 + $0x660] sm:$0xf]  ;;  %v12380_v33 = vld [vmem:[%s19731_s1 + $0x76c] sm:$0xf0]  ;;  %v8736_v35 = vor.u32 %v12316_v29, %v8735_v27  ;;  %6379 = vmatpush.bf16.msrb.mxu3 %v9008_v28 }
  0x35   :  { %v8991_v32 = vld [vmem:[%s19731_s1 + $0x760] sm:$0xf]  ;;  %v8864_v36 = vor.u32 %v12348_v31, %v8863_v30  ;;  %v12280_v38 = vld [vmem:[%s19731_s1 + $0x44c] sm:$0xf0]  ;;  %6341 = vmatpush.bf16.msrb.mxu0 %v8608_v34 }
  0x36   :  { %v8591_v37 = vld [vmem:[%s19731_s1 + $0x440] sm:$0xf]  ;;  %v8992_v40 = vor.u32 %v12380_v33, %v8991_v32  ;;  %v12312_v41 = vld [vmem:[%s19731_s1 + $0x54c] sm:$0xf0] }
  0x37   :  { %v8719_v39 = vld [vmem:[%s19731_s1 + $0x540] sm:$0xf]  ;;  %v12344_v43 = vld [vmem:[%s19731_s1 + $0x64c] sm:$0xf0]  ;;  %v8592_v46 = vor.u32 %v12280_v38, %v8591_v37  ;;  %6354 = vmatpush.bf16.msrb.mxu1 %v8736_v35  ;;  %6367 = vmatpush.bf16.msrb.mxu2 %v8864_v36  ;;  %v13638_v38 = vpack.c.b16 %v1075_v17, %v1075_v17 }
  0x38   :  { %v8847_v42 = vld [vmem:[%s19731_s1 + $0x640] sm:$0xf]  ;;  %v12376_v45 = vld [vmem:[%s19731_s1 + $0x74c] sm:$0xf0]  ;;  %v8720_v47 = vor.u32 %v12312_v41, %v8719_v39  ;;  %6380 = vmatpush.bf16.msrb.mxu3 %v8992_v40 }
  0x39   :  { %v8975_v44 = vld [vmem:[%s19731_s1 + $0x740] sm:$0xf]  ;;  %v8848_v48 = vor.u32 %v12344_v43, %v8847_v42  ;;  %v12276_v50 = vld [vmem:[%s19731_s1 + $0x42c] sm:$0xf0]  ;;  %6342 = vmatpush.bf16.msrb.mxu0 %v8592_v46  ;;  %v13648_v42 = vpack.c.b16 %v1076_v25, %v1076_v25 }
  0x3a   :  { %v8575_v49 = vld [vmem:[%s19731_s1 + $0x420] sm:$0xf]  ;;  %v8976_v52 = vor.u32 %v12376_v45, %v8975_v44  ;;  %v12308_v53 = vld [vmem:[%s19731_s1 + $0x52c] sm:$0xf0] }
  0x3b   :  { %v8703_v51 = vld [vmem:[%s19731_s1 + $0x520] sm:$0xf]  ;;  %v12340_v55 = vld [vmem:[%s19731_s1 + $0x62c] sm:$0xf0]  ;;  %v8576_v59 = vor.u32 %v12276_v50, %v8575_v49  ;;  %6355 = vmatpush.bf16.msrb.mxu1 %v8720_v47  ;;  %6368 = vmatpush.bf16.msrb.mxu2 %v8848_v48 }
  0x3c   :  { %v8831_v54 = vld [vmem:[%s19731_s1 + $0x620] sm:$0xf]  ;;  %v12372_v57 = vld [vmem:[%s19731_s1 + $0x72c] sm:$0xf0]  ;;  %v8704_v63 = vor.u32 %v12308_v53, %v8703_v51  ;;  %6381 = vmatpush.bf16.msrb.mxu3 %v8976_v52 }
  0x3d   :  { %v8959_v56 = vld [vmem:[%s19731_s1 + $0x720] sm:$0xf]  ;;  %v12272_v60 = vld [vmem:[%s19731_s1 + $0x40c] sm:$0xf0]  ;;  %v8832_v0 = vor.u32 %v12340_v55, %v8831_v54  ;;  %6343 = vmatpush.bf16.msrb.mxu0 %v8576_v59 }
  0x3e   :  { %v8559_v58 = vld [vmem:[%s19731_s1 + $0x400] sm:$0xf]  ;;  %v12304_v62 = vld [vmem:[%s19731_s1 + $0x50c] sm:$0xf0]  ;;  %v8960_v5 = vor.u32 %v12372_v57, %v8959_v56 }
  0x3f   :  { %v8687_v61 = vld [vmem:[%s19731_s1 + $0x500] sm:$0xf]  ;;  %v12336_v2 = vld [vmem:[%s19731_s1 + $0x60c] sm:$0xf0]  ;;  %v8560_v13 = vor.u32 %v12272_v60, %v8559_v58  ;;  %6356 = vmatpush.bf16.msrb.mxu1 %v8704_v63  ;;  %6369 = vmatpush.bf16.msrb.mxu2 %v8832_v0 }
  0x40   :  { %v8815_v1 = vld [vmem:[%s19731_s1 + $0x600] sm:$0xf]  ;;  %v12368_v8 = vld [vmem:[%s19731_s1 + $0x70c] sm:$0xf0]  ;;  %v8688_v18 = vor.u32 %v12304_v62, %v8687_v61  ;;  %6382 = vmatpush.bf16.msrb.mxu3 %v8960_v5 }
  0x41   :  { %v8943_v7 = vld [vmem:[%s19731_s1 + $0x700] sm:$0xf]  ;;  %v15_v9 = vld [vmem:[%s19732_s0 + $0x10] sm:$0xff]  ;;  %v8816_v19 = vor.u32 %v12336_v2, %v8815_v1  ;;  %6344 = vmatpush.bf16.msrb.mxu0 %v8560_v13 }
  0x42   :  { %v9183_v10 = vld [vmem:[%s19731_s1 + $0x8e0] sm:$0xf]  ;;  %v12428_v11 = vld [vmem:[%s19731_s1 + $0x8ec] sm:$0xf0]  ;;  %v1073_v24 = vunpack.c.l.b16 %v15_v9  ;;  %v8944_v26 = vor.u32 %v12368_v8, %v8943_v7  ;;  %v1074_v28 = vunpack.c.h.b16 %v15_v9 }
  0x43   :  { %v9311_v12 = vld [vmem:[%s19731_s1 + $0x9e0] sm:$0xf]  ;;  %v12460_v14 = vld [vmem:[%s19731_s1 + $0x9ec] sm:$0xf0]  ;;  %v9184_v27 = vor.u32 %v12428_v11, %v9183_v10  ;;  %6357 = vmatpush.bf16.msrb.mxu1 %v8688_v18  ;;  %6370 = vmatpush.bf16.msrb.mxu2 %v8816_v19 }
  0x44   :  { %v9439_v15 = vld [vmem:[%s19731_s1 + $0xae0] sm:$0xf]  ;;  %v12492_v16 = vld [vmem:[%s19731_s1 + $0xaec] sm:$0xf0]  ;;  %v9312_v29 = vor.u32 %v12460_v14, %v9311_v12  ;;  %v13646_v41 = vpack.c.b16 %v1073_v24, %v1073_v24  ;;  %6383 = vmatpush.bf16.msrb.mxu3 %v8944_v26  ;;  %v13650_v44 = vpack.c.b16 %v1074_v28, %v1074_v28 }
  0x45   :  { %v9567_v22 = vld [vmem:[%s19731_s1 + $0xbe0] sm:$0xf]  ;;  %v12524_v23 = vld [vmem:[%s19731_s1 + $0xbec] sm:$0xf0]  ;;  %v9440_v30 = vor.u32 %v12492_v16, %v9439_v15  ;;  %6389 = vmatpush.bf16.msra.mxu0 %v9184_v27 }
  0x46   :  { %v9167_v31 = vld [vmem:[%s19731_s1 + $0x8c0] sm:$0xf]  ;;  %v12424_v32 = vld [vmem:[%s19731_s1 + $0x8cc] sm:$0xf0]  ;;  %v9568_v34 = vor.u32 %v12524_v23, %v9567_v22  ;;  %6371 = vmatmul.bf16.vlgmr.msrb.gmra.mxu2 %v13638_v38  ;;  %6345 = vmatmul.bf16.vlgmr.msrb.gmra.mxu0 %v13646_v41 }
  0x47   :  { %v9295_v33 = vld [vmem:[%s19731_s1 + $0x9c0] sm:$0xf]  ;;  %v12456_v35 = vld [vmem:[%s19731_s1 + $0x9cc] sm:$0xf0]  ;;  %v9168_v43 = vor.u32 %v12424_v32, %v9167_v31  ;;  %6402 = vmatpush.bf16.msra.mxu1 %v9312_v29  ;;  %6415 = vmatpush.bf16.msra.mxu2 %v9440_v30 }
  0x48   :  { %v9423_v36 = vld [vmem:[%s19731_s1 + $0xac0] sm:$0xf]  ;;  %v12488_v37 = vld [vmem:[%s19731_s1 + $0xacc] sm:$0xf0]  ;;  %v9296_v45 = vor.u32 %v12456_v35, %v9295_v33  ;;  %6428 = vmatpush.bf16.msra.mxu3 %v9568_v34  ;;  %6358 = vmatmul.bf16.vlgmr.msrb.gmra.mxu1 %v13650_v44 }
  0x49   :  { %v9551_v39 = vld [vmem:[%s19731_s1 + $0xbc0] sm:$0xf]  ;;  %v12520_v40 = vld [vmem:[%s19731_s1 + $0xbcc] sm:$0xf0]  ;;  %v9424_v46 = vor.u32 %v12488_v37, %v9423_v36  ;;  %6384 = vmatmul.bf16.vlgmr.msrb.gmra.mxu3 %v13648_v42  ;;  %6390 = vmatpush.bf16.msra.mxu0 %v9168_v43 }
  0x4a   :  { %v9151_v47 = vld [vmem:[%s19731_s1 + $0x8a0] sm:$0xf]  ;;  %v12420_v48 = vld [vmem:[%s19731_s1 + $0x8ac] sm:$0xf0]  ;;  %v9552_v50 = vor.u32 %v12520_v40, %v9551_v39 }
  0x4b   :  { %v9279_v49 = vld [vmem:[%s19731_s1 + $0x9a0] sm:$0xf]  ;;  %v12452_v51 = vld [vmem:[%s19731_s1 + $0x9ac] sm:$0xf0]  ;;  %v9152_v56 = vor.u32 %v12420_v48, %v9151_v47  ;;  %6403 = vmatpush.bf16.msra.mxu1 %v9296_v45  ;;  %6416 = vmatpush.bf16.msra.mxu2 %v9424_v46 }
  0x4c   :  { %v9407_v52 = vld [vmem:[%s19731_s1 + $0xaa0] sm:$0xf]  ;;  %v12484_v53 = vld [vmem:[%s19731_s1 + $0xaac] sm:$0xf0]  ;;  %v9280_v57 = vor.u32 %v12452_v51, %v9279_v49  ;;  %6429 = vmatpush.bf16.msra.mxu3 %v9552_v50 }
  0x4d   :  { %v9535_v54 = vld [vmem:[%s19731_s1 + $0xba0] sm:$0xf]  ;;  %v12516_v55 = vld [vmem:[%s19731_s1 + $0xbac] sm:$0xf0]  ;;  %v9408_v58 = vor.u32 %v12484_v53, %v9407_v52  ;;  %6391 = vmatpush.bf16.msra.mxu0 %v9152_v56 }
  0x4e   :  { %v9135_v59 = vld [vmem:[%s19731_s1 + $0x880] sm:$0xf]  ;;  %v12416_v60 = vld [vmem:[%s19731_s1 + $0x88c] sm:$0xf0]  ;;  %v9536_v62 = vor.u32 %v12516_v55, %v9535_v54 }
  0x4f   :  { %v9263_v61 = vld [vmem:[%s19731_s1 + $0x980] sm:$0xf]  ;;  %v12448_v63 = vld [vmem:[%s19731_s1 + $0x98c] sm:$0xf0]  ;;  %v9136_v5 = vor.u32 %v12416_v60, %v9135_v59  ;;  %6404 = vmatpush.bf16.msra.mxu1 %v9280_v57  ;;  %6417 = vmatpush.bf16.msra.mxu2 %v9408_v58 }
  0x50   :  { %v9391_v0 = vld [vmem:[%s19731_s1 + $0xa80] sm:$0xf]  ;;  %v12480_v1 = vld [vmem:[%s19731_s1 + $0xa8c] sm:$0xf0]  ;;  %v9264_v7 = vor.u32 %v12448_v63, %v9263_v61  ;;  %6430 = vmatpush.bf16.msra.mxu3 %v9536_v62  ;;  %v18_v61 = vld [vmem:[%s19732_s0 + $0x28] sm:$0xff] }
  0x51   :  { %v9519_v2 = vld [vmem:[%s19731_s1 + $0xb80] sm:$0xf]  ;;  %v12512_v3 = vld [vmem:[%s19731_s1 + $0xb8c] sm:$0xf0]  ;;  %v9392_v8 = vor.u32 %v12480_v1, %v9391_v0  ;;  %6392 = vmatpush.bf16.msra.mxu0 %v9136_v5 }
  0x52   :  { %v9119_v9 = vld [vmem:[%s19731_s1 + $0x860] sm:$0xf]  ;;  %v12412_v10 = vld [vmem:[%s19731_s1 + $0x86c] sm:$0xf0]  ;;  %v9520_v12 = vor.u32 %v12512_v3, %v9519_v2 }
  0x53   :  { %v9247_v11 = vld [vmem:[%s19731_s1 + $0x960] sm:$0xf]  ;;  %v12444_v13 = vld [vmem:[%s19731_s1 + $0x96c] sm:$0xf0]  ;;  %v9120_v18 = vor.u32 %v12412_v10, %v9119_v9  ;;  %6405 = vmatpush.bf16.msra.mxu1 %v9264_v7  ;;  %6418 = vmatpush.bf16.msra.mxu2 %v9392_v8 }
  0x54   :  { %v9375_v14 = vld [vmem:[%s19731_s1 + $0xa60] sm:$0xf]  ;;  %v12476_v15 = vld [vmem:[%s19731_s1 + $0xa6c] sm:$0xf0]  ;;  %v9248_v19 = vor.u32 %v12444_v13, %v9247_v11  ;;  %6431 = vmatpush.bf16.msra.mxu3 %v9520_v12  ;;  %v1079_v12 = vunpack.c.l.b16 %v18_v61 }
  0x55   :  { %v9503_v16 = vld [vmem:[%s19731_s1 + $0xb60] sm:$0xf]  ;;  %v12508_v17 = vld [vmem:[%s19731_s1 + $0xb6c] sm:$0xf0]  ;;  %v9376_v22 = vor.u32 %v12476_v15, %v9375_v14  ;;  %6393 = vmatpush.bf16.msra.mxu0 %v9120_v18 }
  0x56   :  { %v9103_v23 = vld [vmem:[%s19731_s1 + $0x840] sm:$0xf]  ;;  %v12408_v24 = vld [vmem:[%s19731_s1 + $0x84c] sm:$0xf0]  ;;  %v9504_v26 = vor.u32 %v12508_v17, %v9503_v16  ;;  %v1080_v16 = vunpack.c.h.b16 %v18_v61 }
  0x57   :  { %v9231_v25 = vld [vmem:[%s19731_s1 + $0x940] sm:$0xf]  ;;  %v12440_v27 = vld [vmem:[%s19731_s1 + $0x94c] sm:$0xf0]  ;;  %v9104_v32 = vor.u32 %v12408_v24, %v9103_v23  ;;  %6406 = vmatpush.bf16.msra.mxu1 %v9248_v19  ;;  %6419 = vmatpush.bf16.msra.mxu2 %v9376_v22 }
  0x58   :  { %v9359_v28 = vld [vmem:[%s19731_s1 + $0xa40] sm:$0xf]  ;;  %v12472_v29 = vld [vmem:[%s19731_s1 + $0xa4c] sm:$0xf0]  ;;  %v9232_v33 = vor.u32 %v12440_v27, %v9231_v25  ;;  %6432 = vmatpush.bf16.msra.mxu3 %v9504_v26 }
  0x59   :  { %v9487_v30 = vld [vmem:[%s19731_s1 + $0xb40] sm:$0xf]  ;;  %v12504_v31 = vld [vmem:[%s19731_s1 + $0xb4c] sm:$0xf0]  ;;  %v9360_v34 = vor.u32 %v12472_v29, %v9359_v28  ;;  %6394 = vmatpush.bf16.msra.mxu0 %v9104_v32  ;;  %v13850_v29 = vpack.c.b16 %v1079_v12, %v1079_v12 }
  0x5a   :  { %v9087_v35 = vld [vmem:[%s19731_s1 + $0x820] sm:$0xf]  ;;  %v12404_v36 = vld [vmem:[%s19731_s1 + $0x82c] sm:$0xf0]  ;;  %v9488_v39 = vor.u32 %v12504_v31, %v9487_v30 }
  0x5b   :  { %v9215_v37 = vld [vmem:[%s19731_s1 + $0x920] sm:$0xf]  ;;  %v12436_v40 = vld [vmem:[%s19731_s1 + $0x92c] sm:$0xf0]  ;;  %v9088_v49 = vor.u32 %v12404_v36, %v9087_v35  ;;  %6407 = vmatpush.bf16.msra.mxu1 %v9232_v33  ;;  %6420 = vmatpush.bf16.msra.mxu2 %v9360_v34  ;;  %v13860_v33 = vpack.c.b16 %v1080_v16, %v1080_v16 }
  0x5c   :  { %v9343_v43 = vld [vmem:[%s19731_s1 + $0xa20] sm:$0xf]  ;;  %v12468_v45 = vld [vmem:[%s19731_s1 + $0xa2c] sm:$0xf0]  ;;  %v9216_v53 = vor.u32 %v12436_v40, %v9215_v37  ;;  %6433 = vmatpush.bf16.msra.mxu3 %v9488_v39 }
  0x5d   :  { %v9471_v46 = vld [vmem:[%s19731_s1 + $0xb20] sm:$0xf]  ;;  %v12500_v47 = vld [vmem:[%s19731_s1 + $0xb2c] sm:$0xf0]  ;;  %v9344_v54 = vor.u32 %v12468_v45, %v9343_v43  ;;  %6395 = vmatpush.bf16.msra.mxu0 %v9088_v49 }
  0x5e   :  { %v9071_v48 = vld [vmem:[%s19731_s1 + $0x800] sm:$0xf]  ;;  %v12400_v50 = vld [vmem:[%s19731_s1 + $0x80c] sm:$0xf0]  ;;  %v9472_v58 = vor.u32 %v12500_v47, %v9471_v46 }
  0x5f   :  { %v9199_v51 = vld [vmem:[%s19731_s1 + $0x900] sm:$0xf]  ;;  %v12432_v52 = vld [vmem:[%s19731_s1 + $0x90c] sm:$0xf0]  ;;  %v9072_v1 = vor.u32 %v12400_v50, %v9071_v48  ;;  %6408 = vmatpush.bf16.msra.mxu1 %v9216_v53  ;;  %6421 = vmatpush.bf16.msra.mxu2 %v9344_v54 }
  0x60   :  { %v9327_v55 = vld [vmem:[%s19731_s1 + $0xa00] sm:$0xf]  ;;  %v12464_v56 = vld [vmem:[%s19731_s1 + $0xa0c] sm:$0xf0]  ;;  %v9200_v8 = vor.u32 %v12432_v52, %v9199_v51  ;;  %6434 = vmatpush.bf16.msra.mxu3 %v9472_v58 }
  0x61   :  { %v17_v57 = vld [vmem:[%s19732_s0 + $0x20] sm:$0xff]  ;;  %v12496_v60 = vld [vmem:[%s19731_s1 + $0xb0c] sm:$0xf0]  ;;  %v9328_v9 = vor.u32 %v12464_v56, %v9327_v55  ;;  %6396 = vmatpush.bf16.msra.mxu0 %v9072_v1 }
  0x62   :  { %v9455_v59 = vld [vmem:[%s19731_s1 + $0xb00] sm:$0xf]  ;;  %v12556_v63 = vld [vmem:[%s19731_s1 + $0xcec] sm:$0xf0]  ;;  %v1077_v7 = vunpack.c.l.b16 %v17_v57  ;;  %v1078_v13 = vunpack.c.h.b16 %v17_v57 }
  0x63   :  { %v9695_v62 = vld [vmem:[%s19731_s1 + $0xce0] sm:$0xf]  ;;  %v12588_v2 = vld [vmem:[%s19731_s1 + $0xdec] sm:$0xf0]  ;;  %v9456_v14 = vor.u32 %v12496_v60, %v9455_v59  ;;  %6409 = vmatpush.bf16.msra.mxu1 %v9200_v8  ;;  %6422 = vmatpush.bf16.msra.mxu2 %v9328_v9 }
  0x64   :  { %v9823_v0 = vld [vmem:[%s19731_s1 + $0xde0] sm:$0xf]  ;;  %v12620_v5 = vld [vmem:[%s19731_s1 + $0xeec] sm:$0xf0]  ;;  %v9696_v15 = vor.u32 %v12556_v63, %v9695_v62  ;;  %v13839_v25 = vpack.c.b16 %v1077_v7, %v1077_v7  ;;  %v13852_v30 = vpack.c.b16 %v1078_v13, %v1078_v13 }
  0x65   :  { %v9951_v3 = vld [vmem:[%s19731_s1 + $0xee0] sm:$0xf]  ;;  %v12652_v11 = vld [vmem:[%s19731_s1 + $0xfec] sm:$0xf0]  ;;  %v9824_v17 = vor.u32 %v12588_v2, %v9823_v0  ;;  %6435 = vmatpush.bf16.msra.mxu3 %v9456_v14 }
  0x66   :  { %v10079_v10 = vld [vmem:[%s19731_s1 + $0xfe0] sm:$0xf]  ;;  %v9952_v18 = vor.u32 %v12620_v5, %v9951_v3  ;;  %v12552_v22 = vld [vmem:[%s19731_s1 + $0xccc] sm:$0xf0]  ;;  %6441 = vmatpush.bf16.msrb.mxu0 %v9696_v15  ;;  %6423 = vmatmul.bf16.vlgmr.msra.gmra.mxu2 %v13850_v29 }
  0x67   :  { %v9679_v19 = vld [vmem:[%s19731_s1 + $0xcc0] sm:$0xf]  ;;  %v10080_v24 = vor.u32 %v12652_v11, %v10079_v10  ;;  %v12584_v26 = vld [vmem:[%s19731_s1 + $0xdcc] sm:$0xf0]  ;;  %6454 = vmatpush.bf16.msrb.mxu1 %v9824_v17  ;;  %6397 = vmatmul.bf16.vlgmr.msra.gmra.mxu0 %v13839_v25 }
  0x68   :  { %v9807_v23 = vld [vmem:[%s19731_s1 + $0xdc0] sm:$0xf]  ;;  %v12616_v28 = vld [vmem:[%s19731_s1 + $0xecc] sm:$0xf0]  ;;  %v9680_v34 = vor.u32 %v12552_v22, %v9679_v19  ;;  %6467 = vmatpush.bf16.msrb.mxu2 %v9952_v18  ;;  %6410 = vmatmul.bf16.vlgmr.msra.gmra.mxu1 %v13852_v30 }
  0x69   :  { %v9935_v27 = vld [vmem:[%s19731_s1 + $0xec0] sm:$0xf]  ;;  %v12648_v32 = vld [vmem:[%s19731_s1 + $0xfcc] sm:$0xf0]  ;;  %v9808_v35 = vor.u32 %v12584_v26, %v9807_v23  ;;  %6480 = vmatpush.bf16.msrb.mxu3 %v10080_v24 }
  0x6a   :  { %v10063_v31 = vld [vmem:[%s19731_s1 + $0xfc0] sm:$0xf]  ;;  %v9936_v36 = vor.u32 %v12616_v28, %v9935_v27  ;;  %v12548_v39 = vld [vmem:[%s19731_s1 + $0xcac] sm:$0xf0]  ;;  %6436 = vmatmul.bf16.vlgmr.msra.gmra.mxu3 %v13860_v33  ;;  %6442 = vmatpush.bf16.msrb.mxu0 %v9680_v34 }
  0x6b   :  { %v9663_v37 = vld [vmem:[%s19731_s1 + $0xca0] sm:$0xf]  ;;  %v10064_v43 = vor.u32 %v12648_v32, %v10063_v31  ;;  %v12580_v45 = vld [vmem:[%s19731_s1 + $0xdac] sm:$0xf0]  ;;  %6455 = vmatpush.bf16.msrb.mxu1 %v9808_v35 }
  0x6c   :  { %v9791_v40 = vld [vmem:[%s19731_s1 + $0xda0] sm:$0xf]  ;;  %v12612_v47 = vld [vmem:[%s19731_s1 + $0xeac] sm:$0xf0]  ;;  %v9664_v50 = vor.u32 %v12548_v39, %v9663_v37  ;;  %6468 = vmatpush.bf16.msrb.mxu2 %v9936_v36 }
  0x6d   :  { %v9919_v46 = vld [vmem:[%s19731_s1 + $0xea0] sm:$0xf]  ;;  %v12644_v49 = vld [vmem:[%s19731_s1 + $0xfac] sm:$0xf0]  ;;  %v9792_v51 = vor.u32 %v12580_v45, %v9791_v40  ;;  %6481 = vmatpush.bf16.msrb.mxu3 %v10064_v43 }
  0x6e   :  { %v10047_v48 = vld [vmem:[%s19731_s1 + $0xfa0] sm:$0xf]  ;;  %v9920_v52 = vor.u32 %v12612_v47, %v9919_v46  ;;  %v12544_v54 = vld [vmem:[%s19731_s1 + $0xc8c] sm:$0xf0]  ;;  %6443 = vmatpush.bf16.msrb.mxu0 %v9664_v50 }
  0x6f   :  { %v9647_v53 = vld [vmem:[%s19731_s1 + $0xc80] sm:$0xf]  ;;  %v10048_v56 = vor.u32 %v12644_v49, %v10047_v48  ;;  %v12576_v57 = vld [vmem:[%s19731_s1 + $0xd8c] sm:$0xf0]  ;;  %6456 = vmatpush.bf16.msrb.mxu1 %v9792_v51 }
  0x70   :  { %v9775_v55 = vld [vmem:[%s19731_s1 + $0xd80] sm:$0xf]  ;;  %v12608_v59 = vld [vmem:[%s19731_s1 + $0xe8c] sm:$0xf0]  ;;  %v9648_v62 = vor.u32 %v12544_v54, %v9647_v53  ;;  %6469 = vmatpush.bf16.msrb.mxu2 %v9920_v52 }
  0x71   :  { %v9903_v58 = vld [vmem:[%s19731_s1 + $0xe80] sm:$0xf]  ;;  %v12640_v61 = vld [vmem:[%s19731_s1 + $0xf8c] sm:$0xf0]  ;;  %v9776_v63 = vor.u32 %v12576_v57, %v9775_v55  ;;  %6482 = vmatpush.bf16.msrb.mxu3 %v10048_v56 }
  0x72   :  { %v10031_v60 = vld [vmem:[%s19731_s1 + $0xf80] sm:$0xf]  ;;  %v9904_v0 = vor.u32 %v12608_v59, %v9903_v58  ;;  %v12540_v2 = vld [vmem:[%s19731_s1 + $0xc6c] sm:$0xf0]  ;;  %6444 = vmatpush.bf16.msrb.mxu0 %v9648_v62  ;;  %v20_v59 = vld [vmem:[%s19732_s0 + $0x38] sm:$0xff] }
  0x73   :  { %v9631_v1 = vld [vmem:[%s19731_s1 + $0xc60] sm:$0xf]  ;;  %v10032_v5 = vor.u32 %v12640_v61, %v10031_v60  ;;  %v12572_v7 = vld [vmem:[%s19731_s1 + $0xd6c] sm:$0xf0]  ;;  %6457 = vmatpush.bf16.msrb.mxu1 %v9776_v63 }
  0x74   :  { %v9759_v3 = vld [vmem:[%s19731_s1 + $0xd60] sm:$0xf]  ;;  %v12604_v9 = vld [vmem:[%s19731_s1 + $0xe6c] sm:$0xf0]  ;;  %v9632_v12 = vor.u32 %v12540_v2, %v9631_v1  ;;  %6470 = vmatpush.bf16.msrb.mxu2 %v9904_v0 }
  0x75   :  { %v9887_v8 = vld [vmem:[%s19731_s1 + $0xe60] sm:$0xf]  ;;  %v12636_v11 = vld [vmem:[%s19731_s1 + $0xf6c] sm:$0xf0]  ;;  %v9760_v13 = vor.u32 %v12572_v7, %v9759_v3  ;;  %6483 = vmatpush.bf16.msrb.mxu3 %v10032_v5 }
  0x76   :  { %v10015_v10 = vld [vmem:[%s19731_s1 + $0xf60] sm:$0xf]  ;;  %v9888_v14 = vor.u32 %v12604_v9, %v9887_v8  ;;  %v12536_v16 = vld [vmem:[%s19731_s1 + $0xc4c] sm:$0xf0]  ;;  %6445 = vmatpush.bf16.msrb.mxu0 %v9632_v12 }
  0x77   :  { %v9615_v15 = vld [vmem:[%s19731_s1 + $0xc40] sm:$0xf]  ;;  %v10016_v18 = vor.u32 %v12636_v11, %v10015_v10  ;;  %v12568_v19 = vld [vmem:[%s19731_s1 + $0xd4c] sm:$0xf0]  ;;  %6458 = vmatpush.bf16.msrb.mxu1 %v9760_v13  ;;  %v1083_v10 = vunpack.c.l.b16 %v20_v59 }
  0x78   :  { %v9743_v17 = vld [vmem:[%s19731_s1 + $0xd40] sm:$0xf]  ;;  %v12600_v23 = vld [vmem:[%s19731_s1 + $0xe4c] sm:$0xf0]  ;;  %v9616_v27 = vor.u32 %v12536_v16, %v9615_v15  ;;  %6471 = vmatpush.bf16.msrb.mxu2 %v9888_v14  ;;  %v1084_v14 = vunpack.c.h.b16 %v20_v59 }
  0x79   :  { %v9871_v22 = vld [vmem:[%s19731_s1 + $0xe40] sm:$0xf]  ;;  %v12632_v26 = vld [vmem:[%s19731_s1 + $0xf4c] sm:$0xf0]  ;;  %v9744_v28 = vor.u32 %v12568_v19, %v9743_v17  ;;  %6484 = vmatpush.bf16.msrb.mxu3 %v10016_v18 }
  0x7a   :  { %v9999_v24 = vld [vmem:[%s19731_s1 + $0xf40] sm:$0xf]  ;;  %v9872_v31 = vor.u32 %v12600_v23, %v9871_v22  ;;  %v12532_v34 = vld [vmem:[%s19731_s1 + $0xc2c] sm:$0xf0]  ;;  %6446 = vmatpush.bf16.msrb.mxu0 %v9616_v27 }
  0x7b   :  { %v9599_v32 = vld [vmem:[%s19731_s1 + $0xc20] sm:$0xf]  ;;  %v10000_v36 = vor.u32 %v12632_v26, %v9999_v24  ;;  %v12564_v37 = vld [vmem:[%s19731_s1 + $0xd2c] sm:$0xf0]  ;;  %6459 = vmatpush.bf16.msrb.mxu1 %v9744_v28  ;;  %v14060_v28 = vpack.c.b16 %v1083_v10, %v1083_v10 }
  0x7c   :  { %v9727_v35 = vld [vmem:[%s19731_s1 + $0xd20] sm:$0xf]  ;;  %v12596_v40 = vld [vmem:[%s19731_s1 + $0xe2c] sm:$0xf0]  ;;  %v9600_v47 = vor.u32 %v12532_v34, %v9599_v32  ;;  %6472 = vmatpush.bf16.msrb.mxu2 %v9872_v31 }
  0x7d   :  { %v9855_v39 = vld [vmem:[%s19731_s1 + $0xe20] sm:$0xf]  ;;  %v12628_v45 = vld [vmem:[%s19731_s1 + $0xf2c] sm:$0xf0]  ;;  %v9728_v51 = vor.u32 %v12564_v37, %v9727_v35  ;;  %6485 = vmatpush.bf16.msrb.mxu3 %v10000_v36  ;;  %v14070_v35 = vpack.c.b16 %v1084_v14, %v1084_v14 }
  0x7e   :  { %v9983_v43 = vld [vmem:[%s19731_s1 + $0xf20] sm:$0xf]  ;;  %v12528_v48 = vld [vmem:[%s19731_s1 + $0xc0c] sm:$0xf0]  ;;  %v9856_v52 = vor.u32 %v12596_v40, %v9855_v39  ;;  %6447 = vmatpush.bf16.msrb.mxu0 %v9600_v47 }
  0x7f   :  { %v9583_v46 = vld [vmem:[%s19731_s1 + $0xc00] sm:$0xf]  ;;  %v12560_v50 = vld [vmem:[%s19731_s1 + $0xd0c] sm:$0xf0]  ;;  %v9984_v56 = vor.u32 %v12628_v45, %v9983_v43  ;;  %6460 = vmatpush.bf16.msrb.mxu1 %v9728_v51 }
  0x80   :  { %v9711_v49 = vld [vmem:[%s19731_s1 + $0xd00] sm:$0xf]  ;;  %v12592_v54 = vld [vmem:[%s19731_s1 + $0xe0c] sm:$0xf0]  ;;  %v9584_v63 = vor.u32 %v12528_v48, %v9583_v46  ;;  %6473 = vmatpush.bf16.msrb.mxu2 %v9856_v52 }
  0x81   :  { %v9839_v53 = vld [vmem:[%s19731_s1 + $0xe00] sm:$0xf]  ;;  %v19_v55 = vld [vmem:[%s19732_s0 + $0x30] sm:$0xff]  ;;  %v9712_v5 = vor.u32 %v12560_v50, %v9711_v49  ;;  %6486 = vmatpush.bf16.msrb.mxu3 %v9984_v56 }
  0x82   :  { %v9967_v57 = vld [vmem:[%s19731_s1 + $0xf00] sm:$0xf]  ;;  %v12624_v58 = vld [vmem:[%s19731_s1 + $0xf0c] sm:$0xf0]  ;;  %v1081_v3 = vunpack.c.l.b16 %v19_v55  ;;  %v9840_v7 = vor.u32 %v12592_v54, %v9839_v53  ;;  %v1082_v11 = vunpack.c.h.b16 %v19_v55  ;;  %6448 = vmatpush.bf16.msrb.mxu0 %v9584_v63 }
  0x83   :  { %v10207_v60 = vld [vmem:[%s19731_s1 + $0x10e0] sm:$0xf]  ;;  %v12684_v61 = vld [vmem:[%s19731_s1 + $0x10ec] sm:$0xf0]  ;;  %v9968_v12 = vor.u32 %v12624_v58, %v9967_v57  ;;  %6461 = vmatpush.bf16.msrb.mxu1 %v9712_v5 }
  0x84   :  { %v10335_v62 = vld [vmem:[%s19731_s1 + $0x11e0] sm:$0xf]  ;;  %v12716_v0 = vld [vmem:[%s19731_s1 + $0x11ec] sm:$0xf0]  ;;  %v10208_v13 = vor.u32 %v12684_v61, %v10207_v60  ;;  %v14049_v23 = vpack.c.b16 %v1081_v3, %v1081_v3  ;;  %6474 = vmatpush.bf16.msrb.mxu2 %v9840_v7  ;;  %v14062_v31 = vpack.c.b16 %v1082_v11, %v1082_v11 }
  0x85   :  { %v10463_v1 = vld [vmem:[%s19731_s1 + $0x12e0] sm:$0xf]  ;;  %v12748_v2 = vld [vmem:[%s19731_s1 + $0x12ec] sm:$0xf0]  ;;  %v10336_v15 = vor.u32 %v12716_v0, %v10335_v62  ;;  %6487 = vmatpush.bf16.msrb.mxu3 %v9968_v12 }
  0x86   :  { %v10591_v8 = vld [vmem:[%s19731_s1 + $0x13e0] sm:$0xf]  ;;  %v12780_v9 = vld [vmem:[%s19731_s1 + $0x13ec] sm:$0xf0]  ;;  %v10464_v16 = vor.u32 %v12748_v2, %v10463_v1  ;;  %6493 = vmatpush.bf16.msra.mxu0 %v10208_v13  ;;  %6462 = vmatmul.bf16.vlgmr.msrb.gmra.mxu1 %v14062_v31 }
  0x87   :  { %v10191_v17 = vld [vmem:[%s19731_s1 + $0x10c0] sm:$0xf]  ;;  %v12680_v18 = vld [vmem:[%s19731_s1 + $0x10cc] sm:$0xf0]  ;;  %v10592_v22 = vor.u32 %v12780_v9, %v10591_v8  ;;  %6506 = vmatpush.bf16.msra.mxu1 %v10336_v15  ;;  %6449 = vmatmul.bf16.vlgmr.msrb.gmra.mxu0 %v14049_v23 }
  0x88   :  { %v10319_v19 = vld [vmem:[%s19731_s1 + $0x11c0] sm:$0xf]  ;;  %v12712_v24 = vld [vmem:[%s19731_s1 + $0x11cc] sm:$0xf0]  ;;  %v10192_v36 = vor.u32 %v12680_v18, %v10191_v17  ;;  %6519 = vmatpush.bf16.msra.mxu2 %v10464_v16  ;;  %6488 = vmatmul.bf16.vlgmr.msrb.gmra.mxu3 %v14070_v35 }
  0x89   :  { %v10447_v26 = vld [vmem:[%s19731_s1 + $0x12c0] sm:$0xf]  ;;  %v12744_v27 = vld [vmem:[%s19731_s1 + $0x12cc] sm:$0xf0]  ;;  %v10320_v37 = vor.u32 %v12712_v24, %v10319_v19  ;;  %6532 = vmatpush.bf16.msra.mxu3 %v10592_v22  ;;  %6475 = vmatmul.bf16.vlgmr.msrb.gmra.mxu2 %v14060_v28 }
  0x8a   :  { %v10575_v32 = vld [vmem:[%s19731_s1 + $0x13c0] sm:$0xf]  ;;  %v12776_v34 = vld [vmem:[%s19731_s1 + $0x13cc] sm:$0xf0]  ;;  %v10448_v39 = vor.u32 %v12744_v27, %v10447_v26  ;;  %6494 = vmatpush.bf16.msra.mxu0 %v10192_v36 }
  0x8b   :  { %v10175_v40 = vld [vmem:[%s19731_s1 + $0x10a0] sm:$0xf]  ;;  %v12676_v43 = vld [vmem:[%s19731_s1 + $0x10ac] sm:$0xf0]  ;;  %v10576_v46 = vor.u32 %v12776_v34, %v10575_v32  ;;  %6507 = vmatpush.bf16.msra.mxu1 %v10320_v37 }
  0x8c   :  { %v10303_v45 = vld [vmem:[%s19731_s1 + $0x11a0] sm:$0xf]  ;;  %v12708_v47 = vld [vmem:[%s19731_s1 + $0x11ac] sm:$0xf0]  ;;  %v10176_v52 = vor.u32 %v12676_v43, %v10175_v40  ;;  %6520 = vmatpush.bf16.msra.mxu2 %v10448_v39 }
  0x8d   :  { %v10431_v48 = vld [vmem:[%s19731_s1 + $0x12a0] sm:$0xf]  ;;  %v12740_v49 = vld [vmem:[%s19731_s1 + $0x12ac] sm:$0xf0]  ;;  %v10304_v53 = vor.u32 %v12708_v47, %v10303_v45  ;;  %6533 = vmatpush.bf16.msra.mxu3 %v10576_v46 }
  0x8e   :  { %v10559_v50 = vld [vmem:[%s19731_s1 + $0x13a0] sm:$0xf]  ;;  %v12772_v51 = vld [vmem:[%s19731_s1 + $0x13ac] sm:$0xf0]  ;;  %v10432_v54 = vor.u32 %v12740_v49, %v10431_v48  ;;  %6495 = vmatpush.bf16.msra.mxu0 %v10176_v52 }
  0x8f   :  { %v10159_v55 = vld [vmem:[%s19731_s1 + $0x1080] sm:$0xf]  ;;  %v12672_v56 = vld [vmem:[%s19731_s1 + $0x108c] sm:$0xf0]  ;;  %v10560_v58 = vor.u32 %v12772_v51, %v10559_v50  ;;  %6508 = vmatpush.bf16.msra.mxu1 %v10304_v53 }
  0x90   :  { %v10287_v57 = vld [vmem:[%s19731_s1 + $0x1180] sm:$0xf]  ;;  %v12704_v59 = vld [vmem:[%s19731_s1 + $0x118c] sm:$0xf0]  ;;  %v10160_v0 = vor.u32 %v12672_v56, %v10159_v55  ;;  %6521 = vmatpush.bf16.msra.mxu2 %v10432_v54 }
  0x91   :  { %v10415_v60 = vld [vmem:[%s19731_s1 + $0x1280] sm:$0xf]  ;;  %v12736_v61 = vld [vmem:[%s19731_s1 + $0x128c] sm:$0xf0]  ;;  %v10288_v1 = vor.u32 %v12704_v59, %v10287_v57  ;;  %6534 = vmatpush.bf16.msra.mxu3 %v10560_v58 }
  0x92   :  { %v10543_v62 = vld [vmem:[%s19731_s1 + $0x1380] sm:$0xf]  ;;  %v12768_v63 = vld [vmem:[%s19731_s1 + $0x138c] sm:$0xf0]  ;;  %v10416_v2 = vor.u32 %v12736_v61, %v10415_v60  ;;  %6496 = vmatpush.bf16.msra.mxu0 %v10160_v0 }
  0x93   :  { %v10143_v3 = vld [vmem:[%s19731_s1 + $0x1060] sm:$0xf]  ;;  %v12668_v5 = vld [vmem:[%s19731_s1 + $0x106c] sm:$0xf0]  ;;  %v10544_v8 = vor.u32 %v12768_v63, %v10543_v62  ;;  %6509 = vmatpush.bf16.msra.mxu1 %v10288_v1  ;;  %v22_v1 = vld [vmem:[%s19732_s0 + $0x48] sm:$0xff] }
  0x94   :  { %v10271_v7 = vld [vmem:[%s19731_s1 + $0x1160] sm:$0xf]  ;;  %v12700_v9 = vld [vmem:[%s19731_s1 + $0x116c] sm:$0xf0]  ;;  %v10144_v14 = vor.u32 %v12668_v5, %v10143_v3  ;;  %6522 = vmatpush.bf16.msra.mxu2 %v10416_v2 }
  0x95   :  { %v10399_v10 = vld [vmem:[%s19731_s1 + $0x1260] sm:$0xf]  ;;  %v12732_v11 = vld [vmem:[%s19731_s1 + $0x126c] sm:$0xf0]  ;;  %v10272_v15 = vor.u32 %v12700_v9, %v10271_v7  ;;  %6535 = vmatpush.bf16.msra.mxu3 %v10544_v8 }
  0x96   :  { %v10527_v12 = vld [vmem:[%s19731_s1 + $0x1360] sm:$0xf]  ;;  %v12764_v13 = vld [vmem:[%s19731_s1 + $0x136c] sm:$0xf0]  ;;  %v10400_v16 = vor.u32 %v12732_v11, %v10399_v10  ;;  %6497 = vmatpush.bf16.msra.mxu0 %v10144_v14 }
  0x97   :  { %v10127_v17 = vld [vmem:[%s19731_s1 + $0x1040] sm:$0xf]  ;;  %v12664_v18 = vld [vmem:[%s19731_s1 + $0x104c] sm:$0xf0]  ;;  %v10528_v22 = vor.u32 %v12764_v13, %v10527_v12  ;;  %6510 = vmatpush.bf16.msra.mxu1 %v10272_v15 }
  0x98   :  { %v10255_v19 = vld [vmem:[%s19731_s1 + $0x1140] sm:$0xf]  ;;  %v12696_v24 = vld [vmem:[%s19731_s1 + $0x114c] sm:$0xf0]  ;;  %v10128_v36 = vor.u32 %v12664_v18, %v10127_v17  ;;  %6523 = vmatpush.bf16.msra.mxu2 %v10400_v16  ;;  %v1087_v16 = vunpack.c.l.b16 %v22_v1 }
  0x99   :  { %v10383_v26 = vld [vmem:[%s19731_s1 + $0x1240] sm:$0xf]  ;;  %v12728_v27 = vld [vmem:[%s19731_s1 + $0x124c] sm:$0xf0]  ;;  %v10256_v37 = vor.u32 %v12696_v24, %v10255_v19  ;;  %6536 = vmatpush.bf16.msra.mxu3 %v10528_v22  ;;  %v1088_v22 = vunpack.c.h.b16 %v22_v1 }
  0x9a   :  { %v10511_v32 = vld [vmem:[%s19731_s1 + $0x1340] sm:$0xf]  ;;  %v12760_v34 = vld [vmem:[%s19731_s1 + $0x134c] sm:$0xf0]  ;;  %v10384_v39 = vor.u32 %v12728_v27, %v10383_v26  ;;  %6498 = vmatpush.bf16.msra.mxu0 %v10128_v36 }
  0x9b   :  { %v10111_v40 = vld [vmem:[%s19731_s1 + $0x1020] sm:$0xf]  ;;  %v12660_v43 = vld [vmem:[%s19731_s1 + $0x102c] sm:$0xf0]  ;;  %v10512_v46 = vor.u32 %v12760_v34, %v10511_v32  ;;  %6511 = vmatpush.bf16.msra.mxu1 %v10256_v37 }
  0x9c   :  { %v10239_v45 = vld [vmem:[%s19731_s1 + $0x1120] sm:$0xf]  ;;  %v12692_v47 = vld [vmem:[%s19731_s1 + $0x112c] sm:$0xf0]  ;;  %v10112_v53 = vor.u32 %v12660_v43, %v10111_v40  ;;  %6524 = vmatpush.bf16.msra.mxu2 %v10384_v39 }
  0x9d   :  { %v10367_v48 = vld [vmem:[%s19731_s1 + $0x1220] sm:$0xf]  ;;  %v12724_v49 = vld [vmem:[%s19731_s1 + $0x122c] sm:$0xf0]  ;;  %v10240_v57 = vor.u32 %v12692_v47, %v10239_v45  ;;  %6537 = vmatpush.bf16.msra.mxu3 %v10512_v46  ;;  %v14270_v45 = vpack.c.b16 %v1087_v16, %v1087_v16 }
  0x9e   :  { %v10495_v50 = vld [vmem:[%s19731_s1 + $0x1320] sm:$0xf]  ;;  %v12756_v51 = vld [vmem:[%s19731_s1 + $0x132c] sm:$0xf0]  ;;  %v10368_v58 = vor.u32 %v12724_v49, %v10367_v48  ;;  %6499 = vmatpush.bf16.msra.mxu0 %v10112_v53  ;;  %v14280_v49 = vpack.c.b16 %v1088_v22, %v1088_v22 }
  0x9f   :  { %v10095_v52 = vld [vmem:[%s19731_s1 + $0x1000] sm:$0xf]  ;;  %v12656_v54 = vld [vmem:[%s19731_s1 + $0x100c] sm:$0xf0]  ;;  %v10496_v62 = vor.u32 %v12756_v51, %v10495_v50  ;;  %6512 = vmatpush.bf16.msra.mxu1 %v10240_v57 }
  0xa0   :  { %v10223_v55 = vld [vmem:[%s19731_s1 + $0x1100] sm:$0xf]  ;;  %v12688_v56 = vld [vmem:[%s19731_s1 + $0x110c] sm:$0xf0]  ;;  %v10096_v7 = vor.u32 %v12656_v54, %v10095_v52  ;;  %6525 = vmatpush.bf16.msra.mxu2 %v10368_v58 }
  0xa1   :  { %v10351_v59 = vld [vmem:[%s19731_s1 + $0x1200] sm:$0xf]  ;;  %v12720_v60 = vld [vmem:[%s19731_s1 + $0x120c] sm:$0xf0]  ;;  %v10224_v12 = vor.u32 %v12688_v56, %v10223_v55  ;;  %6538 = vmatpush.bf16.msra.mxu3 %v10496_v62 }
  0xa2   :  { %v21_v61 = vld [vmem:[%s19732_s0 + $0x40] sm:$0xff]  ;;  %v12752_v0 = vld [vmem:[%s19731_s1 + $0x130c] sm:$0xf0]  ;;  %v10352_v13 = vor.u32 %v12720_v60, %v10351_v59  ;;  %6500 = vmatpush.bf16.msra.mxu0 %v10096_v7 }
  0xa3   :  { %v10479_v63 = vld [vmem:[%s19731_s1 + $0x1300] sm:$0xf]  ;;  %v12812_v3 = vld [vmem:[%s19731_s1 + $0x14ec] sm:$0xf0]  ;;  %v1085_v11 = vunpack.c.l.b16 %v21_v61  ;;  %v1086_v17 = vunpack.c.h.b16 %v21_v61  ;;  %6513 = vmatpush.bf16.msra.mxu1 %v10224_v12 }
  0xa4   :  { %v10719_v2 = vld [vmem:[%s19731_s1 + $0x14e0] sm:$0xf]  ;;  %v12844_v8 = vld [vmem:[%s19731_s1 + $0x15ec] sm:$0xf0]  ;;  %v10480_v18 = vor.u32 %v12752_v0, %v10479_v63  ;;  %6526 = vmatpush.bf16.msra.mxu2 %v10352_v13 }
  0xa5   :  { %v10847_v5 = vld [vmem:[%s19731_s1 + $0x15e0] sm:$0xf]  ;;  %v12876_v10 = vld [vmem:[%s19731_s1 + $0x16ec] sm:$0xf0]  ;;  %v10720_v19 = vor.u32 %v12812_v3, %v10719_v2  ;;  %v14259_v37 = vpack.c.b16 %v1085_v11, %v1085_v11  ;;  %v14272_v46 = vpack.c.b16 %v1086_v17, %v1086_v17 }
  0xa6   :  { %v10975_v9 = vld [vmem:[%s19731_s1 + $0x16e0] sm:$0xf]  ;;  %v12908_v15 = vld [vmem:[%s19731_s1 + $0x17ec] sm:$0xf0]  ;;  %v10848_v24 = vor.u32 %v12844_v8, %v10847_v5  ;;  %6539 = vmatpush.bf16.msra.mxu3 %v10480_v18 }
  0xa7   :  { %v11103_v14 = vld [vmem:[%s19731_s1 + $0x17e0] sm:$0xf]  ;;  %v10976_v26 = vor.u32 %v12876_v10, %v10975_v9  ;;  %v12808_v32 = vld [vmem:[%s19731_s1 + $0x14cc] sm:$0xf0]  ;;  %6545 = vmatpush.bf16.msrb.mxu0 %v10720_v19  ;;  %6527 = vmatmul.bf16.vlgmr.msra.gmra.mxu2 %v14270_v45 }
  0xa8   :  { %v10703_v27 = vld [vmem:[%s19731_s1 + $0x14c0] sm:$0xf]  ;;  %v11104_v36 = vor.u32 %v12908_v15, %v11103_v14  ;;  %v12840_v39 = vld [vmem:[%s19731_s1 + $0x15cc] sm:$0xf0]  ;;  %6558 = vmatpush.bf16.msrb.mxu1 %v10848_v24  ;;  %6501 = vmatmul.bf16.vlgmr.msra.gmra.mxu0 %v14259_v37 }
  0xa9   :  { %v10831_v34 = vld [vmem:[%s19731_s1 + $0x15c0] sm:$0xf]  ;;  %v12872_v43 = vld [vmem:[%s19731_s1 + $0x16cc] sm:$0xf0]  ;;  %v10704_v50 = vor.u32 %v12808_v32, %v10703_v27  ;;  %6571 = vmatpush.bf16.msrb.mxu2 %v10976_v26  ;;  %6514 = vmatmul.bf16.vlgmr.msra.gmra.mxu1 %v14272_v46 }
  0xaa   :  { %v10959_v40 = vld [vmem:[%s19731_s1 + $0x16c0] sm:$0xf]  ;;  %v12904_v48 = vld [vmem:[%s19731_s1 + $0x17cc] sm:$0xf0]  ;;  %v10832_v51 = vor.u32 %v12840_v39, %v10831_v34  ;;  %6584 = vmatpush.bf16.msrb.mxu3 %v11104_v36 }
  0xab   :  { %v11087_v47 = vld [vmem:[%s19731_s1 + $0x17c0] sm:$0xf]  ;;  %v10960_v52 = vor.u32 %v12872_v43, %v10959_v40  ;;  %v12804_v54 = vld [vmem:[%s19731_s1 + $0x14ac] sm:$0xf0]  ;;  %6540 = vmatmul.bf16.vlgmr.msra.gmra.mxu3 %v14280_v49  ;;  %6546 = vmatpush.bf16.msrb.mxu0 %v10704_v50 }
  0xac   :  { %v10687_v53 = vld [vmem:[%s19731_s1 + $0x14a0] sm:$0xf]  ;;  %v11088_v56 = vor.u32 %v12904_v48, %v11087_v47  ;;  %v12836_v57 = vld [vmem:[%s19731_s1 + $0x15ac] sm:$0xf0]  ;;  %6559 = vmatpush.bf16.msrb.mxu1 %v10832_v51 }
  0xad   :  { %v10815_v55 = vld [vmem:[%s19731_s1 + $0x15a0] sm:$0xf]  ;;  %v12868_v59 = vld [vmem:[%s19731_s1 + $0x16ac] sm:$0xf0]  ;;  %v10688_v62 = vor.u32 %v12804_v54, %v10687_v53  ;;  %6572 = vmatpush.bf16.msrb.mxu2 %v10960_v52 }
  0xae   :  { %v10943_v58 = vld [vmem:[%s19731_s1 + $0x16a0] sm:$0xf]  ;;  %v12900_v61 = vld [vmem:[%s19731_s1 + $0x17ac] sm:$0xf0]  ;;  %v10816_v63 = vor.u32 %v12836_v57, %v10815_v55  ;;  %6585 = vmatpush.bf16.msrb.mxu3 %v11088_v56 }
  0xaf   :  { %v11071_v60 = vld [vmem:[%s19731_s1 + $0x17a0] sm:$0xf]  ;;  %v10944_v0 = vor.u32 %v12868_v59, %v10943_v58  ;;  %v12800_v2 = vld [vmem:[%s19731_s1 + $0x148c] sm:$0xf0]  ;;  %6547 = vmatpush.bf16.msrb.mxu0 %v10688_v62  ;;  %v6294_v54 = vpop.f32.mrf.mxu0  ;;  %v6307_v56 = vpop.f32.mrf.mxu1 }
  0xb0   :  { %v10671_v1 = vld [vmem:[%s19731_s1 + $0x1480] sm:$0xf]  ;;  %v11072_v5 = vor.u32 %v12900_v61, %v11071_v60  ;;  %v12832_v7 = vld [vmem:[%s19731_s1 + $0x158c] sm:$0xf0]  ;;  %6560 = vmatpush.bf16.msrb.mxu1 %v10816_v63  ;;  %v6308_v62 = vadd.f32 %v6307_v56, %v6294_v54  ;;  %v6320_v63 = vpop.f32.mrf.mxu2 }
  0xb1   :  { %v10799_v3 = vld [vmem:[%s19731_s1 + $0x1580] sm:$0xf]  ;;  %v12864_v9 = vld [vmem:[%s19731_s1 + $0x168c] sm:$0xf0]  ;;  %v10672_v12 = vor.u32 %v12800_v2, %v10671_v1  ;;  %6573 = vmatpush.bf16.msrb.mxu2 %v10944_v0 }
  0xb2   :  { %v10927_v8 = vld [vmem:[%s19731_s1 + $0x1680] sm:$0xf]  ;;  %v12896_v11 = vld [vmem:[%s19731_s1 + $0x178c] sm:$0xf0]  ;;  %v10800_v13 = vor.u32 %v12832_v7, %v10799_v3  ;;  %6586 = vmatpush.bf16.msrb.mxu3 %v11072_v5  ;;  %v6333_v5 = vpop.f32.mrf.mxu3 }
  0xb3   :  { %v11055_v10 = vld [vmem:[%s19731_s1 + $0x1780] sm:$0xf]  ;;  %v10928_v14 = vor.u32 %v12864_v9, %v10927_v8  ;;  %v12796_v16 = vld [vmem:[%s19731_s1 + $0x146c] sm:$0xf0]  ;;  %6548 = vmatpush.bf16.msrb.mxu0 %v10672_v12 }
  0xb4   :  { %v10655_v15 = vld [vmem:[%s19731_s1 + $0x1460] sm:$0xf]  ;;  %v11056_v18 = vor.u32 %v12896_v11, %v11055_v10  ;;  %v12828_v19 = vld [vmem:[%s19731_s1 + $0x156c] sm:$0xf0]  ;;  %6561 = vmatpush.bf16.msrb.mxu1 %v10800_v13  ;;  %v6321_v10 = vadd.f32 %v6320_v63, %v6308_v62 }
  0xb5   :  { %v10783_v17 = vld [vmem:[%s19731_s1 + $0x1560] sm:$0xf]  ;;  %v12860_v24 = vld [vmem:[%s19731_s1 + $0x166c] sm:$0xf0]  ;;  %v10656_v32 = vor.u32 %v12796_v16, %v10655_v15  ;;  %6574 = vmatpush.bf16.msrb.mxu2 %v10928_v14 }
  0xb6   :  { %v10911_v22 = vld [vmem:[%s19731_s1 + $0x1660] sm:$0xf]  ;;  %v12892_v27 = vld [vmem:[%s19731_s1 + $0x176c] sm:$0xf0]  ;;  %v10784_v34 = vor.u32 %v12828_v19, %v10783_v17  ;;  %6587 = vmatpush.bf16.msrb.mxu3 %v11056_v18 }
  0xb7   :  { %v11039_v26 = vld [vmem:[%s19731_s1 + $0x1760] sm:$0xf]  ;;  %v10912_v36 = vor.u32 %v12860_v24, %v10911_v22  ;;  %v12792_v40 = vld [vmem:[%s19731_s1 + $0x144c] sm:$0xf0]  ;;  %6549 = vmatpush.bf16.msrb.mxu0 %v10656_v32  ;;  %v14427_v22 = vadd.f32 %v6333_v5, %v6321_v10  ;;  %v24_v32 = vld [vmem:[%s19732_s0 + $0x58] sm:$0xff] }
  0xb8   :  { %v10639_v39 = vld [vmem:[%s19731_s1 + $0x1440] sm:$0xf]  ;;  %v11040_v47 = vor.u32 %v12892_v27, %v11039_v26  ;;  %v12824_v48 = vld [vmem:[%s19731_s1 + $0x154c] sm:$0xf0]  ;;  %6562 = vmatpush.bf16.msrb.mxu1 %v10784_v34  ;;  %v1092_v62 = vunpack.c.h.b16 %v24_v32 }
  0xb9   :  { %v10767_v43 = vld [vmem:[%s19731_s1 + $0x1540] sm:$0xf]  ;;  %v12856_v51 = vld [vmem:[%s19731_s1 + $0x164c] sm:$0xf0]  ;;  %v10640_v55 = vor.u32 %v12792_v40, %v10639_v39  ;;  %6575 = vmatpush.bf16.msrb.mxu2 %v10912_v36  ;;  %v6296_v40 = vpop.f32.mrf.mxu0 }
  0xba   :  { %v10895_v50 = vld [vmem:[%s19731_s1 + $0x1640] sm:$0xf]  ;;  %v12888_v53 = vld [vmem:[%s19731_s1 + $0x174c] sm:$0xf0]  ;;  %v10768_v57 = vor.u32 %v12824_v48, %v10767_v43  ;;  %6588 = vmatpush.bf16.msrb.mxu3 %v11040_v47  ;;  %v6335_v63 = vpop.f32.mrf.mxu3 }
  0xbb   :  { %v11023_v52 = vld [vmem:[%s19731_s1 + $0x1740] sm:$0xf]  ;;  %v10896_v58 = vor.u32 %v12856_v51, %v10895_v50  ;;  %v12788_v60 = vld [vmem:[%s19731_s1 + $0x142c] sm:$0xf0]  ;;  %6550 = vmatpush.bf16.msrb.mxu0 %v10640_v55 }
  0xbc   :  { %v10623_v59 = vld [vmem:[%s19731_s1 + $0x1420] sm:$0xf]  ;;  %v11024_v0 = vor.u32 %v12888_v53, %v11023_v52  ;;  %v12820_v1 = vld [vmem:[%s19731_s1 + $0x152c] sm:$0xf0]  ;;  %6563 = vmatpush.bf16.msrb.mxu1 %v10768_v57  ;;  %v6309_v52 = vpop.f32.mrf.mxu1  ;;  %v1091_v57 = vunpack.c.l.b16 %v24_v32 }
  0xbd   :  { %v10751_v61 = vld [vmem:[%s19731_s1 + $0x1520] sm:$0xf]  ;;  %v12852_v3 = vld [vmem:[%s19731_s1 + $0x162c] sm:$0xf0]  ;;  %v10624_v11 = vor.u32 %v12788_v60, %v10623_v59  ;;  %6576 = vmatpush.bf16.msrb.mxu2 %v10896_v58  ;;  %v6322_v59 = vpop.f32.mrf.mxu2 }
  0xbe   :  { %v10879_v2 = vld [vmem:[%s19731_s1 + $0x1620] sm:$0xf]  ;;  %v12884_v8 = vld [vmem:[%s19731_s1 + $0x172c] sm:$0xf0]  ;;  %v10752_v15 = vor.u32 %v12820_v1, %v10751_v61  ;;  %6589 = vmatpush.bf16.msrb.mxu3 %v11024_v0 }
  0xbf   :  { %v11007_v7 = vld [vmem:[%s19731_s1 + $0x1720] sm:$0xf]  ;;  %v12784_v12 = vld [vmem:[%s19731_s1 + $0x140c] sm:$0xf0]  ;;  %v10880_v16 = vor.u32 %v12852_v3, %v10879_v2  ;;  %6551 = vmatpush.bf16.msrb.mxu0 %v10624_v11 }
  0xc0   :  { %v10607_v9 = vld [vmem:[%s19731_s1 + $0x1400] sm:$0xf]  ;;  %v12816_v14 = vld [vmem:[%s19731_s1 + $0x150c] sm:$0xf0]  ;;  %v11008_v24 = vor.u32 %v12884_v8, %v11007_v7  ;;  %6564 = vmatpush.bf16.msrb.mxu1 %v10752_v15 }
  0xc1   :  { %v10735_v13 = vld [vmem:[%s19731_s1 + $0x1500] sm:$0xf]  ;;  %v12848_v18 = vld [vmem:[%s19731_s1 + $0x160c] sm:$0xf0]  ;;  %v10608_v43 = vor.u32 %v12784_v12, %v10607_v9  ;;  %6577 = vmatpush.bf16.msrb.mxu2 %v10880_v16  ;;  %v14482_v12 = vpack.c.b16 %v1091_v57, %v1091_v57  ;;  %v14492_v16 = vpack.c.b16 %v1092_v62, %v1092_v62 }
  0xc2   :  { %v10863_v17 = vld [vmem:[%s19731_s1 + $0x1600] sm:$0xf]  ;;  %v23_v19 = vld [vmem:[%s19732_s0 + $0x50] sm:$0xff]  ;;  %v10736_v53 = vor.u32 %v12816_v14, %v10735_v13  ;;  %6590 = vmatpush.bf16.msrb.mxu3 %v11008_v24 }
  0xc3   :  { %v10991_v26 = vld [vmem:[%s19731_s1 + $0x1700] sm:$0xf]  ;;  %v12880_v27 = vld [vmem:[%s19731_s1 + $0x170c] sm:$0xf0]  ;;  %v1089_v51 = vunpack.c.l.b16 %v23_v19  ;;  %v10864_v54 = vor.u32 %v12848_v18, %v10863_v17  ;;  %v1090_v58 = vunpack.c.h.b16 %v23_v19  ;;  %6552 = vmatpush.bf16.msrb.mxu0 %v10608_v43 }
  0xc4   :  { %v11231_v34 = vld [vmem:[%s19731_s1 + $0x18e0] sm:$0xf]  ;;  %v12940_v36 = vld [vmem:[%s19731_s1 + $0x18ec] sm:$0xf0]  ;;  %v10992_v60 = vor.u32 %v12880_v27, %v10991_v26  ;;  %6565 = vmatpush.bf16.msrb.mxu1 %v10736_v53 }
  0xc5   :  { %v11359_v39 = vld [vmem:[%s19731_s1 + $0x19e0] sm:$0xf]  ;;  %v12972_v47 = vld [vmem:[%s19731_s1 + $0x19ec] sm:$0xf0]  ;;  %v11232_v61 = vor.u32 %v12940_v36, %v11231_v34  ;;  %v14471_v8 = vpack.c.b16 %v1089_v51, %v1089_v51  ;;  %6578 = vmatpush.bf16.msrb.mxu2 %v10864_v54  ;;  %v14484_v13 = vpack.c.b16 %v1090_v58, %v1090_v58 }
  0xc6   :  { %v11487_v48 = vld [vmem:[%s19731_s1 + $0x1ae0] sm:$0xf]  ;;  %v13004_v50 = vld [vmem:[%s19731_s1 + $0x1aec] sm:$0xf0]  ;;  %v11360_v0 = vor.u32 %v12972_v47, %v11359_v39  ;;  %6591 = vmatpush.bf16.msrb.mxu3 %v10992_v60 }
  0xc7   :  { %v11615_v55 = vld [vmem:[%s19731_s1 + $0x1be0] sm:$0xf]  ;;  %v13036_v56 = vld [vmem:[%s19731_s1 + $0x1bec] sm:$0xf0]  ;;  %v11488_v1 = vor.u32 %v13004_v50, %v11487_v48  ;;  %6597 = vmatpush.bf16.msra.mxu0 %v11232_v61  ;;  %6566 = vmatmul.bf16.vlgmr.msrb.gmra.mxu1 %v14484_v13  ;;  %v6346_v61 = vpop.f32.mrf.mxu0 }
  0xc8   :  { %v11215_v2 = vld [vmem:[%s19731_s1 + $0x18c0] sm:$0xf]  ;;  %v12936_v3 = vld [vmem:[%s19731_s1 + $0x18cc] sm:$0xf0]  ;;  %v11616_v7 = vor.u32 %v13036_v56, %v11615_v55  ;;  %6610 = vmatpush.bf16.msra.mxu1 %v11360_v0  ;;  %6553 = vmatmul.bf16.vlgmr.msrb.gmra.mxu0 %v14471_v8 }
  0xc9   :  { %v11343_v5 = vld [vmem:[%s19731_s1 + $0x19c0] sm:$0xf]  ;;  %v12968_v9 = vld [vmem:[%s19731_s1 + $0x19cc] sm:$0xf0]  ;;  %v11216_v17 = vor.u32 %v12936_v3, %v11215_v2  ;;  %6623 = vmatpush.bf16.msra.mxu2 %v11488_v1  ;;  %6592 = vmatmul.bf16.vlgmr.msrb.gmra.mxu3 %v14492_v16  ;;  %v6347_v3 = vadd.f32 %v6346_v61, %v14427_v22 }
  0xca   :  { %v11471_v10 = vld [vmem:[%s19731_s1 + $0x1ac0] sm:$0xf]  ;;  %v13000_v11 = vld [vmem:[%s19731_s1 + $0x1acc] sm:$0xf0]  ;;  %v11344_v18 = vor.u32 %v12968_v9, %v11343_v5  ;;  %6636 = vmatpush.bf16.msra.mxu3 %v11616_v7  ;;  %6579 = vmatmul.bf16.vlgmr.msrb.gmra.mxu2 %v14482_v12  ;;  %v6359_v5 = vpop.f32.mrf.mxu1 }
  0xcb   :  { %v11599_v14 = vld [vmem:[%s19731_s1 + $0x1bc0] sm:$0xf]  ;;  %v13032_v15 = vld [vmem:[%s19731_s1 + $0x1bcc] sm:$0xf0]  ;;  %v11472_v19 = vor.u32 %v13000_v11, %v11471_v10  ;;  %6598 = vmatpush.bf16.msra.mxu0 %v11216_v17 }
  0xcc   :  { %v11199_v24 = vld [vmem:[%s19731_s1 + $0x18a0] sm:$0xf]  ;;  %v12932_v26 = vld [vmem:[%s19731_s1 + $0x18ac] sm:$0xf0]  ;;  %v11600_v32 = vor.u32 %v13032_v15, %v11599_v14  ;;  %6611 = vmatpush.bf16.msra.mxu1 %v11344_v18  ;;  %v6360_v15 = vadd.f32 %v6359_v5, %v6347_v3 }
  0xcd   :  { %v11327_v27 = vld [vmem:[%s19731_s1 + $0x19a0] sm:$0xf]  ;;  %v12964_v34 = vld [vmem:[%s19731_s1 + $0x19ac] sm:$0xf0]  ;;  %v11200_v47 = vor.u32 %v12932_v26, %v11199_v24  ;;  %6624 = vmatpush.bf16.msra.mxu2 %v11472_v19 }
  0xce   :  { %v11455_v36 = vld [vmem:[%s19731_s1 + $0x1aa0] sm:$0xf]  ;;  %v12996_v39 = vld [vmem:[%s19731_s1 + $0x1aac] sm:$0xf0]  ;;  %v11328_v48 = vor.u32 %v12964_v34, %v11327_v27  ;;  %6637 = vmatpush.bf16.msra.mxu3 %v11600_v32  ;;  %v6372_v32 = vpop.f32.mrf.mxu2 }
  0xcf   :  { %v11583_v40 = vld [vmem:[%s19731_s1 + $0x1ba0] sm:$0xf]  ;;  %v13028_v43 = vld [vmem:[%s19731_s1 + $0x1bac] sm:$0xf0]  ;;  %v11456_v50 = vor.u32 %v12996_v39, %v11455_v36  ;;  %6599 = vmatpush.bf16.msra.mxu0 %v11200_v47  ;;  %v6385_v47 = vpop.f32.mrf.mxu3 }
  0xd0   :  { %v11183_v51 = vld [vmem:[%s19731_s1 + $0x1880] sm:$0xf]  ;;  %v12928_v52 = vld [vmem:[%s19731_s1 + $0x188c] sm:$0xf0]  ;;  %v11584_v54 = vor.u32 %v13028_v43, %v11583_v40  ;;  %6612 = vmatpush.bf16.msra.mxu1 %v11328_v48  ;;  %v6373_v43 = vadd.f32 %v6372_v32, %v6360_v15 }
  0xd1   :  { %v11311_v53 = vld [vmem:[%s19731_s1 + $0x1980] sm:$0xf]  ;;  %v12960_v55 = vld [vmem:[%s19731_s1 + $0x198c] sm:$0xf0]  ;;  %v11184_v60 = vor.u32 %v12928_v52, %v11183_v51  ;;  %6625 = vmatpush.bf16.msra.mxu2 %v11456_v50 }
  0xd2   :  { %v11439_v56 = vld [vmem:[%s19731_s1 + $0x1a80] sm:$0xf]  ;;  %v12992_v57 = vld [vmem:[%s19731_s1 + $0x1a8c] sm:$0xf0]  ;;  %v11312_v62 = vor.u32 %v12960_v55, %v11311_v53  ;;  %6638 = vmatpush.bf16.msra.mxu3 %v11584_v54  ;;  %v14595_v52 = vadd.f32 %v6385_v47, %v6373_v43  ;;  %v6348_v53 = vpop.f32.mrf.mxu0 }
  0xd3   :  { %v11567_v58 = vld [vmem:[%s19731_s1 + $0x1b80] sm:$0xf]  ;;  %v13024_v59 = vld [vmem:[%s19731_s1 + $0x1b8c] sm:$0xf0]  ;;  %v11440_v63 = vor.u32 %v12992_v57, %v11439_v56  ;;  %6600 = vmatpush.bf16.msra.mxu0 %v11184_v60 }
  0xd4   :  { %v11167_v0 = vld [vmem:[%s19731_s1 + $0x1860] sm:$0xf]  ;;  %v12924_v1 = vld [vmem:[%s19731_s1 + $0x186c] sm:$0xf0]  ;;  %v11568_v7 = vor.u32 %v13024_v59, %v11567_v58  ;;  %6613 = vmatpush.bf16.msra.mxu1 %v11312_v62  ;;  %v6361_v59 = vpop.f32.mrf.mxu1 }
  0xd5   :  { %v11295_v2 = vld [vmem:[%s19731_s1 + $0x1960] sm:$0xf]  ;;  %v12956_v9 = vld [vmem:[%s19731_s1 + $0x196c] sm:$0xf0]  ;;  %v11168_v17 = vor.u32 %v12924_v1, %v11167_v0  ;;  %6626 = vmatpush.bf16.msra.mxu2 %v11440_v63 }
  0xd6   :  { %v11423_v10 = vld [vmem:[%s19731_s1 + $0x1a60] sm:$0xf]  ;;  %v12988_v11 = vld [vmem:[%s19731_s1 + $0x1a6c] sm:$0xf0]  ;;  %v11296_v18 = vor.u32 %v12956_v9, %v11295_v2  ;;  %6639 = vmatpush.bf16.msra.mxu3 %v11568_v7 }
  0xd7   :  { %v11551_v14 = vld [vmem:[%s19731_s1 + $0x1b60] sm:$0xf]  ;;  %v13020_v22 = vld [vmem:[%s19731_s1 + $0x1b6c] sm:$0xf0]  ;;  %v11424_v19 = vor.u32 %v12988_v11, %v11423_v10  ;;  %6601 = vmatpush.bf16.msra.mxu0 %v11168_v17  ;;  %v6374_v17 = vpop.f32.mrf.mxu2 }
  0xd8   :  { %v11151_v24 = vld [vmem:[%s19731_s1 + $0x1840] sm:$0xf]  ;;  %v12920_v26 = vld [vmem:[%s19731_s1 + $0x184c] sm:$0xf0]  ;;  %v11552_v34 = vor.u32 %v13020_v22, %v11551_v14  ;;  %6614 = vmatpush.bf16.msra.mxu1 %v11296_v18 }
  0xd9   :  { %v11279_v27 = vld [vmem:[%s19731_s1 + $0x1940] sm:$0xf]  ;;  %v12952_v36 = vld [vmem:[%s19731_s1 + $0x194c] sm:$0xf0]  ;;  %v11152_v51 = vor.u32 %v12920_v26, %v11151_v24  ;;  %6627 = vmatpush.bf16.msra.mxu2 %v11424_v19  ;;  %v26_v26 = vld [vmem:[%s19732_s0 + $0x68] sm:$0xff] }
  0xda   :  { %v11407_v39 = vld [vmem:[%s19731_s1 + $0x1a40] sm:$0xf]  ;;  %v12984_v40 = vld [vmem:[%s19731_s1 + $0x1a4c] sm:$0xf0]  ;;  %v11280_v54 = vor.u32 %v12952_v36, %v11279_v27  ;;  %6640 = vmatpush.bf16.msra.mxu3 %v11552_v34  ;;  %v6387_v27 = vpop.f32.mrf.mxu3  ;;  %v1096_v59 = vunpack.c.h.b16 %v26_v26 }
  0xdb   :  { %v11535_v48 = vld [vmem:[%s19731_s1 + $0x1b40] sm:$0xf]  ;;  %v13016_v50 = vld [vmem:[%s19731_s1 + $0x1b4c] sm:$0xf0]  ;;  %v11408_v55 = vor.u32 %v12984_v40, %v11407_v39  ;;  %6602 = vmatpush.bf16.msra.mxu0 %v11152_v51 }
  0xdc   :  { %v11135_v56 = vld [vmem:[%s19731_s1 + $0x1820] sm:$0xf]  ;;  %v12916_v57 = vld [vmem:[%s19731_s1 + $0x182c] sm:$0xf0]  ;;  %v11536_v60 = vor.u32 %v13016_v50, %v11535_v48  ;;  %6615 = vmatpush.bf16.msra.mxu1 %v11280_v54 }
  0xdd   :  { %v11263_v58 = vld [vmem:[%s19731_s1 + $0x1920] sm:$0xf]  ;;  %v12948_v61 = vld [vmem:[%s19731_s1 + $0x192c] sm:$0xf0]  ;;  %v11136_v3 = vor.u32 %v12916_v57, %v11135_v56  ;;  %6628 = vmatpush.bf16.msra.mxu2 %v11408_v55  ;;  %v1095_v55 = vunpack.c.l.b16 %v26_v26 }
  0xde   :  { %v11391_v62 = vld [vmem:[%s19731_s1 + $0x1a20] sm:$0xf]  ;;  %v12980_v63 = vld [vmem:[%s19731_s1 + $0x1a2c] sm:$0xf0]  ;;  %v11264_v10 = vor.u32 %v12948_v61, %v11263_v58  ;;  %6641 = vmatpush.bf16.msra.mxu3 %v11536_v60 }
  0xdf   :  { %v11519_v0 = vld [vmem:[%s19731_s1 + $0x1b20] sm:$0xf]  ;;  %v13012_v1 = vld [vmem:[%s19731_s1 + $0x1b2c] sm:$0xf0]  ;;  %v11392_v11 = vor.u32 %v12980_v63, %v11391_v62  ;;  %6603 = vmatpush.bf16.msra.mxu0 %v11136_v3 }
  0xe0   :  { %v11119_v2 = vld [vmem:[%s19731_s1 + $0x1800] sm:$0xf]  ;;  %v12912_v5 = vld [vmem:[%s19731_s1 + $0x180c] sm:$0xf0]  ;;  %v11520_v18 = vor.u32 %v13012_v1, %v11519_v0  ;;  %6616 = vmatpush.bf16.msra.mxu1 %v11264_v10 }
  0xe1   :  { %v11247_v7 = vld [vmem:[%s19731_s1 + $0x1900] sm:$0xf]  ;;  %v12944_v9 = vld [vmem:[%s19731_s1 + $0x190c] sm:$0xf0]  ;;  %v11120_v39 = vor.u32 %v12912_v5, %v11119_v2  ;;  %6629 = vmatpush.bf16.msra.mxu2 %v11392_v11 }
  0xe2   :  { %v11375_v14 = vld [vmem:[%s19731_s1 + $0x1a00] sm:$0xf]  ;;  %v12976_v22 = vld [vmem:[%s19731_s1 + $0x1a0c] sm:$0xf0]  ;;  %v11248_v50 = vor.u32 %v12944_v9, %v11247_v7  ;;  %6642 = vmatpush.bf16.msra.mxu3 %v11520_v18  ;;  %v14695_v9 = vpack.c.b16 %v1095_v55, %v1095_v55 }
  0xe3   :  { %v25_v15 = vld [vmem:[%s19732_s0 + $0x60] sm:$0xff]  ;;  %v13008_v24 = vld [vmem:[%s19731_s1 + $0x1b0c] sm:$0xf0]  ;;  %v11376_v51 = vor.u32 %v12976_v22, %v11375_v14  ;;  %6604 = vmatpush.bf16.msra.mxu0 %v11120_v39  ;;  %v14705_v22 = vpack.c.b16 %v1096_v59, %v1096_v59 }
  0xe4   :  { %v11503_v19 = vld [vmem:[%s19731_s1 + $0x1b00] sm:$0xf]  ;;  %v13068_v34 = vld [vmem:[%s19731_s1 + $0x1cec] sm:$0xf0]  ;;  %v1093_v48 = vunpack.c.l.b16 %v25_v15  ;;  %v1094_v56 = vunpack.c.h.b16 %v25_v15  ;;  %6617 = vmatpush.bf16.msra.mxu1 %v11248_v50 }
  0xe5   :  { %v11743_v32 = vld [vmem:[%s19731_s1 + $0x1ce0] sm:$0xf]  ;;  %v13100_v40 = vld [vmem:[%s19731_s1 + $0x1dec] sm:$0xf0]  ;;  %v11504_v57 = vor.u32 %v13008_v24, %v11503_v19  ;;  %6630 = vmatpush.bf16.msra.mxu2 %v11376_v51 }
  0xe6   :  { %v11871_v36 = vld [vmem:[%s19731_s1 + $0x1de0] sm:$0xf]  ;;  %v13132_v47 = vld [vmem:[%s19731_s1 + $0x1eec] sm:$0xf0]  ;;  %v11744_v58 = vor.u32 %v13068_v34, %v11743_v32  ;;  %v14684_v2 = vpack.c.b16 %v1093_v48, %v1093_v48  ;;  %v14697_v10 = vpack.c.b16 %v1094_v56, %v1094_v56 }
  0xe7   :  { %v11999_v43 = vld [vmem:[%s19731_s1 + $0x1ee0] sm:$0xf]  ;;  %v13164_v54 = vld [vmem:[%s19731_s1 + $0x1fec] sm:$0xf0]  ;;  %v11872_v60 = vor.u32 %v13100_v40, %v11871_v36  ;;  %6643 = vmatpush.bf16.msra.mxu3 %v11504_v57 }
  0xe8   :  { %v12127_v53 = vld [vmem:[%s19731_s1 + $0x1fe0] sm:$0xf]  ;;  %v12000_v61 = vor.u32 %v13132_v47, %v11999_v43  ;;  %v13064_v63 = vld [vmem:[%s19731_s1 + $0x1ccc] sm:$0xf0]  ;;  %6649 = vmatpush.bf16.msrb.mxu0 %v11744_v58  ;;  %6631 = vmatmul.bf16.vlgmr.msra.gmra.mxu2 %v14695_v9  ;;  %v6398_v58 = vpop.f32.mrf.mxu0 }
  0xe9   :  { %v11727_v62 = vld [vmem:[%s19731_s1 + $0x1cc0] sm:$0xf]  ;;  %v12128_v1 = vor.u32 %v13164_v54, %v12127_v53  ;;  %v13096_v3 = vld [vmem:[%s19731_s1 + $0x1dcc] sm:$0xf0]  ;;  %6662 = vmatpush.bf16.msrb.mxu1 %v11872_v60  ;;  %6605 = vmatmul.bf16.vlgmr.msra.gmra.mxu0 %v14684_v2 }
  0xea   :  { %v11855_v0 = vld [vmem:[%s19731_s1 + $0x1dc0] sm:$0xf]  ;;  %v13128_v7 = vld [vmem:[%s19731_s1 + $0x1ecc] sm:$0xf0]  ;;  %v11728_v15 = vor.u32 %v13064_v63, %v11727_v62  ;;  %6675 = vmatpush.bf16.msrb.mxu2 %v12000_v61  ;;  %6618 = vmatmul.bf16.vlgmr.msra.gmra.mxu1 %v14697_v10  ;;  %v6399_v61 = vadd.f32 %v6398_v58, %v14595_v52  ;;  %v6411_v63 = vpop.f32.mrf.mxu1 }
  0xeb   :  { %v11983_v5 = vld [vmem:[%s19731_s1 + $0x1ec0] sm:$0xf]  ;;  %v13160_v14 = vld [vmem:[%s19731_s1 + $0x1fcc] sm:$0xf0]  ;;  %v11856_v17 = vor.u32 %v13096_v3, %v11855_v0  ;;  %6688 = vmatpush.bf16.msrb.mxu3 %v12128_v1 }
  0xec   :  { %v12111_v11 = vld [vmem:[%s19731_s1 + $0x1fc0] sm:$0xf]  ;;  %v11984_v18 = vor.u32 %v13128_v7, %v11983_v5  ;;  %v13060_v24 = vld [vmem:[%s19731_s1 + $0x1cac] sm:$0xf0]  ;;  %6644 = vmatmul.bf16.vlgmr.msra.gmra.mxu3 %v14705_v22  ;;  %6650 = vmatpush.bf16.msrb.mxu0 %v11728_v15 }
  0xed   :  { %v11711_v19 = vld [vmem:[%s19731_s1 + $0x1ca0] sm:$0xf]  ;;  %v12112_v27 = vor.u32 %v13160_v14, %v12111_v11  ;;  %v13092_v32 = vld [vmem:[%s19731_s1 + $0x1dac] sm:$0xf0]  ;;  %6663 = vmatpush.bf16.msrb.mxu1 %v11856_v17  ;;  %v6412_v11 = vadd.f32 %v6411_v63, %v6399_v61 }
  0xee   :  { %v11839_v26 = vld [vmem:[%s19731_s1 + $0x1da0] sm:$0xf]  ;;  %v13124_v36 = vld [vmem:[%s19731_s1 + $0x1eac] sm:$0xf0]  ;;  %v11712_v43 = vor.u32 %v13060_v24, %v11711_v19  ;;  %6676 = vmatpush.bf16.msrb.mxu2 %v11984_v18 }
  0xef   :  { %v11967_v34 = vld [vmem:[%s19731_s1 + $0x1ea0] sm:$0xf]  ;;  %v13156_v40 = vld [vmem:[%s19731_s1 + $0x1fac] sm:$0xf0]  ;;  %v11840_v47 = vor.u32 %v13092_v32, %v11839_v26  ;;  %6689 = vmatpush.bf16.msrb.mxu3 %v12112_v27 }
  0xf0   :  { %v12095_v39 = vld [vmem:[%s19731_s1 + $0x1fa0] sm:$0xf]  ;;  %v11968_v48 = vor.u32 %v13124_v36, %v11967_v34  ;;  %v13056_v51 = vld [vmem:[%s19731_s1 + $0x1c8c] sm:$0xf0]  ;;  %6651 = vmatpush.bf16.msrb.mxu0 %v11712_v43 }
  0xf1   :  { %v11695_v50 = vld [vmem:[%s19731_s1 + $0x1c80] sm:$0xf]  ;;  %v12096_v54 = vor.u32 %v13156_v40, %v12095_v39  ;;  %v13088_v55 = vld [vmem:[%s19731_s1 + $0x1d8c] sm:$0xf0]  ;;  %6664 = vmatpush.bf16.msrb.mxu1 %v11840_v47  ;;  %v6424_v40 = vpop.f32.mrf.mxu2 }
  0xf2   :  { %v11823_v53 = vld [vmem:[%s19731_s1 + $0x1d80] sm:$0xf]  ;;  %v13120_v57 = vld [vmem:[%s19731_s1 + $0x1e8c] sm:$0xf0]  ;;  %v11696_v62 = vor.u32 %v13056_v51, %v11695_v50  ;;  %6677 = vmatpush.bf16.msrb.mxu2 %v11968_v48  ;;  %v6425_v50 = vadd.f32 %v6424_v40, %v6412_v11  ;;  %v6437_v51 = vpop.f32.mrf.mxu3  ;;  %v28_v40 = vld [vmem:[%s19732_s0 + $0x78] sm:$0xff] }
  0xf3   :  { %v11951_v56 = vld [vmem:[%s19731_s1 + $0x1e80] sm:$0xf]  ;;  %v13152_v60 = vld [vmem:[%s19731_s1 + $0x1f8c] sm:$0xf0]  ;;  %v11824_v0 = vor.u32 %v13088_v55, %v11823_v53  ;;  %6690 = vmatpush.bf16.msrb.mxu3 %v12096_v54  ;;  %v6400_v55 = vpop.f32.mrf.mxu0 }
  0xf4   :  { %v12079_v59 = vld [vmem:[%s19731_s1 + $0x1f80] sm:$0xf]  ;;  %v11952_v1 = vor.u32 %v13120_v57, %v11951_v56  ;;  %v13052_v5 = vld [vmem:[%s19731_s1 + $0x1c6c] sm:$0xf0]  ;;  %6652 = vmatpush.bf16.msrb.mxu0 %v11696_v62  ;;  %v6413_v57 = vpop.f32.mrf.mxu1  ;;  %v14808_v58 = vadd.f32 %v6437_v51, %v6425_v50  ;;  %v12202_v50 = vld [vmem:[%s19731_s1 + $0x1e4] sm:$0xf] }
  0xf5   :  { %v11679_v3 = vld [vmem:[%s19731_s1 + $0x1c60] sm:$0xf]  ;;  %v12080_v52 = vor.u32 %v13152_v60, %v12079_v59  ;;  %v13084_v14 = vld [vmem:[%s19731_s1 + $0x1d6c] sm:$0xf0]  ;;  %6665 = vmatpush.bf16.msrb.mxu1 %v11824_v0  ;;  %v12234_v55 = vld [vmem:[%s19731_s1 + $0x2e4] sm:$0xf] }
  0xf6   :  { %v11807_v7 = vld [vmem:[%s19731_s1 + $0x1d60] sm:$0xf]  ;;  %v13116_v17 = vld [vmem:[%s19731_s1 + $0x1e6c] sm:$0xf0]  ;;  %v11680_v24 = vor.u32 %v13052_v5, %v11679_v3  ;;  %6678 = vmatpush.bf16.msrb.mxu2 %v11952_v1 }
  0xf7   :  { %v11935_v15 = vld [vmem:[%s19731_s1 + $0x1e60] sm:$0xf]  ;;  %v13148_v19 = vld [vmem:[%s19731_s1 + $0x1f6c] sm:$0xf0]  ;;  %v11808_v26 = vor.u32 %v13084_v14, %v11807_v7  ;;  %6691 = vmatpush.bf16.msrb.mxu3 %v12080_v52 }
  0xf8   :  { %v12063_v18 = vld [vmem:[%s19731_s1 + $0x1f60] sm:$0xf]  ;;  %v11936_v27 = vor.u32 %v13116_v17, %v11935_v15  ;;  %v13048_v34 = vld [vmem:[%s19731_s1 + $0x1c4c] sm:$0xf0]  ;;  %6653 = vmatpush.bf16.msrb.mxu0 %v11680_v24 }
  0xf9   :  { %v11663_v32 = vld [vmem:[%s19731_s1 + $0x1c40] sm:$0xf]  ;;  %v12064_v39 = vor.u32 %v13148_v19, %v12063_v18  ;;  %v13080_v43 = vld [vmem:[%s19731_s1 + $0x1d4c] sm:$0xf0]  ;;  %6666 = vmatpush.bf16.msrb.mxu1 %v11808_v26 }
  0xfa   :  { %v11791_v36 = vld [vmem:[%s19731_s1 + $0x1d40] sm:$0xf]  ;;  %v13112_v48 = vld [vmem:[%s19731_s1 + $0x1e4c] sm:$0xf0]  ;;  %v11664_v56 = vor.u32 %v13048_v34, %v11663_v32  ;;  %6679 = vmatpush.bf16.msrb.mxu2 %v11936_v27  ;;  %v6439_v51 = vpop.f32.mrf.mxu3 }
  0xfb   :  { %v11919_v47 = vld [vmem:[%s19731_s1 + $0x1e40] sm:$0xf]  ;;  %v13144_v54 = vld [vmem:[%s19731_s1 + $0x1f4c] sm:$0xf0]  ;;  %v11792_v59 = vor.u32 %v13080_v43, %v11791_v36  ;;  %6692 = vmatpush.bf16.msrb.mxu3 %v12064_v39  ;;  %v6426_v43 = vpop.f32.mrf.mxu2  ;;  %v12194_v51 = vld [vmem:[%s19731_s1 + $0x1a4] sm:$0xf] }
  0xfc   :  { %v12047_v53 = vld [vmem:[%s19731_s1 + $0x1f40] sm:$0xf]  ;;  %v11920_v60 = vor.u32 %v13112_v48, %v11919_v47  ;;  %v13044_v62 = vld [vmem:[%s19731_s1 + $0x1c2c] sm:$0xf0]  ;;  %6654 = vmatpush.bf16.msrb.mxu0 %v11664_v56  ;;  %v12170_v47 = vld [vmem:[%s19731_s1 + $0xe4] sm:$0xf] }
  0xfd   :  { %v11647_v61 = vld [vmem:[%s19731_s1 + $0x1c20] sm:$0xf]  ;;  %v12048_v0 = vor.u32 %v13144_v54, %v12047_v53  ;;  %v13076_v1 = vld [vmem:[%s19731_s1 + $0x1d2c] sm:$0xf0]  ;;  %6667 = vmatpush.bf16.msrb.mxu1 %v11792_v59  ;;  %v8161_v48 = vld [vmem:[%s19731_s1 + $0xf0] sm:$0xf0] }
  0xfe   :  { %v11775_v63 = vld [vmem:[%s19731_s1 + $0x1d20] sm:$0xf]  ;;  %v13108_v5 = vld [vmem:[%s19731_s1 + $0x1e2c] sm:$0xf0]  ;;  %v11648_v14 = vor.u32 %v13044_v62, %v11647_v61  ;;  %6680 = vmatpush.bf16.msrb.mxu2 %v11920_v60  ;;  %v8289_v54 = vld [vmem:[%s19731_s1 + $0x1f0] sm:$0xf0] }
  0xff   :  { %v11903_v3 = vld [vmem:[%s19731_s1 + $0x1e20] sm:$0xf]  ;;  %v13140_v52 = vld [vmem:[%s19731_s1 + $0x1f2c] sm:$0xf0]  ;;  %v11776_v19 = vor.u32 %v13076_v1, %v11775_v63  ;;  %6693 = vmatpush.bf16.msrb.mxu3 %v12048_v0  ;;  %v8417_v56 = vld [vmem:[%s19731_s1 + $0x2f0] sm:$0xf0]  ;;  %v1099_v63 = vunpack.c.l.b16 %v28_v40 }
 0x100   :  { %v12031_v7 = vld [vmem:[%s19731_s1 + $0x1f20] sm:$0xf]  ;;  %v13040_v15 = vld [vmem:[%s19731_s1 + $0x1c0c] sm:$0xf0]  ;;  %v11904_v24 = vor.u32 %v13108_v5, %v11903_v3  ;;  %6655 = vmatpush.bf16.msrb.mxu0 %v11648_v14  ;;  %v12266_v61 = vld [vmem:[%s19731_s1 + $0x3e4] sm:$0xf]  ;;  %v8164_v3 = vor.u32 %v12170_v47, %v8161_v48  ;;  %v1100_v5 = vunpack.c.h.b16 %v28_v40 }
 0x101   :  { %v11631_v11 = vld [vmem:[%s19731_s1 + $0x1c00] sm:$0xf]  ;;  %v13072_v18 = vld [vmem:[%s19731_s1 + $0x1d0c] sm:$0xf0]  ;;  %v12032_v34 = vor.u32 %v13140_v52, %v12031_v7  ;;  %6668 = vmatpush.bf16.msrb.mxu1 %v11776_v19  ;;  %v8545_v62 = vld [vmem:[%s19731_s1 + $0x3f0] sm:$0xf0]  ;;  %v8292_v7 = vor.u32 %v12202_v50, %v8289_v54  ;;  %v8420_v52 = vor.u32 %v12234_v55, %v8417_v56 }
 0x102   :  { %v11759_v17 = vld [vmem:[%s19731_s1 + $0x1d00] sm:$0xf]  ;;  %v13104_v27 = vld [vmem:[%s19731_s1 + $0x1e0c] sm:$0xf0]  ;;  %v11632_v53 = vor.u32 %v13040_v15, %v11631_v11  ;;  %6681 = vmatpush.bf16.msrb.mxu2 %v11904_v24  ;;  %v12166_v11 = vld [vmem:[%s19731_s1 + $0xc4] sm:$0xf] }
 0x103   :  { %v11887_v26 = vld [vmem:[%s19731_s1 + $0x1e00] sm:$0xf]  ;;  %v27_v32 = vld [vmem:[%s19732_s0 + $0x70] sm:$0xff]  ;;  %v11760_v59 = vor.u32 %v13072_v18, %v11759_v17  ;;  %6694 = vmatpush.bf16.msrb.mxu3 %v12032_v34  ;;  %v12198_v15 = vld [vmem:[%s19731_s1 + $0x1c4] sm:$0xf]  ;;  %v8548_v17 = vor.u32 %v12266_v61, %v8545_v62 }
 0x104   :  { %v12015_v36 = vld [vmem:[%s19731_s1 + $0x1f00] sm:$0xf]  ;;  %v13136_v39 = vld [vmem:[%s19731_s1 + $0x1f0c] sm:$0xf0]  ;;  %v1097_v57 = vunpack.c.l.b16 %v27_v32  ;;  %v11888_v60 = vor.u32 %v13104_v27, %v11887_v26  ;;  %v1098_v0 = vunpack.c.h.b16 %v27_v32  ;;  %v8145_v14 = vld [vmem:[%s19731_s1 + $0xd0] sm:$0xf0]  ;;  %6656 = vmatpush.bf16.msrb.mxu0 %v11632_v53  ;;  %v14908_v27 = vpack.c.b16 %v1099_v63, %v1099_v63 }
 0x105   :  { %v12016_v1 = vor.u32 %v13136_v39, %v12015_v36  ;;  %v8273_v19 = vld [vmem:[%s19731_s1 + $0x1d0] sm:$0xf0]  ;;  %v12230_v24 = vld [vmem:[%s19731_s1 + $0x2c4] sm:$0xf]  ;;  %6669 = vmatpush.bf16.msrb.mxu1 %v11760_v59  ;;  %v14918_v39 = vpack.c.b16 %v1100_v5, %v1100_v5  ;;  %v8148_v40 = vor.u32 %v12166_v11, %v8145_v14  ;;  %v6450_v11 = vpop.f32.mrf.mxu0 }
 0x106   :  { %v14897_v18 = vpack.c.b16 %v1097_v57, %v1097_v57  ;;  %v8401_v26 = vld [vmem:[%s19731_s1 + $0x2d0] sm:$0xf0]  ;;  %6682 = vmatpush.bf16.msrb.mxu2 %v11888_v60  ;;  %v14910_v32 = vpack.c.b16 %v1098_v0, %v1098_v0  ;;  %v12262_v34 = vld [vmem:[%s19731_s1 + $0x3c4] sm:$0xf]  ;;  %v8276_v43 = vor.u32 %v12198_v15, %v8273_v19 }
 0x107   :  { %v8529_v36 = vld [vmem:[%s19731_s1 + $0x3d0] sm:$0xf0]  ;;  %6695 = vmatpush.bf16.msrb.mxu3 %v12016_v1  ;;  %v8404_v47 = vor.u32 %v12230_v24, %v8401_v26  ;;  %v12162_v48 = vld [vmem:[%s19731_s1 + $0xa4] sm:$0xf]  ;;  %v6463_v24 = vpop.f32.mrf.mxu1 }
 0x108   :  { %6701 = vmatpush.bf16.msra.mxu0 %v8164_v3  ;;  %v8129_v50 = vld [vmem:[%s19731_s1 + $0xb0] sm:$0xf0]  ;;  %v8532_v53 = vor.u32 %v12262_v34, %v8529_v36  ;;  %v12226_v55 = vld [vmem:[%s19731_s1 + $0x2a4] sm:$0xf]  ;;  %6670 = vmatmul.bf16.vlgmr.msrb.gmra.mxu1 %v14910_v32 }
 0x109   :  { %6714 = vmatpush.bf16.msra.mxu1 %v8292_v7  ;;  %6657 = vmatmul.bf16.vlgmr.msrb.gmra.mxu0 %v14897_v18  ;;  %v8257_v54 = vld [vmem:[%s19731_s1 + $0x1b0] sm:$0xf0]  ;;  %v12258_v57 = vld [vmem:[%s19731_s1 + $0x3a4] sm:$0xf]  ;;  %v8132_v60 = vor.u32 %v12162_v48, %v8129_v50 }
 0x10a   :  { %6727 = vmatpush.bf16.msra.mxu2 %v8420_v52  ;;  %v8385_v56 = vld [vmem:[%s19731_s1 + $0x2b0] sm:$0xf0]  ;;  %6696 = vmatmul.bf16.vlgmr.msrb.gmra.mxu3 %v14918_v39  ;;  %v8260_v61 = vor.u32 %v12194_v51, %v8257_v54  ;;  %v12158_v63 = vld [vmem:[%s19731_s1 + $0x84] sm:$0xf] }
 0x10b   :  { %6740 = vmatpush.bf16.msra.mxu3 %v8548_v17  ;;  %6683 = vmatmul.bf16.vlgmr.msrb.gmra.mxu2 %v14908_v27  ;;  %v8513_v59 = vld [vmem:[%s19731_s1 + $0x3b0] sm:$0xf0]  ;;  %v8388_v62 = vor.u32 %v12226_v55, %v8385_v56  ;;  %v12190_v1 = vld [vmem:[%s19731_s1 + $0x184] sm:$0xf]  ;;  %v6451_v17 = vadd.f32 %v6450_v11, %v14808_v58 }
 0x10c   :  { %6702 = vmatpush.bf16.msra.mxu0 %v8148_v40  ;;  %v8113_v0 = vld [vmem:[%s19731_s1 + $0x90] sm:$0xf0]  ;;  %v8516_v3 = vor.u32 %v12258_v57, %v8513_v59  ;;  %v12222_v7 = vld [vmem:[%s19731_s1 + $0x284] sm:$0xf] }
 0x10d   :  { %6715 = vmatpush.bf16.msra.mxu1 %v8276_v43  ;;  %v8241_v5 = vld [vmem:[%s19731_s1 + $0x190] sm:$0xf0]  ;;  %v12254_v14 = vld [vmem:[%s19731_s1 + $0x384] sm:$0xf]  ;;  %v8116_v19 = vor.u32 %v12158_v63, %v8113_v0  ;;  %v6476_v63 = vpop.f32.mrf.mxu2 }
 0x10e   :  { %6728 = vmatpush.bf16.msra.mxu2 %v8404_v47  ;;  %v8369_v52 = vld [vmem:[%s19731_s1 + $0x290] sm:$0xf0]  ;;  %v8244_v26 = vor.u32 %v12190_v1, %v8241_v5  ;;  %v12154_v36 = vld [vmem:[%s19731_s1 + $0x64] sm:$0xf]  ;;  %v6464_v47 = vadd.f32 %v6463_v24, %v6451_v17 }
 0x10f   :  { %6741 = vmatpush.bf16.msra.mxu3 %v8532_v53  ;;  %v8497_v15 = vld [vmem:[%s19731_s1 + $0x390] sm:$0xf0]  ;;  %v8372_v34 = vor.u32 %v12222_v7, %v8369_v52  ;;  %v12186_v43 = vld [vmem:[%s19731_s1 + $0x164] sm:$0xf]  ;;  %v6489_v7 = vpop.f32.mrf.mxu3  ;;  %v6465_v17 = vpop.f32.mrf.mxu1 }
 0x110   :  { %6703 = vmatpush.bf16.msra.mxu0 %v8132_v60  ;;  %v8097_v40 = vld [vmem:[%s19731_s1 + $0x70] sm:$0xf0]  ;;  %v8500_v58 = vor.u32 %v12254_v14, %v8497_v15  ;;  %v12218_v50 = vld [vmem:[%s19731_s1 + $0x264] sm:$0xf]  ;;  %v6477_v5 = vadd.f32 %v6476_v63, %v6464_v47  ;;  %v6452_v14 = vpop.f32.mrf.mxu0 }
 0x111   :  { %6716 = vmatpush.bf16.msra.mxu1 %v8260_v61  ;;  %v8225_v48 = vld [vmem:[%s19731_s1 + $0x170] sm:$0xf0]  ;;  %v12250_v53 = vld [vmem:[%s19731_s1 + $0x364] sm:$0xf]  ;;  %v8100_v55 = vor.u32 %v12154_v36, %v8097_v40 }
 0x112   :  { %6729 = vmatpush.bf16.msra.mxu2 %v8388_v62  ;;  %v8353_v51 = vld [vmem:[%s19731_s1 + $0x270] sm:$0xf0]  ;;  %v8228_v56 = vor.u32 %v12186_v43, %v8225_v48  ;;  %v12150_v59 = vld [vmem:[%s19731_s1 + $0x44] sm:$0xf] }
 0x113   :  { %6742 = vmatpush.bf16.msra.mxu3 %v8516_v3  ;;  %v8481_v54 = vld [vmem:[%s19731_s1 + $0x370] sm:$0xf0]  ;;  %v8356_v57 = vor.u32 %v12218_v50, %v8353_v51  ;;  %v12182_v61 = vld [vmem:[%s19731_s1 + $0x144] sm:$0xf] }
 0x114   :  { %6704 = vmatpush.bf16.msra.mxu0 %v8116_v19  ;;  %v8081_v60 = vld [vmem:[%s19731_s1 + $0x50] sm:$0xf0]  ;;  %v8484_v62 = vor.u32 %v12250_v53, %v8481_v54  ;;  %v12214_v1 = vld [vmem:[%s19731_s1 + $0x244] sm:$0xf]  ;;  %v15021_v19 = vadd.f32 %v6489_v7, %v6477_v5 }
 0x115   :  { %6717 = vmatpush.bf16.msra.mxu1 %v8244_v26  ;;  %v8209_v0 = vld [vmem:[%s19731_s1 + $0x150] sm:$0xf0]  ;;  %v12246_v52 = vld [vmem:[%s19731_s1 + $0x344] sm:$0xf]  ;;  %v8084_v15 = vor.u32 %v12150_v59, %v8081_v60 }
 0x116   :  { %6730 = vmatpush.bf16.msra.mxu2 %v8372_v34  ;;  %v8337_v3 = vld [vmem:[%s19731_s1 + $0x250] sm:$0xf0]  ;;  %v8212_v24 = vor.u32 %v12182_v61, %v8209_v0  ;;  %v12146_v34 = vld [vmem:[%s19731_s1 + $0x24] sm:$0xf] }
 0x117   :  { %6743 = vmatpush.bf16.msra.mxu3 %v8500_v58  ;;  %v8465_v11 = vld [vmem:[%s19731_s1 + $0x350] sm:$0xf0]  ;;  %v8340_v26 = vor.u32 %v12214_v1, %v8337_v3  ;;  %v12178_v40 = vld [vmem:[%s19731_s1 + $0x124] sm:$0xf]  ;;  %v6478_v3 = vpop.f32.mrf.mxu2 }
 0x118   :  { %6705 = vmatpush.bf16.msra.mxu0 %v8100_v55  ;;  %v8065_v36 = vld [vmem:[%s19731_s1 + $0x30] sm:$0xf0]  ;;  %v8468_v43 = vor.u32 %v12246_v52, %v8465_v11  ;;  %v12210_v47 = vld [vmem:[%s19731_s1 + $0x224] sm:$0xf]  ;;  %v6491_v11 = vpop.f32.mrf.mxu3 }
 0x119   :  { %6718 = vmatpush.bf16.msra.mxu1 %v8228_v56  ;;  %v8193_v58 = vld [vmem:[%s19731_s1 + $0x130] sm:$0xf0]  ;;  %v12242_v50 = vld [vmem:[%s19731_s1 + $0x324] sm:$0xf]  ;;  %v8068_v53 = vor.u32 %v12146_v34, %v8065_v36 }
 0x11a   :  { %6731 = vmatpush.bf16.msra.mxu2 %v8356_v57  ;;  %v8321_v48 = vld [vmem:[%s19731_s1 + $0x230] sm:$0xf0]  ;;  %v12142_v54 = vld [vmem:[%s19731_s1 + $0x4] sm:$0xf]  ;;  %v8196_v56 = vor.u32 %v12178_v40, %v8193_v58 }
 0x11b   :  { %6744 = vmatpush.bf16.msra.mxu3 %v8484_v62  ;;  %v8449_v51 = vld [vmem:[%s19731_s1 + $0x330] sm:$0xf0]  ;;  %v8324_v57 = vor.u32 %v12210_v47, %v8321_v48  ;;  %v12174_v59 = vld [vmem:[%s19731_s1 + $0x104] sm:$0xf] }
 0x11c   :  { %6706 = vmatpush.bf16.msra.mxu0 %v8084_v15  ;;  %v8049_v55 = vld [vmem:[%s19731_s1 + $0x10] sm:$0xf0]  ;;  %v12206_v61 = vld [vmem:[%s19731_s1 + $0x204] sm:$0xf]  ;;  %v8452_v62 = vor.u32 %v12242_v50, %v8449_v51 }
 0x11d   :  { %6719 = vmatpush.bf16.msra.mxu1 %v8212_v24  ;;  %v8177_v60 = vld [vmem:[%s19731_s1 + $0x110] sm:$0xf0]  ;;  %v12238_v0 = vld [vmem:[%s19731_s1 + $0x304] sm:$0xf]  ;;  %v8052_v14 = vor.u32 %v12142_v54, %v8049_v55 }
 0x11e   :  { %6732 = vmatpush.bf16.msra.mxu2 %v8340_v26  ;;  %v8305_v63 = vld [vmem:[%s19731_s1 + $0x210] sm:$0xf0]  ;;  %v12298_v5 = vld [vmem:[%s19731_s1 + $0x4e4] sm:$0xf]  ;;  %v8180_v26 = vor.u32 %v12174_v59, %v8177_v60 }
 0x11f   :  { %6745 = vmatpush.bf16.msra.mxu3 %v8468_v43  ;;  %v8433_v1 = vld [vmem:[%s19731_s1 + $0x310] sm:$0xf0]  ;;  %v12330_v52 = vld [vmem:[%s19731_s1 + $0x5e4] sm:$0xf]  ;;  %v8308_v34 = vor.u32 %v12206_v61, %v8305_v63 }
 0x120   :  { %v8673_v7 = vld [vmem:[%s19731_s1 + $0x4f0] sm:$0xf0]  ;;  %6707 = vmatpush.bf16.msra.mxu0 %v8068_v53  ;;  %v12362_v17 = vld [vmem:[%s19731_s1 + $0x6e4] sm:$0xf]  ;;  %v8436_v43 = vor.u32 %v12238_v0, %v8433_v1 }
 0x121   :  { %v8801_v15 = vld [vmem:[%s19731_s1 + $0x5f0] sm:$0xf0]  ;;  %6720 = vmatpush.bf16.msra.mxu1 %v8196_v56  ;;  %v12394_v36 = vld [vmem:[%s19731_s1 + $0x7e4] sm:$0xf]  ;;  %v8676_v58 = vor.u32 %v12298_v5, %v8673_v7 }
 0x122   :  { %v8929_v24 = vld [vmem:[%s19731_s1 + $0x6f0] sm:$0xf0]  ;;  %6733 = vmatpush.bf16.msra.mxu2 %v8324_v57  ;;  %v8804_v47 = vor.u32 %v12330_v52, %v8801_v15  ;;  %v12294_v50 = vld [vmem:[%s19731_s1 + $0x4c4] sm:$0xf] }
 0x123   :  { %v9057_v40 = vld [vmem:[%s19731_s1 + $0x7f0] sm:$0xf0]  ;;  %6746 = vmatpush.bf16.msra.mxu3 %v8452_v62  ;;  %v8932_v48 = vor.u32 %v12362_v17, %v8929_v24  ;;  %v12326_v53 = vld [vmem:[%s19731_s1 + $0x5c4] sm:$0xf] }
 0x124   :  { %v8657_v51 = vld [vmem:[%s19731_s1 + $0x4d0] sm:$0xf0]  ;;  %6708 = vmatpush.bf16.msra.mxu0 %v8052_v14  ;;  %v9060_v54 = vor.u32 %v12394_v36, %v9057_v40  ;;  %v12358_v56 = vld [vmem:[%s19731_s1 + $0x6c4] sm:$0xf] }
 0x125   :  { %v8785_v55 = vld [vmem:[%s19731_s1 + $0x5d0] sm:$0xf0]  ;;  %6721 = vmatpush.bf16.msra.mxu1 %v8180_v26  ;;  %v12390_v59 = vld [vmem:[%s19731_s1 + $0x7c4] sm:$0xf]  ;;  %v8660_v61 = vor.u32 %v12294_v50, %v8657_v51  ;;  %v6502_v50 = vpop.f32.mrf.mxu0 }
 0x126   :  { %v8913_v57 = vld [vmem:[%s19731_s1 + $0x6d0] sm:$0xf0]  ;;  %6734 = vmatpush.bf16.msra.mxu2 %v8308_v34  ;;  %v8788_v62 = vor.u32 %v12326_v53, %v8785_v55  ;;  %v12290_v0 = vld [vmem:[%s19731_s1 + $0x4a4] sm:$0xf] }
 0x127   :  { %v9041_v60 = vld [vmem:[%s19731_s1 + $0x7d0] sm:$0xf0]  ;;  %6747 = vmatpush.bf16.msra.mxu3 %v8436_v43  ;;  %v8916_v63 = vor.u32 %v12358_v56, %v8913_v57  ;;  %v12322_v3 = vld [vmem:[%s19731_s1 + $0x5a4] sm:$0xf]  ;;  %6709 = vmatmul.bf16.vlgmr.msra.gmra.mxu0 %v13487_v20  ;;  %v6515_v56 = vpop.f32.mrf.mxu1 }
 0x128   :  { %6753 = vmatpush.bf16.msrb.mxu0 %v8676_v58  ;;  %v8641_v1 = vld [vmem:[%s19731_s1 + $0x4b0] sm:$0xf0]  ;;  %v9044_v5 = vor.u32 %v12390_v59, %v9041_v60  ;;  %v12354_v52 = vld [vmem:[%s19731_s1 + $0x6a4] sm:$0xf]  ;;  %6722 = vmatmul.bf16.vlgmr.msra.gmra.mxu1 %v13490_v21 }
 0x129   :  { %6766 = vmatpush.bf16.msrb.mxu1 %v8804_v47  ;;  %v8769_v7 = vld [vmem:[%s19731_s1 + $0x5b0] sm:$0xf0]  ;;  %6735 = vmatmul.bf16.vlgmr.msra.gmra.mxu2 %v13455_v4  ;;  %v12386_v14 = vld [vmem:[%s19731_s1 + $0x7a4] sm:$0xf]  ;;  %v8644_v17 = vor.u32 %v12290_v0, %v8641_v1 }
 0x12a   :  { %6779 = vmatpush.bf16.msrb.mxu2 %v8932_v48  ;;  %v8897_v11 = vld [vmem:[%s19731_s1 + $0x6b0] sm:$0xf0]  ;;  %6748 = vmatmul.bf16.vlgmr.msra.gmra.mxu3 %v13460_v6  ;;  %v8772_v24 = vor.u32 %v12322_v3, %v8769_v7  ;;  %v12286_v34 = vld [vmem:[%s19731_s1 + $0x484] sm:$0xf] }
 0x12b   :  { %6792 = vmatpush.bf16.msrb.mxu3 %v9060_v54  ;;  %v9025_v15 = vld [vmem:[%s19731_s1 + $0x7b0] sm:$0xf0]  ;;  %v8900_v26 = vor.u32 %v12354_v52, %v8897_v11  ;;  %v12318_v40 = vld [vmem:[%s19731_s1 + $0x584] sm:$0xf]  ;;  %v6503_v54 = vadd.f32 %v6502_v50, %v15021_v19 }
 0x12c   :  { %6754 = vmatpush.bf16.msrb.mxu0 %v8660_v61  ;;  %v8625_v36 = vld [vmem:[%s19731_s1 + $0x490] sm:$0xf0]  ;;  %v9028_v43 = vor.u32 %v12386_v14, %v9025_v15  ;;  %v12350_v47 = vld [vmem:[%s19731_s1 + $0x684] sm:$0xf] }
 0x12d   :  { %6767 = vmatpush.bf16.msrb.mxu1 %v8788_v62  ;;  %v8753_v58 = vld [vmem:[%s19731_s1 + $0x590] sm:$0xf0]  ;;  %v12382_v51 = vld [vmem:[%s19731_s1 + $0x784] sm:$0xf]  ;;  %v8628_v55 = vor.u32 %v12286_v34, %v8625_v36  ;;  %v6528_v34 = vpop.f32.mrf.mxu2 }
 0x12e   :  { %6780 = vmatpush.bf16.msrb.mxu2 %v8916_v63  ;;  %v8881_v48 = vld [vmem:[%s19731_s1 + $0x690] sm:$0xf0]  ;;  %v8756_v57 = vor.u32 %v12318_v40, %v8753_v58  ;;  %v12282_v60 = vld [vmem:[%s19731_s1 + $0x464] sm:$0xf]  ;;  %v6516_v63 = vadd.f32 %v6515_v56, %v6503_v54 }
 0x12f   :  { %6793 = vmatpush.bf16.msrb.mxu3 %v9044_v5  ;;  %v9009_v53 = vld [vmem:[%s19731_s1 + $0x790] sm:$0xf0]  ;;  %v8884_v59 = vor.u32 %v12350_v47, %v8881_v48  ;;  %v12314_v62 = vld [vmem:[%s19731_s1 + $0x564] sm:$0xf]  ;;  %v6541_v47 = vpop.f32.mrf.mxu3  ;;  %v6517_v54 = vpop.f32.mrf.mxu1 }
 0x130   :  { %6755 = vmatpush.bf16.msrb.mxu0 %v8644_v17  ;;  %v8609_v61 = vld [vmem:[%s19731_s1 + $0x470] sm:$0xf0]  ;;  %v9012_v19 = vor.u32 %v12382_v51, %v9009_v53  ;;  %v12346_v1 = vld [vmem:[%s19731_s1 + $0x664] sm:$0xf]  ;;  %v6529_v58 = vadd.f32 %v6528_v34, %v6516_v63  ;;  %v6504_v51 = vpop.f32.mrf.mxu0 }
 0x131   :  { %6768 = vmatpush.bf16.msrb.mxu1 %v8772_v24  ;;  %v8737_v0 = vld [vmem:[%s19731_s1 + $0x570] sm:$0xf0]  ;;  %v12378_v5 = vld [vmem:[%s19731_s1 + $0x764] sm:$0xf]  ;;  %v8612_v52 = vor.u32 %v12282_v60, %v8609_v61 }
 0x132   :  { %6781 = vmatpush.bf16.msrb.mxu2 %v8900_v26  ;;  %v8865_v3 = vld [vmem:[%s19731_s1 + $0x670] sm:$0xf0]  ;;  %v8740_v11 = vor.u32 %v12314_v62, %v8737_v0  ;;  %v12278_v15 = vld [vmem:[%s19731_s1 + $0x444] sm:$0xf] }
 0x133   :  { %6794 = vmatpush.bf16.msrb.mxu3 %v9028_v43  ;;  %v8993_v7 = vld [vmem:[%s19731_s1 + $0x770] sm:$0xf0]  ;;  %v8868_v14 = vor.u32 %v12346_v1, %v8865_v3  ;;  %v12310_v24 = vld [vmem:[%s19731_s1 + $0x544] sm:$0xf] }
 0x134   :  { %6756 = vmatpush.bf16.msrb.mxu0 %v8628_v55  ;;  %v8593_v17 = vld [vmem:[%s19731_s1 + $0x450] sm:$0xf0]  ;;  %v8996_v26 = vor.u32 %v12378_v5, %v8993_v7  ;;  %v12342_v40 = vld [vmem:[%s19731_s1 + $0x644] sm:$0xf]  ;;  %v15220_v55 = vadd.f32 %v6541_v47, %v6529_v58 }
 0x135   :  { %6769 = vmatpush.bf16.msrb.mxu1 %v8756_v57  ;;  %v8721_v36 = vld [vmem:[%s19731_s1 + $0x550] sm:$0xf0]  ;;  %v12374_v48 = vld [vmem:[%s19731_s1 + $0x744] sm:$0xf]  ;;  %v8596_v53 = vor.u32 %v12278_v15, %v8593_v17 }
 0x136   :  { %6782 = vmatpush.bf16.msrb.mxu2 %v8884_v59  ;;  %v8849_v43 = vld [vmem:[%s19731_s1 + $0x650] sm:$0xf0]  ;;  %v8724_v56 = vor.u32 %v12310_v24, %v8721_v36  ;;  %v12274_v59 = vld [vmem:[%s19731_s1 + $0x424] sm:$0xf] }
 0x137   :  { %6795 = vmatpush.bf16.msrb.mxu3 %v9012_v19  ;;  %v8977_v50 = vld [vmem:[%s19731_s1 + $0x750] sm:$0xf0]  ;;  %v8852_v57 = vor.u32 %v12342_v40, %v8849_v43  ;;  %v12306_v61 = vld [vmem:[%s19731_s1 + $0x524] sm:$0xf]  ;;  %v6530_v43 = vpop.f32.mrf.mxu2 }
 0x138   :  { %6757 = vmatpush.bf16.msrb.mxu0 %v8612_v52  ;;  %v8577_v60 = vld [vmem:[%s19731_s1 + $0x430] sm:$0xf0]  ;;  %v8980_v62 = vor.u32 %v12374_v48, %v8977_v50  ;;  %v12338_v63 = vld [vmem:[%s19731_s1 + $0x624] sm:$0xf]  ;;  %v6543_v50 = vpop.f32.mrf.mxu3 }
 0x139   :  { %6770 = vmatpush.bf16.msrb.mxu1 %v8740_v11  ;;  %v8705_v19 = vld [vmem:[%s19731_s1 + $0x530] sm:$0xf0]  ;;  %v12370_v1 = vld [vmem:[%s19731_s1 + $0x724] sm:$0xf]  ;;  %v8580_v5 = vor.u32 %v12274_v59, %v8577_v60 }
 0x13a   :  { %6783 = vmatpush.bf16.msrb.mxu2 %v8868_v14  ;;  %v8833_v0 = vld [vmem:[%s19731_s1 + $0x630] sm:$0xf0]  ;;  %v12270_v7 = vld [vmem:[%s19731_s1 + $0x404] sm:$0xf]  ;;  %v8708_v11 = vor.u32 %v12306_v61, %v8705_v19 }
 0x13b   :  { %6796 = vmatpush.bf16.msrb.mxu3 %v8996_v26  ;;  %v8961_v3 = vld [vmem:[%s19731_s1 + $0x730] sm:$0xf0]  ;;  %v8836_v14 = vor.u32 %v12338_v63, %v8833_v0  ;;  %v12302_v15 = vld [vmem:[%s19731_s1 + $0x504] sm:$0xf] }
 0x13c   :  { %6758 = vmatpush.bf16.msrb.mxu0 %v8596_v53  ;;  %v8561_v52 = vld [vmem:[%s19731_s1 + $0x410] sm:$0xf0]  ;;  %v12334_v24 = vld [vmem:[%s19731_s1 + $0x604] sm:$0xf]  ;;  %v8964_v26 = vor.u32 %v12370_v1, %v8961_v3 }
 0x13d   :  { %6771 = vmatpush.bf16.msrb.mxu1 %v8724_v56  ;;  %v8689_v17 = vld [vmem:[%s19731_s1 + $0x510] sm:$0xf0]  ;;  %v12366_v36 = vld [vmem:[%s19731_s1 + $0x704] sm:$0xf]  ;;  %v8564_v51 = vor.u32 %v12270_v7, %v8561_v52 }
 0x13e   :  { %6784 = vmatpush.bf16.msrb.mxu2 %v8852_v57  ;;  %v8817_v34 = vld [vmem:[%s19731_s1 + $0x610] sm:$0xf0]  ;;  %v12426_v58 = vld [vmem:[%s19731_s1 + $0x8e4] sm:$0xf]  ;;  %v8692_v57 = vor.u32 %v12302_v15, %v8689_v17 }
 0x13f   :  { %6797 = vmatpush.bf16.msrb.mxu3 %v8980_v62  ;;  %v8945_v40 = vld [vmem:[%s19731_s1 + $0x710] sm:$0xf0]  ;;  %v12458_v48 = vld [vmem:[%s19731_s1 + $0x9e4] sm:$0xf]  ;;  %v8820_v59 = vor.u32 %v12334_v24, %v8817_v34 }
 0x140   :  { %v9185_v47 = vld [vmem:[%s19731_s1 + $0x8f0] sm:$0xf0]  ;;  %6759 = vmatpush.bf16.msrb.mxu0 %v8580_v5  ;;  %v12490_v54 = vld [vmem:[%s19731_s1 + $0xae4] sm:$0xf]  ;;  %v8948_v62 = vor.u32 %v12366_v36, %v8945_v40 }
 0x141   :  { %v9313_v53 = vld [vmem:[%s19731_s1 + $0x9f0] sm:$0xf0]  ;;  %6772 = vmatpush.bf16.msrb.mxu1 %v8708_v11  ;;  %v12522_v60 = vld [vmem:[%s19731_s1 + $0xbe4] sm:$0xf]  ;;  %v9188_v19 = vor.u32 %v12426_v58, %v9185_v47 }
 0x142   :  { %v9441_v56 = vld [vmem:[%s19731_s1 + $0xaf0] sm:$0xf0]  ;;  %6785 = vmatpush.bf16.msrb.mxu2 %v8836_v14  ;;  %v9316_v63 = vor.u32 %v12458_v48, %v9313_v53  ;;  %v12422_v1 = vld [vmem:[%s19731_s1 + $0x8c4] sm:$0xf] }
 0x143   :  { %v9569_v61 = vld [vmem:[%s19731_s1 + $0xbf0] sm:$0xf0]  ;;  %6798 = vmatpush.bf16.msrb.mxu3 %v8964_v26  ;;  %v9444_v0 = vor.u32 %v12490_v54, %v9441_v56  ;;  %v12454_v5 = vld [vmem:[%s19731_s1 + $0x9c4] sm:$0xf] }
 0x144   :  { %v9169_v3 = vld [vmem:[%s19731_s1 + $0x8d0] sm:$0xf0]  ;;  %6760 = vmatpush.bf16.msrb.mxu0 %v8564_v51  ;;  %v9572_v7 = vor.u32 %v12522_v60, %v9569_v61  ;;  %v12486_v11 = vld [vmem:[%s19731_s1 + $0xac4] sm:$0xf] }
 0x145   :  { %v9297_v52 = vld [vmem:[%s19731_s1 + $0x9d0] sm:$0xf0]  ;;  %6773 = vmatpush.bf16.msrb.mxu1 %v8692_v57  ;;  %v12518_v15 = vld [vmem:[%s19731_s1 + $0xbc4] sm:$0xf]  ;;  %v9172_v24 = vor.u32 %v12422_v1, %v9169_v3  ;;  %v15364_v1 = vpop.f32.mrf.mxu0 }
 0x146   :  { %v9425_v14 = vld [vmem:[%s19731_s1 + $0xad0] sm:$0xf0]  ;;  %6786 = vmatpush.bf16.msrb.mxu2 %v8820_v59  ;;  %v9300_v26 = vor.u32 %v12454_v5, %v9297_v52  ;;  %v12418_v36 = vld [vmem:[%s19731_s1 + $0x8a4] sm:$0xf]  ;;  %v15372_v52 = vpop.f32.mrf.mxu1 }
 0x147   :  { %v9553_v17 = vld [vmem:[%s19731_s1 + $0xbd0] sm:$0xf0]  ;;  %6799 = vmatpush.bf16.msrb.mxu3 %v8948_v62  ;;  %v9428_v34 = vor.u32 %v12486_v11, %v9425_v14  ;;  %v12450_v43 = vld [vmem:[%s19731_s1 + $0x9a4] sm:$0xf]  ;;  %6761 = vmatmul.bf16.vlgmr.msrb.gmra.mxu0 %v13646_v41 }
 0x148   :  { %6805 = vmatpush.bf16.msra.mxu0 %v9188_v19  ;;  %v9153_v40 = vld [vmem:[%s19731_s1 + $0x8b0] sm:$0xf0]  ;;  %v9556_v58 = vor.u32 %v12518_v15, %v9553_v17  ;;  %v12482_v48 = vld [vmem:[%s19731_s1 + $0xaa4] sm:$0xf]  ;;  %6774 = vmatmul.bf16.vlgmr.msrb.gmra.mxu1 %v13650_v44 }
 0x149   :  { %6818 = vmatpush.bf16.msra.mxu1 %v9316_v63  ;;  %6787 = vmatmul.bf16.vlgmr.msrb.gmra.mxu2 %v13638_v38  ;;  %v9281_v47 = vld [vmem:[%s19731_s1 + $0x9b0] sm:$0xf0]  ;;  %v12514_v51 = vld [vmem:[%s19731_s1 + $0xba4] sm:$0xf]  ;;  %v9156_v54 = vor.u32 %v12418_v36, %v9153_v40 }
 0x14a   :  { %6831 = vmatpush.bf16.msra.mxu2 %v9444_v0  ;;  %v9409_v50 = vld [vmem:[%s19731_s1 + $0xab0] sm:$0xf0]  ;;  %6800 = vmatmul.bf16.vlgmr.msrb.gmra.mxu3 %v13648_v42  ;;  %v9284_v56 = vor.u32 %v12450_v43, %v9281_v47  ;;  %v12414_v59 = vld [vmem:[%s19731_s1 + $0x884] sm:$0xf] }
 0x14b   :  { %6844 = vmatpush.bf16.msra.mxu3 %v9572_v7  ;;  %v9537_v53 = vld [vmem:[%s19731_s1 + $0xbb0] sm:$0xf0]  ;;  %v9412_v57 = vor.u32 %v12482_v48, %v9409_v50  ;;  %v12446_v61 = vld [vmem:[%s19731_s1 + $0x984] sm:$0xf] }
 0x14c   :  { %6806 = vmatpush.bf16.msra.mxu0 %v9172_v24  ;;  %v9137_v60 = vld [vmem:[%s19731_s1 + $0x890] sm:$0xf0]  ;;  %v9540_v62 = vor.u32 %v12514_v51, %v9537_v53  ;;  %v12478_v63 = vld [vmem:[%s19731_s1 + $0xa84] sm:$0xf] }
 0x14d   :  { %6819 = vmatpush.bf16.msra.mxu1 %v9300_v26  ;;  %v9265_v19 = vld [vmem:[%s19731_s1 + $0x990] sm:$0xf0]  ;;  %v12510_v3 = vld [vmem:[%s19731_s1 + $0xb84] sm:$0xf]  ;;  %v9140_v7 = vor.u32 %v12414_v59, %v9137_v60 }
 0x14e   :  { %6832 = vmatpush.bf16.msra.mxu2 %v9428_v34  ;;  %v9393_v0 = vld [vmem:[%s19731_s1 + $0xa90] sm:$0xf0]  ;;  %v9268_v11 = vor.u32 %v12446_v61, %v9265_v19  ;;  %v12410_v15 = vld [vmem:[%s19731_s1 + $0x864] sm:$0xf] }
 0x14f   :  { %6845 = vmatpush.bf16.msra.mxu3 %v9556_v58  ;;  %v9521_v5 = vld [vmem:[%s19731_s1 + $0xb90] sm:$0xf0]  ;;  %v9396_v14 = vor.u32 %v12478_v63, %v9393_v0  ;;  %v12442_v24 = vld [vmem:[%s19731_s1 + $0x964] sm:$0xf]  ;;  %v6556_v0 = vpop.f32.mrf.mxu0 }
 0x150   :  { %6807 = vmatpush.bf16.msra.mxu0 %v9156_v54  ;;  %v9121_v17 = vld [vmem:[%s19731_s1 + $0x870] sm:$0xf0]  ;;  %v9524_v26 = vor.u32 %v12510_v3, %v9521_v5  ;;  %v12474_v36 = vld [vmem:[%s19731_s1 + $0xa64] sm:$0xf]  ;;  %v6569_v5 = vpop.f32.mrf.mxu1 }
 0x151   :  { %6820 = vmatpush.bf16.msra.mxu1 %v9284_v56  ;;  %v9249_v34 = vld [vmem:[%s19731_s1 + $0x970] sm:$0xf0]  ;;  %v12506_v43 = vld [vmem:[%s19731_s1 + $0xb64] sm:$0xf]  ;;  %v9124_v47 = vor.u32 %v12410_v15, %v9121_v17 }
 0x152   :  { %6833 = vmatpush.bf16.msra.mxu2 %v9412_v57  ;;  %v9377_v40 = vld [vmem:[%s19731_s1 + $0xa70] sm:$0xf0]  ;;  %v9252_v48 = vor.u32 %v12442_v24, %v9249_v34  ;;  %v12406_v51 = vld [vmem:[%s19731_s1 + $0x844] sm:$0xf]  ;;  %v15407_v57 = vpop.f32.mrf.mxu2 }
 0x153   :  { %6846 = vmatpush.bf16.msra.mxu3 %v9540_v62  ;;  %v9505_v58 = vld [vmem:[%s19731_s1 + $0xb70] sm:$0xf0]  ;;  %v9380_v50 = vor.u32 %v12474_v36, %v9377_v40  ;;  %v12438_v54 = vld [vmem:[%s19731_s1 + $0x944] sm:$0xf]  ;;  %v15418_v62 = vpop.f32.mrf.mxu3 }
 0x154   :  { %6808 = vmatpush.bf16.msra.mxu0 %v9140_v7  ;;  %v9105_v53 = vld [vmem:[%s19731_s1 + $0x850] sm:$0xf0]  ;;  %v9508_v56 = vor.u32 %v12506_v43, %v9505_v58  ;;  %v12470_v60 = vld [vmem:[%s19731_s1 + $0xa44] sm:$0xf] }
 0x155   :  { %6821 = vmatpush.bf16.msra.mxu1 %v9268_v11  ;;  %v9233_v59 = vld [vmem:[%s19731_s1 + $0x950] sm:$0xf0]  ;;  %v12502_v19 = vld [vmem:[%s19731_s1 + $0xb44] sm:$0xf]  ;;  %v9108_v3 = vor.u32 %v12406_v51, %v9105_v53 }
 0x156   :  { %6834 = vmatpush.bf16.msra.mxu2 %v9396_v14  ;;  %v9361_v61 = vld [vmem:[%s19731_s1 + $0xa50] sm:$0xf0]  ;;  %v9236_v7 = vor.u32 %v12438_v54, %v9233_v59  ;;  %v12402_v14 = vld [vmem:[%s19731_s1 + $0x824] sm:$0xf] }
 0x157   :  { %6847 = vmatpush.bf16.msra.mxu3 %v9524_v26  ;;  %v9489_v63 = vld [vmem:[%s19731_s1 + $0xb50] sm:$0xf0]  ;;  %v9364_v11 = vor.u32 %v12470_v60, %v9361_v61  ;;  %v12434_v17 = vld [vmem:[%s19731_s1 + $0x924] sm:$0xf] }
 0x158   :  { %6809 = vmatpush.bf16.msra.mxu0 %v9124_v47  ;;  %v9089_v15 = vld [vmem:[%s19731_s1 + $0x830] sm:$0xf0]  ;;  %v9492_v24 = vor.u32 %v12502_v19, %v9489_v63  ;;  %v12466_v34 = vld [vmem:[%s19731_s1 + $0xa24] sm:$0xf] }
 0x159   :  { %6822 = vmatpush.bf16.msra.mxu1 %v9252_v48  ;;  %v9217_v26 = vld [vmem:[%s19731_s1 + $0x930] sm:$0xf0]  ;;  %v12498_v40 = vld [vmem:[%s19731_s1 + $0xb24] sm:$0xf]  ;;  %v9092_v58 = vor.u32 %v12402_v14, %v9089_v15 }
 0x15a   :  { %6835 = vmatpush.bf16.msra.mxu2 %v9380_v50  ;;  %v9345_v36 = vld [vmem:[%s19731_s1 + $0xa30] sm:$0xf0]  ;;  %v12398_v47 = vld [vmem:[%s19731_s1 + $0x804] sm:$0xf]  ;;  %v9220_v50 = vor.u32 %v12434_v17, %v9217_v26  ;;  %v6582_v63 = vpop.f32.mrf.mxu2 }
 0x15b   :  { %6848 = vmatpush.bf16.msra.mxu3 %v9508_v56  ;;  %v9473_v43 = vld [vmem:[%s19731_s1 + $0xb30] sm:$0xf0]  ;;  %v9348_v51 = vor.u32 %v12466_v34, %v9345_v36  ;;  %v12430_v53 = vld [vmem:[%s19731_s1 + $0x904] sm:$0xf] }
 0x15c   :  { %6810 = vmatpush.bf16.msra.mxu0 %v9108_v3  ;;  %v9073_v48 = vld [vmem:[%s19731_s1 + $0x810] sm:$0xf0]  ;;  %v12462_v56 = vld [vmem:[%s19731_s1 + $0xa04] sm:$0xf]  ;;  %v9476_v59 = vor.u32 %v12498_v40, %v9473_v43 }
 0x15d   :  { %6823 = vmatpush.bf16.msra.mxu1 %v9236_v7  ;;  %v9201_v54 = vld [vmem:[%s19731_s1 + $0x910] sm:$0xf0]  ;;  %v12494_v61 = vld [vmem:[%s19731_s1 + $0xb04] sm:$0xf]  ;;  %v6595_v7 = vpop.f32.mrf.mxu3 }
 0x15e   :  { %6836 = vmatpush.bf16.msra.mxu2 %v9364_v11  ;;  %v9329_v60 = vld [vmem:[%s19731_s1 + $0xa10] sm:$0xf0]  ;;  %v12554_v0 = vld [vmem:[%s19731_s1 + $0xce4] sm:$0xf]  ;;  %v9076_v11 = vor.u32 %v12398_v47, %v9073_v48 }
 0x15f   :  { %6849 = vmatpush.bf16.msra.mxu3 %v9492_v24  ;;  %v9457_v19 = vld [vmem:[%s19731_s1 + $0xb10] sm:$0xf0]  ;;  %v12586_v5 = vld [vmem:[%s19731_s1 + $0xde4] sm:$0xf]  ;;  %v9204_v24 = vor.u32 %v12430_v53, %v9201_v54  ;;  %v9332_v26 = vor.u32 %v12462_v56, %v9329_v60 }
 0x160   :  { %v9697_v3 = vld [vmem:[%s19731_s1 + $0xcf0] sm:$0xf0]  ;;  %6811 = vmatpush.bf16.msra.mxu0 %v9092_v58  ;;  %v12618_v15 = vld [vmem:[%s19731_s1 + $0xee4] sm:$0xf]  ;;  %v9460_v40 = vor.u32 %v12494_v61, %v9457_v19 }
 0x161   :  { %v9825_v14 = vld [vmem:[%s19731_s1 + $0xdf0] sm:$0xf0]  ;;  %6824 = vmatpush.bf16.msra.mxu1 %v9220_v50  ;;  %v12650_v34 = vld [vmem:[%s19731_s1 + $0xfe4] sm:$0xf]  ;;  %v9700_v43 = vor.u32 %v12554_v0, %v9697_v3 }
 0x162   :  { %v9953_v17 = vld [vmem:[%s19731_s1 + $0xef0] sm:$0xf0]  ;;  %6837 = vmatpush.bf16.msra.mxu2 %v9348_v51  ;;  %v9828_v58 = vor.u32 %v12586_v5, %v9825_v14  ;;  %v12550_v48 = vld [vmem:[%s19731_s1 + $0xcc4] sm:$0xf] }
 0x163   :  { %v10081_v36 = vld [vmem:[%s19731_s1 + $0xff0] sm:$0xf0]  ;;  %6850 = vmatpush.bf16.msra.mxu3 %v9476_v59  ;;  %v9956_v47 = vor.u32 %v12618_v15, %v9953_v17  ;;  %v12582_v51 = vld [vmem:[%s19731_s1 + $0xdc4] sm:$0xf] }
 0x164   :  { %v9681_v50 = vld [vmem:[%s19731_s1 + $0xcd0] sm:$0xf0]  ;;  %6812 = vmatpush.bf16.msra.mxu0 %v9076_v11  ;;  %v10084_v53 = vor.u32 %v12650_v34, %v10081_v36  ;;  %v12614_v56 = vld [vmem:[%s19731_s1 + $0xec4] sm:$0xf] }
 0x165   :  { %v9809_v54 = vld [vmem:[%s19731_s1 + $0xdd0] sm:$0xf0]  ;;  %6825 = vmatpush.bf16.msra.mxu1 %v9204_v24  ;;  %v12646_v60 = vld [vmem:[%s19731_s1 + $0xfc4] sm:$0xf]  ;;  %v9684_v19 = vor.u32 %v12550_v48, %v9681_v50 }
 0x166   :  { %v9937_v59 = vld [vmem:[%s19731_s1 + $0xed0] sm:$0xf0]  ;;  %6838 = vmatpush.bf16.msra.mxu2 %v9332_v26  ;;  %v9812_v63 = vor.u32 %v12582_v51, %v9809_v54  ;;  %v12546_v3 = vld [vmem:[%s19731_s1 + $0xca4] sm:$0xf]  ;;  %v15568_v54 = vpop.f32.mrf.mxu0 }
 0x167   :  { %v10065_v61 = vld [vmem:[%s19731_s1 + $0xfd0] sm:$0xf0]  ;;  %6851 = vmatpush.bf16.msra.mxu3 %v9460_v40  ;;  %v9940_v0 = vor.u32 %v12614_v56, %v9937_v59  ;;  %v12578_v7 = vld [vmem:[%s19731_s1 + $0xda4] sm:$0xf]  ;;  %6813 = vmatmul.bf16.vlgmr.msra.gmra.mxu0 %v13839_v25 }
 0x168   :  { %6857 = vmatpush.bf16.msrb.mxu0 %v9700_v43  ;;  %v9665_v5 = vld [vmem:[%s19731_s1 + $0xcb0] sm:$0xf0]  ;;  %v10068_v11 = vor.u32 %v12646_v60, %v10065_v61  ;;  %v12610_v15 = vld [vmem:[%s19731_s1 + $0xea4] sm:$0xf]  ;;  %6826 = vmatmul.bf16.vlgmr.msra.gmra.mxu1 %v13852_v30  ;;  %v15576_v61 = vpop.f32.mrf.mxu1 }
 0x169   :  { %6870 = vmatpush.bf16.msrb.mxu1 %v9828_v58  ;;  %v9793_v14 = vld [vmem:[%s19731_s1 + $0xdb0] sm:$0xf0]  ;;  %6839 = vmatmul.bf16.vlgmr.msra.gmra.mxu2 %v13850_v29  ;;  %v12642_v24 = vld [vmem:[%s19731_s1 + $0xfa4] sm:$0xf]  ;;  %v9668_v34 = vor.u32 %v12546_v3, %v9665_v5 }
 0x16a   :  { %6883 = vmatpush.bf16.msrb.mxu2 %v9956_v47  ;;  %v9921_v17 = vld [vmem:[%s19731_s1 + $0xeb0] sm:$0xf0]  ;;  %6852 = vmatmul.bf16.vlgmr.msra.gmra.mxu3 %v13860_v33  ;;  %v9796_v36 = vor.u32 %v12578_v7, %v9793_v14  ;;  %v12542_v43 = vld [vmem:[%s19731_s1 + $0xc84] sm:$0xf] }
 0x16b   :  { %6896 = vmatpush.bf16.msrb.mxu3 %v10084_v53  ;;  %v10049_v26 = vld [vmem:[%s19731_s1 + $0xfb0] sm:$0xf0]  ;;  %v9924_v40 = vor.u32 %v12610_v15, %v9921_v17  ;;  %v12574_v47 = vld [vmem:[%s19731_s1 + $0xd84] sm:$0xf] }
 0x16c   :  { %6858 = vmatpush.bf16.msrb.mxu0 %v9684_v19  ;;  %v9649_v58 = vld [vmem:[%s19731_s1 + $0xc90] sm:$0xf0]  ;;  %v10052_v48 = vor.u32 %v12642_v24, %v10049_v26  ;;  %v12606_v51 = vld [vmem:[%s19731_s1 + $0xe84] sm:$0xf] }
 0x16d   :  { %6871 = vmatpush.bf16.msrb.mxu1 %v9812_v63  ;;  %v9777_v50 = vld [vmem:[%s19731_s1 + $0xd90] sm:$0xf0]  ;;  %v12638_v56 = vld [vmem:[%s19731_s1 + $0xf84] sm:$0xf]  ;;  %v9652_v60 = vor.u32 %v12542_v43, %v9649_v58 }
 0x16e   :  { %6884 = vmatpush.bf16.msrb.mxu2 %v9940_v0  ;;  %v9905_v53 = vld [vmem:[%s19731_s1 + $0xe90] sm:$0xf0]  ;;  %v9780_v19 = vor.u32 %v12574_v47, %v9777_v50  ;;  %v12538_v0 = vld [vmem:[%s19731_s1 + $0xc64] sm:$0xf] }
 0x16f   :  { %6897 = vmatpush.bf16.msrb.mxu3 %v10068_v11  ;;  %v10033_v59 = vld [vmem:[%s19731_s1 + $0xf90] sm:$0xf0]  ;;  %v9908_v63 = vor.u32 %v12606_v51, %v9905_v53  ;;  %v12570_v5 = vld [vmem:[%s19731_s1 + $0xd64] sm:$0xf] }
 0x170   :  { %6859 = vmatpush.bf16.msrb.mxu0 %v9668_v34  ;;  %v9633_v3 = vld [vmem:[%s19731_s1 + $0xc70] sm:$0xf0]  ;;  %v10036_v7 = vor.u32 %v12638_v56, %v10033_v59  ;;  %v12602_v14 = vld [vmem:[%s19731_s1 + $0xe64] sm:$0xf]  ;;  %v6555_v56 = vadd.f32 %v15364_v1, %v15220_v55  ;;  %v15624_v59 = vpop.f32.mrf.mxu3 }
 0x171   :  { %6872 = vmatpush.bf16.msrb.mxu1 %v9796_v36  ;;  %v9761_v11 = vld [vmem:[%s19731_s1 + $0xd70] sm:$0xf0]  ;;  %v12634_v17 = vld [vmem:[%s19731_s1 + $0xf64] sm:$0xf]  ;;  %v9636_v26 = vor.u32 %v12538_v0, %v9633_v3  ;;  %v6621_v3 = vpop.f32.mrf.mxu1 }
 0x172   :  { %6885 = vmatpush.bf16.msrb.mxu2 %v9924_v40  ;;  %v9889_v15 = vld [vmem:[%s19731_s1 + $0xe70] sm:$0xf0]  ;;  %v9764_v34 = vor.u32 %v12570_v5, %v9761_v11  ;;  %v12534_v40 = vld [vmem:[%s19731_s1 + $0xc44] sm:$0xf] }
 0x173   :  { %6898 = vmatpush.bf16.msrb.mxu3 %v10052_v48  ;;  %v10017_v24 = vld [vmem:[%s19731_s1 + $0xf70] sm:$0xf0]  ;;  %v9892_v36 = vor.u32 %v12602_v14, %v9889_v15  ;;  %v12566_v58 = vld [vmem:[%s19731_s1 + $0xd44] sm:$0xf]  ;;  %v15611_v48 = vpop.f32.mrf.mxu2 }
 0x174   :  { %6860 = vmatpush.bf16.msrb.mxu0 %v9652_v60  ;;  %v9617_v43 = vld [vmem:[%s19731_s1 + $0xc50] sm:$0xf0]  ;;  %v10020_v47 = vor.u32 %v12634_v17, %v10017_v24  ;;  %v12598_v51 = vld [vmem:[%s19731_s1 + $0xe44] sm:$0xf] }
 0x175   :  { %6873 = vmatpush.bf16.msrb.mxu1 %v9780_v19  ;;  %v9745_v50 = vld [vmem:[%s19731_s1 + $0xd50] sm:$0xf0]  ;;  %v12630_v60 = vld [vmem:[%s19731_s1 + $0xf44] sm:$0xf]  ;;  %v9620_v0 = vor.u32 %v12534_v40, %v9617_v43 }
 0x176   :  { %6886 = vmatpush.bf16.msrb.mxu2 %v9908_v63  ;;  %v9873_v53 = vld [vmem:[%s19731_s1 + $0xe50] sm:$0xf0]  ;;  %v6608_v63 = vpop.f32.mrf.mxu0  ;;  %v9748_v5 = vor.u32 %v12566_v58, %v9745_v50  ;;  %v12530_v55 = vld [vmem:[%s19731_s1 + $0xc24] sm:$0xf] }
 0x177   :  { %6899 = vmatpush.bf16.msrb.mxu3 %v10036_v7  ;;  %v10001_v19 = vld [vmem:[%s19731_s1 + $0xf50] sm:$0xf0]  ;;  %v9876_v7 = vor.u32 %v12598_v51, %v9873_v53  ;;  %v12562_v11 = vld [vmem:[%s19731_s1 + $0xd24] sm:$0xf] }
 0x178   :  { %6861 = vmatpush.bf16.msrb.mxu0 %v9636_v26  ;;  %v9601_v1 = vld [vmem:[%s19731_s1 + $0xc30] sm:$0xf0]  ;;  %v10004_v14 = vor.u32 %v12630_v60, %v10001_v19  ;;  %v12594_v17 = vld [vmem:[%s19731_s1 + $0xe24] sm:$0xf]  ;;  %v6568_v26 = vadd.f32 %v15372_v52, %v6555_v56 }
 0x179   :  { %6874 = vmatpush.bf16.msrb.mxu1 %v9764_v34  ;;  %v9729_v15 = vld [vmem:[%s19731_s1 + $0xd30] sm:$0xf0]  ;;  %v12626_v34 = vld [vmem:[%s19731_s1 + $0xf24] sm:$0xf]  ;;  %v9604_v40 = vor.u32 %v12530_v55, %v9601_v1  ;;  %v6647_v55 = vpop.f32.mrf.mxu3 }
 0x17a   :  { %6887 = vmatpush.bf16.msrb.mxu2 %v9892_v36  ;;  %v9857_v24 = vld [vmem:[%s19731_s1 + $0xe30] sm:$0xf0]  ;;  %v12526_v43 = vld [vmem:[%s19731_s1 + $0xc04] sm:$0xf]  ;;  %v6581_v52 = vadd.f32 %v15407_v57, %v6568_v26 }
 0x17b   :  { %6900 = vmatpush.bf16.msrb.mxu3 %v10020_v47  ;;  %v9985_v36 = vld [vmem:[%s19731_s1 + $0xf30] sm:$0xf0]  ;;  %v9732_v47 = vor.u32 %v12562_v11, %v9729_v15  ;;  %v9860_v50 = vor.u32 %v12594_v17, %v9857_v24  ;;  %v12558_v51 = vld [vmem:[%s19731_s1 + $0xd04] sm:$0xf] }
 0x17c   :  { %6862 = vmatpush.bf16.msrb.mxu0 %v9620_v0  ;;  %v9585_v58 = vld [vmem:[%s19731_s1 + $0xc10] sm:$0xf0]  ;;  %v12590_v56 = vld [vmem:[%s19731_s1 + $0xe04] sm:$0xf]  ;;  %v9988_v60 = vor.u32 %v12626_v34, %v9985_v36  ;;  %v6634_v0 = vpop.f32.mrf.mxu2  ;;  %v6594_v17 = vadd.f32 %v15418_v62, %v6581_v52 }
 0x17d   :  { %6875 = vmatpush.bf16.msrb.mxu1 %v9748_v5  ;;  %v9713_v53 = vld [vmem:[%s19731_s1 + $0xd10] sm:$0xf0]  ;;  %v12622_v19 = vld [vmem:[%s19731_s1 + $0xf04] sm:$0xf]  ;;  %v9588_v1 = vor.u32 %v12526_v43, %v9585_v58 }
 0x17e   :  { %6888 = vmatpush.bf16.msrb.mxu2 %v9876_v7  ;;  %v9841_v57 = vld [vmem:[%s19731_s1 + $0xe10] sm:$0xf0]  ;;  %v12682_v3 = vld [vmem:[%s19731_s1 + $0x10e4] sm:$0xf]  ;;  %v9716_v24 = vor.u32 %v12558_v51, %v9713_v53  ;;  %v6607_v58 = vadd.f32 %v15568_v54, %v6594_v17 }
 0x17f   :  { %6901 = vmatpush.bf16.msrb.mxu3 %v10004_v14  ;;  %v9969_v63 = vld [vmem:[%s19731_s1 + $0xf10] sm:$0xf0]  ;;  %v12714_v7 = vld [vmem:[%s19731_s1 + $0x11e4] sm:$0xf]  ;;  %v9844_v26 = vor.u32 %v12590_v56, %v9841_v57 }
 0x180   :  { %v10209_v5 = vld [vmem:[%s19731_s1 + $0x10f0] sm:$0xf0]  ;;  %6863 = vmatpush.bf16.msrb.mxu0 %v9604_v40  ;;  %v12746_v14 = vld [vmem:[%s19731_s1 + $0x12e4] sm:$0xf]  ;;  %v9972_v40 = vor.u32 %v12622_v19, %v9969_v63  ;;  %v6620_v19 = vadd.f32 %v15576_v61, %v6607_v58 }
 0x181   :  { %v10337_v11 = vld [vmem:[%s19731_s1 + $0x11f0] sm:$0xf0]  ;;  %6876 = vmatpush.bf16.msrb.mxu1 %v9732_v47  ;;  %v12778_v34 = vld [vmem:[%s19731_s1 + $0x13e4] sm:$0xf]  ;;  %v10212_v43 = vor.u32 %v12682_v3, %v10209_v5 }
 0x182   :  { %v10465_v15 = vld [vmem:[%s19731_s1 + $0x12f0] sm:$0xf0]  ;;  %6889 = vmatpush.bf16.msrb.mxu2 %v9860_v50  ;;  %v10340_v0 = vor.u32 %v12714_v7, %v10337_v11  ;;  %v12678_v62 = vld [vmem:[%s19731_s1 + $0x10c4] sm:$0xf]  ;;  %v6633_v17 = vadd.f32 %v15611_v48, %v6620_v19 }
 0x183   :  { %v10593_v36 = vld [vmem:[%s19731_s1 + $0x13f0] sm:$0xf0]  ;;  %6902 = vmatpush.bf16.msrb.mxu3 %v9988_v60  ;;  %v10468_v55 = vor.u32 %v12746_v14, %v10465_v15  ;;  %v12710_v47 = vld [vmem:[%s19731_s1 + $0x11c4] sm:$0xf] }
 0x184   :  { %v10193_v52 = vld [vmem:[%s19731_s1 + $0x10d0] sm:$0xf0]  ;;  %6864 = vmatpush.bf16.msrb.mxu0 %v9588_v1  ;;  %v10596_v50 = vor.u32 %v12778_v34, %v10593_v36  ;;  %v12742_v51 = vld [vmem:[%s19731_s1 + $0x12c4] sm:$0xf] }
 0x185   :  { %v10321_v54 = vld [vmem:[%s19731_s1 + $0x11d0] sm:$0xf0]  ;;  %6877 = vmatpush.bf16.msrb.mxu1 %v9716_v24  ;;  %v12774_v56 = vld [vmem:[%s19731_s1 + $0x13c4] sm:$0xf]  ;;  %v10196_v57 = vor.u32 %v12678_v62, %v10193_v52 }
 0x186   :  { %v10449_v53 = vld [vmem:[%s19731_s1 + $0x12d0] sm:$0xf0]  ;;  %6890 = vmatpush.bf16.msrb.mxu2 %v9844_v26  ;;  %v10324_v63 = vor.u32 %v12710_v47, %v10321_v54  ;;  %v12674_v5 = vld [vmem:[%s19731_s1 + $0x10a4] sm:$0xf]  ;;  %v6646_v47 = vadd.f32 %v15624_v59, %v6633_v17 }
 0x187   :  { %v10577_v60 = vld [vmem:[%s19731_s1 + $0x13d0] sm:$0xf0]  ;;  %6903 = vmatpush.bf16.msrb.mxu3 %v9972_v40  ;;  %v10452_v3 = vor.u32 %v12742_v51, %v10449_v53  ;;  %v12706_v1 = vld [vmem:[%s19731_s1 + $0x11a4] sm:$0xf]  ;;  %6865 = vmatmul.bf16.vlgmr.msrb.gmra.mxu0 %v14049_v23 }
 0x188   :  { %6909 = vmatpush.bf16.msra.mxu0 %v10212_v43  ;;  %v10177_v7 = vld [vmem:[%s19731_s1 + $0x10b0] sm:$0xf0]  ;;  %v10580_v61 = vor.u32 %v12774_v56, %v10577_v60  ;;  %v12738_v14 = vld [vmem:[%s19731_s1 + $0x12a4] sm:$0xf]  ;;  %6878 = vmatmul.bf16.vlgmr.msrb.gmra.mxu1 %v14062_v31  ;;  %v6671_v56 = vpop.f32.mrf.mxu1 }
 0x189   :  { %6922 = vmatpush.bf16.msra.mxu1 %v10340_v0  ;;  %v10305_v11 = vld [vmem:[%s19731_s1 + $0x11b0] sm:$0xf0]  ;;  %6891 = vmatmul.bf16.vlgmr.msrb.gmra.mxu2 %v14060_v28  ;;  %v12770_v24 = vld [vmem:[%s19731_s1 + $0x13a4] sm:$0xf]  ;;  %v10180_v34 = vor.u32 %v12674_v5, %v10177_v7 }
 0x18a   :  { %6935 = vmatpush.bf16.msra.mxu2 %v10468_v55  ;;  %v10433_v15 = vld [vmem:[%s19731_s1 + $0x12b0] sm:$0xf0]  ;;  %6904 = vmatmul.bf16.vlgmr.msrb.gmra.mxu3 %v14070_v35  ;;  %v10308_v36 = vor.u32 %v12706_v1, %v10305_v11  ;;  %v12670_v40 = vld [vmem:[%s19731_s1 + $0x1084] sm:$0xf] }
 0x18b   :  { %6948 = vmatpush.bf16.msra.mxu3 %v10596_v50  ;;  %v10561_v26 = vld [vmem:[%s19731_s1 + $0x13b0] sm:$0xf0]  ;;  %v10436_v48 = vor.u32 %v12738_v14, %v10433_v15  ;;  %v12702_v58 = vld [vmem:[%s19731_s1 + $0x1184] sm:$0xf]  ;;  %v6658_v50 = vpop.f32.mrf.mxu0 }
 0x18c   :  { %6910 = vmatpush.bf16.msra.mxu0 %v10196_v57  ;;  %v10161_v43 = vld [vmem:[%s19731_s1 + $0x1090] sm:$0xf0]  ;;  %v10564_v0 = vor.u32 %v12770_v24, %v10561_v26  ;;  %v12734_v62 = vld [vmem:[%s19731_s1 + $0x1284] sm:$0xf]  ;;  %v6659_v60 = vadd.f32 %v6658_v50, %v6646_v47 }
 0x18d   :  { %6923 = vmatpush.bf16.msra.mxu1 %v10324_v63  ;;  %v10289_v55 = vld [vmem:[%s19731_s1 + $0x1190] sm:$0xf0]  ;;  %v12766_v54 = vld [vmem:[%s19731_s1 + $0x1384] sm:$0xf]  ;;  %v10164_v53 = vor.u32 %v12670_v40, %v10161_v43 }
 0x18e   :  { %6936 = vmatpush.bf16.msra.mxu2 %v10452_v3  ;;  %v10417_v52 = vld [vmem:[%s19731_s1 + $0x1290] sm:$0xf0]  ;;  %v10292_v57 = vor.u32 %v12702_v58, %v10289_v55  ;;  %v12666_v59 = vld [vmem:[%s19731_s1 + $0x1064] sm:$0xf]  ;;  %v6672_v17 = vadd.f32 %v6671_v56, %v6659_v60  ;;  %v6684_v43 = vpop.f32.mrf.mxu2 }
 0x18f   :  { %6949 = vmatpush.bf16.msra.mxu3 %v10580_v61  ;;  %v10545_v51 = vld [vmem:[%s19731_s1 + $0x1390] sm:$0xf0]  ;;  %v10420_v19 = vor.u32 %v12734_v62, %v10417_v52  ;;  %v12698_v3 = vld [vmem:[%s19731_s1 + $0x1164] sm:$0xf]  ;;  %v6697_v52 = vpop.f32.mrf.mxu3 }
 0x190   :  { %6911 = vmatpush.bf16.msra.mxu0 %v10180_v34  ;;  %v10145_v63 = vld [vmem:[%s19731_s1 + $0x1070] sm:$0xf0]  ;;  %v10548_v5 = vor.u32 %v12766_v54, %v10545_v51  ;;  %v12730_v1 = vld [vmem:[%s19731_s1 + $0x1264] sm:$0xf]  ;;  %v6685_v62 = vadd.f32 %v6684_v43, %v6672_v17 }
 0x191   :  { %6924 = vmatpush.bf16.msra.mxu1 %v10308_v36  ;;  %v10273_v7 = vld [vmem:[%s19731_s1 + $0x1170] sm:$0xf0]  ;;  %v12762_v11 = vld [vmem:[%s19731_s1 + $0x1364] sm:$0xf]  ;;  %v10148_v15 = vor.u32 %v12666_v59, %v10145_v63 }
 0x192   :  { %6937 = vmatpush.bf16.msra.mxu2 %v10436_v48  ;;  %v10401_v61 = vld [vmem:[%s19731_s1 + $0x1270] sm:$0xf0]  ;;  %v10276_v24 = vor.u32 %v12698_v3, %v10273_v7  ;;  %v12662_v34 = vld [vmem:[%s19731_s1 + $0x1044] sm:$0xf]  ;;  %v6698_v56 = vadd.f32 %v6697_v52, %v6685_v62 }
 0x193   :  { %6950 = vmatpush.bf16.msra.mxu3 %v10564_v0  ;;  %v10529_v14 = vld [vmem:[%s19731_s1 + $0x1370] sm:$0xf0]  ;;  %v10404_v26 = vor.u32 %v12730_v1, %v10401_v61  ;;  %v12694_v48 = vld [vmem:[%s19731_s1 + $0x1144] sm:$0xf]  ;;  %v6660_v54 = vpop.f32.mrf.mxu0 }
 0x194   :  { %6912 = vmatpush.bf16.msra.mxu0 %v10164_v53  ;;  %v10129_v36 = vld [vmem:[%s19731_s1 + $0x1050] sm:$0xf0]  ;;  %v10532_v40 = vor.u32 %v12762_v11, %v10529_v14  ;;  %v12726_v0 = vld [vmem:[%s19731_s1 + $0x1244] sm:$0xf]  ;;  %v6673_v53 = vpop.f32.mrf.mxu1  ;;  %7949 = vst [vmem:[%s19733_s2] sm:$0xff] %v6698_v56 }
 0x195   :  { %6925 = vmatpush.bf16.msra.mxu1 %v10292_v57  ;;  %v10257_v58 = vld [vmem:[%s19731_s1 + $0x1150] sm:$0xf0]  ;;  %v12758_v47 = vld [vmem:[%s19731_s1 + $0x1344] sm:$0xf]  ;;  %v10132_v51 = vor.u32 %v12662_v34, %v10129_v36 }
 0x196   :  { %6938 = vmatpush.bf16.msra.mxu2 %v10420_v19  ;;  %v10385_v55 = vld [vmem:[%s19731_s1 + $0x1250] sm:$0xf0]  ;;  %v10260_v60 = vor.u32 %v12694_v48, %v10257_v58  ;;  %v12658_v19 = vld [vmem:[%s19731_s1 + $0x1024] sm:$0xf] }
 0x197   :  { %6951 = vmatpush.bf16.msra.mxu3 %v10548_v5  ;;  %v10513_v50 = vld [vmem:[%s19731_s1 + $0x1350] sm:$0xf0]  ;;  %v10388_v57 = vor.u32 %v12726_v0, %v10385_v55  ;;  %v12690_v63 = vld [vmem:[%s19731_s1 + $0x1124] sm:$0xf]  ;;  %v6686_v55 = vpop.f32.mrf.mxu2 }
 0x198   :  { %6913 = vmatpush.bf16.msra.mxu0 %v10148_v15  ;;  %v10113_v59 = vld [vmem:[%s19731_s1 + $0x1030] sm:$0xf0]  ;;  %v10516_v3 = vor.u32 %v12758_v47, %v10513_v50  ;;  %v12722_v7 = vld [vmem:[%s19731_s1 + $0x1224] sm:$0xf]  ;;  %v6699_v50 = vpop.f32.mrf.mxu3 }
 0x199   :  { %6926 = vmatpush.bf16.msra.mxu1 %v10276_v24  ;;  %v10241_v5 = vld [vmem:[%s19731_s1 + $0x1130] sm:$0xf0]  ;;  %v12754_v61 = vld [vmem:[%s19731_s1 + $0x1324] sm:$0xf]  ;;  %v10116_v14 = vor.u32 %v12658_v19, %v10113_v59 }
 0x19a   :  { %6939 = vmatpush.bf16.msra.mxu2 %v10404_v26  ;;  %v10369_v1 = vld [vmem:[%s19731_s1 + $0x1230] sm:$0xf0]  ;;  %v12654_v15 = vld [vmem:[%s19731_s1 + $0x1004] sm:$0xf]  ;;  %v10244_v24 = vor.u32 %v12690_v63, %v10241_v5 }
 0x19b   :  { %6952 = vmatpush.bf16.msra.mxu3 %v10532_v40  ;;  %v10497_v11 = vld [vmem:[%s19731_s1 + $0x1330] sm:$0xf0]  ;;  %v10372_v26 = vor.u32 %v12722_v7, %v10369_v1  ;;  %v12686_v34 = vld [vmem:[%s19731_s1 + $0x1104] sm:$0xf] }
 0x19c   :  { %6914 = vmatpush.bf16.msra.mxu0 %v10132_v51  ;;  %v10097_v17 = vld [vmem:[%s19731_s1 + $0x1010] sm:$0xf0]  ;;  %v12718_v48 = vld [vmem:[%s19731_s1 + $0x1204] sm:$0xf]  ;;  %v10500_v40 = vor.u32 %v12754_v61, %v10497_v11 }
 0x19d   :  { %6927 = vmatpush.bf16.msra.mxu1 %v10260_v60  ;;  %v10225_v36 = vld [vmem:[%s19731_s1 + $0x1110] sm:$0xf0]  ;;  %v12750_v58 = vld [vmem:[%s19731_s1 + $0x1304] sm:$0xf]  ;;  %v10100_v54 = vor.u32 %v12654_v15, %v10097_v17 }
 0x19e   :  { %6940 = vmatpush.bf16.msra.mxu2 %v10388_v57  ;;  %v10353_v43 = vld [vmem:[%s19731_s1 + $0x1210] sm:$0xf0]  ;;  %v12810_v62 = vld [vmem:[%s19731_s1 + $0x14e4] sm:$0xf]  ;;  %v10228_v60 = vor.u32 %v12686_v34, %v10225_v36 }
 0x19f   :  { %6953 = vmatpush.bf16.msra.mxu3 %v10516_v3  ;;  %v10481_v0 = vld [vmem:[%s19731_s1 + $0x1310] sm:$0xf0]  ;;  %v12842_v47 = vld [vmem:[%s19731_s1 + $0x15e4] sm:$0xf]  ;;  %v10356_v57 = vor.u32 %v12718_v48, %v10353_v43 }
 0x1a0   :  { %v10721_v52 = vld [vmem:[%s19731_s1 + $0x14f0] sm:$0xf0]  ;;  %6915 = vmatpush.bf16.msra.mxu0 %v10116_v14  ;;  %v12874_v53 = vld [vmem:[%s19731_s1 + $0x16e4] sm:$0xf]  ;;  %v10484_v63 = vor.u32 %v12750_v58, %v10481_v0 }
 0x1a1   :  { %v10849_v51 = vld [vmem:[%s19731_s1 + $0x15f0] sm:$0xf0]  ;;  %6928 = vmatpush.bf16.msra.mxu1 %v10244_v24  ;;  %v12906_v19 = vld [vmem:[%s19731_s1 + $0x17e4] sm:$0xf]  ;;  %v10724_v3 = vor.u32 %v12810_v62, %v10721_v52 }
 0x1a2   :  { %v10977_v56 = vld [vmem:[%s19731_s1 + $0x16f0] sm:$0xf0]  ;;  %6941 = vmatpush.bf16.msra.mxu2 %v10372_v26  ;;  %v10852_v5 = vor.u32 %v12842_v47, %v10849_v51  ;;  %v12806_v1 = vld [vmem:[%s19731_s1 + $0x14c4] sm:$0xf] }
 0x1a3   :  { %v11105_v59 = vld [vmem:[%s19731_s1 + $0x17f0] sm:$0xf0]  ;;  %6954 = vmatpush.bf16.msra.mxu3 %v10500_v40  ;;  %v10980_v7 = vor.u32 %v12874_v53, %v10977_v56  ;;  %v12838_v11 = vld [vmem:[%s19731_s1 + $0x15c4] sm:$0xf] }
 0x1a4   :  { %v10705_v61 = vld [vmem:[%s19731_s1 + $0x14d0] sm:$0xf0]  ;;  %6916 = vmatpush.bf16.msra.mxu0 %v10100_v54  ;;  %v11108_v14 = vor.u32 %v12906_v19, %v11105_v59  ;;  %v12870_v17 = vld [vmem:[%s19731_s1 + $0x16c4] sm:$0xf] }
 0x1a5   :  { %v10833_v15 = vld [vmem:[%s19731_s1 + $0x15d0] sm:$0xf0]  ;;  %6929 = vmatpush.bf16.msra.mxu1 %v10228_v60  ;;  %v12902_v26 = vld [vmem:[%s19731_s1 + $0x17c4] sm:$0xf]  ;;  %v10708_v36 = vor.u32 %v12806_v1, %v10705_v61 }
 0x1a6   :  { %v10961_v24 = vld [vmem:[%s19731_s1 + $0x16d0] sm:$0xf0]  ;;  %6942 = vmatpush.bf16.msra.mxu2 %v10356_v57  ;;  %v10836_v48 = vor.u32 %v12838_v11, %v10833_v15  ;;  %v12802_v43 = vld [vmem:[%s19731_s1 + $0x14a4] sm:$0xf]  ;;  %v6710_v11 = vpop.f32.mrf.mxu0 }
 0x1a7   :  { %v11089_v34 = vld [vmem:[%s19731_s1 + $0x17d0] sm:$0xf0]  ;;  %6955 = vmatpush.bf16.msra.mxu3 %v10484_v63  ;;  %v10964_v40 = vor.u32 %v12870_v17, %v10961_v24  ;;  %v12834_v0 = vld [vmem:[%s19731_s1 + $0x15a4] sm:$0xf]  ;;  %6917 = vmatmul.bf16.vlgmr.msra.gmra.mxu0 %v14259_v37 }
 0x1a8   :  { %6961 = vmatpush.bf16.msrb.mxu0 %v10724_v3  ;;  %v10689_v58 = vld [vmem:[%s19731_s1 + $0x14b0] sm:$0xf0]  ;;  %v11092_v55 = vor.u32 %v12902_v26, %v11089_v34  ;;  %v12866_v52 = vld [vmem:[%s19731_s1 + $0x16a4] sm:$0xf]  ;;  %6930 = vmatmul.bf16.vlgmr.msra.gmra.mxu1 %v14272_v46  ;;  %v6723_v34 = vpop.f32.mrf.mxu1 }
 0x1a9   :  { %6974 = vmatpush.bf16.msrb.mxu1 %v10852_v5  ;;  %v10817_v62 = vld [vmem:[%s19731_s1 + $0x15b0] sm:$0xf0]  ;;  %6943 = vmatmul.bf16.vlgmr.msra.gmra.mxu2 %v14270_v45  ;;  %v12898_v50 = vld [vmem:[%s19731_s1 + $0x17a4] sm:$0xf]  ;;  %v10692_v51 = vor.u32 %v12802_v43, %v10689_v58  ;;  %v6724_v58 = vadd.f32 %v6723_v34, %v6710_v11 }
 0x1aa   :  { %6987 = vmatpush.bf16.msrb.mxu2 %v10980_v7  ;;  %v10945_v47 = vld [vmem:[%s19731_s1 + $0x16b0] sm:$0xf0]  ;;  %6956 = vmatmul.bf16.vlgmr.msra.gmra.mxu3 %v14280_v49  ;;  %v10820_v53 = vor.u32 %v12834_v0, %v10817_v62  ;;  %v12798_v60 = vld [vmem:[%s19731_s1 + $0x1484] sm:$0xf] }
 0x1ab   :  { %7000 = vmatpush.bf16.msrb.mxu3 %v11108_v14  ;;  %v11073_v54 = vld [vmem:[%s19731_s1 + $0x17b0] sm:$0xf0]  ;;  %v10948_v56 = vor.u32 %v12866_v52, %v10945_v47  ;;  %v12830_v19 = vld [vmem:[%s19731_s1 + $0x1584] sm:$0xf] }
 0x1ac   :  { %6962 = vmatpush.bf16.msrb.mxu0 %v10708_v36  ;;  %v10673_v57 = vld [vmem:[%s19731_s1 + $0x1490] sm:$0xf0]  ;;  %v11076_v59 = vor.u32 %v12898_v50, %v11073_v54  ;;  %v12862_v3 = vld [vmem:[%s19731_s1 + $0x1684] sm:$0xf] }
 0x1ad   :  { %6975 = vmatpush.bf16.msrb.mxu1 %v10836_v48  ;;  %v10801_v63 = vld [vmem:[%s19731_s1 + $0x1590] sm:$0xf0]  ;;  %v12894_v7 = vld [vmem:[%s19731_s1 + $0x1784] sm:$0xf]  ;;  %v10676_v61 = vor.u32 %v12798_v60, %v10673_v57 }
 0x1ae   :  { %6988 = vmatpush.bf16.msrb.mxu2 %v10964_v40  ;;  %v10929_v5 = vld [vmem:[%s19731_s1 + $0x1690] sm:$0xf0]  ;;  %v10804_v14 = vor.u32 %v12830_v19, %v10801_v63  ;;  %v12794_v17 = vld [vmem:[%s19731_s1 + $0x1464] sm:$0xf]  ;;  %v6749_v63 = vpop.f32.mrf.mxu3 }
 0x1af   :  { %7001 = vmatpush.bf16.msrb.mxu3 %v11092_v55  ;;  %v11057_v1 = vld [vmem:[%s19731_s1 + $0x1790] sm:$0xf0]  ;;  %v10932_v15 = vor.u32 %v12862_v3, %v10929_v5  ;;  %v12826_v26 = vld [vmem:[%s19731_s1 + $0x1564] sm:$0xf] }
 0x1b0   :  { %6963 = vmatpush.bf16.msrb.mxu0 %v10692_v51  ;;  %v10657_v24 = vld [vmem:[%s19731_s1 + $0x1470] sm:$0xf0]  ;;  %v11060_v36 = vor.u32 %v12894_v7, %v11057_v1  ;;  %v12858_v40 = vld [vmem:[%s19731_s1 + $0x1664] sm:$0xf] }
 0x1b1   :  { %6976 = vmatpush.bf16.msrb.mxu1 %v10820_v53  ;;  %v10785_v48 = vld [vmem:[%s19731_s1 + $0x1570] sm:$0xf0]  ;;  %v12890_v0 = vld [vmem:[%s19731_s1 + $0x1764] sm:$0xf]  ;;  %v10660_v62 = vor.u32 %v12794_v17, %v10657_v24  ;;  %v6736_v53 = vpop.f32.mrf.mxu2 }
 0x1b2   :  { %6989 = vmatpush.bf16.msrb.mxu2 %v10948_v56  ;;  %v10913_v43 = vld [vmem:[%s19731_s1 + $0x1670] sm:$0xf0]  ;;  %v10788_v52 = vor.u32 %v12826_v26, %v10785_v48  ;;  %v12790_v50 = vld [vmem:[%s19731_s1 + $0x1444] sm:$0xf]  ;;  %v6725_v26 = vpop.f32.mrf.mxu1 }
 0x1b3   :  { %7002 = vmatpush.bf16.msrb.mxu3 %v11076_v59  ;;  %v11041_v55 = vld [vmem:[%s19731_s1 + $0x1770] sm:$0xf0]  ;;  %v10916_v47 = vor.u32 %v12858_v40, %v10913_v43  ;;  %v12822_v51 = vld [vmem:[%s19731_s1 + $0x1544] sm:$0xf]  ;;  %v6737_v59 = vadd.f32 %v6736_v53, %v6724_v58 }
 0x1b4   :  { %6964 = vmatpush.bf16.msrb.mxu0 %v10676_v61  ;;  %v10641_v54 = vld [vmem:[%s19731_s1 + $0x1450] sm:$0xf0]  ;;  %v11044_v56 = vor.u32 %v12890_v0, %v11041_v55  ;;  %v12854_v57 = vld [vmem:[%s19731_s1 + $0x1644] sm:$0xf]  ;;  %v6712_v61 = vpop.f32.mrf.mxu0 }
 0x1b5   :  { %6977 = vmatpush.bf16.msrb.mxu1 %v10804_v14  ;;  %v10769_v60 = vld [vmem:[%s19731_s1 + $0x1550] sm:$0xf0]  ;;  %v12886_v3 = vld [vmem:[%s19731_s1 + $0x1744] sm:$0xf]  ;;  %v10644_v7 = vor.u32 %v12790_v50, %v10641_v54  ;;  %v16034_v1 = vadd.f32 %v6749_v63, %v6737_v59 }
 0x1b6   :  { %6990 = vmatpush.bf16.msrb.mxu2 %v10932_v15  ;;  %v10897_v19 = vld [vmem:[%s19731_s1 + $0x1650] sm:$0xf0]  ;;  %v10772_v11 = vor.u32 %v12822_v51, %v10769_v60  ;;  %v12786_v15 = vld [vmem:[%s19731_s1 + $0x1424] sm:$0xf]  ;;  %v6751_v59 = vpop.f32.mrf.mxu3 }
 0x1b7   :  { %7003 = vmatpush.bf16.msrb.mxu3 %v11060_v36  ;;  %v11025_v5 = vld [vmem:[%s19731_s1 + $0x1750] sm:$0xf0]  ;;  %v10900_v14 = vor.u32 %v12854_v57, %v10897_v19  ;;  %v12818_v24 = vld [vmem:[%s19731_s1 + $0x1524] sm:$0xf] }
 0x1b8   :  { %6965 = vmatpush.bf16.msrb.mxu0 %v10660_v62  ;;  %v10625_v17 = vld [vmem:[%s19731_s1 + $0x1430] sm:$0xf0]  ;;  %v11028_v34 = vor.u32 %v12886_v3, %v11025_v5  ;;  %v12850_v48 = vld [vmem:[%s19731_s1 + $0x1624] sm:$0xf] }
 0x1b9   :  { %6978 = vmatpush.bf16.msrb.mxu1 %v10788_v52  ;;  %v10753_v36 = vld [vmem:[%s19731_s1 + $0x1530] sm:$0xf0]  ;;  %v12882_v43 = vld [vmem:[%s19731_s1 + $0x1724] sm:$0xf]  ;;  %v10628_v0 = vor.u32 %v12786_v15, %v10625_v17  ;;  %v6738_v53 = vpop.f32.mrf.mxu2 }
 0x1ba   :  { %6991 = vmatpush.bf16.msrb.mxu2 %v10916_v47  ;;  %v10881_v40 = vld [vmem:[%s19731_s1 + $0x1630] sm:$0xf0]  ;;  %v12782_v55 = vld [vmem:[%s19731_s1 + $0x1404] sm:$0xf]  ;;  %v10756_v52 = vor.u32 %v12818_v24, %v10753_v36 }
 0x1bb   :  { %7004 = vmatpush.bf16.msrb.mxu3 %v11044_v56  ;;  %v11009_v58 = vld [vmem:[%s19731_s1 + $0x1730] sm:$0xf0]  ;;  %v10884_v47 = vor.u32 %v12850_v48, %v10881_v40  ;;  %v12814_v50 = vld [vmem:[%s19731_s1 + $0x1504] sm:$0xf] }
 0x1bc   :  { %6966 = vmatpush.bf16.msrb.mxu0 %v10644_v7  ;;  %v10609_v62 = vld [vmem:[%s19731_s1 + $0x1410] sm:$0xf0]  ;;  %v12846_v51 = vld [vmem:[%s19731_s1 + $0x1604] sm:$0xf]  ;;  %v11012_v56 = vor.u32 %v12882_v43, %v11009_v58 }
 0x1bd   :  { %6979 = vmatpush.bf16.msrb.mxu1 %v10772_v11  ;;  %v10737_v54 = vld [vmem:[%s19731_s1 + $0x1510] sm:$0xf0]  ;;  %v12878_v57 = vld [vmem:[%s19731_s1 + $0x1704] sm:$0xf]  ;;  %v10612_v7 = vor.u32 %v12782_v55, %v10609_v62 }
 0x1be   :  { %6992 = vmatpush.bf16.msrb.mxu2 %v10900_v14  ;;  %v10865_v60 = vld [vmem:[%s19731_s1 + $0x1610] sm:$0xf0]  ;;  %v12938_v63 = vld [vmem:[%s19731_s1 + $0x18e4] sm:$0xf]  ;;  %v10740_v15 = vor.u32 %v12814_v50, %v10737_v54 }
 0x1bf   :  { %7005 = vmatpush.bf16.msrb.mxu3 %v11028_v34  ;;  %v10993_v19 = vld [vmem:[%s19731_s1 + $0x1710] sm:$0xf0]  ;;  %v12970_v5 = vld [vmem:[%s19731_s1 + $0x19e4] sm:$0xf]  ;;  %v10868_v17 = vor.u32 %v12846_v51, %v10865_v60 }
 0x1c0   :  { %v11233_v3 = vld [vmem:[%s19731_s1 + $0x18f0] sm:$0xf0]  ;;  %6967 = vmatpush.bf16.msrb.mxu0 %v10628_v0  ;;  %v13002_v11 = vld [vmem:[%s19731_s1 + $0x1ae4] sm:$0xf]  ;;  %v10996_v34 = vor.u32 %v12878_v57, %v10993_v19 }
 0x1c1   :  { %v11361_v61 = vld [vmem:[%s19731_s1 + $0x19f0] sm:$0xf0]  ;;  %6980 = vmatpush.bf16.msrb.mxu1 %v10756_v52  ;;  %v13034_v24 = vld [vmem:[%s19731_s1 + $0x1be4] sm:$0xf]  ;;  %v11236_v36 = vor.u32 %v12938_v63, %v11233_v3 }
 0x1c2   :  { %v11489_v14 = vld [vmem:[%s19731_s1 + $0x1af0] sm:$0xf0]  ;;  %6993 = vmatpush.bf16.msrb.mxu2 %v10884_v47  ;;  %v11364_v48 = vor.u32 %v12970_v5, %v11361_v61  ;;  %v12934_v43 = vld [vmem:[%s19731_s1 + $0x18c4] sm:$0xf] }
 0x1c3   :  { %v11617_v26 = vld [vmem:[%s19731_s1 + $0x1bf0] sm:$0xf0]  ;;  %7006 = vmatpush.bf16.msrb.mxu3 %v11012_v56  ;;  %v11492_v40 = vor.u32 %v13002_v11, %v11489_v14  ;;  %v12966_v0 = vld [vmem:[%s19731_s1 + $0x19c4] sm:$0xf] }
 0x1c4   :  { %v11217_v58 = vld [vmem:[%s19731_s1 + $0x18d0] sm:$0xf0]  ;;  %6968 = vmatpush.bf16.msrb.mxu0 %v10612_v7  ;;  %v11620_v55 = vor.u32 %v13034_v24, %v11617_v26  ;;  %v12998_v52 = vld [vmem:[%s19731_s1 + $0x1ac4] sm:$0xf] }
 0x1c5   :  { %v11345_v62 = vld [vmem:[%s19731_s1 + $0x19d0] sm:$0xf0]  ;;  %6981 = vmatpush.bf16.msrb.mxu1 %v10740_v15  ;;  %v13030_v50 = vld [vmem:[%s19731_s1 + $0x1bc4] sm:$0xf]  ;;  %v11220_v51 = vor.u32 %v12934_v43, %v11217_v58 }
 0x1c6   :  { %v11473_v47 = vld [vmem:[%s19731_s1 + $0x1ad0] sm:$0xf0]  ;;  %6994 = vmatpush.bf16.msrb.mxu2 %v10868_v17  ;;  %v11348_v53 = vor.u32 %v12966_v0, %v11345_v62  ;;  %v12930_v60 = vld [vmem:[%s19731_s1 + $0x18a4] sm:$0xf] }
 0x1c7   :  { %v11601_v54 = vld [vmem:[%s19731_s1 + $0x1bd0] sm:$0xf0]  ;;  %7007 = vmatpush.bf16.msrb.mxu3 %v10996_v34  ;;  %v11476_v56 = vor.u32 %v12998_v52, %v11473_v47  ;;  %v12962_v19 = vld [vmem:[%s19731_s1 + $0x19a4] sm:$0xf]  ;;  %6969 = vmatmul.bf16.vlgmr.msrb.gmra.mxu0 %v14471_v8 }
 0x1c8   :  { %7013 = vmatpush.bf16.msra.mxu0 %v11236_v36  ;;  %v11201_v57 = vld [vmem:[%s19731_s1 + $0x18b0] sm:$0xf0]  ;;  %v11604_v59 = vor.u32 %v13030_v50, %v11601_v54  ;;  %v12994_v3 = vld [vmem:[%s19731_s1 + $0x1aa4] sm:$0xf]  ;;  %6982 = vmatmul.bf16.vlgmr.msrb.gmra.mxu1 %v14484_v13 }
 0x1c9   :  { %7026 = vmatpush.bf16.msra.mxu1 %v11364_v48  ;;  %v11329_v63 = vld [vmem:[%s19731_s1 + $0x19b0] sm:$0xf0]  ;;  %6995 = vmatmul.bf16.vlgmr.msrb.gmra.mxu2 %v14482_v12  ;;  %v13026_v7 = vld [vmem:[%s19731_s1 + $0x1ba4] sm:$0xf]  ;;  %v11204_v11 = vor.u32 %v12930_v60, %v11201_v57 }
 0x1ca   :  { %7039 = vmatpush.bf16.msra.mxu2 %v11492_v40  ;;  %v11457_v5 = vld [vmem:[%s19731_s1 + $0x1ab0] sm:$0xf0]  ;;  %7008 = vmatmul.bf16.vlgmr.msrb.gmra.mxu3 %v14492_v16  ;;  %v11332_v14 = vor.u32 %v12962_v19, %v11329_v63  ;;  %v12926_v17 = vld [vmem:[%s19731_s1 + $0x1884] sm:$0xf] }
 0x1cb   :  { %7052 = vmatpush.bf16.msra.mxu3 %v11620_v55  ;;  %v11585_v61 = vld [vmem:[%s19731_s1 + $0x1bb0] sm:$0xf0]  ;;  %v11460_v15 = vor.u32 %v12994_v3, %v11457_v5  ;;  %v12958_v26 = vld [vmem:[%s19731_s1 + $0x1984] sm:$0xf]  ;;  %v6762_v55 = vpop.f32.mrf.mxu0 }
 0x1cc   :  { %7014 = vmatpush.bf16.msra.mxu0 %v11220_v51  ;;  %v11185_v24 = vld [vmem:[%s19731_s1 + $0x1890] sm:$0xf0]  ;;  %v11588_v34 = vor.u32 %v13026_v7, %v11585_v61  ;;  %v12990_v48 = vld [vmem:[%s19731_s1 + $0x1a84] sm:$0xf]  ;;  %v6763_v51 = vadd.f32 %v6762_v55, %v16034_v1 }
 0x1cd   :  { %7027 = vmatpush.bf16.msra.mxu1 %v11348_v53  ;;  %v11313_v36 = vld [vmem:[%s19731_s1 + $0x1990] sm:$0xf0]  ;;  %v13022_v43 = vld [vmem:[%s19731_s1 + $0x1b84] sm:$0xf]  ;;  %v11188_v0 = vor.u32 %v12926_v17, %v11185_v24  ;;  %v6775_v53 = vpop.f32.mrf.mxu1 }
 0x1ce   :  { %7040 = vmatpush.bf16.msra.mxu2 %v11476_v56  ;;  %v11441_v40 = vld [vmem:[%s19731_s1 + $0x1a90] sm:$0xf0]  ;;  %v11316_v62 = vor.u32 %v12958_v26, %v11313_v36  ;;  %v12922_v47 = vld [vmem:[%s19731_s1 + $0x1864] sm:$0xf]  ;;  %v6776_v63 = vadd.f32 %v6775_v53, %v6763_v51 }
 0x1cf   :  { %7053 = vmatpush.bf16.msra.mxu3 %v11604_v59  ;;  %v11569_v58 = vld [vmem:[%s19731_s1 + $0x1b90] sm:$0xf0]  ;;  %v11444_v52 = vor.u32 %v12990_v48, %v11441_v40  ;;  %v12954_v54 = vld [vmem:[%s19731_s1 + $0x1964] sm:$0xf]  ;;  %v6801_v48 = vpop.f32.mrf.mxu3 }
 0x1d0   :  { %7015 = vmatpush.bf16.msra.mxu0 %v11204_v11  ;;  %v11169_v50 = vld [vmem:[%s19731_s1 + $0x1870] sm:$0xf0]  ;;  %v11572_v56 = vor.u32 %v13022_v43, %v11569_v58  ;;  %v12986_v57 = vld [vmem:[%s19731_s1 + $0x1a64] sm:$0xf] }
 0x1d1   :  { %7028 = vmatpush.bf16.msra.mxu1 %v11332_v14  ;;  %v11297_v60 = vld [vmem:[%s19731_s1 + $0x1970] sm:$0xf0]  ;;  %v13018_v59 = vld [vmem:[%s19731_s1 + $0x1b64] sm:$0xf]  ;;  %v11172_v3 = vor.u32 %v12922_v47, %v11169_v50 }
 0x1d2   :  { %7041 = vmatpush.bf16.msra.mxu2 %v11460_v15  ;;  %v11425_v19 = vld [vmem:[%s19731_s1 + $0x1a70] sm:$0xf0]  ;;  %v11300_v5 = vor.u32 %v12954_v54, %v11297_v60  ;;  %v12918_v61 = vld [vmem:[%s19731_s1 + $0x1844] sm:$0xf]  ;;  %v6788_v15 = vpop.f32.mrf.mxu2 }
 0x1d3   :  { %7054 = vmatpush.bf16.msra.mxu3 %v11588_v34  ;;  %v11553_v1 = vld [vmem:[%s19731_s1 + $0x1b70] sm:$0xf0]  ;;  %v11428_v7 = vor.u32 %v12986_v57, %v11425_v19  ;;  %v12950_v14 = vld [vmem:[%s19731_s1 + $0x1944] sm:$0xf]  ;;  %v6789_v36 = vadd.f32 %v6788_v15, %v6776_v63  ;;  %v6764_v55 = vpop.f32.mrf.mxu0 }
 0x1d4   :  { %7016 = vmatpush.bf16.msra.mxu0 %v11188_v0  ;;  %v11153_v11 = vld [vmem:[%s19731_s1 + $0x1850] sm:$0xf0]  ;;  %v11556_v17 = vor.u32 %v13018_v59, %v11553_v1  ;;  %v12982_v26 = vld [vmem:[%s19731_s1 + $0x1a44] sm:$0xf] }
 0x1d5   :  { %7029 = vmatpush.bf16.msra.mxu1 %v11316_v62  ;;  %v11281_v24 = vld [vmem:[%s19731_s1 + $0x1950] sm:$0xf0]  ;;  %v13014_v40 = vld [vmem:[%s19731_s1 + $0x1b44] sm:$0xf]  ;;  %v11156_v58 = vor.u32 %v12918_v61, %v11153_v11  ;;  %v16233_v0 = vadd.f32 %v6801_v48, %v6789_v36  ;;  %v6777_v51 = vpop.f32.mrf.mxu1 }
 0x1d6   :  { %7042 = vmatpush.bf16.msra.mxu2 %v11444_v52  ;;  %v11409_v34 = vld [vmem:[%s19731_s1 + $0x1a50] sm:$0xf0]  ;;  %v11284_v62 = vor.u32 %v12950_v14, %v11281_v24  ;;  %v12914_v47 = vld [vmem:[%s19731_s1 + $0x1824] sm:$0xf] }
 0x1d7   :  { %7055 = vmatpush.bf16.msra.mxu3 %v11572_v56  ;;  %v11537_v43 = vld [vmem:[%s19731_s1 + $0x1b50] sm:$0xf0]  ;;  %v11412_v52 = vor.u32 %v12982_v26, %v11409_v34  ;;  %v12946_v54 = vld [vmem:[%s19731_s1 + $0x1924] sm:$0xf]  ;;  %v6803_v36 = vpop.f32.mrf.mxu3 }
 0x1d8   :  { %7017 = vmatpush.bf16.msra.mxu0 %v11172_v3  ;;  %v11137_v50 = vld [vmem:[%s19731_s1 + $0x1830] sm:$0xf0]  ;;  %v11540_v53 = vor.u32 %v13014_v40, %v11537_v43  ;;  %v12978_v60 = vld [vmem:[%s19731_s1 + $0x1a24] sm:$0xf] }
 0x1d9   :  { %7030 = vmatpush.bf16.msra.mxu1 %v11300_v5  ;;  %v11265_v56 = vld [vmem:[%s19731_s1 + $0x1930] sm:$0xf0]  ;;  %v13010_v19 = vld [vmem:[%s19731_s1 + $0x1b24] sm:$0xf]  ;;  %v11140_v1 = vor.u32 %v12914_v47, %v11137_v50 }
 0x1da   :  { %7043 = vmatpush.bf16.msra.mxu2 %v11428_v7  ;;  %v11393_v57 = vld [vmem:[%s19731_s1 + $0x1a30] sm:$0xf0]  ;;  %v12910_v63 = vld [vmem:[%s19731_s1 + $0x1804] sm:$0xf]  ;;  %v11268_v5 = vor.u32 %v12946_v54, %v11265_v56  ;;  %v6790_v15 = vpop.f32.mrf.mxu2 }
 0x1db   :  { %7056 = vmatpush.bf16.msra.mxu3 %v11556_v17  ;;  %v11521_v59 = vld [vmem:[%s19731_s1 + $0x1b30] sm:$0xf0]  ;;  %v11396_v7 = vor.u32 %v12978_v60, %v11393_v57  ;;  %v12942_v61 = vld [vmem:[%s19731_s1 + $0x1904] sm:$0xf] }
 0x1dc   :  { %7018 = vmatpush.bf16.msra.mxu0 %v11156_v58  ;;  %v11121_v3 = vld [vmem:[%s19731_s1 + $0x1810] sm:$0xf0]  ;;  %v12974_v14 = vld [vmem:[%s19731_s1 + $0x1a04] sm:$0xf]  ;;  %v11524_v17 = vor.u32 %v13010_v19, %v11521_v59 }
 0x1dd   :  { %7031 = vmatpush.bf16.msra.mxu1 %v11284_v62  ;;  %v11249_v11 = vld [vmem:[%s19731_s1 + $0x1910] sm:$0xf0]  ;;  %v13006_v26 = vld [vmem:[%s19731_s1 + $0x1b04] sm:$0xf]  ;;  %v11124_v58 = vor.u32 %v12910_v63, %v11121_v3 }
 0x1de   :  { %7044 = vmatpush.bf16.msra.mxu2 %v11412_v52  ;;  %v11377_v24 = vld [vmem:[%s19731_s1 + $0x1a10] sm:$0xf0]  ;;  %v13066_v48 = vld [vmem:[%s19731_s1 + $0x1ce4] sm:$0xf]  ;;  %v11252_v47 = vor.u32 %v12942_v61, %v11249_v11 }
 0x1df   :  { %7057 = vmatpush.bf16.msra.mxu3 %v11540_v53  ;;  %v11505_v34 = vld [vmem:[%s19731_s1 + $0x1b10] sm:$0xf0]  ;;  %v13098_v43 = vld [vmem:[%s19731_s1 + $0x1de4] sm:$0xf]  ;;  %v11380_v50 = vor.u32 %v12974_v14, %v11377_v24 }
 0x1e0   :  { %v11745_v40 = vld [vmem:[%s19731_s1 + $0x1cf0] sm:$0xf0]  ;;  %7019 = vmatpush.bf16.msra.mxu0 %v11140_v1  ;;  %v13130_v62 = vld [vmem:[%s19731_s1 + $0x1ee4] sm:$0xf]  ;;  %v11508_v53 = vor.u32 %v13006_v26, %v11505_v34 }
 0x1e1   :  { %v11873_v55 = vld [vmem:[%s19731_s1 + $0x1df0] sm:$0xf0]  ;;  %7032 = vmatpush.bf16.msra.mxu1 %v11268_v5  ;;  %v13162_v54 = vld [vmem:[%s19731_s1 + $0x1fe4] sm:$0xf]  ;;  %v11748_v56 = vor.u32 %v13066_v48, %v11745_v40 }
 0x1e2   :  { %v12001_v52 = vld [vmem:[%s19731_s1 + $0x1ef0] sm:$0xf0]  ;;  %7045 = vmatpush.bf16.msra.mxu2 %v11396_v7  ;;  %v11876_v60 = vor.u32 %v13098_v43, %v11873_v55  ;;  %v13062_v19 = vld [vmem:[%s19731_s1 + $0x1cc4] sm:$0xf] }
 0x1e3   :  { %v12129_v51 = vld [vmem:[%s19731_s1 + $0x1ff0] sm:$0xf0]  ;;  %7058 = vmatpush.bf16.msra.mxu3 %v11524_v17  ;;  %v12004_v57 = vor.u32 %v13130_v62, %v12001_v52  ;;  %v13094_v1 = vld [vmem:[%s19731_s1 + $0x1dc4] sm:$0xf] }
 0x1e4   :  { %v11729_v59 = vld [vmem:[%s19731_s1 + $0x1cd0] sm:$0xf0]  ;;  %7020 = vmatpush.bf16.msra.mxu0 %v11124_v58  ;;  %v12132_v63 = vor.u32 %v13162_v54, %v12129_v51  ;;  %v13126_v5 = vld [vmem:[%s19731_s1 + $0x1ec4] sm:$0xf] }
 0x1e5   :  { %v11857_v3 = vld [vmem:[%s19731_s1 + $0x1dd0] sm:$0xf0]  ;;  %7033 = vmatpush.bf16.msra.mxu1 %v11252_v47  ;;  %v13158_v61 = vld [vmem:[%s19731_s1 + $0x1fc4] sm:$0xf]  ;;  %v11732_v14 = vor.u32 %v13062_v19, %v11729_v59  ;;  %v6814_v19 = vpop.f32.mrf.mxu0 }
 0x1e6   :  { %v11985_v7 = vld [vmem:[%s19731_s1 + $0x1ed0] sm:$0xf0]  ;;  %7046 = vmatpush.bf16.msra.mxu2 %v11380_v50  ;;  %v11860_v15 = vor.u32 %v13094_v1, %v11857_v3  ;;  %v13058_v24 = vld [vmem:[%s19731_s1 + $0x1ca4] sm:$0xf] }
 0x1e7   :  { %v12113_v11 = vld [vmem:[%s19731_s1 + $0x1fd0] sm:$0xf0]  ;;  %7059 = vmatpush.bf16.msra.mxu3 %v11508_v53  ;;  %v11988_v17 = vor.u32 %v13126_v5, %v11985_v7  ;;  %v13090_v34 = vld [vmem:[%s19731_s1 + $0x1da4] sm:$0xf]  ;;  %7021 = vmatmul.bf16.vlgmr.msra.gmra.mxu0 %v14684_v2  ;;  %v6827_v5 = vpop.f32.mrf.mxu1 }
 0x1e8   :  { %7065 = vmatpush.bf16.msrb.mxu0 %v11748_v56  ;;  %v11713_v26 = vld [vmem:[%s19731_s1 + $0x1cb0] sm:$0xf0]  ;;  %v12116_v36 = vor.u32 %v13158_v61, %v12113_v11  ;;  %v13122_v40 = vld [vmem:[%s19731_s1 + $0x1ea4] sm:$0xf]  ;;  %7034 = vmatmul.bf16.vlgmr.msra.gmra.mxu1 %v14697_v10 }
 0x1e9   :  { %7078 = vmatpush.bf16.msrb.mxu1 %v11876_v60  ;;  %v11841_v48 = vld [vmem:[%s19731_s1 + $0x1db0] sm:$0xf0]  ;;  %7047 = vmatmul.bf16.vlgmr.msra.gmra.mxu2 %v14695_v9  ;;  %v13154_v58 = vld [vmem:[%s19731_s1 + $0x1fa4] sm:$0xf]  ;;  %v11716_v62 = vor.u32 %v13058_v24, %v11713_v26 }
 0x1ea   :  { %7091 = vmatpush.bf16.msrb.mxu2 %v12004_v57  ;;  %v11969_v43 = vld [vmem:[%s19731_s1 + $0x1eb0] sm:$0xf0]  ;;  %7060 = vmatmul.bf16.vlgmr.msra.gmra.mxu3 %v14705_v22  ;;  %v11844_v52 = vor.u32 %v13090_v34, %v11841_v48  ;;  %v13054_v50 = vld [vmem:[%s19731_s1 + $0x1c84] sm:$0xf] }
 0x1eb   :  { %7104 = vmatpush.bf16.msrb.mxu3 %v12132_v63  ;;  %v12097_v55 = vld [vmem:[%s19731_s1 + $0x1fb0] sm:$0xf0]  ;;  %v11972_v47 = vor.u32 %v13122_v40, %v11969_v43  ;;  %v13086_v51 = vld [vmem:[%s19731_s1 + $0x1d84] sm:$0xf]  ;;  %v6815_v63 = vadd.f32 %v6814_v19, %v16233_v0 }
 0x1ec   :  { %7066 = vmatpush.bf16.msrb.mxu0 %v11732_v14  ;;  %v11697_v54 = vld [vmem:[%s19731_s1 + $0x1c90] sm:$0xf0]  ;;  %v12100_v53 = vor.u32 %v13154_v58, %v12097_v55  ;;  %v13118_v60 = vld [vmem:[%s19731_s1 + $0x1e84] sm:$0xf] }
 0x1ed   :  { %7079 = vmatpush.bf16.msrb.mxu1 %v11860_v15  ;;  %v11825_v56 = vld [vmem:[%s19731_s1 + $0x1d90] sm:$0xf0]  ;;  %v13150_v59 = vld [vmem:[%s19731_s1 + $0x1f84] sm:$0xf]  ;;  %v11700_v3 = vor.u32 %v13054_v50, %v11697_v54  ;;  %v6840_v50 = vpop.f32.mrf.mxu2 }
 0x1ee   :  { %7092 = vmatpush.bf16.msrb.mxu2 %v11988_v17  ;;  %v11953_v57 = vld [vmem:[%s19731_s1 + $0x1e90] sm:$0xf0]  ;;  %v11828_v7 = vor.u32 %v13086_v51, %v11825_v56  ;;  %v13050_v11 = vld [vmem:[%s19731_s1 + $0x1c64] sm:$0xf]  ;;  %v6828_v17 = vadd.f32 %v6827_v5, %v6815_v63 }
 0x1ef   :  { %7105 = vmatpush.bf16.msrb.mxu3 %v12116_v36  ;;  %v12081_v1 = vld [vmem:[%s19731_s1 + $0x1f90] sm:$0xf0]  ;;  %v11956_v61 = vor.u32 %v13118_v60, %v11953_v57  ;;  %v13082_v15 = vld [vmem:[%s19731_s1 + $0x1d64] sm:$0xf]  ;;  %v6853_v60 = vpop.f32.mrf.mxu3  ;;  %v6829_v63 = vpop.f32.mrf.mxu1 }
 0x1f0   :  { %7067 = vmatpush.bf16.msrb.mxu0 %v11716_v62  ;;  %v11681_v14 = vld [vmem:[%s19731_s1 + $0x1c70] sm:$0xf0]  ;;  %v12084_v0 = vor.u32 %v13150_v59, %v12081_v1  ;;  %v13114_v26 = vld [vmem:[%s19731_s1 + $0x1e64] sm:$0xf]  ;;  %v6841_v56 = vadd.f32 %v6840_v50, %v6828_v17  ;;  %v6816_v59 = vpop.f32.mrf.mxu0  ;;  %v8423_v63 = vld [vmem:[%s19731_s1 + $0x2e8] sm:$0xf] }
 0x1f1   :  { %7080 = vmatpush.bf16.msrb.mxu1 %v11844_v52  ;;  %v11809_v24 = vld [vmem:[%s19731_s1 + $0x1d70] sm:$0xf0]  ;;  %v13146_v36 = vld [vmem:[%s19731_s1 + $0x1f64] sm:$0xf]  ;;  %v11684_v40 = vor.u32 %v13050_v11, %v11681_v14 }
 0x1f2   :  { %7093 = vmatpush.bf16.msrb.mxu2 %v11972_v47  ;;  %v11937_v34 = vld [vmem:[%s19731_s1 + $0x1e70] sm:$0xf0]  ;;  %v11812_v43 = vor.u32 %v13082_v15, %v11809_v24  ;;  %v13046_v55 = vld [vmem:[%s19731_s1 + $0x1c44] sm:$0xf] }
 0x1f3   :  { %7106 = vmatpush.bf16.msrb.mxu3 %v12100_v53  ;;  %v12065_v48 = vld [vmem:[%s19731_s1 + $0x1f70] sm:$0xf0]  ;;  %v11940_v58 = vor.u32 %v13114_v26, %v11937_v34  ;;  %v13078_v52 = vld [vmem:[%s19731_s1 + $0x1d44] sm:$0xf] }
 0x1f4   :  { %7068 = vmatpush.bf16.msrb.mxu0 %v11700_v3  ;;  %v11665_v62 = vld [vmem:[%s19731_s1 + $0x1c50] sm:$0xf0]  ;;  %v12068_v47 = vor.u32 %v13146_v36, %v12065_v48  ;;  %v13110_v51 = vld [vmem:[%s19731_s1 + $0x1e44] sm:$0xf]  ;;  %v16432_v3 = vadd.f32 %v6853_v60, %v6841_v56  ;;  %v8167_v56 = vld [vmem:[%s19731_s1 + $0xe8] sm:$0xf] }
 0x1f5   :  { %7081 = vmatpush.bf16.msrb.mxu1 %v11828_v7  ;;  %v11793_v54 = vld [vmem:[%s19731_s1 + $0x1d50] sm:$0xf0]  ;;  %v13142_v57 = vld [vmem:[%s19731_s1 + $0x1f44] sm:$0xf]  ;;  %v11668_v1 = vor.u32 %v13046_v55, %v11665_v62  ;;  %v12173_v60 = vld [vmem:[%s19731_s1 + $0xf4] sm:$0xf0] }
 0x1f6   :  { %7094 = vmatpush.bf16.msrb.mxu2 %v11956_v61  ;;  %v11921_v53 = vld [vmem:[%s19731_s1 + $0x1e50] sm:$0xf0]  ;;  %v11796_v5 = vor.u32 %v13078_v52, %v11793_v54  ;;  %v13042_v61 = vld [vmem:[%s19731_s1 + $0x1c24] sm:$0xf] }
 0x1f7   :  { %7107 = vmatpush.bf16.msrb.mxu3 %v12084_v0  ;;  %v12049_v19 = vld [vmem:[%s19731_s1 + $0x1f50] sm:$0xf0]  ;;  %v11924_v7 = vor.u32 %v13110_v51, %v11921_v53  ;;  %v13074_v14 = vld [vmem:[%s19731_s1 + $0x1d24] sm:$0xf]  ;;  %v6842_v53 = vpop.f32.mrf.mxu2 }
 0x1f8   :  { %7069 = vmatpush.bf16.msrb.mxu0 %v11684_v40  ;;  %v11649_v11 = vld [vmem:[%s19731_s1 + $0x1c30] sm:$0xf0]  ;;  %v12052_v15 = vor.u32 %v13142_v57, %v12049_v19  ;;  %v13106_v17 = vld [vmem:[%s19731_s1 + $0x1e24] sm:$0xf]  ;;  %v8295_v57 = vld [vmem:[%s19731_s1 + $0x1e8] sm:$0xf]  ;;  %v6855_v19 = vpop.f32.mrf.mxu3 }
 0x1f9   :  { %7082 = vmatpush.bf16.msrb.mxu1 %v11812_v43  ;;  %v11777_v0 = vld [vmem:[%s19731_s1 + $0x1d30] sm:$0xf0]  ;;  %v13138_v26 = vld [vmem:[%s19731_s1 + $0x1f24] sm:$0xf]  ;;  %v11652_v36 = vor.u32 %v13042_v61, %v11649_v11  ;;  %v8551_v11 = vld [vmem:[%s19731_s1 + $0x3e8] sm:$0xf] }
 0x1fa   :  { %7095 = vmatpush.bf16.msrb.mxu2 %v11940_v58  ;;  %v11905_v24 = vld [vmem:[%s19731_s1 + $0x1e30] sm:$0xf0]  ;;  %v13038_v48 = vld [vmem:[%s19731_s1 + $0x1c04] sm:$0xf]  ;;  %v11780_v43 = vor.u32 %v13074_v14, %v11777_v0  ;;  %v12269_v14 = vld [vmem:[%s19731_s1 + $0x3f4] sm:$0xf0]  ;;  %v8168_v0 = vor.u32 %v12173_v60, %v8167_v56 }
 0x1fb   :  { %7108 = vmatpush.bf16.msrb.mxu3 %v12068_v47  ;;  %v12033_v34 = vld [vmem:[%s19731_s1 + $0x1f30] sm:$0xf0]  ;;  %v11908_v58 = vor.u32 %v13106_v17, %v11905_v24  ;;  %v13070_v55 = vld [vmem:[%s19731_s1 + $0x1d04] sm:$0xf]  ;;  %v8263_v53 = vld [vmem:[%s19731_s1 + $0x1a8] sm:$0xf] }
 0x1fc   :  { %7070 = vmatpush.bf16.msrb.mxu0 %v11668_v1  ;;  %v11633_v40 = vld [vmem:[%s19731_s1 + $0x1c10] sm:$0xf0]  ;;  %v13102_v52 = vld [vmem:[%s19731_s1 + $0x1e04] sm:$0xf]  ;;  %v12036_v47 = vor.u32 %v13138_v26, %v12033_v34  ;;  %v12205_v1 = vld [vmem:[%s19731_s1 + $0x1f4] sm:$0xf0] }
 0x1fd   :  { %7083 = vmatpush.bf16.msrb.mxu1 %v11796_v5  ;;  %v11761_v62 = vld [vmem:[%s19731_s1 + $0x1d10] sm:$0xf0]  ;;  %v13134_v54 = vld [vmem:[%s19731_s1 + $0x1f04] sm:$0xf]  ;;  %v11636_v59 = vor.u32 %v13038_v48, %v11633_v40  ;;  %v12237_v5 = vld [vmem:[%s19731_s1 + $0x2f4] sm:$0xf0]  ;;  %v8296_v17 = vor.u32 %v12205_v1, %v8295_v57  ;;  %v8552_v48 = vor.u32 %v12269_v14, %v8551_v11 }
 0x1fe   :  { %7096 = vmatpush.bf16.msrb.mxu2 %v11924_v7  ;;  %v11889_v50 = vld [vmem:[%s19731_s1 + $0x1e10] sm:$0xf0]  ;;  %v11764_v7 = vor.u32 %v13070_v55, %v11761_v62  ;;  %v8424_v24 = vor.u32 %v12237_v5, %v8423_v63  ;;  %v8151_v26 = vld [vmem:[%s19731_s1 + $0xc8] sm:$0xf]  ;;  %v12169_v34 = vld [vmem:[%s19731_s1 + $0xd4] sm:$0xf0] }
 0x1ff   :  { %7109 = vmatpush.bf16.msrb.mxu3 %v12052_v15  ;;  %v12017_v51 = vld [vmem:[%s19731_s1 + $0x1f10] sm:$0xf0]  ;;  %v11892_v61 = vor.u32 %v13102_v52, %v11889_v50  ;;  %v12201_v40 = vld [vmem:[%s19731_s1 + $0x1d4] sm:$0xf0]  ;;  %v8535_v55 = vld [vmem:[%s19731_s1 + $0x3c8] sm:$0xf]  ;;  %v8152_v52 = vor.u32 %v12169_v34, %v8151_v26 }
 0x200   :  { %7071 = vmatpush.bf16.msrb.mxu0 %v11652_v36  ;;  %v12020_v15 = vor.u32 %v13134_v54, %v12017_v51  ;;  %v8279_v36 = vld [vmem:[%s19731_s1 + $0x1c8] sm:$0xf]  ;;  %v12265_v62 = vld [vmem:[%s19731_s1 + $0x3d4] sm:$0xf0] }
 0x201   :  { %7084 = vmatpush.bf16.msrb.mxu1 %v11780_v43  ;;  %v8407_v43 = vld [vmem:[%s19731_s1 + $0x2c8] sm:$0xf]  ;;  %v12165_v51 = vld [vmem:[%s19731_s1 + $0xb4] sm:$0xf0]  ;;  %v8536_v56 = vor.u32 %v12265_v62, %v8535_v55 }
 0x202   :  { %7097 = vmatpush.bf16.msrb.mxu2 %v11908_v58  ;;  %v12233_v58 = vld [vmem:[%s19731_s1 + $0x2d4] sm:$0xf0]  ;;  %v8135_v54 = vld [vmem:[%s19731_s1 + $0xa8] sm:$0xf] }
 0x203   :  { %7110 = vmatpush.bf16.msrb.mxu3 %v12036_v47  ;;  %v8280_v47 = vor.u32 %v12201_v40, %v8279_v36  ;;  %v8408_v50 = vor.u32 %v12233_v58, %v8407_v43  ;;  %v12197_v60 = vld [vmem:[%s19731_s1 + $0x1b4] sm:$0xf0]  ;;  %v8391_v57 = vld [vmem:[%s19731_s1 + $0x2a8] sm:$0xf]  ;;  %v8136_v63 = vor.u32 %v12165_v51, %v8135_v54 }
 0x204   :  { %7072 = vmatpush.bf16.msrb.mxu0 %v11636_v59  ;;  %v12229_v19 = vld [vmem:[%s19731_s1 + $0x2b4] sm:$0xf0]  ;;  %v8519_v59 = vld [vmem:[%s19731_s1 + $0x3a8] sm:$0xf]  ;;  %v8264_v5 = vor.u32 %v12197_v60, %v8263_v53  ;;  %v6866_v26 = vpop.f32.mrf.mxu0 }
 0x205   :  { %7085 = vmatpush.bf16.msrb.mxu1 %v11764_v7  ;;  %v12261_v1 = vld [vmem:[%s19731_s1 + $0x3b4] sm:$0xf0]  ;;  %v8392_v7 = vor.u32 %v12229_v19, %v8391_v57  ;;  %v8247_v14 = vld [vmem:[%s19731_s1 + $0x188] sm:$0xf]  ;;  %v6879_v43 = vpop.f32.mrf.mxu1 }
 0x206   :  { %7098 = vmatpush.bf16.msrb.mxu2 %v11892_v61  ;;  %v8119_v61 = vld [vmem:[%s19731_s1 + $0x88] sm:$0xf]  ;;  %v12161_v11 = vld [vmem:[%s19731_s1 + $0x94] sm:$0xf0] }
 0x207   :  { %7111 = vmatpush.bf16.msrb.mxu3 %v12020_v15  ;;  %7073 = vmatmul.bf16.vlgmr.msrb.gmra.mxu0 %v14897_v18  ;;  %v8520_v15 = vor.u32 %v12261_v1, %v8519_v59  ;;  %v8503_v34 = vld [vmem:[%s19731_s1 + $0x388] sm:$0xf]  ;;  %v12257_v36 = vld [vmem:[%s19731_s1 + $0x394] sm:$0xf0]  ;;  %v8120_v40 = vor.u32 %v12161_v11, %v8119_v61 }
 0x208   :  { %7117 = vmatpush.bf16.msra.mxu0 %v8168_v0  ;;  %7086 = vmatmul.bf16.vlgmr.msrb.gmra.mxu1 %v14910_v32  ;;  %v12193_v0 = vld [vmem:[%s19731_s1 + $0x194] sm:$0xf0]  ;;  %v8103_v62 = vld [vmem:[%s19731_s1 + $0x68] sm:$0xf] }
 0x209   :  { %7130 = vmatpush.bf16.msra.mxu1 %v8296_v17  ;;  %7099 = vmatmul.bf16.vlgmr.msrb.gmra.mxu2 %v14908_v27  ;;  %v8375_v17 = vld [vmem:[%s19731_s1 + $0x288] sm:$0xf]  ;;  %v8248_v58 = vor.u32 %v12193_v0, %v8247_v14  ;;  %v12189_v54 = vld [vmem:[%s19731_s1 + $0x174] sm:$0xf0] }
 0x20a   :  { %7143 = vmatpush.bf16.msra.mxu2 %v8424_v24  ;;  %7112 = vmatmul.bf16.vlgmr.msrb.gmra.mxu3 %v14918_v39  ;;  %v12225_v24 = vld [vmem:[%s19731_s1 + $0x294] sm:$0xf0]  ;;  %v8359_v51 = vld [vmem:[%s19731_s1 + $0x268] sm:$0xf] }
 0x20b   :  { %7156 = vmatpush.bf16.msra.mxu3 %v8552_v48  ;;  %v6867_v48 = vadd.f32 %v6866_v26, %v16432_v3  ;;  %v8376_v55 = vor.u32 %v12225_v24, %v8375_v17  ;;  %v8504_v3 = vor.u32 %v12257_v36, %v8503_v34  ;;  %v12221_v53 = vld [vmem:[%s19731_s1 + $0x274] sm:$0xf0]  ;;  %v8087_v1 = vld [vmem:[%s19731_s1 + $0x48] sm:$0xf] }
 0x20c   :  { %7118 = vmatpush.bf16.msra.mxu0 %v8152_v52  ;;  %v12157_v52 = vld [vmem:[%s19731_s1 + $0x74] sm:$0xf0]  ;;  %v8360_v59 = vor.u32 %v12221_v53, %v8359_v51  ;;  %v6892_v61 = vpop.f32.mrf.mxu2  ;;  %v8343_v14 = vld [vmem:[%s19731_s1 + $0x248] sm:$0xf]  ;;  %v6868_v34 = vpop.f32.mrf.mxu0 }
 0x20d   :  { %7131 = vmatpush.bf16.msra.mxu1 %v8280_v47  ;;  %v8231_v47 = vld [vmem:[%s19731_s1 + $0x168] sm:$0xf]  ;;  %v12253_v60 = vld [vmem:[%s19731_s1 + $0x374] sm:$0xf0]  ;;  %v8104_v57 = vor.u32 %v12157_v52, %v8103_v62  ;;  %v6905_v17 = vpop.f32.mrf.mxu3 }
 0x20e   :  { %7144 = vmatpush.bf16.msra.mxu2 %v8408_v50  ;;  %v6880_v50 = vadd.f32 %v6879_v43, %v6867_v48  ;;  %v8232_v19 = vor.u32 %v12189_v54, %v8231_v47  ;;  %v12185_v11 = vld [vmem:[%s19731_s1 + $0x154] sm:$0xf0]  ;;  %v8471_v24 = vld [vmem:[%s19731_s1 + $0x348] sm:$0xf]  ;;  %v6881_v48 = vpop.f32.mrf.mxu1 }
 0x20f   :  { %7157 = vmatpush.bf16.msra.mxu3 %v8536_v56  ;;  %v8487_v56 = vld [vmem:[%s19731_s1 + $0x368] sm:$0xf]  ;;  %v12249_v26 = vld [vmem:[%s19731_s1 + $0x354] sm:$0xf0] }
 0x210   :  { %7119 = vmatpush.bf16.msra.mxu0 %v8136_v63  ;;  %v12153_v63 = vld [vmem:[%s19731_s1 + $0x54] sm:$0xf0]  ;;  %v6893_v0 = vadd.f32 %v6892_v61, %v6880_v50  ;;  %v8199_v52 = vld [vmem:[%s19731_s1 + $0x128] sm:$0xf]  ;;  %v8472_v47 = vor.u32 %v12249_v26, %v8471_v24 }
 0x211   :  { %7132 = vmatpush.bf16.msra.mxu1 %v8264_v5  ;;  %v8215_v5 = vld [vmem:[%s19731_s1 + $0x148] sm:$0xf]  ;;  %v8088_v36 = vor.u32 %v12153_v63, %v8087_v1  ;;  %v12149_v62 = vld [vmem:[%s19731_s1 + $0x34] sm:$0xf0] }
 0x212   :  { %7145 = vmatpush.bf16.msra.mxu2 %v8392_v7  ;;  %v8488_v7 = vor.u32 %v12253_v60, %v8487_v56  ;;  %v8216_v43 = vor.u32 %v12185_v11, %v8215_v5  ;;  %v8327_v50 = vld [vmem:[%s19731_s1 + $0x228] sm:$0xf]  ;;  %v12213_v54 = vld [vmem:[%s19731_s1 + $0x234] sm:$0xf0] }
 0x213   :  { %7158 = vmatpush.bf16.msra.mxu3 %v8520_v15  ;;  %v12217_v15 = vld [vmem:[%s19731_s1 + $0x254] sm:$0xf0]  ;;  %v8455_v51 = vld [vmem:[%s19731_s1 + $0x328] sm:$0xf] }
 0x214   :  { %7120 = vmatpush.bf16.msra.mxu0 %v8120_v40  ;;  %v16631_v40 = vadd.f32 %v6905_v17, %v6893_v0  ;;  %v12245_v53 = vld [vmem:[%s19731_s1 + $0x334] sm:$0xf0]  ;;  %v8055_v60 = vld [vmem:[%s19731_s1 + $0x8] sm:$0xf] }
 0x215   :  { %7133 = vmatpush.bf16.msra.mxu1 %v8248_v58  ;;  %v8344_v58 = vor.u32 %v12217_v15, %v8343_v14  ;;  %v8183_v1 = vld [vmem:[%s19731_s1 + $0x108] sm:$0xf]  ;;  %v12177_v63 = vld [vmem:[%s19731_s1 + $0x114] sm:$0xf0]  ;;  %v6894_v15 = vpop.f32.mrf.mxu2  ;;  %v6907_v26 = vpop.f32.mrf.mxu3 }
 0x216   :  { %7146 = vmatpush.bf16.msra.mxu2 %v8376_v55  ;;  %v8071_v55 = vld [vmem:[%s19731_s1 + $0x28] sm:$0xf]  ;;  %v12209_v61 = vld [vmem:[%s19731_s1 + $0x214] sm:$0xf0] }
 0x217   :  { %7159 = vmatpush.bf16.msra.mxu3 %v8504_v3  ;;  %v12181_v3 = vld [vmem:[%s19731_s1 + $0x134] sm:$0xf0]  ;;  %v8072_v56 = vor.u32 %v12149_v62, %v8071_v55  ;;  %v8311_v5 = vld [vmem:[%s19731_s1 + $0x208] sm:$0xf] }
 0x218   :  { %7121 = vmatpush.bf16.msra.mxu0 %v8104_v57  ;;  %v12145_v57 = vld [vmem:[%s19731_s1 + $0x14] sm:$0xf0]  ;;  %v8439_v11 = vld [vmem:[%s19731_s1 + $0x308] sm:$0xf]  ;;  %v8312_v55 = vor.u32 %v12209_v61, %v8311_v5 }
 0x219   :  { %7134 = vmatpush.bf16.msra.mxu1 %v8232_v19  ;;  %v8200_v19 = vor.u32 %v12181_v3, %v8199_v52  ;;  %v12241_v14 = vld [vmem:[%s19731_s1 + $0x314] sm:$0xf0]  ;;  %v8679_v0 = vld [vmem:[%s19731_s1 + $0x4e8] sm:$0xf]  ;;  %v8056_v34 = vor.u32 %v12145_v57, %v8055_v60 }
 0x21a   :  { %7147 = vmatpush.bf16.msra.mxu2 %v8360_v59  ;;  %v8328_v59 = vor.u32 %v12213_v54, %v8327_v50  ;;  %v12301_v17 = vld [vmem:[%s19731_s1 + $0x4f4] sm:$0xf0]  ;;  %v8807_v24 = vld [vmem:[%s19731_s1 + $0x5e8] sm:$0xf] }
 0x21b   :  { %7160 = vmatpush.bf16.msra.mxu3 %v8488_v7  ;;  %v8456_v7 = vor.u32 %v12245_v53, %v8455_v51  ;;  %v8935_v48 = vld [vmem:[%s19731_s1 + $0x6e8] sm:$0xf]  ;;  %v12397_v52 = vld [vmem:[%s19731_s1 + $0x7f4] sm:$0xf0]  ;;  %v8680_v3 = vor.u32 %v12301_v17, %v8679_v0 }
 0x21c   :  { %7122 = vmatpush.bf16.msra.mxu0 %v8088_v36  ;;  %v12333_v36 = vld [vmem:[%s19731_s1 + $0x5f4] sm:$0xf0]  ;;  %v9063_v62 = vld [vmem:[%s19731_s1 + $0x7e8] sm:$0xf] }
 0x21d   :  { %7135 = vmatpush.bf16.msra.mxu1 %v8216_v43  ;;  %v12365_v43 = vld [vmem:[%s19731_s1 + $0x6f4] sm:$0xf0]  ;;  %v8808_v50 = vor.u32 %v12333_v36, %v8807_v24  ;;  %v8663_v51 = vld [vmem:[%s19731_s1 + $0x4c8] sm:$0xf]  ;;  %v9064_v60 = vor.u32 %v12397_v52, %v9063_v62 }
 0x21e   :  { %7148 = vmatpush.bf16.msra.mxu2 %v8344_v58  ;;  %v8184_v58 = vor.u32 %v12177_v63, %v8183_v1  ;;  %v8936_v54 = vor.u32 %v12365_v43, %v8935_v48  ;;  %v12297_v53 = vld [vmem:[%s19731_s1 + $0x4d4] sm:$0xf0]  ;;  %v9047_v1 = vld [vmem:[%s19731_s1 + $0x7c8] sm:$0xf] }
 0x21f   :  { %7161 = vmatpush.bf16.msra.mxu3 %v8472_v47  ;;  %v8440_v47 = vor.u32 %v12241_v14, %v8439_v11  ;;  %v12329_v57 = vld [vmem:[%s19731_s1 + $0x5d4] sm:$0xf0]  ;;  %v8664_v5 = vor.u32 %v12297_v53, %v8663_v51  ;;  %v8647_v11 = vld [vmem:[%s19731_s1 + $0x4a8] sm:$0xf] }
 0x220   :  { %7123 = vmatpush.bf16.msra.mxu0 %v8072_v56  ;;  %v8791_v56 = vld [vmem:[%s19731_s1 + $0x5c8] sm:$0xf]  ;;  %v12393_v63 = vld [vmem:[%s19731_s1 + $0x7d4] sm:$0xf0] }
 0x221   :  { %7136 = vmatpush.bf16.msra.mxu1 %v8200_v19  ;;  %v8919_v19 = vld [vmem:[%s19731_s1 + $0x6c8] sm:$0xf]  ;;  %v12293_v14 = vld [vmem:[%s19731_s1 + $0x4b4] sm:$0xf0]  ;;  %v9048_v0 = vor.u32 %v12393_v63, %v9047_v1 }
 0x222   :  { %7149 = vmatpush.bf16.msra.mxu2 %v8328_v59  ;;  %v12361_v59 = vld [vmem:[%s19731_s1 + $0x6d4] sm:$0xf0]  ;;  %v8775_v15 = vld [vmem:[%s19731_s1 + $0x5a8] sm:$0xf]  ;;  %v8648_v48 = vor.u32 %v12293_v14, %v8647_v11 }
 0x223   :  { %7162 = vmatpush.bf16.msra.mxu3 %v8456_v7  ;;  %v8792_v7 = vor.u32 %v12329_v57, %v8791_v56  ;;  %v8920_v61 = vor.u32 %v12361_v59, %v8919_v19  ;;  %v12325_v17 = vld [vmem:[%s19731_s1 + $0x5b4] sm:$0xf0]  ;;  %v8903_v24 = vld [vmem:[%s19731_s1 + $0x6a8] sm:$0xf] }
 0x224   :  { %7124 = vmatpush.bf16.msra.mxu0 %v8056_v34  ;;  %v12357_v26 = vld [vmem:[%s19731_s1 + $0x6b4] sm:$0xf0]  ;;  %v9031_v34 = vld [vmem:[%s19731_s1 + $0x7a8] sm:$0xf]  ;;  %v8776_v43 = vor.u32 %v12325_v17, %v8775_v15  ;;  %v6918_v51 = vpop.f32.mrf.mxu0 }
 0x225   :  { %7137 = vmatpush.bf16.msra.mxu1 %v8184_v58  ;;  %v12389_v36 = vld [vmem:[%s19731_s1 + $0x7b4] sm:$0xf0]  ;;  %v8904_v58 = vor.u32 %v12357_v26, %v8903_v24  ;;  %v8759_v52 = vld [vmem:[%s19731_s1 + $0x588] sm:$0xf]  ;;  %v6931_v19 = vpop.f32.mrf.mxu1 }
 0x226   :  { %7150 = vmatpush.bf16.msra.mxu2 %v8312_v55  ;;  %v8631_v55 = vld [vmem:[%s19731_s1 + $0x488] sm:$0xf]  ;;  %v12289_v62 = vld [vmem:[%s19731_s1 + $0x494] sm:$0xf0] }
 0x227   :  { %7163 = vmatpush.bf16.msra.mxu3 %v8440_v47  ;;  %7125 = vmatmul.bf16.vlgmr.msra.gmra.mxu0 %v13487_v20  ;;  %v9032_v47 = vor.u32 %v12389_v36, %v9031_v34  ;;  %v9015_v53 = vld [vmem:[%s19731_s1 + $0x788] sm:$0xf]  ;;  %v12385_v56 = vld [vmem:[%s19731_s1 + $0x794] sm:$0xf0]  ;;  %v8632_v57 = vor.u32 %v12289_v62, %v8631_v55 }
 0x228   :  { %7169 = vmatpush.bf16.msrb.mxu0 %v8680_v3  ;;  %7138 = vmatmul.bf16.vlgmr.msra.gmra.mxu1 %v13490_v21  ;;  %v12321_v3 = vld [vmem:[%s19731_s1 + $0x594] sm:$0xf0]  ;;  %v8615_v63 = vld [vmem:[%s19731_s1 + $0x468] sm:$0xf] }
 0x229   :  { %7182 = vmatpush.bf16.msrb.mxu1 %v8808_v50  ;;  %7151 = vmatmul.bf16.vlgmr.msra.gmra.mxu2 %v13455_v4  ;;  %v8887_v50 = vld [vmem:[%s19731_s1 + $0x688] sm:$0xf]  ;;  %v8760_v59 = vor.u32 %v12321_v3, %v8759_v52  ;;  %v12317_v11 = vld [vmem:[%s19731_s1 + $0x574] sm:$0xf0] }
 0x22a   :  { %7195 = vmatpush.bf16.msrb.mxu2 %v8936_v54  ;;  %7164 = vmatmul.bf16.vlgmr.msra.gmra.mxu3 %v13460_v6  ;;  %v12353_v54 = vld [vmem:[%s19731_s1 + $0x694] sm:$0xf0]  ;;  %v8871_v14 = vld [vmem:[%s19731_s1 + $0x668] sm:$0xf] }
 0x22b   :  { %7208 = vmatpush.bf16.msrb.mxu3 %v9064_v60  ;;  %v6919_v60 = vadd.f32 %v6918_v51, %v16631_v40  ;;  %v8888_v1 = vor.u32 %v12353_v54, %v8887_v50  ;;  %v9016_v40 = vor.u32 %v12385_v56, %v9015_v53  ;;  %v12349_v15 = vld [vmem:[%s19731_s1 + $0x674] sm:$0xf0]  ;;  %v8599_v36 = vld [vmem:[%s19731_s1 + $0x448] sm:$0xf] }
 0x22c   :  { %7170 = vmatpush.bf16.msrb.mxu0 %v8664_v5  ;;  %v12285_v5 = vld [vmem:[%s19731_s1 + $0x474] sm:$0xf0]  ;;  %v8872_v34 = vor.u32 %v12349_v15, %v8871_v14  ;;  %v6944_v55 = vpop.f32.mrf.mxu2  ;;  %v8855_v52 = vld [vmem:[%s19731_s1 + $0x648] sm:$0xf]  ;;  %v6920_v53 = vpop.f32.mrf.mxu0 }
 0x22d   :  { %7183 = vmatpush.bf16.msrb.mxu1 %v8792_v7  ;;  %v8743_v7 = vld [vmem:[%s19731_s1 + $0x568] sm:$0xf]  ;;  %v12381_v17 = vld [vmem:[%s19731_s1 + $0x774] sm:$0xf0]  ;;  %v8616_v24 = vor.u32 %v12285_v5, %v8615_v63  ;;  %v6957_v50 = vpop.f32.mrf.mxu3 }
 0x22e   :  { %7196 = vmatpush.bf16.msrb.mxu2 %v8920_v61  ;;  %v6932_v61 = vadd.f32 %v6931_v19, %v6919_v60  ;;  %v8744_v26 = vor.u32 %v12317_v11, %v8743_v7  ;;  %v12313_v62 = vld [vmem:[%s19731_s1 + $0x554] sm:$0xf0]  ;;  %v8983_v54 = vld [vmem:[%s19731_s1 + $0x748] sm:$0xf]  ;;  %v6933_v60 = vpop.f32.mrf.mxu1 }
 0x22f   :  { %7209 = vmatpush.bf16.msrb.mxu3 %v9048_v0  ;;  %v8999_v0 = vld [vmem:[%s19731_s1 + $0x768] sm:$0xf]  ;;  %v12377_v51 = vld [vmem:[%s19731_s1 + $0x754] sm:$0xf0] }
 0x230   :  { %7171 = vmatpush.bf16.msrb.mxu0 %v8648_v48  ;;  %v12281_v48 = vld [vmem:[%s19731_s1 + $0x454] sm:$0xf0]  ;;  %v6945_v3 = vadd.f32 %v6944_v55, %v6932_v61  ;;  %v8711_v5 = vld [vmem:[%s19731_s1 + $0x528] sm:$0xf]  ;;  %v8984_v7 = vor.u32 %v12377_v51, %v8983_v54 }
 0x231   :  { %7184 = vmatpush.bf16.msrb.mxu1 %v8776_v43  ;;  %v8727_v43 = vld [vmem:[%s19731_s1 + $0x548] sm:$0xf]  ;;  %v8600_v56 = vor.u32 %v12281_v48, %v8599_v36  ;;  %v12277_v63 = vld [vmem:[%s19731_s1 + $0x434] sm:$0xf0] }
 0x232   :  { %7197 = vmatpush.bf16.msrb.mxu2 %v8904_v58  ;;  %v9000_v58 = vor.u32 %v12381_v17, %v8999_v0  ;;  %v8728_v19 = vor.u32 %v12313_v62, %v8727_v43  ;;  %v8839_v61 = vld [vmem:[%s19731_s1 + $0x628] sm:$0xf]  ;;  %v12341_v11 = vld [vmem:[%s19731_s1 + $0x634] sm:$0xf0] }
 0x233   :  { %7210 = vmatpush.bf16.msrb.mxu3 %v9032_v47  ;;  %v12345_v47 = vld [vmem:[%s19731_s1 + $0x654] sm:$0xf0]  ;;  %v8967_v14 = vld [vmem:[%s19731_s1 + $0x728] sm:$0xf] }
 0x234   :  { %7172 = vmatpush.bf16.msrb.mxu0 %v8632_v57  ;;  %v16830_v57 = vadd.f32 %v6957_v50, %v6945_v3  ;;  %v12373_v15 = vld [vmem:[%s19731_s1 + $0x734] sm:$0xf0]  ;;  %v8567_v17 = vld [vmem:[%s19731_s1 + $0x408] sm:$0xf] }
 0x235   :  { %7185 = vmatpush.bf16.msrb.mxu1 %v8760_v59  ;;  %v8856_v59 = vor.u32 %v12345_v47, %v8855_v52  ;;  %v8695_v36 = vld [vmem:[%s19731_s1 + $0x508] sm:$0xf]  ;;  %v12305_v48 = vld [vmem:[%s19731_s1 + $0x514] sm:$0xf0]  ;;  %v6946_v47 = vpop.f32.mrf.mxu2  ;;  %v6959_v51 = vpop.f32.mrf.mxu3 }
 0x236   :  { %7198 = vmatpush.bf16.msrb.mxu2 %v8888_v1  ;;  %v8583_v1 = vld [vmem:[%s19731_s1 + $0x428] sm:$0xf]  ;;  %v12337_v55 = vld [vmem:[%s19731_s1 + $0x614] sm:$0xf0] }
 0x237   :  { %7211 = vmatpush.bf16.msrb.mxu3 %v9016_v40  ;;  %v12309_v40 = vld [vmem:[%s19731_s1 + $0x534] sm:$0xf0]  ;;  %v8584_v0 = vor.u32 %v12277_v63, %v8583_v1  ;;  %v8823_v43 = vld [vmem:[%s19731_s1 + $0x608] sm:$0xf] }
 0x238   :  { %7173 = vmatpush.bf16.msrb.mxu0 %v8616_v24  ;;  %v12273_v24 = vld [vmem:[%s19731_s1 + $0x414] sm:$0xf0]  ;;  %v8951_v62 = vld [vmem:[%s19731_s1 + $0x708] sm:$0xf]  ;;  %v8824_v1 = vor.u32 %v12337_v55, %v8823_v43 }
 0x239   :  { %7186 = vmatpush.bf16.msrb.mxu1 %v8744_v26  ;;  %v8712_v26 = vor.u32 %v12309_v40, %v8711_v5  ;;  %v12369_v52 = vld [vmem:[%s19731_s1 + $0x714] sm:$0xf0]  ;;  %v9191_v3 = vld [vmem:[%s19731_s1 + $0x8e8] sm:$0xf]  ;;  %v8568_v53 = vor.u32 %v12273_v24, %v8567_v17 }
 0x23a   :  { %7199 = vmatpush.bf16.msrb.mxu2 %v8872_v34  ;;  %v8840_v34 = vor.u32 %v12341_v11, %v8839_v61  ;;  %v12429_v50 = vld [vmem:[%s19731_s1 + $0x8f4] sm:$0xf0]  ;;  %v9319_v54 = vld [vmem:[%s19731_s1 + $0x9e8] sm:$0xf] }
 0x23b   :  { %7212 = vmatpush.bf16.msrb.mxu3 %v9000_v58  ;;  %v8968_v58 = vor.u32 %v12373_v15, %v8967_v14  ;;  %v9447_v60 = vld [vmem:[%s19731_s1 + $0xae8] sm:$0xf]  ;;  %v12525_v5 = vld [vmem:[%s19731_s1 + $0xbf4] sm:$0xf0]  ;;  %v9192_v40 = vor.u32 %v12429_v50, %v9191_v3 }
 0x23c   :  { %7174 = vmatpush.bf16.msrb.mxu0 %v8600_v56  ;;  %v12461_v56 = vld [vmem:[%s19731_s1 + $0x9f4] sm:$0xf0]  ;;  %v9575_v63 = vld [vmem:[%s19731_s1 + $0xbe8] sm:$0xf] }
 0x23d   :  { %7187 = vmatpush.bf16.msrb.mxu1 %v8728_v19  ;;  %v12493_v19 = vld [vmem:[%s19731_s1 + $0xaf4] sm:$0xf0]  ;;  %v9320_v61 = vor.u32 %v12461_v56, %v9319_v54  ;;  %v9175_v14 = vld [vmem:[%s19731_s1 + $0x8c8] sm:$0xf]  ;;  %v9576_v17 = vor.u32 %v12525_v5, %v9575_v63 }
 0x23e   :  { %7200 = vmatpush.bf16.msrb.mxu2 %v8856_v59  ;;  %v8696_v59 = vor.u32 %v12305_v48, %v8695_v36  ;;  %v9448_v11 = vor.u32 %v12493_v19, %v9447_v60  ;;  %v12425_v15 = vld [vmem:[%s19731_s1 + $0x8d4] sm:$0xf0]  ;;  %v9559_v36 = vld [vmem:[%s19731_s1 + $0xbc8] sm:$0xf] }
 0x23f   :  { %7213 = vmatpush.bf16.msrb.mxu3 %v8984_v7  ;;  %v8952_v7 = vor.u32 %v12369_v52, %v8951_v62  ;;  %v12457_v24 = vld [vmem:[%s19731_s1 + $0x9d4] sm:$0xf0]  ;;  %v9176_v43 = vor.u32 %v12425_v15, %v9175_v14  ;;  %v9159_v62 = vld [vmem:[%s19731_s1 + $0x8a8] sm:$0xf] }
 0x240   :  { %7175 = vmatpush.bf16.msrb.mxu0 %v8584_v0  ;;  %v9303_v0 = vld [vmem:[%s19731_s1 + $0x9c8] sm:$0xf]  ;;  %v12521_v48 = vld [vmem:[%s19731_s1 + $0xbd4] sm:$0xf0] }
 0x241   :  { %7188 = vmatpush.bf16.msrb.mxu1 %v8712_v26  ;;  %v9431_v26 = vld [vmem:[%s19731_s1 + $0xac8] sm:$0xf]  ;;  %v12421_v52 = vld [vmem:[%s19731_s1 + $0x8b4] sm:$0xf0]  ;;  %v9560_v3 = vor.u32 %v12521_v48, %v9559_v36 }
 0x242   :  { %7201 = vmatpush.bf16.msrb.mxu2 %v8840_v34  ;;  %v12489_v34 = vld [vmem:[%s19731_s1 + $0xad4] sm:$0xf0]  ;;  %v9287_v47 = vld [vmem:[%s19731_s1 + $0x9a8] sm:$0xf]  ;;  %v9160_v60 = vor.u32 %v12421_v52, %v9159_v62 }
 0x243   :  { %7214 = vmatpush.bf16.msrb.mxu3 %v8968_v58  ;;  %v9304_v58 = vor.u32 %v12457_v24, %v9303_v0  ;;  %v9432_v55 = vor.u32 %v12489_v34, %v9431_v26  ;;  %v12453_v50 = vld [vmem:[%s19731_s1 + $0x9b4] sm:$0xf0]  ;;  %v9415_v54 = vld [vmem:[%s19731_s1 + $0xaa8] sm:$0xf] }
 0x244   :  { %7176 = vmatpush.bf16.msrb.mxu0 %v8568_v53  ;;  %v12485_v51 = vld [vmem:[%s19731_s1 + $0xab4] sm:$0xf0]  ;;  %v9543_v53 = vld [vmem:[%s19731_s1 + $0xba8] sm:$0xf]  ;;  %v9288_v19 = vor.u32 %v12453_v50, %v9287_v47  ;;  %v16974_v14 = vpop.f32.mrf.mxu0 }
 0x245   :  { %7189 = vmatpush.bf16.msrb.mxu1 %v8696_v59  ;;  %v12517_v56 = vld [vmem:[%s19731_s1 + $0xbb4] sm:$0xf0]  ;;  %v9416_v59 = vor.u32 %v12485_v51, %v9415_v54  ;;  %v9271_v5 = vld [vmem:[%s19731_s1 + $0x988] sm:$0xf]  ;;  %v16982_v24 = vpop.f32.mrf.mxu1 }
 0x246   :  { %7202 = vmatpush.bf16.msrb.mxu2 %v8824_v1  ;;  %v9143_v1 = vld [vmem:[%s19731_s1 + $0x888] sm:$0xf]  ;;  %v12417_v63 = vld [vmem:[%s19731_s1 + $0x894] sm:$0xf0] }
 0x247   :  { %7215 = vmatpush.bf16.msrb.mxu3 %v8952_v7  ;;  %7177 = vmatmul.bf16.vlgmr.msrb.gmra.mxu0 %v13646_v41  ;;  %v9544_v7 = vor.u32 %v12517_v56, %v9543_v53  ;;  %v9527_v15 = vld [vmem:[%s19731_s1 + $0xb88] sm:$0xf]  ;;  %v12513_v0 = vld [vmem:[%s19731_s1 + $0xb94] sm:$0xf0] }
 0x248   :  { %7221 = vmatpush.bf16.msra.mxu0 %v9192_v40  ;;  %7190 = vmatmul.bf16.vlgmr.msrb.gmra.mxu1 %v13650_v44  ;;  %v12449_v40 = vld [vmem:[%s19731_s1 + $0x994] sm:$0xf0]  ;;  %v9127_v36 = vld [vmem:[%s19731_s1 + $0x868] sm:$0xf] }
 0x249   :  { %7234 = vmatpush.bf16.msra.mxu1 %v9320_v61  ;;  %7203 = vmatmul.bf16.vlgmr.msrb.gmra.mxu2 %v13638_v38  ;;  %v9399_v61 = vld [vmem:[%s19731_s1 + $0xa88] sm:$0xf]  ;;  %v9272_v26 = vor.u32 %v12449_v40, %v9271_v5  ;;  %v12413_v48 = vld [vmem:[%s19731_s1 + $0x874] sm:$0xf0] }
 0x24a   :  { %7247 = vmatpush.bf16.msra.mxu2 %v9448_v11  ;;  %7216 = vmatmul.bf16.vlgmr.msrb.gmra.mxu3 %v13648_v42  ;;  %v12481_v11 = vld [vmem:[%s19731_s1 + $0xa94] sm:$0xf0]  ;;  %v9383_v62 = vld [vmem:[%s19731_s1 + $0xa68] sm:$0xf]  ;;  %v9128_v50 = vor.u32 %v12413_v48, %v9127_v36 }
 0x24b   :  { %7260 = vmatpush.bf16.msra.mxu3 %v9576_v17  ;;  %v9144_v17 = vor.u32 %v12417_v63, %v9143_v1  ;;  %v9400_v34 = vor.u32 %v12481_v11, %v9399_v61  ;;  %v12477_v52 = vld [vmem:[%s19731_s1 + $0xa74] sm:$0xf0]  ;;  %v9511_v47 = vld [vmem:[%s19731_s1 + $0xb68] sm:$0xf] }
 0x24c   :  { %7222 = vmatpush.bf16.msra.mxu0 %v9176_v43  ;;  %v9255_v43 = vld [vmem:[%s19731_s1 + $0x968] sm:$0xf]  ;;  %v9384_v51 = vor.u32 %v12477_v52, %v9383_v62  ;;  %v12409_v56 = vld [vmem:[%s19731_s1 + $0x854] sm:$0xf0]  ;;  %v6972_v11 = vpop.f32.mrf.mxu0 }
 0x24d   :  { %7235 = vmatpush.bf16.msra.mxu1 %v9304_v58  ;;  %v9528_v58 = vor.u32 %v12513_v0, %v9527_v15  ;;  %v9111_v53 = vld [vmem:[%s19731_s1 + $0x848] sm:$0xf]  ;;  %v12441_v1 = vld [vmem:[%s19731_s1 + $0x954] sm:$0xf0]  ;;  %v6985_v0 = vpop.f32.mrf.mxu1 }
 0x24e   :  { %7248 = vmatpush.bf16.msra.mxu2 %v9432_v55  ;;  %v12445_v55 = vld [vmem:[%s19731_s1 + $0x974] sm:$0xf0]  ;;  %v9367_v63 = vld [vmem:[%s19731_s1 + $0xa48] sm:$0xf]  ;;  %v9112_v15 = vor.u32 %v12409_v56, %v9111_v53 }
 0x24f   :  { %7261 = vmatpush.bf16.msra.mxu3 %v9560_v3  ;;  %v12509_v3 = vld [vmem:[%s19731_s1 + $0xb74] sm:$0xf0]  ;;  %v9256_v54 = vor.u32 %v12445_v55, %v9255_v43  ;;  %v9495_v40 = vld [vmem:[%s19731_s1 + $0xb48] sm:$0xf] }
 0x250   :  { %7223 = vmatpush.bf16.msra.mxu0 %v9160_v60  ;;  %v9239_v60 = vld [vmem:[%s19731_s1 + $0x948] sm:$0xf]  ;;  %v12473_v5 = vld [vmem:[%s19731_s1 + $0xa54] sm:$0xf0] }
 0x251   :  { %7236 = vmatpush.bf16.msra.mxu1 %v9288_v19  ;;  %v9512_v19 = vor.u32 %v12509_v3, %v9511_v47  ;;  %v12505_v61 = vld [vmem:[%s19731_s1 + $0xb54] sm:$0xf0]  ;;  %v9223_v48 = vld [vmem:[%s19731_s1 + $0x928] sm:$0xf] }
 0x252   :  { %7249 = vmatpush.bf16.msra.mxu2 %v9416_v59  ;;  %v17017_v59 = vpop.f32.mrf.mxu2  ;;  %v12405_v36 = vld [vmem:[%s19731_s1 + $0x834] sm:$0xf0]  ;;  %v9496_v43 = vor.u32 %v12505_v61, %v9495_v40  ;;  %v9351_v55 = vld [vmem:[%s19731_s1 + $0xa28] sm:$0xf] }
 0x253   :  { %7262 = vmatpush.bf16.msra.mxu3 %v9544_v7  ;;  %v17028_v7 = vpop.f32.mrf.mxu3  ;;  %v12469_v62 = vld [vmem:[%s19731_s1 + $0xa34] sm:$0xf0]  ;;  %v9479_v52 = vld [vmem:[%s19731_s1 + $0xb28] sm:$0xf] }
 0x254   :  { %7224 = vmatpush.bf16.msra.mxu0 %v9144_v17  ;;  %v9240_v17 = vor.u32 %v12441_v1, %v9239_v60  ;;  %v12501_v47 = vld [vmem:[%s19731_s1 + $0xb34] sm:$0xf0]  ;;  %v9352_v53 = vor.u32 %v12469_v62, %v9351_v55  ;;  %v9207_v56 = vld [vmem:[%s19731_s1 + $0x908] sm:$0xf] }
 0x255   :  { %7237 = vmatpush.bf16.msra.mxu1 %v9272_v26  ;;  %v9368_v26 = vor.u32 %v12473_v5, %v9367_v63  ;;  %v12433_v60 = vld [vmem:[%s19731_s1 + $0x914] sm:$0xf0]  ;;  %v9480_v1 = vor.u32 %v12501_v47, %v9479_v52  ;;  %v9463_v5 = vld [vmem:[%s19731_s1 + $0xb08] sm:$0xf] }
 0x256   :  { %7250 = vmatpush.bf16.msra.mxu2 %v9400_v34  ;;  %v9095_v34 = vld [vmem:[%s19731_s1 + $0x828] sm:$0xf]  ;;  %v12465_v63 = vld [vmem:[%s19731_s1 + $0xa14] sm:$0xf0] }
 0x257   :  { %7263 = vmatpush.bf16.msra.mxu3 %v9528_v58  ;;  %v12437_v58 = vld [vmem:[%s19731_s1 + $0x934] sm:$0xf0]  ;;  %v9096_v3 = vor.u32 %v12405_v36, %v9095_v34  ;;  %v9703_v11 = vld [vmem:[%s19731_s1 + $0xce8] sm:$0xf] }
 0x258   :  { %7225 = vmatpush.bf16.msra.mxu0 %v9128_v50  ;;  %v9079_v50 = vld [vmem:[%s19731_s1 + $0x808] sm:$0xf]  ;;  %v12497_v40 = vld [vmem:[%s19731_s1 + $0xb14] sm:$0xf0] }
 0x259   :  { %7238 = vmatpush.bf16.msra.mxu1 %v9256_v54  ;;  %v12401_v54 = vld [vmem:[%s19731_s1 + $0x814] sm:$0xf0]  ;;  %v9831_v0 = vld [vmem:[%s19731_s1 + $0xde8] sm:$0xf]  ;;  %v9464_v52 = vor.u32 %v12497_v40, %v9463_v5 }
 0x25a   :  { %7251 = vmatpush.bf16.msra.mxu2 %v9384_v51  ;;  %v9224_v51 = vor.u32 %v12437_v58, %v9223_v48  ;;  %v6998_v61 = vpop.f32.mrf.mxu2  ;;  %v12589_v34 = vld [vmem:[%s19731_s1 + $0xdf4] sm:$0xf0]  ;;  %v9959_v36 = vld [vmem:[%s19731_s1 + $0xee8] sm:$0xf] }
 0x25b   :  { %7264 = vmatpush.bf16.msra.mxu3 %v9512_v19  ;;  %v9335_v19 = vld [vmem:[%s19731_s1 + $0xa08] sm:$0xf]  ;;  %v12621_v48 = vld [vmem:[%s19731_s1 + $0xef4] sm:$0xf0] }
 0x25c   :  { %7226 = vmatpush.bf16.msra.mxu0 %v9112_v15  ;;  %v12557_v15 = vld [vmem:[%s19731_s1 + $0xcf4] sm:$0xf0]  ;;  %v9336_v58 = vor.u32 %v12465_v63, %v9335_v19  ;;  %v10087_v55 = vld [vmem:[%s19731_s1 + $0xfe8] sm:$0xf] }
 0x25d   :  { %7239 = vmatpush.bf16.msra.mxu1 %v9240_v17  ;;  %v7011_v17 = vpop.f32.mrf.mxu3  ;;  %v12653_v62 = vld [vmem:[%s19731_s1 + $0xff4] sm:$0xf0]  ;;  %v9704_v47 = vor.u32 %v12557_v15, %v9703_v11  ;;  %v9943_v19 = vld [vmem:[%s19731_s1 + $0xec8] sm:$0xf] }
 0x25e   :  { %7252 = vmatpush.bf16.msra.mxu2 %v9368_v26  ;;  %v9080_v26 = vor.u32 %v12401_v54, %v9079_v50  ;;  %v9960_v50 = vor.u32 %v12621_v48, %v9959_v36  ;;  %v9687_v54 = vld [vmem:[%s19731_s1 + $0xcc8] sm:$0xf]  ;;  %v12649_v5 = vld [vmem:[%s19731_s1 + $0xfd4] sm:$0xf0] }
 0x25f   :  { %7265 = vmatpush.bf16.msra.mxu3 %v9496_v43  ;;  %v9208_v43 = vor.u32 %v12433_v60, %v9207_v56  ;;  %v10088_v56 = vor.u32 %v12653_v62, %v10087_v55  ;;  %v12585_v60 = vld [vmem:[%s19731_s1 + $0xdd4] sm:$0xf0]  ;;  %v10071_v63 = vld [vmem:[%s19731_s1 + $0xfc8] sm:$0xf] }
 0x260   :  { %7227 = vmatpush.bf16.msra.mxu0 %v9096_v3  ;;  %v9832_v3 = vor.u32 %v12589_v34, %v9831_v0  ;;  %v9671_v15 = vld [vmem:[%s19731_s1 + $0xca8] sm:$0xf]  ;;  %v12549_v0 = vld [vmem:[%s19731_s1 + $0xcb4] sm:$0xf0] }
 0x261   :  { %7240 = vmatpush.bf16.msra.mxu1 %v9224_v51  ;;  %v12553_v51 = vld [vmem:[%s19731_s1 + $0xcd4] sm:$0xf0]  ;;  %v9799_v17 = vld [vmem:[%s19731_s1 + $0xda8] sm:$0xf]  ;;  %v9672_v55 = vor.u32 %v12549_v0, %v9671_v15 }
 0x262   :  { %7253 = vmatpush.bf16.msra.mxu2 %v9352_v53  ;;  %v9815_v53 = vld [vmem:[%s19731_s1 + $0xdc8] sm:$0xf]  ;;  %v9688_v40 = vor.u32 %v12553_v51, %v9687_v54  ;;  %v12581_v34 = vld [vmem:[%s19731_s1 + $0xdb4] sm:$0xf0] }
 0x263   :  { %7266 = vmatpush.bf16.msra.mxu3 %v9480_v1  ;;  %v12617_v1 = vld [vmem:[%s19731_s1 + $0xed4] sm:$0xf0]  ;;  %v9816_v61 = vor.u32 %v12585_v60, %v9815_v53  ;;  %v9927_v36 = vld [vmem:[%s19731_s1 + $0xea8] sm:$0xf]  ;;  %v9800_v62 = vor.u32 %v12581_v34, %v9799_v17 }
 0x264   :  { %7228 = vmatpush.bf16.msra.mxu0 %v9080_v26  ;;  %v9944_v11 = vor.u32 %v12617_v1, %v9943_v19  ;;  %v10072_v26 = vor.u32 %v12649_v5, %v10071_v63  ;;  %v12613_v48 = vld [vmem:[%s19731_s1 + $0xeb4] sm:$0xf0]  ;;  %v9911_v53 = vld [vmem:[%s19731_s1 + $0xe88] sm:$0xf]  ;;  %v17178_v60 = vpop.f32.mrf.mxu0 }
 0x265   :  { %7241 = vmatpush.bf16.msra.mxu1 %v9208_v43  ;;  %v10055_v43 = vld [vmem:[%s19731_s1 + $0xfa8] sm:$0xf]  ;;  %v12577_v51 = vld [vmem:[%s19731_s1 + $0xd94] sm:$0xf0]  ;;  %v17186_v5 = vpop.f32.mrf.mxu1 }
 0x266   :  { %7254 = vmatpush.bf16.msra.mxu2 %v9336_v58  ;;  %v12645_v58 = vld [vmem:[%s19731_s1 + $0xfb4] sm:$0xf0]  ;;  %v10039_v19 = vld [vmem:[%s19731_s1 + $0xf88] sm:$0xf] }
 0x267   :  { %7267 = vmatpush.bf16.msra.mxu3 %v9464_v52  ;;  %7229 = vmatmul.bf16.vlgmr.msra.gmra.mxu0 %v13839_v25  ;;  %v9928_v52 = vor.u32 %v12613_v48, %v9927_v36  ;;  %v10056_v54 = vor.u32 %v12645_v58, %v10055_v43  ;;  %v12641_v1 = vld [vmem:[%s19731_s1 + $0xf94] sm:$0xf0]  ;;  %v9767_v0 = vld [vmem:[%s19731_s1 + $0xd68] sm:$0xf] }
 0x268   :  { %7273 = vmatpush.bf16.msrb.mxu0 %v9704_v47  ;;  %7242 = vmatmul.bf16.vlgmr.msra.gmra.mxu1 %v13852_v30  ;;  %v9655_v47 = vld [vmem:[%s19731_s1 + $0xc88] sm:$0xf]  ;;  %v12541_v15 = vld [vmem:[%s19731_s1 + $0xc74] sm:$0xf0]  ;;  %v10040_v17 = vor.u32 %v12641_v1, %v10039_v19  ;;  %v6971_v19 = vadd.f32 %v16974_v14, %v16830_v57 }
 0x269   :  { %7286 = vmatpush.bf16.msrb.mxu1 %v9832_v3  ;;  %7255 = vmatmul.bf16.vlgmr.msra.gmra.mxu2 %v13850_v29  ;;  %v12545_v3 = vld [vmem:[%s19731_s1 + $0xc94] sm:$0xf0]  ;;  %v9895_v34 = vld [vmem:[%s19731_s1 + $0xe68] sm:$0xf] }
 0x26a   :  { %7299 = vmatpush.bf16.msrb.mxu2 %v9960_v50  ;;  %7268 = vmatmul.bf16.vlgmr.msra.gmra.mxu3 %v13860_v33  ;;  %v9783_v50 = vld [vmem:[%s19731_s1 + $0xd88] sm:$0xf]  ;;  %v9656_v63 = vor.u32 %v12545_v3, %v9655_v47  ;;  %v12605_v36 = vld [vmem:[%s19731_s1 + $0xe74] sm:$0xf0] }
 0x26b   :  { %7312 = vmatpush.bf16.msrb.mxu3 %v10088_v56  ;;  %v12609_v56 = vld [vmem:[%s19731_s1 + $0xe94] sm:$0xf0]  ;;  %v10023_v48 = vld [vmem:[%s19731_s1 + $0xf68] sm:$0xf] }
 0x26c   :  { %7274 = vmatpush.bf16.msrb.mxu0 %v9688_v40  ;;  %v9784_v40 = vor.u32 %v12577_v51, %v9783_v50  ;;  %v12637_v43 = vld [vmem:[%s19731_s1 + $0xf74] sm:$0xf0]  ;;  %v9751_v3 = vld [vmem:[%s19731_s1 + $0xd48] sm:$0xf] }
 0x26d   :  { %7287 = vmatpush.bf16.msrb.mxu1 %v9816_v61  ;;  %v9912_v61 = vor.u32 %v12609_v56, %v9911_v53  ;;  %v12537_v47 = vld [vmem:[%s19731_s1 + $0xc54] sm:$0xf0]  ;;  %v10024_v50 = vor.u32 %v12637_v43, %v10023_v48  ;;  %v9879_v53 = vld [vmem:[%s19731_s1 + $0xe48] sm:$0xf]  ;;  %v17234_v1 = vpop.f32.mrf.mxu3 }
 0x26e   :  { %7300 = vmatpush.bf16.msrb.mxu2 %v9944_v11  ;;  %v9639_v11 = vld [vmem:[%s19731_s1 + $0xc68] sm:$0xf]  ;;  %v12569_v51 = vld [vmem:[%s19731_s1 + $0xd54] sm:$0xf0] }
 0x26f   :  { %7313 = vmatpush.bf16.msrb.mxu3 %v10072_v26  ;;  %v12573_v26 = vld [vmem:[%s19731_s1 + $0xd74] sm:$0xf0]  ;;  %v9640_v58 = vor.u32 %v12541_v15, %v9639_v11  ;;  %v7037_v15 = vpop.f32.mrf.mxu1  ;;  %v9607_v57 = vld [vmem:[%s19731_s1 + $0xc28] sm:$0xf] }
 0x270   :  { %7275 = vmatpush.bf16.msrb.mxu0 %v9672_v55  ;;  %v9768_v55 = vor.u32 %v12573_v26, %v9767_v0  ;;  %v12601_v56 = vld [vmem:[%s19731_s1 + $0xe54] sm:$0xf0]  ;;  %v9752_v0 = vor.u32 %v12569_v51, %v9751_v3  ;;  %v9735_v26 = vld [vmem:[%s19731_s1 + $0xd28] sm:$0xf] }
 0x271   :  { %7288 = vmatpush.bf16.msrb.mxu1 %v9800_v62  ;;  %v9896_v62 = vor.u32 %v12605_v36, %v9895_v34  ;;  %v12533_v14 = vld [vmem:[%s19731_s1 + $0xc34] sm:$0xf0]  ;;  %v9863_v48 = vld [vmem:[%s19731_s1 + $0xe28] sm:$0xf] }
 0x272   :  { %7301 = vmatpush.bf16.msrb.mxu2 %v9928_v52  ;;  %v9623_v52 = vld [vmem:[%s19731_s1 + $0xc48] sm:$0xf]  ;;  %v12565_v36 = vld [vmem:[%s19731_s1 + $0xd34] sm:$0xf0] }
 0x273   :  { %7314 = vmatpush.bf16.msrb.mxu3 %v10056_v54  ;;  %v17221_v54 = vpop.f32.mrf.mxu2  ;;  %v9624_v11 = vor.u32 %v12537_v47, %v9623_v52  ;;  %v12597_v43 = vld [vmem:[%s19731_s1 + $0xe34] sm:$0xf0]  ;;  %v9608_v52 = vor.u32 %v12533_v14, %v9607_v57  ;;  %v9591_v47 = vld [vmem:[%s19731_s1 + $0xc08] sm:$0xf] }
 0x274   :  { %7276 = vmatpush.bf16.msrb.mxu0 %v9656_v63  ;;  %v10007_v63 = vld [vmem:[%s19731_s1 + $0xf48] sm:$0xf]  ;;  %v12529_v3 = vld [vmem:[%s19731_s1 + $0xc14] sm:$0xf0]  ;;  %v9864_v51 = vor.u32 %v12597_v43, %v9863_v48 }
 0x275   :  { %7289 = vmatpush.bf16.msrb.mxu1 %v9784_v40  ;;  %v12633_v40 = vld [vmem:[%s19731_s1 + $0xf54] sm:$0xf0]  ;;  %v10215_v15 = vld [vmem:[%s19731_s1 + $0x10e8] sm:$0xf]  ;;  %v7063_v57 = vpop.f32.mrf.mxu3  ;;  %v9592_v14 = vor.u32 %v12529_v3, %v9591_v47 }
 0x276   :  { %7302 = vmatpush.bf16.msrb.mxu2 %v9912_v61  ;;  %v7024_v61 = vpop.f32.mrf.mxu0  ;;  %v10008_v34 = vor.u32 %v12633_v40, %v10007_v63  ;;  %v9975_v40 = vld [vmem:[%s19731_s1 + $0xf08] sm:$0xf] }
 0x277   :  { %7315 = vmatpush.bf16.msrb.mxu3 %v10040_v17  ;;  %v9880_v17 = vor.u32 %v12601_v56, %v9879_v53  ;;  %v9719_v53 = vld [vmem:[%s19731_s1 + $0xd08] sm:$0xf]  ;;  %v12561_v56 = vld [vmem:[%s19731_s1 + $0xd14] sm:$0xf0] }
 0x278   :  { %7277 = vmatpush.bf16.msrb.mxu0 %v9640_v58  ;;  %v6984_v58 = vadd.f32 %v16982_v24, %v6971_v19  ;;  %v9847_v19 = vld [vmem:[%s19731_s1 + $0xe08] sm:$0xf]  ;;  %v12625_v61 = vld [vmem:[%s19731_s1 + $0xf14] sm:$0xf0]  ;;  %v9720_v43 = vor.u32 %v12561_v56, %v9719_v53 }
 0x279   :  { %7290 = vmatpush.bf16.msrb.mxu1 %v9768_v55  ;;  %v9991_v55 = vld [vmem:[%s19731_s1 + $0xf28] sm:$0xf]  ;;  %v12745_v56 = vld [vmem:[%s19731_s1 + $0x12d4] sm:$0xf0] }
 0x27a   :  { %7303 = vmatpush.bf16.msrb.mxu2 %v9896_v62  ;;  %v12629_v62 = vld [vmem:[%s19731_s1 + $0xf34] sm:$0xf0]  ;;  %v6997_v24 = vadd.f32 %v17017_v59, %v6984_v58  ;;  %v10455_v53 = vld [vmem:[%s19731_s1 + $0x12c8] sm:$0xf] }
 0x27b   :  { %7316 = vmatpush.bf16.msrb.mxu3 %v10024_v50  ;;  %v9736_v50 = vor.u32 %v12565_v36, %v9735_v26  ;;  %v9992_v63 = vor.u32 %v12629_v62, %v9991_v55  ;;  %v12593_v59 = vld [vmem:[%s19731_s1 + $0xe14] sm:$0xf0]  ;;  %v10599_v55 = vld [vmem:[%s19731_s1 + $0x13e8] sm:$0xf] }
 0x27c   :  { %7278 = vmatpush.bf16.msrb.mxu0 %v9624_v11  ;;  %v7050_v11 = vpop.f32.mrf.mxu2  ;;  %v12717_v26 = vld [vmem:[%s19731_s1 + $0x11f4] sm:$0xf0]  ;;  %v7010_v48 = vadd.f32 %v17028_v7, %v6997_v24  ;;  %v9848_v58 = vor.u32 %v12593_v59, %v9847_v19  ;;  %v10199_v7 = vld [vmem:[%s19731_s1 + $0x10c8] sm:$0xf] }
 0x27d   :  { %7291 = vmatpush.bf16.msrb.mxu1 %v9752_v0  ;;  %v12685_v0 = vld [vmem:[%s19731_s1 + $0x10f4] sm:$0xf0]  ;;  %v10583_v19 = vld [vmem:[%s19731_s1 + $0x13c8] sm:$0xf] }
 0x27e   :  { %7304 = vmatpush.bf16.msrb.mxu2 %v9880_v17  ;;  %v10343_v17 = vld [vmem:[%s19731_s1 + $0x11e8] sm:$0xf]  ;;  %v12749_v36 = vld [vmem:[%s19731_s1 + $0x12f4] sm:$0xf0]  ;;  %v10216_v47 = vor.u32 %v12685_v0, %v10215_v15  ;;  %v7023_v3 = vadd.f32 %v17178_v60, %v7010_v48  ;;  %v10456_v15 = vor.u32 %v12745_v56, %v10455_v53 }
 0x27f   :  { %7317 = vmatpush.bf16.msrb.mxu3 %v10008_v34  ;;  %v10471_v34 = vld [vmem:[%s19731_s1 + $0x12e8] sm:$0xf]  ;;  %v12781_v62 = vld [vmem:[%s19731_s1 + $0x13f4] sm:$0xf0]  ;;  %v10344_v11 = vor.u32 %v12717_v26, %v10343_v17 }
 0x280   :  { %7279 = vmatpush.bf16.msrb.mxu0 %v9608_v52  ;;  %v9976_v52 = vor.u32 %v12625_v61, %v9975_v40  ;;  %v10472_v57 = vor.u32 %v12749_v36, %v10471_v34  ;;  %v12681_v24 = vld [vmem:[%s19731_s1 + $0x10d4] sm:$0xf0]  ;;  %v7036_v40 = vadd.f32 %v17186_v5, %v7023_v3  ;;  %v10183_v0 = vld [vmem:[%s19731_s1 + $0x10a8] sm:$0xf] }
 0x281   :  { %7292 = vmatpush.bf16.msrb.mxu1 %v9736_v50  ;;  %v10327_v50 = vld [vmem:[%s19731_s1 + $0x11c8] sm:$0xf]  ;;  %v12713_v60 = vld [vmem:[%s19731_s1 + $0x11d4] sm:$0xf0]  ;;  %v10200_v59 = vor.u32 %v12681_v24, %v10199_v7 }
 0x282   :  { %7305 = vmatpush.bf16.msrb.mxu2 %v9864_v51  ;;  %v10600_v51 = vor.u32 %v12781_v62, %v10599_v55  ;;  %v10328_v61 = vor.u32 %v12713_v60, %v10327_v50  ;;  %v12677_v17 = vld [vmem:[%s19731_s1 + $0x10b4] sm:$0xf0]  ;;  %v10439_v34 = vld [vmem:[%s19731_s1 + $0x12a8] sm:$0xf]  ;;  %v7049_v48 = vadd.f32 %v17221_v54, %v7036_v40  ;;  %v13166_v55 = vld [vmem:[%s19733_s2] sm:$0xff] }
 0x283   :  { %7318 = vmatpush.bf16.msrb.mxu3 %v9992_v63  ;;  %v12777_v63 = vld [vmem:[%s19731_s1 + $0x13d4] sm:$0xf0]  ;;  %v7996_v62 = vmul.f32 %v13166_v55, %v13166_v55  ;;  %v10184_v54 = vor.u32 %v12677_v17, %v10183_v0  ;;  %v10167_v3 = vld [vmem:[%s19731_s1 + $0x1088] sm:$0xf] }
 0x284   :  { %7280 = vmatpush.bf16.msrb.mxu0 %v9592_v14  ;;  %v10311_v14 = vld [vmem:[%s19731_s1 + $0x11a8] sm:$0xf]  ;;  %v10584_v5 = vor.u32 %v12777_v63, %v10583_v19  ;;  %v12709_v26 = vld [vmem:[%s19731_s1 + $0x11b4] sm:$0xf0]  ;;  %v7062_v60 = vadd.f32 %v17234_v1, %v7049_v48  ;;  %v7074_v53 = vpop.f32.mrf.mxu0  ;;  %v7953_v63 = vrot.slane %v13166_v55, 4 }
 0x285   :  { %7293 = vmatpush.bf16.msrb.mxu1 %v9720_v43  ;;  %v12741_v36 = vld [vmem:[%s19731_s1 + $0x12b4] sm:$0xf0]  ;;  %v10567_v43 = vld [vmem:[%s19731_s1 + $0x13a8] sm:$0xf] }
 0x286   :  { %7306 = vmatpush.bf16.msrb.mxu2 %v9848_v58  ;;  %v12773_v58 = vld [vmem:[%s19731_s1 + $0x13b4] sm:$0xf0]  ;;  %v10423_v50 = vld [vmem:[%s19731_s1 + $0x1288] sm:$0xf] }
 0x287   :  { %7319 = vmatpush.bf16.msrb.mxu3 %v9976_v52  ;;  %7281 = vmatmul.bf16.vlgmr.msrb.gmra.mxu0 %v14049_v23  ;;  %v10312_v52 = vor.u32 %v12709_v26, %v10311_v14  ;;  %v10568_v7 = vor.u32 %v12773_v58, %v10567_v43  ;;  %v12705_v24 = vld [vmem:[%s19731_s1 + $0x1194] sm:$0xf0]  ;;  %v10551_v56 = vld [vmem:[%s19731_s1 + $0x1388] sm:$0xf] }
 0x288   :  { %7325 = vmatpush.bf16.msra.mxu0 %v10216_v47  ;;  %7294 = vmatmul.bf16.vlgmr.msrb.gmra.mxu1 %v14062_v31  ;;  %v10440_v47 = vor.u32 %v12741_v36, %v10439_v34  ;;  %v12769_v19 = vld [vmem:[%s19731_s1 + $0x1394] sm:$0xf0]  ;;  %v10151_v1 = vld [vmem:[%s19731_s1 + $0x1068] sm:$0xf] }
 0x289   :  { %7338 = vmatpush.bf16.msra.mxu1 %v10344_v11  ;;  %7307 = vmatmul.bf16.vlgmr.msrb.gmra.mxu2 %v14060_v28  ;;  %v12673_v11 = vld [vmem:[%s19731_s1 + $0x1094] sm:$0xf0]  ;;  %v10552_v26 = vor.u32 %v12769_v19, %v10551_v56  ;;  %v10407_v36 = vld [vmem:[%s19731_s1 + $0x1268] sm:$0xf] }
 0x28a   :  { %7351 = vmatpush.bf16.msra.mxu2 %v10472_v57  ;;  %7320 = vmatmul.bf16.vlgmr.msrb.gmra.mxu3 %v14070_v35  ;;  %v10295_v57 = vld [vmem:[%s19731_s1 + $0x1188] sm:$0xf]  ;;  %v10168_v40 = vor.u32 %v12673_v11, %v10167_v3  ;;  %v12669_v14 = vld [vmem:[%s19731_s1 + $0x1074] sm:$0xf0] }
 0x28b   :  { %7364 = vmatpush.bf16.msra.mxu3 %v10600_v51  ;;  %v12737_v51 = vld [vmem:[%s19731_s1 + $0x1294] sm:$0xf0]  ;;  %v10296_v0 = vor.u32 %v12705_v24, %v10295_v57  ;;  %v10535_v43 = vld [vmem:[%s19731_s1 + $0x1368] sm:$0xf] }
 0x28c   :  { %7326 = vmatpush.bf16.msra.mxu0 %v10200_v59  ;;  %v8000_v59 = vrot.slane %v7996_v62, 4  ;;  %v10424_v17 = vor.u32 %v12737_v51, %v10423_v50  ;;  %v12701_v34 = vld [vmem:[%s19731_s1 + $0x1174] sm:$0xf0]  ;;  %v7100_v50 = vpop.f32.mrf.mxu2 }
 0x28d   :  { %7339 = vmatpush.bf16.msra.mxu1 %v10328_v61  ;;  %v7087_v61 = vpop.f32.mrf.mxu1  ;;  %v12733_v48 = vld [vmem:[%s19731_s1 + $0x1274] sm:$0xf0]  ;;  %v7113_v19 = vpop.f32.mrf.mxu3 }
 0x28e   :  { %7352 = vmatpush.bf16.msra.mxu2 %v10456_v15  ;;  %v7075_v15 = vadd.f32 %v7074_v53, %v7062_v60  ;;  %v12765_v58 = vld [vmem:[%s19731_s1 + $0x1374] sm:$0xf0]  ;;  %v10408_v57 = vor.u32 %v12733_v48, %v10407_v36  ;;  %v10391_v60 = vld [vmem:[%s19731_s1 + $0x1248] sm:$0xf] }
 0x28f   :  { %7365 = vmatpush.bf16.msra.mxu3 %v10584_v5  ;;  %v10279_v5 = vld [vmem:[%s19731_s1 + $0x1168] sm:$0xf]  ;;  %v12665_v24 = vld [vmem:[%s19731_s1 + $0x1054] sm:$0xf0] }
 0x290   :  { %7327 = vmatpush.bf16.msra.mxu0 %v10184_v54  ;;  %v7954_v54 = vadd.f32 %v13166_v55, %v7953_v63  ;;  %v7088_v3 = vadd.f32 %v7087_v61, %v7075_v15  ;;  %v10280_v11 = vor.u32 %v12701_v34, %v10279_v5  ;;  %v10263_v55 = vld [vmem:[%s19731_s1 + $0x1148] sm:$0xf]  ;;  %v12697_v51 = vld [vmem:[%s19731_s1 + $0x1154] sm:$0xf0] }
 0x291   :  { %7340 = vmatpush.bf16.msra.mxu1 %v10312_v52  ;;  %v17424_v52 = vadd.f32 %v8000_v59, %v7996_v62  ;;  %v10536_v62 = vor.u32 %v12765_v58, %v10535_v43  ;;  %v12729_v53 = vld [vmem:[%s19731_s1 + $0x1254] sm:$0xf0]  ;;  %v10519_v63 = vld [vmem:[%s19731_s1 + $0x1348] sm:$0xf]  ;;  %v10264_v5 = vor.u32 %v12697_v51, %v10263_v55 }
 0x292   :  { %7353 = vmatpush.bf16.msra.mxu2 %v10440_v47  ;;  %v10152_v47 = vor.u32 %v12669_v14, %v10151_v1  ;;  %v7101_v56 = vadd.f32 %v7100_v50, %v7088_v3  ;;  %v12761_v59 = vld [vmem:[%s19731_s1 + $0x1354] sm:$0xf0]  ;;  %v7955_v61 = vrot.slane %v7954_v54, 2  ;;  %v10247_v36 = vld [vmem:[%s19731_s1 + $0x1128] sm:$0xf] }
 0x293   :  { %7366 = vmatpush.bf16.msra.mxu3 %v10568_v7  ;;  %v10135_v7 = vld [vmem:[%s19731_s1 + $0x1048] sm:$0xf]  ;;  %v8002_v15 = vrot.slane %v17424_v52, 2  ;;  %v12661_v34 = vld [vmem:[%s19731_s1 + $0x1034] sm:$0xf0]  ;;  %v10520_v43 = vor.u32 %v12761_v59, %v10519_v63 }
 0x294   :  { %7328 = vmatpush.bf16.msra.mxu0 %v10168_v40  ;;  %v7076_v40 = vpop.f32.mrf.mxu0  ;;  %v7114_v14 = vadd.f32 %v7113_v19, %v7101_v56  ;;  %v12693_v48 = vld [vmem:[%s19731_s1 + $0x1134] sm:$0xf0]  ;;  %v10375_v58 = vld [vmem:[%s19731_s1 + $0x1228] sm:$0xf] }
 0x295   :  { %7341 = vmatpush.bf16.msra.mxu1 %v10296_v0  ;;  %v10136_v0 = vor.u32 %v12665_v24, %v10135_v7  ;;  %v7089_v1 = vpop.f32.mrf.mxu1  ;;  %v10503_v3 = vld [vmem:[%s19731_s1 + $0x1328] sm:$0xf]  ;;  %v12757_v7 = vld [vmem:[%s19731_s1 + $0x1334] sm:$0xf0]  ;;  %v10248_v56 = vor.u32 %v12693_v48, %v10247_v36  ;;  %v7956_v40 = vadd.f32 %v7955_v61, %v7954_v54  ;;  %v7115_v36 = vpop.f32.mrf.mxu3  ;;  %v8003_v48 = vadd.f32 %v8002_v15, %v17424_v52 }
 0x296   :  { %7354 = vmatpush.bf16.msra.mxu2 %v10424_v17  ;;  %v10119_v17 = vld [vmem:[%s19731_s1 + $0x1028] sm:$0xf]  ;;  %7950 = vst [vmem:[%s19733_s2 + $0x8] sm:$0xff] %v7114_v14  ;;  %v12689_v51 = vld [vmem:[%s19731_s1 + $0x1114] sm:$0xf0] }
 0x297   :  { %7367 = vmatpush.bf16.msra.mxu3 %v10552_v26  ;;  %v10392_v26 = vor.u32 %v12729_v53, %v10391_v60  ;;  %v10103_v24 = vld [vmem:[%s19731_s1 + $0x1008] sm:$0xf]  ;;  %v10120_v55 = vor.u32 %v12661_v34, %v10119_v17  ;;  %v12721_v59 = vld [vmem:[%s19731_s1 + $0x1214] sm:$0xf0] }
 0x298   :  { %7329 = vmatpush.bf16.msra.mxu0 %v10152_v47  ;;  %v12725_v47 = vld [vmem:[%s19731_s1 + $0x1234] sm:$0xf0]  ;;  %v10231_v50 = vld [vmem:[%s19731_s1 + $0x1108] sm:$0xf] }
 0x299   :  { %7342 = vmatpush.bf16.msra.mxu1 %v10280_v11  ;;  %v7959_v11 = vrot.slane %v7114_v14, 4  ;;  %v10376_v19 = vor.u32 %v12725_v47, %v10375_v58  ;;  %v10359_v63 = vld [vmem:[%s19731_s1 + $0x1208] sm:$0xf]  ;;  %v12753_v1 = vld [vmem:[%s19731_s1 + $0x1314] sm:$0xf0] }
 0x29a   :  { %7355 = vmatpush.bf16.msra.mxu2 %v10408_v57  ;;  %v7997_v57 = vmul.f32 %v7114_v14, %v7114_v14  ;;  %v10487_v17 = vld [vmem:[%s19731_s1 + $0x1308] sm:$0xf]  ;;  %v12813_v54 = vld [vmem:[%s19731_s1 + $0x14f4] sm:$0xf0]  ;;  %v10360_v52 = vor.u32 %v12721_v59, %v10359_v63 }
 0x29b   :  { %7368 = vmatpush.bf16.msra.mxu3 %v10536_v62  ;;  %v12657_v62 = vld [vmem:[%s19731_s1 + $0x1014] sm:$0xf0]  ;;  %v7960_v60 = vadd.f32 %v7959_v11, %v7114_v14  ;;  %v10727_v14 = vld [vmem:[%s19731_s1 + $0x14e8] sm:$0xf] }
 0x29c   :  { %7330 = vmatpush.bf16.msra.mxu0 %v10136_v0  ;;  %v8006_v53 = vrot.slane %v7997_v57, 4  ;;  %v10504_v0 = vor.u32 %v12757_v7, %v10503_v3  ;;  %v10855_v61 = vld [vmem:[%s19731_s1 + $0x15e8] sm:$0xf]  ;;  %v12845_v58 = vld [vmem:[%s19731_s1 + $0x15f4] sm:$0xf0]  ;;  %v10232_v7 = vor.u32 %v12689_v51, %v10231_v50 }
 0x29d   :  { %7343 = vmatpush.bf16.msra.mxu1 %v10264_v5  ;;  %v7102_v5 = vpop.f32.mrf.mxu2  ;;  %v10983_v47 = vld [vmem:[%s19731_s1 + $0x16e8] sm:$0xf]  ;;  %v12877_v3 = vld [vmem:[%s19731_s1 + $0x16f4] sm:$0xf0]  ;;  %v10856_v50 = vor.u32 %v12845_v58, %v10855_v61 }
 0x29e   :  { %7356 = vmatpush.bf16.msra.mxu2 %v10392_v26  ;;  %v7961_v26 = vrot.slane %v7960_v60, 2  ;;  %v8007_v34 = vadd.f32 %v8006_v53, %v7997_v57  ;;  %v11111_v15 = vld [vmem:[%s19731_s1 + $0x17e8] sm:$0xf]  ;;  %v10728_v53 = vor.u32 %v12813_v54, %v10727_v14  ;;  %v10984_v51 = vor.u32 %v12877_v3, %v10983_v47  ;;  %v12809_v63 = vld [vmem:[%s19731_s1 + $0x14d4] sm:$0xf0] }
 0x29f   :  { %7369 = vmatpush.bf16.msra.mxu3 %v10520_v43  ;;  %v10104_v43 = vor.u32 %v12657_v62, %v10103_v24  ;;  %v12909_v24 = vld [vmem:[%s19731_s1 + $0x17f4] sm:$0xf0]  ;;  %v10488_v62 = vor.u32 %v12753_v1, %v10487_v17  ;;  %v10839_v59 = vld [vmem:[%s19731_s1 + $0x15c8] sm:$0xf]  ;;  %v8004_v5 = vrot.slane %v8003_v48, 1 }
 0x2a0   :  { %7331 = vmatpush.bf16.msra.mxu0 %v10120_v55  ;;  %v7962_v11 = vadd.f32 %v7961_v26, %v7960_v60  ;;  %v8008_v57 = vrot.slane %v8007_v34, 2  ;;  %v7957_v55 = vrot.slane %v7956_v40, 1  ;;  %v10711_v60 = vld [vmem:[%s19731_s1 + $0x14c8] sm:$0xf]  ;;  %v12841_v17 = vld [vmem:[%s19731_s1 + $0x15d4] sm:$0xf0] }
 0x2a1   :  { %7344 = vmatpush.bf16.msra.mxu1 %v10248_v56  ;;  %v10967_v1 = vld [vmem:[%s19731_s1 + $0x16c8] sm:$0xf]  ;;  %v12873_v14 = vld [vmem:[%s19731_s1 + $0x16d4] sm:$0xf0] }
 0x2a2   :  { %7357 = vmatpush.bf16.msra.mxu2 %v10376_v19  ;;  %v7963_v56 = vrot.slane %v7962_v11, 1  ;;  %v8009_v19 = vadd.f32 %v8008_v57, %v8007_v34  ;;  %v11095_v54 = vld [vmem:[%s19731_s1 + $0x17c8] sm:$0xf]  ;;  %v12905_v61 = vld [vmem:[%s19731_s1 + $0x17d4] sm:$0xf0]  ;;  %v7958_v36 = vadd.f32 %v7957_v55, %v7956_v40  ;;  %v10968_v57 = vor.u32 %v12873_v14, %v10967_v1 }
 0x2a3   :  { %7370 = vmatpush.bf16.msra.mxu3 %v10504_v0  ;;  %v11112_v0 = vor.u32 %v12909_v24, %v11111_v15  ;;  %v10695_v58 = vld [vmem:[%s19731_s1 + $0x14a8] sm:$0xf]  ;;  %v12837_v15 = vld [vmem:[%s19731_s1 + $0x15b4] sm:$0xf0] }
 0x2a4   :  { %7332 = vmatpush.bf16.msra.mxu0 %v10104_v43  ;;  %v7964_v26 = vadd.f32 %v7963_v56, %v7962_v11  ;;  %v8010_v34 = vrot.slane %v8009_v19, 1  ;;  %v10712_v43 = vor.u32 %v12809_v63, %v10711_v60  ;;  %v10840_v11 = vor.u32 %v12841_v17, %v10839_v59  ;;  %v10823_v40 = vld [vmem:[%s19731_s1 + $0x15a8] sm:$0xf]  ;;  %v12869_v55 = vld [vmem:[%s19731_s1 + $0x16b4] sm:$0xf0] }
 0x2a5   :  { %7345 = vmatpush.bf16.msra.mxu1 %v10232_v7  ;;  %v12805_v7 = vld [vmem:[%s19731_s1 + $0x14b4] sm:$0xf0]  ;;  %v10951_v24 = vld [vmem:[%s19731_s1 + $0x16a8] sm:$0xf] }
 0x2a6   :  { %7358 = vmatpush.bf16.msra.mxu2 %v10360_v52  ;;  %v7981_v47 = vrot.slane %v7964_v26, 7  ;;  %v8011_v3 = vadd.f32 %v8010_v34, %v8009_v19  ;;  %v11096_v52 = vor.u32 %v12905_v61, %v11095_v54  ;;  %v11079_v56 = vld [vmem:[%s19731_s1 + $0x17a8] sm:$0xf]  ;;  %v12901_v19 = vld [vmem:[%s19731_s1 + $0x17b4] sm:$0xf0]  ;;  %v10952_v63 = vor.u32 %v12869_v55, %v10951_v24 }
 0x2a7   :  { %7371 = vmatpush.bf16.msra.mxu3 %v10488_v62  ;;  %7333 = vmatmul.bf16.vlgmr.msra.gmra.mxu0 %v14259_v37  ;;  %v8005_v62 = vadd.f32 %v8004_v5, %v8003_v48  ;;  %v10696_v48 = vor.u32 %v12805_v7, %v10695_v58  ;;  %v10679_v59 = vld [vmem:[%s19731_s1 + $0x1488] sm:$0xf]  ;;  %v11080_v1 = vor.u32 %v12901_v19, %v11079_v56  ;;  %v12833_v14 = vld [vmem:[%s19731_s1 + $0x1594] sm:$0xf0] }
 0x2a8   :  { %7377 = vmatpush.bf16.msrb.mxu0 %v10728_v53  ;;  %v17571_v53 = vsel %vm7984_vm0, %v7958_v36, %v7981_v47  ;;  %v8028_v60 = vrot.slane %v8011_v3, 7  ;;  %7346 = vmatmul.bf16.vlgmr.msra.gmra.mxu1 %v14272_v46  ;;  %v10807_v17 = vld [vmem:[%s19731_s1 + $0x1588] sm:$0xf]  ;;  %v12865_v26 = vld [vmem:[%s19731_s1 + $0x1694] sm:$0xf0]  ;;  %v7126_v36 = vpop.f32.mrf.mxu0 }
 0x2a9   :  { %7390 = vmatpush.bf16.msrb.mxu1 %v10856_v50  ;;  %7359 = vmatmul.bf16.vlgmr.msra.gmra.mxu2 %v14270_v45  ;;  %v10935_v5 = vld [vmem:[%s19731_s1 + $0x1688] sm:$0xf]  ;;  %v12897_v54 = vld [vmem:[%s19731_s1 + $0x1794] sm:$0xf0] }
 0x2aa   :  { %7403 = vmatpush.bf16.msrb.mxu2 %v10984_v51  ;;  %7372 = vmatmul.bf16.vlgmr.msra.gmra.mxu3 %v14280_v49  ;;  %v17583_v50 = vsel %vm7984_vm0, %v8005_v62, %v8028_v60  ;;  %v10824_v51 = vor.u32 %v12837_v15, %v10823_v40  ;;  %v11063_v34 = vld [vmem:[%s19731_s1 + $0x1788] sm:$0xf]  ;;  %v10936_v58 = vor.u32 %v12865_v26, %v10935_v5  ;;  %v12797_v3 = vld [vmem:[%s19731_s1 + $0x1474] sm:$0xf0] }
 0x2ab   :  { %7416 = vmatpush.bf16.msrb.mxu3 %v11112_v0  ;;  %v12801_v0 = vld [vmem:[%s19731_s1 + $0x1494] sm:$0xf0]  ;;  %v10663_v47 = vld [vmem:[%s19731_s1 + $0x1468] sm:$0xf]  ;;  %v11064_v7 = vor.u32 %v12897_v54, %v11063_v34 }
 0x2ac   :  { %7378 = vmatpush.bf16.msrb.mxu0 %v10712_v43  ;;  %v10680_v61 = vor.u32 %v12801_v0, %v10679_v59  ;;  %v10808_v43 = vor.u32 %v12833_v14, %v10807_v17  ;;  %v12829_v40 = vld [vmem:[%s19731_s1 + $0x1574] sm:$0xf0]  ;;  %v11047_v55 = vld [vmem:[%s19731_s1 + $0x1768] sm:$0xf]  ;;  %v10664_v60 = vor.u32 %v12797_v3, %v10663_v47  ;;  %v7152_v59 = vpop.f32.mrf.mxu2 }
 0x2ad   :  { %7391 = vmatpush.bf16.msrb.mxu1 %v10840_v11  ;;  %v10791_v11 = vld [vmem:[%s19731_s1 + $0x1568] sm:$0xf]  ;;  %v12861_v15 = vld [vmem:[%s19731_s1 + $0x1674] sm:$0xf0]  ;;  %v7165_v26 = vpop.f32.mrf.mxu3 }
 0x2ae   :  { %7404 = vmatpush.bf16.msrb.mxu2 %v10968_v57  ;;  %v7139_v57 = vpop.f32.mrf.mxu1  ;;  %v12893_v62 = vld [vmem:[%s19731_s1 + $0x1774] sm:$0xf0]  ;;  %v10792_v56 = vor.u32 %v12829_v40, %v10791_v11  ;;  %v11031_v34 = vld [vmem:[%s19731_s1 + $0x1748] sm:$0xf] }
 0x2af   :  { %7417 = vmatpush.bf16.msrb.mxu3 %v11096_v52  ;;  %v10919_v52 = vld [vmem:[%s19731_s1 + $0x1668] sm:$0xf]  ;;  %v7140_v24 = vadd.f32 %v7139_v57, %v7126_v36  ;;  %v11048_v0 = vor.u32 %v12893_v62, %v11047_v55  ;;  %v12825_v17 = vld [vmem:[%s19731_s1 + $0x1554] sm:$0xf0] }
 0x2b0   :  { %7379 = vmatpush.bf16.msrb.mxu0 %v10696_v48  ;;  %v10920_v19 = vor.u32 %v12861_v15, %v10919_v52  ;;  %v10647_v48 = vld [vmem:[%s19731_s1 + $0x1448] sm:$0xf]  ;;  %v12857_v14 = vld [vmem:[%s19731_s1 + $0x1654] sm:$0xf0] }
 0x2b1   :  { %7392 = vmatpush.bf16.msrb.mxu1 %v10824_v51  ;;  %v12793_v51 = vld [vmem:[%s19731_s1 + $0x1454] sm:$0xf0]  ;;  %v7153_v5 = vadd.f32 %v7152_v59, %v7140_v24  ;;  %v10631_v3 = vld [vmem:[%s19731_s1 + $0x1428] sm:$0xf] }
 0x2b2   :  { %7405 = vmatpush.bf16.msrb.mxu2 %v10952_v63  ;;  %v10775_v63 = vld [vmem:[%s19731_s1 + $0x1548] sm:$0xf]  ;;  %v12889_v54 = vld [vmem:[%s19731_s1 + $0x1754] sm:$0xf0] }
 0x2b3   :  { %7418 = vmatpush.bf16.msrb.mxu3 %v11080_v1  ;;  %v10903_v1 = vld [vmem:[%s19731_s1 + $0x1648] sm:$0xf]  ;;  %v17657_v36 = vadd.f32 %v7165_v26, %v7153_v5  ;;  %v12789_v11 = vld [vmem:[%s19731_s1 + $0x1434] sm:$0xf0]  ;;  %v11032_v40 = vor.u32 %v12889_v54, %v11031_v34 }
 0x2b4   :  { %7380 = vmatpush.bf16.msrb.mxu0 %v10680_v61  ;;  %v10648_v61 = vor.u32 %v12793_v51, %v10647_v48  ;;  %v10904_v47 = vor.u32 %v12857_v14, %v10903_v1  ;;  %v10759_v57 = vld [vmem:[%s19731_s1 + $0x1528] sm:$0xf]  ;;  %v12821_v52 = vld [vmem:[%s19731_s1 + $0x1534] sm:$0xf0] }
 0x2b5   :  { %7393 = vmatpush.bf16.msrb.mxu1 %v10808_v43  ;;  %v7128_v43 = vpop.f32.mrf.mxu0  ;;  %v10887_v15 = vld [vmem:[%s19731_s1 + $0x1628] sm:$0xf]  ;;  %v12853_v24 = vld [vmem:[%s19731_s1 + $0x1634] sm:$0xf0]  ;;  %v10760_v48 = vor.u32 %v12821_v52, %v10759_v57  ;;  %v7167_v34 = vpop.f32.mrf.mxu3 }
 0x2b6   :  { %7406 = vmatpush.bf16.msrb.mxu2 %v10936_v58  ;;  %v10776_v58 = vor.u32 %v12825_v17, %v10775_v63  ;;  %v11015_v55 = vld [vmem:[%s19731_s1 + $0x1728] sm:$0xf]  ;;  %v12885_v62 = vld [vmem:[%s19731_s1 + $0x1734] sm:$0xf0]  ;;  %v10888_v51 = vor.u32 %v12853_v24, %v10887_v15  ;;  %v7154_v17 = vpop.f32.mrf.mxu2 }
 0x2b7   :  { %7419 = vmatpush.bf16.msrb.mxu3 %v11064_v7  ;;  %v7141_v7 = vpop.f32.mrf.mxu1  ;;  %v10743_v63 = vld [vmem:[%s19731_s1 + $0x1508] sm:$0xf]  ;;  %v12817_v59 = vld [vmem:[%s19731_s1 + $0x1514] sm:$0xf0]  ;;  %v11016_v1 = vor.u32 %v12885_v62, %v11015_v55 }
 0x2b8   :  { %7381 = vmatpush.bf16.msrb.mxu0 %v10664_v60  ;;  %v10632_v60 = vor.u32 %v12789_v11, %v10631_v3  ;;  %v12849_v14 = vld [vmem:[%s19731_s1 + $0x1614] sm:$0xf0]  ;;  %v10999_v5 = vld [vmem:[%s19731_s1 + $0x1708] sm:$0xf]  ;;  %v10744_v57 = vor.u32 %v12817_v59, %v10743_v63 }
 0x2b9   :  { %7394 = vmatpush.bf16.msrb.mxu1 %v10792_v56  ;;  %v10615_v56 = vld [vmem:[%s19731_s1 + $0x1408] sm:$0xf]  ;;  %v12881_v26 = vld [vmem:[%s19731_s1 + $0x1714] sm:$0xf0] }
 0x2ba   :  { %7407 = vmatpush.bf16.msrb.mxu2 %v10920_v19  ;;  %v12785_v19 = vld [vmem:[%s19731_s1 + $0x1414] sm:$0xf0]  ;;  %v11239_v54 = vld [vmem:[%s19731_s1 + $0x18e8] sm:$0xf]  ;;  %v11000_v15 = vor.u32 %v12881_v26, %v10999_v5 }
 0x2bb   :  { %7420 = vmatpush.bf16.msrb.mxu3 %v11048_v0  ;;  %v10871_v0 = vld [vmem:[%s19731_s1 + $0x1608] sm:$0xf]  ;;  %v13005_v11 = vld [vmem:[%s19731_s1 + $0x1af4] sm:$0xf0] }
 0x2bc   :  { %7382 = vmatpush.bf16.msrb.mxu0 %v10648_v61  ;;  %v12941_v61 = vld [vmem:[%s19731_s1 + $0x18f4] sm:$0xf0]  ;;  %v11367_v43 = vld [vmem:[%s19731_s1 + $0x19e8] sm:$0xf]  ;;  %v10872_v7 = vor.u32 %v12849_v14, %v10871_v0 }
 0x2bd   :  { %7395 = vmatpush.bf16.msrb.mxu1 %v10776_v58  ;;  %v10616_v58 = vor.u32 %v12785_v19, %v10615_v56  ;;  %v11495_v3 = vld [vmem:[%s19731_s1 + $0x1ae8] sm:$0xf]  ;;  %v13037_v52 = vld [vmem:[%s19731_s1 + $0x1bf4] sm:$0xf0]  ;;  %v11240_v24 = vor.u32 %v12941_v61, %v11239_v54 }
 0x2be   :  { %7408 = vmatpush.bf16.msrb.mxu2 %v10904_v47  ;;  %v12973_v47 = vld [vmem:[%s19731_s1 + $0x19f4] sm:$0xf0]  ;;  %v11496_v62 = vor.u32 %v13005_v11, %v11495_v3  ;;  %v11351_v19 = vld [vmem:[%s19731_s1 + $0x19c8] sm:$0xf] }
 0x2bf   :  { %7421 = vmatpush.bf16.msrb.mxu3 %v11032_v40  ;;  %v11623_v40 = vld [vmem:[%s19731_s1 + $0x1be8] sm:$0xf]  ;;  %v11368_v55 = vor.u32 %v12973_v47, %v11367_v43  ;;  %v12937_v56 = vld [vmem:[%s19731_s1 + $0x18d4] sm:$0xf0] }
 0x2c0   :  { %7383 = vmatpush.bf16.msrb.mxu0 %v10632_v60  ;;  %v11223_v60 = vld [vmem:[%s19731_s1 + $0x18c8] sm:$0xf]  ;;  %v13001_v59 = vld [vmem:[%s19731_s1 + $0x1ad4] sm:$0xf0] }
 0x2c1   :  { %7396 = vmatpush.bf16.msrb.mxu1 %v10760_v48  ;;  %v11624_v48 = vor.u32 %v13037_v52, %v11623_v40  ;;  %v11479_v63 = vld [vmem:[%s19731_s1 + $0x1ac8] sm:$0xf]  ;;  %v13033_v17 = vld [vmem:[%s19731_s1 + $0x1bd4] sm:$0xf0] }
 0x2c2   :  { %7409 = vmatpush.bf16.msrb.mxu2 %v10888_v51  ;;  %v12969_v51 = vld [vmem:[%s19731_s1 + $0x19d4] sm:$0xf0]  ;;  %v11607_v0 = vld [vmem:[%s19731_s1 + $0x1bc8] sm:$0xf]  ;;  %v11480_v5 = vor.u32 %v13001_v59, %v11479_v63 }
 0x2c3   :  { %7422 = vmatpush.bf16.msrb.mxu3 %v11016_v1  ;;  %v11224_v1 = vor.u32 %v12937_v56, %v11223_v60  ;;  %v11352_v14 = vor.u32 %v12969_v51, %v11351_v19  ;;  %v11207_v26 = vld [vmem:[%s19731_s1 + $0x18a8] sm:$0xf]  ;;  %v12933_v34 = vld [vmem:[%s19731_s1 + $0x18b4] sm:$0xf0]  ;;  %v11608_v61 = vor.u32 %v13033_v17, %v11607_v0 }
 0x2c4   :  { %7384 = vmatpush.bf16.msrb.mxu0 %v10616_v58  ;;  %v11335_v54 = vld [vmem:[%s19731_s1 + $0x19a8] sm:$0xf]  ;;  %v12965_v43 = vld [vmem:[%s19731_s1 + $0x19b4] sm:$0xf0]  ;;  %v7178_v63 = vpop.f32.mrf.mxu0 }
 0x2c5   :  { %7397 = vmatpush.bf16.msrb.mxu1 %v10744_v57  ;;  %v11463_v58 = vld [vmem:[%s19731_s1 + $0x1aa8] sm:$0xf]  ;;  %v12997_v47 = vld [vmem:[%s19731_s1 + $0x1ab4] sm:$0xf0]  ;;  %v11208_v57 = vor.u32 %v12933_v34, %v11207_v26  ;;  %v7191_v26 = vpop.f32.mrf.mxu1 }
 0x2c6   :  { %7410 = vmatpush.bf16.msrb.mxu2 %v10872_v7  ;;  %v11591_v3 = vld [vmem:[%s19731_s1 + $0x1ba8] sm:$0xf]  ;;  %v13029_v11 = vld [vmem:[%s19731_s1 + $0x1bb4] sm:$0xf0]  ;;  %v11336_v7 = vor.u32 %v12965_v43, %v11335_v54  ;;  %v11464_v40 = vor.u32 %v12997_v47, %v11463_v58 }
 0x2c7   :  { %7423 = vmatpush.bf16.msrb.mxu3 %v11000_v15  ;;  %7385 = vmatmul.bf16.vlgmr.msrb.gmra.mxu0 %v14471_v8  ;;  %v11191_v52 = vld [vmem:[%s19731_s1 + $0x1888] sm:$0xf]  ;;  %v12929_v15 = vld [vmem:[%s19731_s1 + $0x1894] sm:$0xf0] }
 0x2c8   :  { %7429 = vmatpush.bf16.msra.mxu0 %v11240_v24  ;;  %7398 = vmatmul.bf16.vlgmr.msrb.gmra.mxu1 %v14484_v13  ;;  %v11319_v24 = vld [vmem:[%s19731_s1 + $0x1988] sm:$0xf]  ;;  %v12993_v56 = vld [vmem:[%s19731_s1 + $0x1a94] sm:$0xf0]  ;;  %v11192_v51 = vor.u32 %v12929_v15, %v11191_v52 }
 0x2c9   :  { %7442 = vmatpush.bf16.msra.mxu1 %v11368_v55  ;;  %7411 = vmatmul.bf16.vlgmr.msrb.gmra.mxu2 %v14482_v12  ;;  %v11592_v55 = vor.u32 %v13029_v11, %v11591_v3  ;;  %v11447_v60 = vld [vmem:[%s19731_s1 + $0x1a88] sm:$0xf]  ;;  %v12957_v54 = vld [vmem:[%s19731_s1 + $0x1974] sm:$0xf0] }
 0x2ca   :  { %7455 = vmatpush.bf16.msra.mxu2 %v11496_v62  ;;  %7424 = vmatmul.bf16.vlgmr.msrb.gmra.mxu3 %v14492_v16  ;;  %v12961_v62 = vld [vmem:[%s19731_s1 + $0x1994] sm:$0xf0]  ;;  %v11575_v19 = vld [vmem:[%s19731_s1 + $0x1b88] sm:$0xf]  ;;  %v11448_v0 = vor.u32 %v12993_v56, %v11447_v60 }
 0x2cb   :  { %7468 = vmatpush.bf16.msra.mxu3 %v11624_v48  ;;  %v13025_v48 = vld [vmem:[%s19731_s1 + $0x1b94] sm:$0xf0]  ;;  %v11320_v59 = vor.u32 %v12961_v62, %v11319_v24  ;;  %v11175_v17 = vld [vmem:[%s19731_s1 + $0x1868] sm:$0xf] }
 0x2cc   :  { %7430 = vmatpush.bf16.msra.mxu0 %v11224_v1  ;;  %v12925_v1 = vld [vmem:[%s19731_s1 + $0x1874] sm:$0xf0]  ;;  %v11576_v34 = vor.u32 %v13025_v48, %v11575_v19  ;;  %v11559_v58 = vld [vmem:[%s19731_s1 + $0x1b68] sm:$0xf]  ;;  %v7204_v15 = vpop.f32.mrf.mxu2 }
 0x2cd   :  { %7443 = vmatpush.bf16.msra.mxu1 %v11352_v14  ;;  %v11303_v14 = vld [vmem:[%s19731_s1 + $0x1968] sm:$0xf]  ;;  %v12989_v43 = vld [vmem:[%s19731_s1 + $0x1a74] sm:$0xf0]  ;;  %v11176_v3 = vor.u32 %v12925_v1, %v11175_v17  ;;  %v7217_v19 = vpop.f32.mrf.mxu3 }
 0x2ce   :  { %7456 = vmatpush.bf16.msra.mxu2 %v11480_v5  ;;  %v7179_v5 = vadd.f32 %v7178_v63, %v17657_v36  ;;  %v13021_v36 = vld [vmem:[%s19731_s1 + $0x1b74] sm:$0xf0]  ;;  %v11304_v11 = vor.u32 %v12957_v54, %v11303_v14  ;;  %v11287_v52 = vld [vmem:[%s19731_s1 + $0x1948] sm:$0xf] }
 0x2cf   :  { %7469 = vmatpush.bf16.msra.mxu3 %v11608_v61  ;;  %v11431_v61 = vld [vmem:[%s19731_s1 + $0x1a68] sm:$0xf]  ;;  %v11560_v24 = vor.u32 %v13021_v36, %v11559_v58  ;;  %v12985_v60 = vld [vmem:[%s19731_s1 + $0x1a54] sm:$0xf0] }
 0x2d0   :  { %7431 = vmatpush.bf16.msra.mxu0 %v11208_v57  ;;  %v7192_v47 = vadd.f32 %v7191_v26, %v7179_v5  ;;  %v11432_v57 = vor.u32 %v12989_v43, %v11431_v61  ;;  %v11415_v62 = vld [vmem:[%s19731_s1 + $0x1a48] sm:$0xf]  ;;  %v12917_v5 = vld [vmem:[%s19731_s1 + $0x1834] sm:$0xf0] }
 0x2d1   :  { %7444 = vmatpush.bf16.msra.mxu1 %v11336_v7  ;;  %v11159_v7 = vld [vmem:[%s19731_s1 + $0x1848] sm:$0xf]  ;;  %v11416_v1 = vor.u32 %v12985_v60, %v11415_v62  ;;  %v12949_v61 = vld [vmem:[%s19731_s1 + $0x1934] sm:$0xf0] }
 0x2d2   :  { %7457 = vmatpush.bf16.msra.mxu2 %v11464_v40  ;;  %v12921_v40 = vld [vmem:[%s19731_s1 + $0x1854] sm:$0xf0]  ;;  %v7205_v56 = vadd.f32 %v7204_v15, %v7192_v47  ;;  %v11543_v48 = vld [vmem:[%s19731_s1 + $0x1b48] sm:$0xf] }
 0x2d3   :  { %7470 = vmatpush.bf16.msra.mxu3 %v11592_v55  ;;  %v12953_v55 = vld [vmem:[%s19731_s1 + $0x1954] sm:$0xf0]  ;;  %v11160_v63 = vor.u32 %v12921_v40, %v11159_v7  ;;  %v11143_v14 = vld [vmem:[%s19731_s1 + $0x1828] sm:$0xf] }
 0x2d4   :  { %7432 = vmatpush.bf16.msra.mxu0 %v11192_v51  ;;  %v13017_v51 = vld [vmem:[%s19731_s1 + $0x1b54] sm:$0xf0]  ;;  %v11288_v17 = vor.u32 %v12953_v55, %v11287_v52  ;;  %v11271_v26 = vld [vmem:[%s19731_s1 + $0x1928] sm:$0xf]  ;;  %v7206_v55 = vpop.f32.mrf.mxu2 }
 0x2d5   :  { %7445 = vmatpush.bf16.msra.mxu1 %v11320_v59  ;;  %v17856_v59 = vadd.f32 %v7217_v19, %v7205_v56  ;;  %v11544_v54 = vor.u32 %v13017_v51, %v11543_v48  ;;  %v11399_v43 = vld [vmem:[%s19731_s1 + $0x1a28] sm:$0xf]  ;;  %v12981_v58 = vld [vmem:[%s19731_s1 + $0x1a34] sm:$0xf0]  ;;  %v11272_v7 = vor.u32 %v12949_v61, %v11271_v26  ;;  %v7219_v48 = vpop.f32.mrf.mxu3 }
 0x2d6   :  { %7458 = vmatpush.bf16.msra.mxu2 %v11448_v0  ;;  %v7180_v0 = vpop.f32.mrf.mxu0  ;;  %v11527_v36 = vld [vmem:[%s19731_s1 + $0x1b28] sm:$0xf]  ;;  %v13013_v47 = vld [vmem:[%s19731_s1 + $0x1b34] sm:$0xf0]  ;;  %v11400_v40 = vor.u32 %v12981_v58, %v11399_v43 }
 0x2d7   :  { %7471 = vmatpush.bf16.msra.mxu3 %v11576_v34  ;;  %v7193_v34 = vpop.f32.mrf.mxu1  ;;  %v11255_v52 = vld [vmem:[%s19731_s1 + $0x1908] sm:$0xf]  ;;  %v12945_v15 = vld [vmem:[%s19731_s1 + $0x1914] sm:$0xf0]  ;;  %v11528_v62 = vor.u32 %v13013_v47, %v11527_v36 }
 0x2d8   :  { %7433 = vmatpush.bf16.msra.mxu0 %v11176_v3  ;;  %v11144_v3 = vor.u32 %v12917_v5, %v11143_v14  ;;  %v12977_v60 = vld [vmem:[%s19731_s1 + $0x1a14] sm:$0xf0]  ;;  %v11511_v56 = vld [vmem:[%s19731_s1 + $0x1b08] sm:$0xf]  ;;  %v11256_v26 = vor.u32 %v12945_v15, %v11255_v52 }
 0x2d9   :  { %7446 = vmatpush.bf16.msra.mxu1 %v11304_v11  ;;  %v11127_v11 = vld [vmem:[%s19731_s1 + $0x1808] sm:$0xf]  ;;  %v13009_v19 = vld [vmem:[%s19731_s1 + $0x1b14] sm:$0xf0] }
 0x2da   :  { %7459 = vmatpush.bf16.msra.mxu2 %v11432_v57  ;;  %v12913_v57 = vld [vmem:[%s19731_s1 + $0x1814] sm:$0xf0]  ;;  %v11751_v51 = vld [vmem:[%s19731_s1 + $0x1ce8] sm:$0xf]  ;;  %v11512_v43 = vor.u32 %v13009_v19, %v11511_v56 }
 0x2db   :  { %7472 = vmatpush.bf16.msra.mxu3 %v11560_v24  ;;  %v11383_v24 = vld [vmem:[%s19731_s1 + $0x1a08] sm:$0xf]  ;;  %v13133_v5 = vld [vmem:[%s19731_s1 + $0x1ef4] sm:$0xf0] }
 0x2dc   :  { %7434 = vmatpush.bf16.msra.mxu0 %v11160_v63  ;;  %v13069_v63 = vld [vmem:[%s19731_s1 + $0x1cf4] sm:$0xf0]  ;;  %v11879_v0 = vld [vmem:[%s19731_s1 + $0x1de8] sm:$0xf]  ;;  %v11384_v34 = vor.u32 %v12977_v60, %v11383_v24 }
 0x2dd   :  { %7447 = vmatpush.bf16.msra.mxu1 %v11288_v17  ;;  %v11128_v17 = vor.u32 %v12913_v57, %v11127_v11  ;;  %v12007_v14 = vld [vmem:[%s19731_s1 + $0x1ee8] sm:$0xf]  ;;  %v13165_v61 = vld [vmem:[%s19731_s1 + $0x1ff4] sm:$0xf0]  ;;  %v11752_v58 = vor.u32 %v13069_v63, %v11751_v51 }
 0x2de   :  { %7460 = vmatpush.bf16.msra.mxu2 %v11416_v1  ;;  %v13101_v1 = vld [vmem:[%s19731_s1 + $0x1df4] sm:$0xf0]  ;;  %v12008_v47 = vor.u32 %v13133_v5, %v12007_v14  ;;  %v11863_v57 = vld [vmem:[%s19731_s1 + $0x1dc8] sm:$0xf] }
 0x2df   :  { %7473 = vmatpush.bf16.msra.mxu3 %v11544_v54  ;;  %v12135_v54 = vld [vmem:[%s19731_s1 + $0x1fe8] sm:$0xf]  ;;  %v11880_v36 = vor.u32 %v13101_v1, %v11879_v0  ;;  %v13065_v11 = vld [vmem:[%s19731_s1 + $0x1cd4] sm:$0xf0] }
 0x2e0   :  { %7435 = vmatpush.bf16.msra.mxu0 %v11144_v3  ;;  %v11735_v3 = vld [vmem:[%s19731_s1 + $0x1cc8] sm:$0xf]  ;;  %v13129_v15 = vld [vmem:[%s19731_s1 + $0x1ed4] sm:$0xf0] }
 0x2e1   :  { %7448 = vmatpush.bf16.msra.mxu1 %v11272_v7  ;;  %v12136_v7 = vor.u32 %v13165_v61, %v12135_v54  ;;  %v11991_v52 = vld [vmem:[%s19731_s1 + $0x1ec8] sm:$0xf]  ;;  %v13161_v55 = vld [vmem:[%s19731_s1 + $0x1fd4] sm:$0xf0] }
 0x2e2   :  { %7461 = vmatpush.bf16.msra.mxu2 %v11400_v40  ;;  %v13097_v40 = vld [vmem:[%s19731_s1 + $0x1dd4] sm:$0xf0]  ;;  %v12119_v24 = vld [vmem:[%s19731_s1 + $0x1fc8] sm:$0xf]  ;;  %v11992_v56 = vor.u32 %v13129_v15, %v11991_v52 }
 0x2e3   :  { %7474 = vmatpush.bf16.msra.mxu3 %v11528_v62  ;;  %v11736_v62 = vor.u32 %v13065_v11, %v11735_v3  ;;  %v11864_v60 = vor.u32 %v13097_v40, %v11863_v57  ;;  %v11719_v19 = vld [vmem:[%s19731_s1 + $0x1ca8] sm:$0xf]  ;;  %v13061_v48 = vld [vmem:[%s19731_s1 + $0x1cb4] sm:$0xf0]  ;;  %v12120_v63 = vor.u32 %v13161_v55, %v12119_v24 }
 0x2e4   :  { %7436 = vmatpush.bf16.msra.mxu0 %v11128_v17  ;;  %v11847_v51 = vld [vmem:[%s19731_s1 + $0x1da8] sm:$0xf]  ;;  %v13093_v0 = vld [vmem:[%s19731_s1 + $0x1db4] sm:$0xf0]  ;;  %v7230_v57 = vpop.f32.mrf.mxu0 }
 0x2e5   :  { %7449 = vmatpush.bf16.msra.mxu1 %v11256_v26  ;;  %v11975_v17 = vld [vmem:[%s19731_s1 + $0x1ea8] sm:$0xf]  ;;  %v13125_v1 = vld [vmem:[%s19731_s1 + $0x1eb4] sm:$0xf0]  ;;  %v11720_v26 = vor.u32 %v13061_v48, %v11719_v19  ;;  %v7231_v52 = vadd.f32 %v7230_v57, %v17856_v59  ;;  %v7243_v24 = vpop.f32.mrf.mxu1 }
 0x2e6   :  { %7462 = vmatpush.bf16.msra.mxu2 %v11384_v34  ;;  %v12103_v14 = vld [vmem:[%s19731_s1 + $0x1fa8] sm:$0xf]  ;;  %v13157_v5 = vld [vmem:[%s19731_s1 + $0x1fb4] sm:$0xf0]  ;;  %v11848_v34 = vor.u32 %v13093_v0, %v11847_v51  ;;  %v11976_v54 = vor.u32 %v13125_v1, %v11975_v17 }
 0x2e7   :  { %7475 = vmatpush.bf16.msra.mxu3 %v11512_v43  ;;  %7437 = vmatmul.bf16.vlgmr.msra.gmra.mxu0 %v14684_v2  ;;  %v11703_v61 = vld [vmem:[%s19731_s1 + $0x1c88] sm:$0xf]  ;;  %v13057_v43 = vld [vmem:[%s19731_s1 + $0x1c94] sm:$0xf0]  ;;  %v7244_v48 = vadd.f32 %v7243_v24, %v7231_v52 }
 0x2e8   :  { %7481 = vmatpush.bf16.msrb.mxu0 %v11752_v58  ;;  %7450 = vmatmul.bf16.vlgmr.msra.gmra.mxu1 %v14697_v10  ;;  %v11831_v58 = vld [vmem:[%s19731_s1 + $0x1d88] sm:$0xf]  ;;  %v13121_v11 = vld [vmem:[%s19731_s1 + $0x1e94] sm:$0xf0]  ;;  %v11704_v15 = vor.u32 %v13057_v43, %v11703_v61 }
 0x2e9   :  { %7494 = vmatpush.bf16.msrb.mxu1 %v11880_v36  ;;  %7463 = vmatmul.bf16.vlgmr.msra.gmra.mxu2 %v14695_v9  ;;  %v12104_v36 = vor.u32 %v13157_v5, %v12103_v14  ;;  %v11959_v3 = vld [vmem:[%s19731_s1 + $0x1e88] sm:$0xf]  ;;  %v13153_v40 = vld [vmem:[%s19731_s1 + $0x1f94] sm:$0xf0] }
 0x2ea   :  { %7507 = vmatpush.bf16.msrb.mxu2 %v12008_v47  ;;  %7476 = vmatmul.bf16.vlgmr.msra.gmra.mxu3 %v14705_v22  ;;  %v13089_v47 = vld [vmem:[%s19731_s1 + $0x1d94] sm:$0xf0]  ;;  %v11815_v19 = vld [vmem:[%s19731_s1 + $0x1d68] sm:$0xf] }
 0x2eb   :  { %7520 = vmatpush.bf16.msrb.mxu3 %v12136_v7  ;;  %v12087_v7 = vld [vmem:[%s19731_s1 + $0x1f88] sm:$0xf]  ;;  %v11832_v55 = vor.u32 %v13089_v47, %v11831_v58  ;;  %v13085_v51 = vld [vmem:[%s19731_s1 + $0x1d74] sm:$0xf0] }
 0x2ec   :  { %7482 = vmatpush.bf16.msrb.mxu0 %v11736_v62  ;;  %v11960_v62 = vor.u32 %v13121_v11, %v11959_v3  ;;  %v12088_v59 = vor.u32 %v13153_v40, %v12087_v7  ;;  %v13117_v0 = vld [vmem:[%s19731_s1 + $0x1e74] sm:$0xf0]  ;;  %v12071_v17 = vld [vmem:[%s19731_s1 + $0x1f68] sm:$0xf]  ;;  %v11816_v5 = vor.u32 %v13085_v51, %v11815_v19  ;;  %v7256_v58 = vpop.f32.mrf.mxu2  ;;  %v7232_v52 = vpop.f32.mrf.mxu0 }
 0x2ed   :  { %7495 = vmatpush.bf16.msrb.mxu1 %v11864_v60  ;;  %v11687_v60 = vld [vmem:[%s19731_s1 + $0x1c68] sm:$0xf]  ;;  %v13149_v1 = vld [vmem:[%s19731_s1 + $0x1f74] sm:$0xf0]  ;;  %v7257_v11 = vadd.f32 %v7256_v58, %v7244_v48  ;;  %v7269_v57 = vpop.f32.mrf.mxu3  ;;  %v7245_v24 = vpop.f32.mrf.mxu1  ;;  %v12203_v52 = vld [vmem:[%s19731_s1 + $0x1ec] sm:$0xf] }
 0x2ee   :  { %7508 = vmatpush.bf16.msrb.mxu2 %v11992_v56  ;;  %v13053_v56 = vld [vmem:[%s19731_s1 + $0x1c74] sm:$0xf0]  ;;  %v11799_v61 = vld [vmem:[%s19731_s1 + $0x1d48] sm:$0xf]  ;;  %v12072_v43 = vor.u32 %v13149_v1, %v12071_v17 }
 0x2ef   :  { %7521 = vmatpush.bf16.msrb.mxu3 %v12120_v63  ;;  %v11943_v63 = vld [vmem:[%s19731_s1 + $0x1e68] sm:$0xf]  ;;  %v11688_v14 = vor.u32 %v13053_v56, %v11687_v60  ;;  %v13113_v3 = vld [vmem:[%s19731_s1 + $0x1e54] sm:$0xf0] }
 0x2f0   :  { %7483 = vmatpush.bf16.msrb.mxu0 %v11720_v26  ;;  %v11944_v26 = vor.u32 %v13117_v0, %v11943_v63  ;;  %v11927_v47 = vld [vmem:[%s19731_s1 + $0x1e48] sm:$0xf]  ;;  %v13145_v40 = vld [vmem:[%s19731_s1 + $0x1f54] sm:$0xf0] }
 0x2f1   :  { %7496 = vmatpush.bf16.msrb.mxu1 %v11848_v34  ;;  %v11671_v34 = vld [vmem:[%s19731_s1 + $0x1c48] sm:$0xf]  ;;  %v11928_v60 = vor.u32 %v13113_v3, %v11927_v47  ;;  %v13045_v19 = vld [vmem:[%s19731_s1 + $0x1c34] sm:$0xf0] }
 0x2f2   :  { %7509 = vmatpush.bf16.msrb.mxu2 %v11976_v54  ;;  %v13049_v54 = vld [vmem:[%s19731_s1 + $0x1c54] sm:$0xf0]  ;;  %v12055_v7 = vld [vmem:[%s19731_s1 + $0x1f48] sm:$0xf] }
 0x2f3   :  { %7522 = vmatpush.bf16.msrb.mxu3 %v12104_v36  ;;  %v13081_v36 = vld [vmem:[%s19731_s1 + $0x1d54] sm:$0xf0]  ;;  %v11655_v56 = vld [vmem:[%s19731_s1 + $0x1c28] sm:$0xf]  ;;  %v12056_v48 = vor.u32 %v13145_v40, %v12055_v7  ;;  %v12171_v7 = vld [vmem:[%s19731_s1 + $0xec] sm:$0xf] }
 0x2f4   :  { %7484 = vmatpush.bf16.msrb.mxu0 %v11704_v15  ;;  %v11672_v15 = vor.u32 %v13049_v54, %v11671_v34  ;;  %v13077_v51 = vld [vmem:[%s19731_s1 + $0x1d34] sm:$0xf0]  ;;  %v11911_v63 = vld [vmem:[%s19731_s1 + $0x1e28] sm:$0xf]  ;;  %v8169_v40 = vld [vmem:[%s19731_s1 + $0xf8] sm:$0xf0] }
 0x2f5   :  { %7497 = vmatpush.bf16.msrb.mxu1 %v11832_v55  ;;  %v18055_v55 = vadd.f32 %v7269_v57, %v7257_v11  ;;  %v13109_v0 = vld [vmem:[%s19731_s1 + $0x1e34] sm:$0xf0]  ;;  %v12039_v17 = vld [vmem:[%s19731_s1 + $0x1f28] sm:$0xf]  ;;  %v7258_v57 = vpop.f32.mrf.mxu2 }
 0x2f6   :  { %7510 = vmatpush.bf16.msrb.mxu2 %v11960_v62  ;;  %v11800_v62 = vor.u32 %v13081_v36, %v11799_v61  ;;  %v13141_v1 = vld [vmem:[%s19731_s1 + $0x1f34] sm:$0xf0]  ;;  %v11912_v54 = vor.u32 %v13109_v0, %v11911_v63  ;;  %v11767_v61 = vld [vmem:[%s19731_s1 + $0x1d08] sm:$0xf]  ;;  %v8172_v0 = vor.u32 %v12171_v7, %v8169_v40  ;;  %v12163_v57 = vld [vmem:[%s19731_s1 + $0xac] sm:$0xf] }
 0x2f7   :  { %7523 = vmatpush.bf16.msrb.mxu3 %v12088_v59  ;;  %v11783_v59 = vld [vmem:[%s19731_s1 + $0x1d28] sm:$0xf]  ;;  %v12040_v36 = vor.u32 %v13141_v1, %v12039_v17  ;;  %v13105_v47 = vld [vmem:[%s19731_s1 + $0x1e14] sm:$0xf0]  ;;  %v8137_v7 = vld [vmem:[%s19731_s1 + $0xb8] sm:$0xf0] }
 0x2f8   :  { %7485 = vmatpush.bf16.msrb.mxu0 %v11688_v14  ;;  %v11656_v14 = vor.u32 %v13045_v19, %v11655_v56  ;;  %v11784_v34 = vor.u32 %v13077_v51, %v11783_v59  ;;  %v11895_v58 = vld [vmem:[%s19731_s1 + $0x1e08] sm:$0xf]  ;;  %v13137_v11 = vld [vmem:[%s19731_s1 + $0x1f14] sm:$0xf0]  ;;  %v8425_v56 = vld [vmem:[%s19731_s1 + $0x2f8] sm:$0xf0] }
 0x2f9   :  { %7498 = vmatpush.bf16.msrb.mxu1 %v11816_v5  ;;  %v11639_v5 = vld [vmem:[%s19731_s1 + $0x1c08] sm:$0xf]  ;;  %v11896_v59 = vor.u32 %v13105_v47, %v11895_v58  ;;  %v8553_v51 = vld [vmem:[%s19731_s1 + $0x3f8] sm:$0xf0]  ;;  %v12263_v58 = vld [vmem:[%s19731_s1 + $0x3cc] sm:$0xf] }
 0x2fa   :  { %7511 = vmatpush.bf16.msrb.mxu2 %v11944_v26  ;;  %v13041_v26 = vld [vmem:[%s19731_s1 + $0x1c14] sm:$0xf0]  ;;  %v12023_v3 = vld [vmem:[%s19731_s1 + $0x1f08] sm:$0xf]  ;;  %v12195_v40 = vld [vmem:[%s19731_s1 + $0x1ac] sm:$0xf] }
 0x2fb   :  { %7524 = vmatpush.bf16.msrb.mxu3 %v12072_v43  ;;  %v13073_v43 = vld [vmem:[%s19731_s1 + $0x1d14] sm:$0xf0]  ;;  %v11640_v24 = vor.u32 %v13041_v26, %v11639_v5  ;;  %v12024_v63 = vor.u32 %v13137_v11, %v12023_v3  ;;  %v8153_v5 = vld [vmem:[%s19731_s1 + $0xd8] sm:$0xf0]  ;;  %v12199_v26 = vld [vmem:[%s19731_s1 + $0x1cc] sm:$0xf] }
 0x2fc   :  { %7486 = vmatpush.bf16.msrb.mxu0 %v11672_v15  ;;  %v7271_v15 = vpop.f32.mrf.mxu3  ;;  %v11768_v19 = vor.u32 %v13073_v43, %v11767_v61  ;;  %v12231_v61 = vld [vmem:[%s19731_s1 + $0x2cc] sm:$0xf]  ;;  %v8409_v43 = vld [vmem:[%s19731_s1 + $0x2d8] sm:$0xf0] }
 0x2fd   :  { %7499 = vmatpush.bf16.msrb.mxu1 %v11800_v62  ;;  %v8297_v62 = vld [vmem:[%s19731_s1 + $0x1f8] sm:$0xf0]  ;;  %v8412_v11 = vor.u32 %v12231_v61, %v8409_v43 }
 0x2fe   :  { %7512 = vmatpush.bf16.msrb.mxu2 %v11928_v60  ;;  %v12235_v60 = vld [vmem:[%s19731_s1 + $0x2ec] sm:$0xf]  ;;  %v8300_v17 = vor.u32 %v12203_v52, %v8297_v62  ;;  %v8265_v15 = vld [vmem:[%s19731_s1 + $0x1b8] sm:$0xf0] }
 0x2ff   :  { %7525 = vmatpush.bf16.msrb.mxu3 %v12056_v48  ;;  %v12267_v48 = vld [vmem:[%s19731_s1 + $0x3ec] sm:$0xf]  ;;  %v8428_v1 = vor.u32 %v12235_v60, %v8425_v56  ;;  %v8393_v62 = vld [vmem:[%s19731_s1 + $0x2b8] sm:$0xf0] }
 0x300   :  { %7487 = vmatpush.bf16.msrb.mxu0 %v11656_v14  ;;  %v12167_v14 = vld [vmem:[%s19731_s1 + $0xcc] sm:$0xf]  ;;  %v8521_v56 = vld [vmem:[%s19731_s1 + $0x3b8] sm:$0xf0] }
 0x301   :  { %7500 = vmatpush.bf16.msrb.mxu1 %v11784_v34  ;;  %v8556_v34 = vor.u32 %v12267_v48, %v8553_v51  ;;  %v8156_v47 = vor.u32 %v12167_v14, %v8153_v5  ;;  %v12259_v60 = vld [vmem:[%s19731_s1 + $0x3ac] sm:$0xf]  ;;  %v8377_v5 = vld [vmem:[%s19731_s1 + $0x298] sm:$0xf0] }
 0x302   :  { %7513 = vmatpush.bf16.msrb.mxu2 %v11912_v54  ;;  %v8281_v54 = vld [vmem:[%s19731_s1 + $0x1d8] sm:$0xf0]  ;;  %v12159_v51 = vld [vmem:[%s19731_s1 + $0x8c] sm:$0xf] }
 0x303   :  { %7526 = vmatpush.bf16.msrb.mxu3 %v12040_v36  ;;  %v8537_v36 = vld [vmem:[%s19731_s1 + $0x3d8] sm:$0xf0]  ;;  %v8284_v3 = vor.u32 %v12199_v26, %v8281_v54  ;;  %v12223_v14 = vld [vmem:[%s19731_s1 + $0x28c] sm:$0xf] }
 0x304   :  { %7488 = vmatpush.bf16.msrb.mxu0 %v11640_v24  ;;  %v8540_v52 = vor.u32 %v12263_v58, %v8537_v36  ;;  %v12227_v24 = vld [vmem:[%s19731_s1 + $0x2ac] sm:$0xf]  ;;  %v7282_v26 = vpop.f32.mrf.mxu0  ;;  %v8505_v54 = vld [vmem:[%s19731_s1 + $0x398] sm:$0xf0] }
 0x305   :  { %7501 = vmatpush.bf16.msrb.mxu1 %v11768_v19  ;;  %v8140_v19 = vor.u32 %v12163_v57, %v8137_v7  ;;  %v8396_v48 = vor.u32 %v12227_v24, %v8393_v62  ;;  %v7283_v61 = vadd.f32 %v7282_v26, %v18055_v55  ;;  %v7295_v58 = vpop.f32.mrf.mxu1  ;;  %v12187_v57 = vld [vmem:[%s19731_s1 + $0x16c] sm:$0xf]  ;;  %v8489_v62 = vld [vmem:[%s19731_s1 + $0x378] sm:$0xf0] }
 0x306   :  { %7514 = vmatpush.bf16.msrb.mxu2 %v11896_v59  ;;  %v8268_v59 = vor.u32 %v12195_v40, %v8265_v15  ;;  %v8233_v40 = vld [vmem:[%s19731_s1 + $0x178] sm:$0xf0]  ;;  %v12251_v24 = vld [vmem:[%s19731_s1 + $0x36c] sm:$0xf] }
 0x307   :  { %7527 = vmatpush.bf16.msrb.mxu3 %v12024_v63  ;;  %7489 = vmatmul.bf16.vlgmr.msrb.gmra.mxu0 %v14897_v18  ;;  %v8121_v63 = vld [vmem:[%s19731_s1 + $0x98] sm:$0xf0]  ;;  %v7296_v7 = vadd.f32 %v7295_v58, %v7283_v61 }
 0x308   :  { %7533 = vmatpush.bf16.msra.mxu0 %v8172_v0  ;;  %7502 = vmatmul.bf16.vlgmr.msrb.gmra.mxu1 %v14910_v32  ;;  %v12191_v0 = vld [vmem:[%s19731_s1 + $0x18c] sm:$0xf]  ;;  %v8124_v43 = vor.u32 %v12159_v51, %v8121_v63  ;;  %v8361_v15 = vld [vmem:[%s19731_s1 + $0x278] sm:$0xf0]  ;;  %v8492_v63 = vor.u32 %v12251_v24, %v8489_v62 }
 0x309   :  { %7546 = vmatpush.bf16.msra.mxu1 %v8300_v17  ;;  %7515 = vmatmul.bf16.vlgmr.msrb.gmra.mxu2 %v14908_v27  ;;  %v8524_v17 = vor.u32 %v12259_v60, %v8521_v56  ;;  %v8236_v56 = vor.u32 %v12187_v57, %v8233_v40  ;;  %v12183_v51 = vld [vmem:[%s19731_s1 + $0x14c] sm:$0xf]  ;;  %v8073_v57 = vld [vmem:[%s19731_s1 + $0x38] sm:$0xf0] }
 0x30a   :  { %7559 = vmatpush.bf16.msra.mxu2 %v8428_v1  ;;  %7528 = vmatmul.bf16.vlgmr.msrb.gmra.mxu3 %v14918_v39  ;;  %v8249_v1 = vld [vmem:[%s19731_s1 + $0x198] sm:$0xf0]  ;;  %v12243_v24 = vld [vmem:[%s19731_s1 + $0x32c] sm:$0xf] }
 0x30b   :  { %7572 = vmatpush.bf16.msra.mxu3 %v8556_v34  ;;  %v12255_v34 = vld [vmem:[%s19731_s1 + $0x38c] sm:$0xf]  ;;  %v8252_v36 = vor.u32 %v12191_v0, %v8249_v1  ;;  %v8201_v40 = vld [vmem:[%s19731_s1 + $0x138] sm:$0xf0] }
 0x30c   :  { %7534 = vmatpush.bf16.msra.mxu0 %v8156_v47  ;;  %v8380_v47 = vor.u32 %v12223_v14, %v8377_v5  ;;  %v8508_v55 = vor.u32 %v12255_v34, %v8505_v54  ;;  %v7308_v0 = vpop.f32.mrf.mxu2  ;;  %v12215_v1 = vld [vmem:[%s19731_s1 + $0x24c] sm:$0xf]  ;;  %v8345_v14 = vld [vmem:[%s19731_s1 + $0x258] sm:$0xf0]  ;;  %v7284_v61 = vpop.f32.mrf.mxu0 }
 0x30d   :  { %7547 = vmatpush.bf16.msra.mxu1 %v8284_v3  ;;  %v12155_v3 = vld [vmem:[%s19731_s1 + $0x6c] sm:$0xf]  ;;  %v7309_v5 = vadd.f32 %v7308_v0, %v7296_v7  ;;  %v7321_v26 = vpop.f32.mrf.mxu3  ;;  %v8473_v54 = vld [vmem:[%s19731_s1 + $0x358] sm:$0xf0]  ;;  %v7297_v58 = vpop.f32.mrf.mxu1 }
 0x30e   :  { %7560 = vmatpush.bf16.msra.mxu2 %v8412_v11  ;;  %v8105_v11 = vld [vmem:[%s19731_s1 + $0x78] sm:$0xf0]  ;;  %v12247_v34 = vld [vmem:[%s19731_s1 + $0x34c] sm:$0xf] }
 0x30f   :  { %7573 = vmatpush.bf16.msra.mxu3 %v8540_v52  ;;  %v12219_v52 = vld [vmem:[%s19731_s1 + $0x26c] sm:$0xf]  ;;  %v8108_v60 = vor.u32 %v12155_v3, %v8105_v11  ;;  %v8348_v3 = vor.u32 %v12215_v1, %v8345_v14  ;;  %v8476_v7 = vor.u32 %v12247_v34, %v8473_v54  ;;  %v8457_v62 = vld [vmem:[%s19731_s1 + $0x338] sm:$0xf0] }
 0x310   :  { %7535 = vmatpush.bf16.msra.mxu0 %v8140_v19  ;;  %v8364_v19 = vor.u32 %v12219_v52, %v8361_v15  ;;  %v12147_v11 = vld [vmem:[%s19731_s1 + $0x2c] sm:$0xf]  ;;  %v8329_v15 = vld [vmem:[%s19731_s1 + $0x238] sm:$0xf0] }
 0x311   :  { %7548 = vmatpush.bf16.msra.mxu1 %v8268_v59  ;;  %v12151_v59 = vld [vmem:[%s19731_s1 + $0x4c] sm:$0xf]  ;;  %v8313_v1 = vld [vmem:[%s19731_s1 + $0x218] sm:$0xf0] }
 0x312   :  { %7561 = vmatpush.bf16.msra.mxu2 %v8396_v48  ;;  %v8089_v48 = vld [vmem:[%s19731_s1 + $0x58] sm:$0xf0]  ;;  %v12211_v52 = vld [vmem:[%s19731_s1 + $0x22c] sm:$0xf] }
 0x313   :  { %7574 = vmatpush.bf16.msra.mxu3 %v8524_v17  ;;  %v8217_v17 = vld [vmem:[%s19731_s1 + $0x158] sm:$0xf0]  ;;  %v12207_v0 = vld [vmem:[%s19731_s1 + $0x20c] sm:$0xf] }
 0x314   :  { %7536 = vmatpush.bf16.msra.mxu0 %v8124_v43  ;;  %v8092_v43 = vor.u32 %v12151_v59, %v8089_v48  ;;  %v8332_v48 = vor.u32 %v12211_v52, %v8329_v15  ;;  %v12239_v14 = vld [vmem:[%s19731_s1 + $0x30c] sm:$0xf]  ;;  %v8681_v54 = vld [vmem:[%s19731_s1 + $0x4f8] sm:$0xf0] }
 0x315   :  { %7549 = vmatpush.bf16.msra.mxu1 %v8252_v36  ;;  %v18254_v36 = vadd.f32 %v7321_v26, %v7309_v5  ;;  %v8441_v5 = vld [vmem:[%s19731_s1 + $0x318] sm:$0xf0]  ;;  %v7310_v26 = vpop.f32.mrf.mxu2  ;;  %v12299_v34 = vld [vmem:[%s19731_s1 + $0x4ec] sm:$0xf] }
 0x316   :  { %7562 = vmatpush.bf16.msra.mxu2 %v8380_v47  ;;  %v8220_v47 = vor.u32 %v12183_v51, %v8217_v17  ;;  %v12175_v51 = vld [vmem:[%s19731_s1 + $0x10c] sm:$0xf]  ;;  %v8460_v17 = vor.u32 %v12243_v24, %v8457_v62  ;;  %v8444_v52 = vor.u32 %v12239_v14, %v8441_v5  ;;  %v8684_v15 = vor.u32 %v12299_v34, %v8681_v54  ;;  %v8649_v34 = vld [vmem:[%s19731_s1 + $0x4b8] sm:$0xf0] }
 0x317   :  { %7575 = vmatpush.bf16.msra.mxu3 %v8508_v55  ;;  %v12179_v55 = vld [vmem:[%s19731_s1 + $0x12c] sm:$0xf] }
 0x318   :  { %7537 = vmatpush.bf16.msra.mxu0 %v8108_v60  ;;  %v8076_v60 = vor.u32 %v12147_v11, %v8073_v57  ;;  %v8204_v59 = vor.u32 %v12179_v55, %v8201_v40  ;;  %v12331_v61 = vld [vmem:[%s19731_s1 + $0x5ec] sm:$0xf]  ;;  %v8937_v11 = vld [vmem:[%s19731_s1 + $0x6f8] sm:$0xf0]  ;;  %v8316_v55 = vor.u32 %v12207_v0, %v8313_v1 }
 0x319   :  { %7550 = vmatpush.bf16.msra.mxu1 %v8236_v56  ;;  %v12143_v56 = vld [vmem:[%s19731_s1 + $0xc] sm:$0xf]  ;;  %v9065_v40 = vld [vmem:[%s19731_s1 + $0x7f8] sm:$0xf0] }
 0x31a   :  { %7563 = vmatpush.bf16.msra.mxu2 %v8364_v19  ;;  %v8057_v19 = vld [vmem:[%s19731_s1 + $0x18] sm:$0xf0]  ;;  %v12391_v0 = vld [vmem:[%s19731_s1 + $0x7cc] sm:$0xf] }
 0x31b   :  { %7576 = vmatpush.bf16.msra.mxu3 %v8492_v63  ;;  %v8185_v63 = vld [vmem:[%s19731_s1 + $0x118] sm:$0xf0]  ;;  %v8060_v58 = vor.u32 %v12143_v56, %v8057_v19  ;;  %v12327_v19 = vld [vmem:[%s19731_s1 + $0x5cc] sm:$0xf] }
 0x31c   :  { %7538 = vmatpush.bf16.msra.mxu0 %v8092_v43  ;;  %v7323_v43 = vpop.f32.mrf.mxu3  ;;  %v8188_v57 = vor.u32 %v12175_v51, %v8185_v63  ;;  %v8665_v56 = vld [vmem:[%s19731_s1 + $0x4d8] sm:$0xf0]  ;;  %v12359_v51 = vld [vmem:[%s19731_s1 + $0x6cc] sm:$0xf] }
 0x31d   :  { %7551 = vmatpush.bf16.msra.mxu1 %v8220_v47  ;;  %v8809_v47 = vld [vmem:[%s19731_s1 + $0x5f8] sm:$0xf0]  ;;  %v12291_v26 = vld [vmem:[%s19731_s1 + $0x4ac] sm:$0xf] }
 0x31e   :  { %7564 = vmatpush.bf16.msra.mxu2 %v8348_v3  ;;  %v12363_v3 = vld [vmem:[%s19731_s1 + $0x6ec] sm:$0xf]  ;;  %v8812_v24 = vor.u32 %v12331_v61, %v8809_v47  ;;  %v8921_v63 = vld [vmem:[%s19731_s1 + $0x6d8] sm:$0xf0] }
 0x31f   :  { %7577 = vmatpush.bf16.msra.mxu3 %v8476_v7  ;;  %v12395_v7 = vld [vmem:[%s19731_s1 + $0x7ec] sm:$0xf]  ;;  %v8940_v62 = vor.u32 %v12363_v3, %v8937_v11  ;;  %v8924_v5 = vor.u32 %v12359_v51, %v8921_v63  ;;  %v8777_v43 = vld [vmem:[%s19731_s1 + $0x5b8] sm:$0xf0] }
 0x320   :  { %7539 = vmatpush.bf16.msra.mxu0 %v8076_v60  ;;  %v12295_v60 = vld [vmem:[%s19731_s1 + $0x4cc] sm:$0xf]  ;;  %v8905_v47 = vld [vmem:[%s19731_s1 + $0x6b8] sm:$0xf0] }
 0x321   :  { %7552 = vmatpush.bf16.msra.mxu1 %v8204_v59  ;;  %v9068_v59 = vor.u32 %v12395_v7, %v9065_v40  ;;  %v8668_v1 = vor.u32 %v12295_v60, %v8665_v56  ;;  %v12323_v54 = vld [vmem:[%s19731_s1 + $0x5ac] sm:$0xf]  ;;  %v9033_v11 = vld [vmem:[%s19731_s1 + $0x7b8] sm:$0xf0] }
 0x322   :  { %7565 = vmatpush.bf16.msra.mxu2 %v8332_v48  ;;  %v8793_v48 = vld [vmem:[%s19731_s1 + $0x5d8] sm:$0xf0]  ;;  %v12387_v3 = vld [vmem:[%s19731_s1 + $0x7ac] sm:$0xf] }
 0x323   :  { %7578 = vmatpush.bf16.msra.mxu3 %v8460_v17  ;;  %v9049_v17 = vld [vmem:[%s19731_s1 + $0x7d8] sm:$0xf0]  ;;  %v8796_v14 = vor.u32 %v12327_v19, %v8793_v48  ;;  %v12287_v7 = vld [vmem:[%s19731_s1 + $0x48c] sm:$0xf] }
 0x324   :  { %7540 = vmatpush.bf16.msra.mxu0 %v8060_v58  ;;  %v9052_v61 = vor.u32 %v12391_v0, %v9049_v17  ;;  %v12355_v58 = vld [vmem:[%s19731_s1 + $0x6ac] sm:$0xf]  ;;  %v8633_v40 = vld [vmem:[%s19731_s1 + $0x498] sm:$0xf0] }
 0x325   :  { %7553 = vmatpush.bf16.msra.mxu1 %v8188_v57  ;;  %v8652_v57 = vor.u32 %v12291_v26, %v8649_v34  ;;  %v9017_v60 = vld [vmem:[%s19731_s1 + $0x798] sm:$0xf0]  ;;  %v8636_v19 = vor.u32 %v12287_v7, %v8633_v40  ;;  %v12283_v63 = vld [vmem:[%s19731_s1 + $0x46c] sm:$0xf] }
 0x326   :  { %7566 = vmatpush.bf16.msra.mxu2 %v8316_v55  ;;  %v8780_v55 = vor.u32 %v12323_v54, %v8777_v43  ;;  %v8617_v0 = vld [vmem:[%s19731_s1 + $0x478] sm:$0xf0]  ;;  %v12315_v17 = vld [vmem:[%s19731_s1 + $0x56c] sm:$0xf] }
 0x327   :  { %7579 = vmatpush.bf16.msra.mxu3 %v8444_v52  ;;  %7541 = vmatmul.bf16.vlgmr.msra.gmra.mxu0 %v13487_v20  ;;  %v9036_v20 = vor.u32 %v12387_v3, %v9033_v11  ;;  %v12351_v52 = vld [vmem:[%s19731_s1 + $0x68c] sm:$0xf]  ;;  %v8873_v26 = vld [vmem:[%s19731_s1 + $0x678] sm:$0xf0] }
 0x328   :  { %7585 = vmatpush.bf16.msrb.mxu0 %v8684_v15  ;;  %7554 = vmatmul.bf16.vlgmr.msra.gmra.mxu1 %v13490_v21  ;;  %v8761_v21 = vld [vmem:[%s19731_s1 + $0x598] sm:$0xf0]  ;;  %v12379_v34 = vld [vmem:[%s19731_s1 + $0x76c] sm:$0xf] }
 0x329   :  { %7598 = vmatpush.bf16.msrb.mxu1 %v8812_v24  ;;  %7567 = vmatmul.bf16.vlgmr.msra.gmra.mxu2 %v13455_v4  ;;  %v8908_v4 = vor.u32 %v12355_v58, %v8905_v47  ;;  %v8889_v15 = vld [vmem:[%s19731_s1 + $0x698] sm:$0xf0]  ;;  %v7334_v24 = vpop.f32.mrf.mxu0  ;;  %v12279_v47 = vld [vmem:[%s19731_s1 + $0x44c] sm:$0xf] }
 0x32a   :  { %7611 = vmatpush.bf16.msrb.mxu2 %v8940_v62  ;;  %7580 = vmatmul.bf16.vlgmr.msra.gmra.mxu3 %v13460_v6  ;;  %v12319_v6 = vld [vmem:[%s19731_s1 + $0x58c] sm:$0xf]  ;;  %v7335_v56 = vadd.f32 %v7334_v24, %v18254_v36  ;;  %v8892_v51 = vor.u32 %v12351_v52, %v8889_v15  ;;  %v9001_v54 = vld [vmem:[%s19731_s1 + $0x778] sm:$0xf0] }
 0x32b   :  { %7624 = vmatpush.bf16.msrb.mxu3 %v9068_v59  ;;  %v12383_v62 = vld [vmem:[%s19731_s1 + $0x78c] sm:$0xf]  ;;  %v7347_v59 = vpop.f32.mrf.mxu1  ;;  %v8764_v48 = vor.u32 %v12319_v6, %v8761_v21  ;;  %v8601_v3 = vld [vmem:[%s19731_s1 + $0x458] sm:$0xf0] }
 0x32c   :  { %7586 = vmatpush.bf16.msrb.mxu0 %v8668_v1  ;;  %v9020_v36 = vor.u32 %v12383_v62, %v9017_v60  ;;  %v7348_v1 = vadd.f32 %v7347_v59, %v7335_v56  ;;  %v12311_v11 = vld [vmem:[%s19731_s1 + $0x54c] sm:$0xf]  ;;  %v8857_v40 = vld [vmem:[%s19731_s1 + $0x658] sm:$0xf0]  ;;  %v8604_v24 = vor.u32 %v12279_v47, %v8601_v3 }
 0x32d   :  { %7599 = vmatpush.bf16.msrb.mxu1 %v8796_v14  ;;  %v8745_v14 = vld [vmem:[%s19731_s1 + $0x578] sm:$0xf0]  ;;  %v12343_v7 = vld [vmem:[%s19731_s1 + $0x64c] sm:$0xf] }
 0x32e   :  { %7612 = vmatpush.bf16.msrb.mxu2 %v8924_v5  ;;  %v12347_v5 = vld [vmem:[%s19731_s1 + $0x66c] sm:$0xf]  ;;  %v8748_v43 = vor.u32 %v12315_v17, %v8745_v14  ;;  %v8985_v52 = vld [vmem:[%s19731_s1 + $0x758] sm:$0xf0] }
 0x32f   :  { %7625 = vmatpush.bf16.msrb.mxu3 %v9052_v61  ;;  %v8620_v61 = vor.u32 %v12283_v63, %v8617_v0  ;;  %v8876_v58 = vor.u32 %v12347_v5, %v8873_v26  ;;  %v12375_v21 = vld [vmem:[%s19731_s1 + $0x74c] sm:$0xf]  ;;  %v8713_v0 = vld [vmem:[%s19731_s1 + $0x538] sm:$0xf0] }
 0x330   :  { %7587 = vmatpush.bf16.msrb.mxu0 %v8652_v57  ;;  %v9004_v57 = vor.u32 %v12379_v34, %v9001_v54  ;;  %v12275_v59 = vld [vmem:[%s19731_s1 + $0x42c] sm:$0xf]  ;;  %v8988_v63 = vor.u32 %v12375_v21, %v8985_v52  ;;  %v8969_v14 = vld [vmem:[%s19731_s1 + $0x738] sm:$0xf0] }
 0x331   :  { %7600 = vmatpush.bf16.msrb.mxu1 %v8780_v55  ;;  %v7360_v55 = vpop.f32.mrf.mxu2  ;;  %v7336_v15 = vpop.f32.mrf.mxu0  ;;  %v12339_v17 = vld [vmem:[%s19731_s1 + $0x62c] sm:$0xf]  ;;  %v8569_v34 = vld [vmem:[%s19731_s1 + $0x418] sm:$0xf0] }
 0x332   :  { %7613 = vmatpush.bf16.msrb.mxu2 %v8908_v4  ;;  %v8729_v4 = vld [vmem:[%s19731_s1 + $0x558] sm:$0xf0]  ;;  %v7361_v6 = vadd.f32 %v7360_v55, %v7348_v1  ;;  %v12371_v1 = vld [vmem:[%s19731_s1 + $0x72c] sm:$0xf] }
 0x333   :  { %7626 = vmatpush.bf16.msrb.mxu3 %v9036_v20  ;;  %v7373_v20 = vpop.f32.mrf.mxu3  ;;  %v7349_v62 = vpop.f32.mrf.mxu1  ;;  %v8732_v56 = vor.u32 %v12311_v11, %v8729_v4  ;;  %v12271_v26 = vld [vmem:[%s19731_s1 + $0x40c] sm:$0xf]  ;;  %v8972_v3 = vor.u32 %v12371_v1, %v8969_v14  ;;  %v8825_v11 = vld [vmem:[%s19731_s1 + $0x618] sm:$0xf0] }
 0x334   :  { %7588 = vmatpush.bf16.msrb.mxu0 %v8636_v19  ;;  %v18453_v60 = vadd.f32 %v7373_v20, %v7361_v6  ;;  %v8860_v19 = vor.u32 %v12343_v7, %v8857_v40  ;;  %v12335_v47 = vld [vmem:[%s19731_s1 + $0x60c] sm:$0xf]  ;;  %v8953_v55 = vld [vmem:[%s19731_s1 + $0x718] sm:$0xf0]  ;;  %v8572_v21 = vor.u32 %v12271_v26, %v8569_v34 }
 0x335   :  { %7601 = vmatpush.bf16.msrb.mxu1 %v8764_v48  ;;  %v8585_v48 = vld [vmem:[%s19731_s1 + $0x438] sm:$0xf0]  ;;  %v12427_v7 = vld [vmem:[%s19731_s1 + $0x8ec] sm:$0xf] }
 0x336   :  { %7614 = vmatpush.bf16.msrb.mxu2 %v8892_v51  ;;  %v12307_v51 = vld [vmem:[%s19731_s1 + $0x52c] sm:$0xf]  ;;  %v8588_v5 = vor.u32 %v12275_v59, %v8585_v48  ;;  %v9193_v40 = vld [vmem:[%s19731_s1 + $0x8f8] sm:$0xf0] }
 0x337   :  { %7627 = vmatpush.bf16.msrb.mxu3 %v9020_v36  ;;  %v8841_v36 = vld [vmem:[%s19731_s1 + $0x638] sm:$0xf0]  ;;  %v8716_v54 = vor.u32 %v12307_v51, %v8713_v0  ;;  %v12459_v6 = vld [vmem:[%s19731_s1 + $0x9ec] sm:$0xf]  ;;  %v9196_v51 = vor.u32 %v12427_v7, %v9193_v40 }
 0x338   :  { %7589 = vmatpush.bf16.msrb.mxu0 %v8620_v61  ;;  %v8844_v61 = vor.u32 %v12339_v17, %v8841_v36  ;;  %v9321_v52 = vld [vmem:[%s19731_s1 + $0x9f8] sm:$0xf0]  ;;  %v12491_v15 = vld [vmem:[%s19731_s1 + $0xaec] sm:$0xf] }
 0x339   :  { %7602 = vmatpush.bf16.msrb.mxu1 %v8748_v43  ;;  %v12303_v43 = vld [vmem:[%s19731_s1 + $0x50c] sm:$0xf]  ;;  %v7362_v4 = vpop.f32.mrf.mxu2  ;;  %v9577_v59 = vld [vmem:[%s19731_s1 + $0xbf8] sm:$0xf0] }
 0x33a   :  { %7615 = vmatpush.bf16.msrb.mxu2 %v8876_v58  ;;  %v8697_v58 = vld [vmem:[%s19731_s1 + $0x518] sm:$0xf0]  ;;  %v12423_v17 = vld [vmem:[%s19731_s1 + $0x8cc] sm:$0xf] }
 0x33b   :  { %7628 = vmatpush.bf16.msrb.mxu3 %v9004_v57  ;;  %v12367_v57 = vld [vmem:[%s19731_s1 + $0x70c] sm:$0xf]  ;;  %v7375_v20 = vpop.f32.mrf.mxu3  ;;  %v8700_v62 = vor.u32 %v12303_v43, %v8697_v58  ;;  %v9177_v36 = vld [vmem:[%s19731_s1 + $0x8d8] sm:$0xf0] }
 0x33c   :  { %7590 = vmatpush.bf16.msrb.mxu0 %v8604_v24  ;;  %v9449_v24 = vld [vmem:[%s19731_s1 + $0xaf8] sm:$0xf0]  ;;  %v8956_v48 = vor.u32 %v12367_v57, %v8953_v55  ;;  %v12455_v1 = vld [vmem:[%s19731_s1 + $0x9cc] sm:$0xf]  ;;  %v9180_v43 = vor.u32 %v12423_v17, %v9177_v36 }
 0x33d   :  { %7603 = vmatpush.bf16.msrb.mxu1 %v8732_v56  ;;  %v8828_v56 = vor.u32 %v12335_v47, %v8825_v11  ;;  %v9452_v0 = vor.u32 %v12491_v15, %v9449_v24  ;;  %v12487_v26 = vld [vmem:[%s19731_s1 + $0xacc] sm:$0xf]  ;;  %v9433_v34 = vld [vmem:[%s19731_s1 + $0xad8] sm:$0xf0] }
 0x33e   :  { %7616 = vmatpush.bf16.msrb.mxu2 %v8860_v19  ;;  %v12523_v19 = vld [vmem:[%s19731_s1 + $0xbec] sm:$0xf]  ;;  %v9436_v47 = vor.u32 %v12487_v26, %v9433_v34  ;;  %v9161_v11 = vld [vmem:[%s19731_s1 + $0x8b8] sm:$0xf0] }
 0x33f   :  { %7629 = vmatpush.bf16.msrb.mxu3 %v8988_v63  ;;  %v9324_v63 = vor.u32 %v12459_v6, %v9321_v52  ;;  %v9580_v14 = vor.u32 %v12523_v19, %v9577_v59  ;;  %v12451_v57 = vld [vmem:[%s19731_s1 + $0x9ac] sm:$0xf]  ;;  %v9289_v4 = vld [vmem:[%s19731_s1 + $0x9b8] sm:$0xf0] }
 0x340   :  { %7591 = vmatpush.bf16.msrb.mxu0 %v8588_v5  ;;  %v9305_v5 = vld [vmem:[%s19731_s1 + $0x9d8] sm:$0xf0]  ;;  %v12483_v7 = vld [vmem:[%s19731_s1 + $0xaac] sm:$0xf] }
 0x341   :  { %7604 = vmatpush.bf16.msrb.mxu1 %v8716_v54  ;;  %v12519_v54 = vld [vmem:[%s19731_s1 + $0xbcc] sm:$0xf]  ;;  %v9308_v58 = vor.u32 %v12455_v1, %v9305_v5  ;;  %v9417_v40 = vld [vmem:[%s19731_s1 + $0xab8] sm:$0xf0] }
 0x342   :  { %7617 = vmatpush.bf16.msrb.mxu2 %v8844_v61  ;;  %v9561_v61 = vld [vmem:[%s19731_s1 + $0xbd8] sm:$0xf0]  ;;  %v9420_v52 = vor.u32 %v12483_v7, %v9417_v40  ;;  %v12447_v15 = vld [vmem:[%s19731_s1 + $0x98c] sm:$0xf] }
 0x343   :  { %7630 = vmatpush.bf16.msrb.mxu3 %v8972_v3  ;;  %v12419_v3 = vld [vmem:[%s19731_s1 + $0x8ac] sm:$0xf]  ;;  %v9564_v55 = vor.u32 %v12519_v54, %v9561_v61  ;;  %v9545_v6 = vld [vmem:[%s19731_s1 + $0xbb8] sm:$0xf0] }
 0x344   :  { %7592 = vmatpush.bf16.msrb.mxu0 %v8572_v21  ;;  %v9164_v20 = vor.u32 %v12419_v3, %v9161_v11  ;;  %v9292_v21 = vor.u32 %v12451_v57, %v9289_v4  ;;  %v18597_v19 = vpop.f32.mrf.mxu0  ;;  %v12511_v59 = vld [vmem:[%s19731_s1 + $0xb8c] sm:$0xf]  ;;  %v9129_v1 = vld [vmem:[%s19731_s1 + $0x878] sm:$0xf0] }
 0x345   :  { %7605 = vmatpush.bf16.msrb.mxu1 %v8700_v62  ;;  %v12479_v62 = vld [vmem:[%s19731_s1 + $0xa8c] sm:$0xf]  ;;  %v9257_v26 = vld [vmem:[%s19731_s1 + $0x978] sm:$0xf0] }
 0x346   :  { %7618 = vmatpush.bf16.msrb.mxu2 %v8828_v56  ;;  %v9401_v56 = vld [vmem:[%s19731_s1 + $0xa98] sm:$0xf0]  ;;  %v12411_v36 = vld [vmem:[%s19731_s1 + $0x86c] sm:$0xf] }
 0x347   :  { %7631 = vmatpush.bf16.msrb.mxu3 %v8956_v48  ;;  %7593 = vmatmul.bf16.vlgmr.msrb.gmra.mxu0 %v13646_v41  ;;  %v12415_v41 = vld [vmem:[%s19731_s1 + $0x88c] sm:$0xf]  ;;  %v9529_v48 = vld [vmem:[%s19731_s1 + $0xb98] sm:$0xf0]  ;;  %v9404_v17 = vor.u32 %v12479_v62, %v9401_v56 }
 0x348   :  { %7637 = vmatpush.bf16.msra.mxu0 %v9196_v51  ;;  %7606 = vmatmul.bf16.vlgmr.msrb.gmra.mxu1 %v13650_v44  ;;  %v9273_v44 = vld [vmem:[%s19731_s1 + $0x998] sm:$0xf0]  ;;  %v9532_v5 = vor.u32 %v12511_v59, %v9529_v48  ;;  %v12475_v34 = vld [vmem:[%s19731_s1 + $0xa6c] sm:$0xf] }
 0x349   :  { %7650 = vmatpush.bf16.msra.mxu1 %v9324_v63  ;;  %7619 = vmatmul.bf16.vlgmr.msrb.gmra.mxu2 %v13638_v38  ;;  %v12515_v38 = vld [vmem:[%s19731_s1 + $0xbac] sm:$0xf]  ;;  %v18605_v63 = vpop.f32.mrf.mxu1  ;;  %v9385_v54 = vld [vmem:[%s19731_s1 + $0xa78] sm:$0xf0] }
 0x34a   :  { %7663 = vmatpush.bf16.msra.mxu2 %v9452_v0  ;;  %7632 = vmatmul.bf16.vlgmr.msrb.gmra.mxu3 %v13648_v42  ;;  %v9145_v42 = vld [vmem:[%s19731_s1 + $0x898] sm:$0xf0]  ;;  %v9548_v24 = vor.u32 %v12515_v38, %v9545_v6  ;;  %v9276_v0 = vor.u32 %v12447_v15, %v9273_v44  ;;  %v12507_v61 = vld [vmem:[%s19731_s1 + $0xb6c] sm:$0xf]  ;;  %v9388_v3 = vor.u32 %v12475_v34, %v9385_v54 }
 0x34b   :  { %7676 = vmatpush.bf16.msra.mxu3 %v9580_v14  ;;  %v9148_v51 = vor.u32 %v12415_v41, %v9145_v42  ;;  %v12443_v14 = vld [vmem:[%s19731_s1 + $0x96c] sm:$0xf]  ;;  %v9113_v57 = vld [vmem:[%s19731_s1 + $0x858] sm:$0xf0] }
 0x34c   :  { %7638 = vmatpush.bf16.msra.mxu0 %v9180_v43  ;;  %v9513_v43 = vld [vmem:[%s19731_s1 + $0xb78] sm:$0xf0]  ;;  %v12407_v11 = vld [vmem:[%s19731_s1 + $0x84c] sm:$0xf]  ;;  %v18640_v7 = vpop.f32.mrf.mxu2  ;;  %v7388_v41 = vpop.f32.mrf.mxu0 }
 0x34d   :  { %7651 = vmatpush.bf16.msra.mxu1 %v9308_v58  ;;  %v9132_v58 = vor.u32 %v12411_v36, %v9129_v1  ;;  %v9516_v4 = vor.u32 %v12507_v61, %v9513_v43  ;;  %v9241_v40 = vld [vmem:[%s19731_s1 + $0x958] sm:$0xf0]  ;;  %v12471_v38 = vld [vmem:[%s19731_s1 + $0xa4c] sm:$0xf]  ;;  %v9116_v42 = vor.u32 %v12407_v11, %v9113_v57 }
 0x34e   :  { %7664 = vmatpush.bf16.msra.mxu2 %v9436_v47  ;;  %v9260_v47 = vor.u32 %v12443_v14, %v9257_v26  ;;  %v9369_v6 = vld [vmem:[%s19731_s1 + $0xa58] sm:$0xf0]  ;;  %v12403_v62 = vld [vmem:[%s19731_s1 + $0x82c] sm:$0xf] }
 0x34f   :  { %7677 = vmatpush.bf16.msra.mxu3 %v9564_v55  ;;  %v12439_v55 = vld [vmem:[%s19731_s1 + $0x94c] sm:$0xf]  ;;  %v9372_v44 = vor.u32 %v12471_v38, %v9369_v6  ;;  %v9097_v56 = vld [vmem:[%s19731_s1 + $0x838] sm:$0xf0] }
 0x350   :  { %7639 = vmatpush.bf16.msra.mxu0 %v9164_v20  ;;  %v18651_v20 = vpop.f32.mrf.mxu3  ;;  %v12435_v59 = vld [vmem:[%s19731_s1 + $0x92c] sm:$0xf]  ;;  %v9481_v1 = vld [vmem:[%s19731_s1 + $0xb38] sm:$0xf0]  ;;  %v9100_v14 = vor.u32 %v12403_v62, %v9097_v56 }
 0x351   :  { %7652 = vmatpush.bf16.msra.mxu1 %v9292_v21  ;;  %v12503_v21 = vld [vmem:[%s19731_s1 + $0xb4c] sm:$0xf]  ;;  %v7401_v15 = vpop.f32.mrf.mxu1  ;;  %v9081_v26 = vld [vmem:[%s19731_s1 + $0x818] sm:$0xf0] }
 0x352   :  { %7665 = vmatpush.bf16.msra.mxu2 %v9420_v52  ;;  %v9497_v52 = vld [vmem:[%s19731_s1 + $0xb58] sm:$0xf0]  ;;  %v12499_v36 = vld [vmem:[%s19731_s1 + $0xb2c] sm:$0xf] }
 0x353   :  { %7678 = vmatpush.bf16.msra.mxu3 %v9548_v24  ;;  %v9244_v24 = vor.u32 %v12439_v55, %v9241_v40  ;;  %v9500_v48 = vor.u32 %v12503_v21, %v9497_v52  ;;  %v12431_v61 = vld [vmem:[%s19731_s1 + $0x90c] sm:$0xf]  ;;  %v9209_v43 = vld [vmem:[%s19731_s1 + $0x918] sm:$0xf0] }
 0x354   :  { %7640 = vmatpush.bf16.msra.mxu0 %v9148_v51  ;;  %v9225_v51 = vld [vmem:[%s19731_s1 + $0x938] sm:$0xf0]  ;;  %v12495_v11 = vld [vmem:[%s19731_s1 + $0xb0c] sm:$0xf]  ;;  %v7414_v55 = vpop.f32.mrf.mxu2  ;;  %v9212_v15 = vor.u32 %v12431_v61, %v9209_v43 }
 0x355   :  { %7653 = vmatpush.bf16.msra.mxu1 %v9276_v0  ;;  %v12467_v0 = vld [vmem:[%s19731_s1 + $0xa2c] sm:$0xf]  ;;  %v9228_v34 = vor.u32 %v12435_v59, %v9225_v51  ;;  %v9465_v57 = vld [vmem:[%s19731_s1 + $0xb18] sm:$0xf0] }
 0x356   :  { %7666 = vmatpush.bf16.msra.mxu2 %v9404_v17  ;;  %v9353_v17 = vld [vmem:[%s19731_s1 + $0xa38] sm:$0xf0]  ;;  %v12587_v38 = vld [vmem:[%s19731_s1 + $0xdec] sm:$0xf]  ;;  %v9468_v56 = vor.u32 %v12495_v11, %v9465_v57 }
 0x357   :  { %7679 = vmatpush.bf16.msra.mxu3 %v9532_v5  ;;  %v12399_v5 = vld [vmem:[%s19731_s1 + $0x80c] sm:$0xf]  ;;  %v9356_v54 = vor.u32 %v12467_v0, %v9353_v17  ;;  %v9705_v40 = vld [vmem:[%s19731_s1 + $0xcf8] sm:$0xf0] }
 0x358   :  { %7641 = vmatpush.bf16.msra.mxu0 %v9132_v58  ;;  %v12463_v58 = vld [vmem:[%s19731_s1 + $0xa0c] sm:$0xf]  ;;  %v7427_v6 = vpop.f32.mrf.mxu3  ;;  %v9084_v21 = vor.u32 %v12399_v5, %v9081_v26  ;;  %v9833_v52 = vld [vmem:[%s19731_s1 + $0xdf8] sm:$0xf0] }
 0x359   :  { %7654 = vmatpush.bf16.msra.mxu1 %v9260_v47  ;;  %v9484_v47 = vor.u32 %v12499_v36, %v9481_v1  ;;  %v12619_v41 = vld [vmem:[%s19731_s1 + $0xeec] sm:$0xf]  ;;  %v10089_v62 = vld [vmem:[%s19731_s1 + $0xff8] sm:$0xf0] }
 0x35a   :  { %7667 = vmatpush.bf16.msra.mxu2 %v9388_v3  ;;  %v9337_v3 = vld [vmem:[%s19731_s1 + $0xa18] sm:$0xf0]  ;;  %v12551_v0 = vld [vmem:[%s19731_s1 + $0xccc] sm:$0xf] }
 0x35b   :  { %7680 = vmatpush.bf16.msra.mxu3 %v9516_v4  ;;  %v12555_v4 = vld [vmem:[%s19731_s1 + $0xcec] sm:$0xf]  ;;  %v9689_v17 = vld [vmem:[%s19731_s1 + $0xcd8] sm:$0xf0] }
 0x35c   :  { %7642 = vmatpush.bf16.msra.mxu0 %v9116_v42  ;;  %v9961_v42 = vld [vmem:[%s19731_s1 + $0xef8] sm:$0xf0]  ;;  %v9708_v59 = vor.u32 %v12555_v4, %v9705_v40  ;;  %v12583_v36 = vld [vmem:[%s19731_s1 + $0xdcc] sm:$0xf]  ;;  %v9692_v61 = vor.u32 %v12551_v0, %v9689_v17 }
 0x35d   :  { %7655 = vmatpush.bf16.msra.mxu1 %v9244_v24  ;;  %v9340_v24 = vor.u32 %v12463_v58, %v9337_v3  ;;  %v9964_v51 = vor.u32 %v12619_v41, %v9961_v42  ;;  %v12615_v5 = vld [vmem:[%s19731_s1 + $0xecc] sm:$0xf]  ;;  %v9945_v26 = vld [vmem:[%s19731_s1 + $0xed8] sm:$0xf0] }
 0x35e   :  { %7668 = vmatpush.bf16.msra.mxu2 %v9372_v44  ;;  %v12651_v44 = vld [vmem:[%s19731_s1 + $0xfec] sm:$0xf]  ;;  %v9948_v58 = vor.u32 %v12615_v5, %v9945_v26  ;;  %v9673_v3 = vld [vmem:[%s19731_s1 + $0xcb8] sm:$0xf0] }
 0x35f   :  { %7681 = vmatpush.bf16.msra.mxu3 %v9500_v48  ;;  %v9836_v48 = vor.u32 %v12587_v38, %v9833_v52  ;;  %v10092_v1 = vor.u32 %v12651_v44, %v10089_v62  ;;  %v12579_v11 = vld [vmem:[%s19731_s1 + $0xdac] sm:$0xf]  ;;  %v9801_v55 = vld [vmem:[%s19731_s1 + $0xdb8] sm:$0xf0] }
 0x360   :  { %7643 = vmatpush.bf16.msra.mxu0 %v9100_v14  ;;  %v9817_v14 = vld [vmem:[%s19731_s1 + $0xdd8] sm:$0xf0]  ;;  %v12611_v4 = vld [vmem:[%s19731_s1 + $0xeac] sm:$0xf] }
 0x361   :  { %7656 = vmatpush.bf16.msra.mxu1 %v9228_v34  ;;  %v12647_v34 = vld [vmem:[%s19731_s1 + $0xfcc] sm:$0xf]  ;;  %v9820_v43 = vor.u32 %v12583_v36, %v9817_v14  ;;  %v9929_v40 = vld [vmem:[%s19731_s1 + $0xeb8] sm:$0xf0] }
 0x362   :  { %7669 = vmatpush.bf16.msra.mxu2 %v9356_v54  ;;  %v10073_v54 = vld [vmem:[%s19731_s1 + $0xfd8] sm:$0xf0]  ;;  %v9932_v52 = vor.u32 %v12611_v4, %v9929_v40  ;;  %v12575_v41 = vld [vmem:[%s19731_s1 + $0xd8c] sm:$0xf] }
 0x363   :  { %7682 = vmatpush.bf16.msra.mxu3 %v9484_v47  ;;  %v12547_v47 = vld [vmem:[%s19731_s1 + $0xcac] sm:$0xf]  ;;  %v10076_v57 = vor.u32 %v12647_v34, %v10073_v54  ;;  %v10057_v38 = vld [vmem:[%s19731_s1 + $0xfb8] sm:$0xf0] }
 0x364   :  { %7644 = vmatpush.bf16.msra.mxu0 %v9084_v21  ;;  %v9676_v6 = vor.u32 %v12547_v47, %v9673_v3  ;;  %v9804_v21 = vor.u32 %v12579_v11, %v9801_v55  ;;  %v9785_v42 = vld [vmem:[%s19731_s1 + $0xd98] sm:$0xf0]  ;;  %v18801_v44 = vpop.f32.mrf.mxu0  ;;  %v12639_v62 = vld [vmem:[%s19731_s1 + $0xf8c] sm:$0xf] }
 0x365   :  { %7657 = vmatpush.bf16.msra.mxu1 %v9212_v15  ;;  %v12607_v15 = vld [vmem:[%s19731_s1 + $0xe8c] sm:$0xf]  ;;  %v9641_v36 = vld [vmem:[%s19731_s1 + $0xc78] sm:$0xf0] }
 0x366   :  { %7670 = vmatpush.bf16.msra.mxu2 %v9340_v24  ;;  %v9913_v24 = vld [vmem:[%s19731_s1 + $0xe98] sm:$0xf0]  ;;  %v12539_v17 = vld [vmem:[%s19731_s1 + $0xc6c] sm:$0xf] }
 0x367   :  { %7683 = vmatpush.bf16.msra.mxu3 %v9468_v56  ;;  %7645 = vmatmul.bf16.vlgmr.msra.gmra.mxu0 %v13839_v25  ;;  %v12643_v25 = vld [vmem:[%s19731_s1 + $0xfac] sm:$0xf]  ;;  %v10041_v56 = vld [vmem:[%s19731_s1 + $0xf98] sm:$0xf0]  ;;  %v9916_v0 = vor.u32 %v12607_v15, %v9913_v24 }
 0x368   :  { %7689 = vmatpush.bf16.msrb.mxu0 %v9708_v59  ;;  %7658 = vmatmul.bf16.vlgmr.msra.gmra.mxu1 %v13852_v30  ;;  %v9657_v30 = vld [vmem:[%s19731_s1 + $0xc98] sm:$0xf0]  ;;  %v10044_v14 = vor.u32 %v12639_v62, %v10041_v56  ;;  %v12603_v26 = vld [vmem:[%s19731_s1 + $0xe6c] sm:$0xf] }
 0x369   :  { %7702 = vmatpush.bf16.msrb.mxu1 %v9836_v48  ;;  %7671 = vmatmul.bf16.vlgmr.msra.gmra.mxu2 %v13850_v29  ;;  %v12543_v29 = vld [vmem:[%s19731_s1 + $0xc8c] sm:$0xf]  ;;  %v18809_v48 = vpop.f32.mrf.mxu1  ;;  %v9769_v5 = vld [vmem:[%s19731_s1 + $0xd78] sm:$0xf0] }
 0x36a   :  { %7715 = vmatpush.bf16.msrb.mxu2 %v9964_v51  ;;  %7684 = vmatmul.bf16.vlgmr.msra.gmra.mxu3 %v13860_v33  ;;  %v10060_v33 = vor.u32 %v12643_v25, %v10057_v38  ;;  %v9660_v59 = vor.u32 %v12543_v29, %v9657_v30  ;;  %v9788_v51 = vor.u32 %v12575_v41, %v9785_v42  ;;  %v9897_v34 = vld [vmem:[%s19731_s1 + $0xe78] sm:$0xf0]  ;;  %v12635_v54 = vld [vmem:[%s19731_s1 + $0xf6c] sm:$0xf] }
 0x36b   :  { %7728 = vmatpush.bf16.msrb.mxu3 %v10092_v1  ;;  %v12571_v1 = vld [vmem:[%s19731_s1 + $0xd6c] sm:$0xf]  ;;  %v9900_v47 = vor.u32 %v12603_v26, %v9897_v34  ;;  %v9625_v11 = vld [vmem:[%s19731_s1 + $0xc58] sm:$0xf0] }
 0x36c   :  { %7690 = vmatpush.bf16.msrb.mxu0 %v9692_v61  ;;  %v10025_v61 = vld [vmem:[%s19731_s1 + $0xf78] sm:$0xf0]  ;;  %v12535_v3 = vld [vmem:[%s19731_s1 + $0xc4c] sm:$0xf]  ;;  %v18844_v4 = vpop.f32.mrf.mxu2  ;;  %v7440_v30 = vpop.f32.mrf.mxu0 }
 0x36d   :  { %7703 = vmatpush.bf16.msrb.mxu1 %v9820_v43  ;;  %v9644_v43 = vor.u32 %v12539_v17, %v9641_v36  ;;  %v10028_v55 = vor.u32 %v12635_v54, %v10025_v61  ;;  %v9753_v40 = vld [vmem:[%s19731_s1 + $0xd58] sm:$0xf0]  ;;  %v12599_v25 = vld [vmem:[%s19731_s1 + $0xe4c] sm:$0xf]  ;;  %v9628_v41 = vor.u32 %v12535_v3, %v9625_v11 }
 0x36e   :  { %7716 = vmatpush.bf16.msrb.mxu2 %v9948_v58  ;;  %v9772_v58 = vor.u32 %v12571_v1, %v9769_v5  ;;  %v9881_v38 = vld [vmem:[%s19731_s1 + $0xe58] sm:$0xf0]  ;;  %v12563_v24 = vld [vmem:[%s19731_s1 + $0xd2c] sm:$0xf] }
 0x36f   :  { %7729 = vmatpush.bf16.msrb.mxu3 %v10076_v57  ;;  %v12567_v57 = vld [vmem:[%s19731_s1 + $0xd4c] sm:$0xf]  ;;  %v10009_v29 = vld [vmem:[%s19731_s1 + $0xf58] sm:$0xf0]  ;;  %v9884_v15 = vor.u32 %v12599_v25, %v9881_v38 }
 0x370   :  { %7691 = vmatpush.bf16.msrb.mxu0 %v9676_v6  ;;  %v7387_v6 = vadd.f32 %v18597_v19, %v18453_v60  ;;  %v9756_v42 = vor.u32 %v12567_v57, %v9753_v40  ;;  %v12531_v60 = vld [vmem:[%s19731_s1 + $0xc2c] sm:$0xf]  ;;  %v9609_v19 = vld [vmem:[%s19731_s1 + $0xc38] sm:$0xf0] }
 0x371   :  { %7704 = vmatpush.bf16.msrb.mxu1 %v9804_v21  ;;  %v18857_v21 = vpop.f32.mrf.mxu3  ;;  %v9737_v56 = vld [vmem:[%s19731_s1 + $0xd38] sm:$0xf0]  ;;  %v12627_v17 = vld [vmem:[%s19731_s1 + $0xf2c] sm:$0xf]  ;;  %v9612_v1 = vor.u32 %v12531_v60, %v9609_v19 }
 0x372   :  { %7717 = vmatpush.bf16.msrb.mxu2 %v9932_v52  ;;  %v12631_v52 = vld [vmem:[%s19731_s1 + $0xf4c] sm:$0xf]  ;;  %v9993_v36 = vld [vmem:[%s19731_s1 + $0xf38] sm:$0xf0]  ;;  %v9740_v26 = vor.u32 %v12563_v24, %v9737_v56 }
 0x373   :  { %7730 = vmatpush.bf16.msrb.mxu3 %v10060_v33  ;;  %v7453_v33 = vpop.f32.mrf.mxu1  ;;  %v10012_v62 = vor.u32 %v12631_v52, %v10009_v29  ;;  %v9593_v5 = vld [vmem:[%s19731_s1 + $0xc18] sm:$0xf0]  ;;  %v12559_v54 = vld [vmem:[%s19731_s1 + $0xd0c] sm:$0xf] }
 0x374   :  { %7692 = vmatpush.bf16.msrb.mxu0 %v9660_v59  ;;  %v12595_v59 = vld [vmem:[%s19731_s1 + $0xe2c] sm:$0xf]  ;;  %v9721_v61 = vld [vmem:[%s19731_s1 + $0xd18] sm:$0xf0]  ;;  %v7466_v11 = vpop.f32.mrf.mxu2 }
 0x375   :  { %7705 = vmatpush.bf16.msrb.mxu1 %v9788_v51  ;;  %v9865_v51 = vld [vmem:[%s19731_s1 + $0xe38] sm:$0xf0]  ;;  %v12683_v57 = vld [vmem:[%s19731_s1 + $0x10ec] sm:$0xf] }
 0x376   :  { %7718 = vmatpush.bf16.msrb.mxu2 %v9916_v0  ;;  %v7400_v0 = vadd.f32 %v18605_v63, %v7387_v6  ;;  %v9868_v34 = vor.u32 %v12595_v59, %v9865_v51  ;;  %v9977_v3 = vld [vmem:[%s19731_s1 + $0xf18] sm:$0xf0]  ;;  %v12715_v40 = vld [vmem:[%s19731_s1 + $0x11ec] sm:$0xf] }
 0x377   :  { %7731 = vmatpush.bf16.msrb.mxu3 %v10044_v14  ;;  %v12527_v14 = vld [vmem:[%s19731_s1 + $0xc0c] sm:$0xf]  ;;  %v10345_v6 = vld [vmem:[%s19731_s1 + $0x11f8] sm:$0xf0] }
 0x378   :  { %7693 = vmatpush.bf16.msrb.mxu0 %v9644_v43  ;;  %v7413_v63 = vadd.f32 %v18640_v7, %v7400_v0  ;;  %v12591_v43 = vld [vmem:[%s19731_s1 + $0xe0c] sm:$0xf]  ;;  %v9849_v7 = vld [vmem:[%s19731_s1 + $0xe18] sm:$0xf0]  ;;  %v9596_v38 = vor.u32 %v12527_v14, %v9593_v5 }
 0x379   :  { %7706 = vmatpush.bf16.msrb.mxu1 %v9772_v58  ;;  %v9996_v58 = vor.u32 %v12627_v17, %v9993_v36  ;;  %v7479_v25 = vpop.f32.mrf.mxu3  ;;  %v12747_v52 = vld [vmem:[%s19731_s1 + $0x12ec] sm:$0xf]  ;;  %v10473_v29 = vld [vmem:[%s19731_s1 + $0x12f8] sm:$0xf0]  ;;  %v9852_v33 = vor.u32 %v12591_v43, %v9849_v7 }
 0x37a   :  { %7719 = vmatpush.bf16.msrb.mxu2 %v9900_v47  ;;  %v12623_v47 = vld [vmem:[%s19731_s1 + $0xf0c] sm:$0xf]  ;;  %v7426_v30 = vadd.f32 %v18651_v20, %v7413_v63  ;;  %v10476_v56 = vor.u32 %v12747_v52, %v10473_v29  ;;  %v10201_v59 = vld [vmem:[%s19731_s1 + $0x10d8] sm:$0xf0] }
 0x37b   :  { %7732 = vmatpush.bf16.msrb.mxu3 %v10028_v55  ;;  %v10217_v55 = vld [vmem:[%s19731_s1 + $0x10f8] sm:$0xf0]  ;;  %v9980_v60 = vor.u32 %v12623_v47, %v9977_v3  ;;  %v12679_v20 = vld [vmem:[%s19731_s1 + $0x10cc] sm:$0xf] }
 0x37c   :  { %7694 = vmatpush.bf16.msrb.mxu0 %v9628_v41  ;;  %v9724_v41 = vor.u32 %v12559_v54, %v9721_v61  ;;  %v10220_v19 = vor.u32 %v12683_v57, %v10217_v55  ;;  %v7439_v24 = vadd.f32 %v18801_v44, %v7426_v30  ;;  %v12711_v51 = vld [vmem:[%s19731_s1 + $0x11cc] sm:$0xf]  ;;  %v10329_v44 = vld [vmem:[%s19731_s1 + $0x11d8] sm:$0xf0]  ;;  %v10204_v5 = vor.u32 %v12679_v20, %v10201_v59 }
 0x37d   :  { %7707 = vmatpush.bf16.msrb.mxu1 %v9756_v42  ;;  %v12779_v42 = vld [vmem:[%s19731_s1 + $0x13ec] sm:$0xf]  ;;  %v10457_v36 = vld [vmem:[%s19731_s1 + $0x12d8] sm:$0xf0] }
 0x37e   :  { %7720 = vmatpush.bf16.msrb.mxu2 %v9884_v15  ;;  %v10601_v15 = vld [vmem:[%s19731_s1 + $0x13f8] sm:$0xf0]  ;;  %v12743_v17 = vld [vmem:[%s19731_s1 + $0x12cc] sm:$0xf]  ;;  %v7452_v63 = vadd.f32 %v18809_v48, %v7439_v24 }
 0x37f   :  { %7733 = vmatpush.bf16.msrb.mxu3 %v10012_v62  ;;  %v10348_v62 = vor.u32 %v12715_v40, %v10345_v6  ;;  %v10604_v0 = vor.u32 %v12779_v42, %v10601_v15  ;;  %v10585_v14 = vld [vmem:[%s19731_s1 + $0x13d8] sm:$0xf0]  ;;  %v12675_v54 = vld [vmem:[%s19731_s1 + $0x10ac] sm:$0xf] }
 0x380   :  { %7695 = vmatpush.bf16.msrb.mxu0 %v9612_v1  ;;  %v12775_v1 = vld [vmem:[%s19731_s1 + $0x13cc] sm:$0xf]  ;;  %v10185_v61 = vld [vmem:[%s19731_s1 + $0x10b8] sm:$0xf0]  ;;  %v7465_v3 = vadd.f32 %v18844_v4, %v7452_v63 }
 0x381   :  { %7708 = vmatpush.bf16.msrb.mxu1 %v9740_v26  ;;  %v10332_v26 = vor.u32 %v12711_v51, %v10329_v44  ;;  %v12707_v43 = vld [vmem:[%s19731_s1 + $0x11ac] sm:$0xf]  ;;  %v10588_v48 = vor.u32 %v12775_v1, %v10585_v14  ;;  %v10441_v47 = vld [vmem:[%s19731_s1 + $0x12b8] sm:$0xf0]  ;;  %v10188_v57 = vor.u32 %v12675_v54, %v10185_v61 }
 0x382   :  { %7721 = vmatpush.bf16.msrb.mxu2 %v9868_v34  ;;  %v10460_v34 = vor.u32 %v12743_v17, %v10457_v36  ;;  %v12739_v7 = vld [vmem:[%s19731_s1 + $0x12ac] sm:$0xf]  ;;  %v10569_v11 = vld [vmem:[%s19731_s1 + $0x13b8] sm:$0xf0]  ;;  %v7478_v52 = vadd.f32 %v18857_v21, %v7465_v3 }
 0x383   :  { %7734 = vmatpush.bf16.msrb.mxu3 %v9996_v58  ;;  %v10313_v58 = vld [vmem:[%s19731_s1 + $0x11b8] sm:$0xf0]  ;;  %v10444_v4 = vor.u32 %v12739_v7, %v10441_v47  ;;  %v12703_v40 = vld [vmem:[%s19731_s1 + $0x118c] sm:$0xf] }
 0x384   :  { %7696 = vmatpush.bf16.msrb.mxu0 %v9596_v38  ;;  %v10316_v55 = vor.u32 %v12707_v43, %v10313_v58  ;;  %v10297_v25 = vld [vmem:[%s19731_s1 + $0x1198] sm:$0xf0]  ;;  %v12735_v38 = vld [vmem:[%s19731_s1 + $0x128c] sm:$0xf]  ;;  %v7490_v29 = vpop.f32.mrf.mxu0 }
 0x385   :  { %7709 = vmatpush.bf16.msrb.mxu1 %v9724_v41  ;;  %v10425_v6 = vld [vmem:[%s19731_s1 + $0x1298] sm:$0xf0]  ;;  %v12767_v30 = vld [vmem:[%s19731_s1 + $0x138c] sm:$0xf]  ;;  %v7503_v42 = vpop.f32.mrf.mxu1  ;;  %v7491_v15 = vadd.f32 %v7490_v29, %v7478_v52 }
 0x386   :  { %7722 = vmatpush.bf16.msrb.mxu2 %v9852_v33  ;;  %v10553_v41 = vld [vmem:[%s19731_s1 + $0x1398] sm:$0xf0]  ;;  %v12667_v21 = vld [vmem:[%s19731_s1 + $0x106c] sm:$0xf] }
 0x387   :  { %7735 = vmatpush.bf16.msrb.mxu3 %v9980_v60  ;;  %7697 = vmatmul.bf16.vlgmr.msrb.gmra.mxu0 %v14049_v23  ;;  %v12771_v23 = vld [vmem:[%s19731_s1 + $0x13ac] sm:$0xf]  ;;  %v10300_v60 = vor.u32 %v12703_v40, %v10297_v25  ;;  %v10153_v24 = vld [vmem:[%s19731_s1 + $0x1078] sm:$0xf0]  ;;  %v7504_v36 = vadd.f32 %v7503_v42, %v7491_v15 }
 0x388   :  { %7741 = vmatpush.bf16.msra.mxu0 %v10220_v19  ;;  %7710 = vmatmul.bf16.vlgmr.msrb.gmra.mxu1 %v14062_v31  ;;  %v10169_v31 = vld [vmem:[%s19731_s1 + $0x1098] sm:$0xf0]  ;;  %v10428_v19 = vor.u32 %v12735_v38, %v10425_v6  ;;  %v12731_v59 = vld [vmem:[%s19731_s1 + $0x126c] sm:$0xf]  ;;  %v10156_v17 = vor.u32 %v12667_v21, %v10153_v24 }
 0x389   :  { %7754 = vmatpush.bf16.msra.mxu1 %v10348_v62  ;;  %7723 = vmatmul.bf16.vlgmr.msrb.gmra.mxu2 %v14060_v28  ;;  %v12671_v28 = vld [vmem:[%s19731_s1 + $0x108c] sm:$0xf]  ;;  %v10281_v20 = vld [vmem:[%s19731_s1 + $0x1178] sm:$0xf0] }
 0x38a   :  { %7767 = vmatpush.bf16.msra.mxu2 %v10476_v56  ;;  %7736 = vmatmul.bf16.vlgmr.msrb.gmra.mxu3 %v14070_v35  ;;  %v10572_v35 = vor.u32 %v12771_v23, %v10569_v11  ;;  %v10172_v33 = vor.u32 %v12671_v28, %v10169_v31  ;;  %v12699_v62 = vld [vmem:[%s19731_s1 + $0x116c] sm:$0xf]  ;;  %v10556_v56 = vor.u32 %v12767_v30, %v10553_v41  ;;  %v10409_v51 = vld [vmem:[%s19731_s1 + $0x1278] sm:$0xf0] }
 0x38b   :  { %7780 = vmatpush.bf16.msra.mxu3 %v10604_v0  ;;  %v12763_v0 = vld [vmem:[%s19731_s1 + $0x136c] sm:$0xf]  ;;  %v10537_v44 = vld [vmem:[%s19731_s1 + $0x1378] sm:$0xf0]  ;;  %v10284_v1 = vor.u32 %v12699_v62, %v10281_v20  ;;  %v10412_v14 = vor.u32 %v12731_v59, %v10409_v51 }
 0x38c   :  { %7742 = vmatpush.bf16.msra.mxu0 %v10204_v5  ;;  %v12663_v5 = vld [vmem:[%s19731_s1 + $0x104c] sm:$0xf]  ;;  %v10137_v63 = vld [vmem:[%s19731_s1 + $0x1058] sm:$0xf0]  ;;  %v7516_v54 = vpop.f32.mrf.mxu2  ;;  %v7492_v23 = vpop.f32.mrf.mxu0 }
 0x38d   :  { %7755 = vmatpush.bf16.msra.mxu1 %v10332_v26  ;;  %v12695_v26 = vld [vmem:[%s19731_s1 + $0x114c] sm:$0xf]  ;;  %v10265_v61 = vld [vmem:[%s19731_s1 + $0x1158] sm:$0xf0]  ;;  %v7517_v58 = vadd.f32 %v7516_v54, %v7504_v36  ;;  %v7529_v7 = vpop.f32.mrf.mxu3  ;;  %v10140_v11 = vor.u32 %v12663_v5, %v10137_v63 }
 0x38e   :  { %7768 = vmatpush.bf16.msra.mxu2 %v10460_v34  ;;  %v10540_v34 = vor.u32 %v12763_v0, %v10537_v44  ;;  %v12727_v43 = vld [vmem:[%s19731_s1 + $0x124c] sm:$0xf]  ;;  %v10521_v3 = vld [vmem:[%s19731_s1 + $0x1358] sm:$0xf0] }
 0x38f   :  { %7781 = vmatpush.bf16.msra.mxu3 %v10588_v48  ;;  %v10393_v48 = vld [vmem:[%s19731_s1 + $0x1258] sm:$0xf0]  ;;  %v12759_v47 = vld [vmem:[%s19731_s1 + $0x134c] sm:$0xf] }
 0x390   :  { %7743 = vmatpush.bf16.msra.mxu0 %v10188_v57  ;;  %v7505_v57 = vpop.f32.mrf.mxu1  ;;  %v10396_v28 = vor.u32 %v12727_v43, %v10393_v48  ;;  %v12659_v31 = vld [vmem:[%s19731_s1 + $0x102c] sm:$0xf]  ;;  %v10121_v40 = vld [vmem:[%s19731_s1 + $0x1038] sm:$0xf0]  ;;  %v10524_v25 = vor.u32 %v12759_v47, %v10521_v3 }
 0x391   :  { %7756 = vmatpush.bf16.msra.mxu1 %v10316_v55  ;;  %v7530_v55 = vadd.f32 %v7529_v7, %v7517_v58  ;;  %v10249_v38 = vld [vmem:[%s19731_s1 + $0x1138] sm:$0xf0]  ;;  %v12723_v6 = vld [vmem:[%s19731_s1 + $0x122c] sm:$0xf]  ;;  %v10124_v41 = vor.u32 %v12659_v31, %v10121_v40 }
 0x392   :  { %7769 = vmatpush.bf16.msra.mxu2 %v10444_v4  ;;  %v10268_v4 = vor.u32 %v12695_v26, %v10265_v61  ;;  %v10377_v52 = vld [vmem:[%s19731_s1 + $0x1238] sm:$0xf0]  ;;  %v12755_v29 = vld [vmem:[%s19731_s1 + $0x132c] sm:$0xf] }
 0x393   :  { %7782 = vmatpush.bf16.msra.mxu3 %v10572_v35  ;;  %v12691_v35 = vld [vmem:[%s19731_s1 + $0x112c] sm:$0xf]  ;;  %7951 = vst [vmem:[%s19733_s2 + $0x10] sm:$0xff] %v7530_v55  ;;  %v10505_v30 = vld [vmem:[%s19731_s1 + $0x1338] sm:$0xf0] }
 0x394   :  { %7744 = vmatpush.bf16.msra.mxu0 %v10172_v33  ;;  %v12655_v33 = vld [vmem:[%s19731_s1 + $0x100c] sm:$0xf]  ;;  %v10105_v42 = vld [vmem:[%s19731_s1 + $0x1018] sm:$0xf0]  ;;  %v10252_v15 = vor.u32 %v12691_v35, %v10249_v38  ;;  %v10508_v62 = vor.u32 %v12755_v29, %v10505_v30  ;;  %v7518_v51 = vpop.f32.mrf.mxu2 }
 0x395   :  { %7757 = vmatpush.bf16.msra.mxu1 %v10300_v60  ;;  %v10380_v60 = vor.u32 %v12723_v6, %v10377_v52  ;;  %v10233_v21 = vld [vmem:[%s19731_s1 + $0x1118] sm:$0xf0]  ;;  %v12719_v24 = vld [vmem:[%s19731_s1 + $0x120c] sm:$0xf]  ;;  %v7531_v36 = vpop.f32.mrf.mxu3 }
 0x396   :  { %7770 = vmatpush.bf16.msra.mxu2 %v10428_v19  ;;  %v12687_v19 = vld [vmem:[%s19731_s1 + $0x110c] sm:$0xf]  ;;  %v10489_v59 = vld [vmem:[%s19731_s1 + $0x1318] sm:$0xf0] }
 0x397   :  { %7783 = vmatpush.bf16.msra.mxu3 %v10556_v56  ;;  %v10361_v56 = vld [vmem:[%s19731_s1 + $0x1218] sm:$0xf0]  ;;  %v12751_v20 = vld [vmem:[%s19731_s1 + $0x130c] sm:$0xf]  ;;  %v10236_v26 = vor.u32 %v12687_v19, %v10233_v21 }
 0x398   :  { %7745 = vmatpush.bf16.msra.mxu0 %v10156_v17  ;;  %v12811_v0 = vld [vmem:[%s19731_s1 + $0x14ec] sm:$0xf]  ;;  %v10729_v44 = vld [vmem:[%s19731_s1 + $0x14f8] sm:$0xf0]  ;;  %v10492_v43 = vor.u32 %v12751_v20, %v10489_v59 }
 0x399   :  { %7758 = vmatpush.bf16.msra.mxu1 %v10284_v1  ;;  %v12843_v17 = vld [vmem:[%s19731_s1 + $0x15ec] sm:$0xf]  ;;  %v10108_v1 = vor.u32 %v12655_v33, %v10105_v42  ;;  %v10985_v63 = vld [vmem:[%s19731_s1 + $0x16f8] sm:$0xf0]  ;;  %v10732_v48 = vor.u32 %v12811_v0, %v10729_v44 }
 0x39a   :  { %7771 = vmatpush.bf16.msra.mxu2 %v10412_v14  ;;  %v10857_v14 = vld [vmem:[%s19731_s1 + $0x15f8] sm:$0xf0]  ;;  %v12875_v5 = vld [vmem:[%s19731_s1 + $0x16ec] sm:$0xf] }
 0x39b   :  { %7784 = vmatpush.bf16.msra.mxu3 %v10540_v34  ;;  %v10364_v34 = vor.u32 %v12719_v24, %v10361_v56  ;;  %v12907_v54 = vld [vmem:[%s19731_s1 + $0x17ec] sm:$0xf]  ;;  %v11113_v61 = vld [vmem:[%s19731_s1 + $0x17f8] sm:$0xf0]  ;;  %v10860_v58 = vor.u32 %v12843_v17, %v10857_v14  ;;  %v10988_v7 = vor.u32 %v12875_v5, %v10985_v63 }
 0x39c   :  { %7746 = vmatpush.bf16.msra.mxu0 %v10140_v11  ;;  %v12807_v47 = vld [vmem:[%s19731_s1 + $0x14cc] sm:$0xf]  ;;  %v10713_v3 = vld [vmem:[%s19731_s1 + $0x14d8] sm:$0xf0]  ;;  %v11116_v11 = vor.u32 %v12907_v54, %v11113_v61 }
 0x39d   :  { %7759 = vmatpush.bf16.msra.mxu1 %v10268_v4  ;;  %v12839_v23 = vld [vmem:[%s19731_s1 + $0x15cc] sm:$0xf]  ;;  %v10841_v57 = vld [vmem:[%s19731_s1 + $0x15d8] sm:$0xf0]  ;;  %v10716_v40 = vor.u32 %v12807_v47, %v10713_v3 }
 0x39e   :  { %7772 = vmatpush.bf16.msra.mxu2 %v10396_v28  ;;  %v12871_v55 = vld [vmem:[%s19731_s1 + $0x16cc] sm:$0xf]  ;;  %v10969_v4 = vld [vmem:[%s19731_s1 + $0x16d8] sm:$0xf0]  ;;  %v10844_v35 = vor.u32 %v12839_v23, %v10841_v57 }
 0x39f   :  { %7785 = vmatpush.bf16.msra.mxu3 %v10524_v25  ;;  %v12903_v28 = vld [vmem:[%s19731_s1 + $0x17cc] sm:$0xf]  ;;  %v11097_v31 = vld [vmem:[%s19731_s1 + $0x17d8] sm:$0xf0]  ;;  %v10972_v25 = vor.u32 %v12871_v55, %v10969_v4 }
 0x3a0   :  { %7747 = vmatpush.bf16.msra.mxu0 %v10124_v41  ;;  %v12803_v38 = vld [vmem:[%s19731_s1 + $0x14ac] sm:$0xf]  ;;  %v10697_v6 = vld [vmem:[%s19731_s1 + $0x14b8] sm:$0xf0]  ;;  %v11100_v29 = vor.u32 %v12903_v28, %v11097_v31 }
 0x3a1   :  { %7760 = vmatpush.bf16.msra.mxu1 %v10252_v15  ;;  %v12835_v52 = vld [vmem:[%s19731_s1 + $0x15ac] sm:$0xf]  ;;  %v10825_v30 = vld [vmem:[%s19731_s1 + $0x15b8] sm:$0xf0]  ;;  %v10700_v15 = vor.u32 %v12803_v38, %v10697_v6 }
 0x3a2   :  { %7773 = vmatpush.bf16.msra.mxu2 %v10380_v60  ;;  %v12867_v41 = vld [vmem:[%s19731_s1 + $0x16ac] sm:$0xf]  ;;  %v10953_v33 = vld [vmem:[%s19731_s1 + $0x16b8] sm:$0xf0]  ;;  %v10828_v60 = vor.u32 %v12835_v52, %v10825_v30 }
 0x3a3   :  { %7786 = vmatpush.bf16.msra.mxu3 %v10508_v62  ;;  %v11081_v42 = vld [vmem:[%s19731_s1 + $0x17b8] sm:$0xf0]  ;;  %v10956_v19 = vor.u32 %v12867_v41, %v10953_v33  ;;  %v12831_v21 = vld [vmem:[%s19731_s1 + $0x158c] sm:$0xf] }
 0x3a4   :  { %7748 = vmatpush.bf16.msra.mxu0 %v10108_v1  ;;  %v10809_v24 = vld [vmem:[%s19731_s1 + $0x1598] sm:$0xf0]  ;;  %v12863_v62 = vld [vmem:[%s19731_s1 + $0x168c] sm:$0xf]  ;;  %v7542_v0 = vpop.f32.mrf.mxu0 }
 0x3a5   :  { %7761 = vmatpush.bf16.msra.mxu1 %v10236_v26  ;;  %v10937_v56 = vld [vmem:[%s19731_s1 + $0x1698] sm:$0xf0]  ;;  %v12895_v20 = vld [vmem:[%s19731_s1 + $0x178c] sm:$0xf]  ;;  %v10812_v44 = vor.u32 %v12831_v21, %v10809_v24  ;;  %v7555_v5 = vpop.f32.mrf.mxu1 }
 0x3a6   :  { %7774 = vmatpush.bf16.msra.mxu2 %v10364_v34  ;;  %v11065_v59 = vld [vmem:[%s19731_s1 + $0x1798] sm:$0xf0]  ;;  %v10940_v17 = vor.u32 %v12863_v62, %v10937_v56  ;;  %v12795_v36 = vld [vmem:[%s19731_s1 + $0x146c] sm:$0xf]  ;;  %v7556_v61 = vadd.f32 %v7555_v5, %v7542_v0 }
 0x3a7   :  { %7787 = vmatpush.bf16.msra.mxu3 %v10492_v43  ;;  %7749 = vmatmul.bf16.vlgmr.msra.gmra.mxu0 %v14259_v37  ;;  %v12899_v37 = vld [vmem:[%s19731_s1 + $0x17ac] sm:$0xf]  ;;  %v10665_v1 = vld [vmem:[%s19731_s1 + $0x1478] sm:$0xf0]  ;;  %v11068_v63 = vor.u32 %v12895_v20, %v11065_v59 }
 0x3a8   :  { %7793 = vmatpush.bf16.msrb.mxu0 %v10732_v48  ;;  %7762 = vmatmul.bf16.vlgmr.msra.gmra.mxu1 %v14272_v46  ;;  %v10681_v46 = vld [vmem:[%s19731_s1 + $0x1498] sm:$0xf0]  ;;  %v12827_v14 = vld [vmem:[%s19731_s1 + $0x156c] sm:$0xf] }
 0x3a9   :  { %7806 = vmatpush.bf16.msrb.mxu1 %v10860_v58  ;;  %7775 = vmatmul.bf16.vlgmr.msra.gmra.mxu2 %v14270_v45  ;;  %v12799_v45 = vld [vmem:[%s19731_s1 + $0x148c] sm:$0xf]  ;;  %v10793_v26 = vld [vmem:[%s19731_s1 + $0x1578] sm:$0xf0]  ;;  %v10668_v58 = vor.u32 %v12795_v36, %v10665_v1 }
 0x3aa   :  { %7819 = vmatpush.bf16.msrb.mxu2 %v10988_v7  ;;  %7788 = vmatmul.bf16.vlgmr.msra.gmra.mxu3 %v14280_v49  ;;  %v11084_v49 = vor.u32 %v12899_v37, %v11081_v42  ;;  %v10684_v51 = vor.u32 %v12799_v45, %v10681_v46  ;;  %v12859_v34 = vld [vmem:[%s19731_s1 + $0x166c] sm:$0xf]  ;;  %v10921_v54 = vld [vmem:[%s19731_s1 + $0x1678] sm:$0xf0]  ;;  %v10796_v7 = vor.u32 %v12827_v14, %v10793_v26 }
 0x3ab   :  { %7832 = vmatpush.bf16.msrb.mxu3 %v11116_v11  ;;  %v12891_v43 = vld [vmem:[%s19731_s1 + $0x176c] sm:$0xf]  ;;  %v11049_v48 = vld [vmem:[%s19731_s1 + $0x1778] sm:$0xf0]  ;;  %v10924_v47 = vor.u32 %v12859_v34, %v10921_v54 }
 0x3ac   :  { %7794 = vmatpush.bf16.msrb.mxu0 %v10716_v40  ;;  %v12791_v3 = vld [vmem:[%s19731_s1 + $0x144c] sm:$0xf]  ;;  %v10649_v23 = vld [vmem:[%s19731_s1 + $0x1458] sm:$0xf0]  ;;  %v7568_v57 = vpop.f32.mrf.mxu2  ;;  %v11052_v55 = vor.u32 %v12891_v43, %v11049_v48 }
 0x3ad   :  { %7807 = vmatpush.bf16.msrb.mxu1 %v10844_v35  ;;  %v12823_v11 = vld [vmem:[%s19731_s1 + $0x154c] sm:$0xf]  ;;  %v10777_v4 = vld [vmem:[%s19731_s1 + $0x1558] sm:$0xf0]  ;;  %v7569_v40 = vadd.f32 %v7568_v57, %v7556_v61  ;;  %v7581_v35 = vpop.f32.mrf.mxu3  ;;  %v10652_v6 = vor.u32 %v12791_v3, %v10649_v23 }
 0x3ae   :  { %7820 = vmatpush.bf16.msrb.mxu2 %v10972_v25  ;;  %v12855_v28 = vld [vmem:[%s19731_s1 + $0x164c] sm:$0xf]  ;;  %v10905_v31 = vld [vmem:[%s19731_s1 + $0x1658] sm:$0xf0]  ;;  %v10780_v30 = vor.u32 %v12823_v11, %v10777_v4 }
 0x3af   :  { %7833 = vmatpush.bf16.msrb.mxu3 %v11100_v29  ;;  %v12887_v25 = vld [vmem:[%s19731_s1 + $0x174c] sm:$0xf]  ;;  %v11033_v38 = vld [vmem:[%s19731_s1 + $0x1758] sm:$0xf0]  ;;  %v19267_v52 = vadd.f32 %v7581_v35, %v7569_v40  ;;  %v7544_v29 = vpop.f32.mrf.mxu0  ;;  %v10908_v41 = vor.u32 %v12855_v28, %v10905_v31 }
 0x3b0   :  { %7795 = vmatpush.bf16.msrb.mxu0 %v10700_v15  ;;  %v12787_v33 = vld [vmem:[%s19731_s1 + $0x142c] sm:$0xf]  ;;  %v10633_v37 = vld [vmem:[%s19731_s1 + $0x1438] sm:$0xf0]  ;;  %v7557_v15 = vpop.f32.mrf.mxu1 }
 0x3b1   :  { %7808 = vmatpush.bf16.msrb.mxu1 %v10828_v60  ;;  %v12819_v42 = vld [vmem:[%s19731_s1 + $0x152c] sm:$0xf]  ;;  %v11036_v60 = vor.u32 %v12887_v25, %v11033_v38  ;;  %v10889_v46 = vld [vmem:[%s19731_s1 + $0x1638] sm:$0xf0]  ;;  %v10636_v24 = vor.u32 %v12787_v33, %v10633_v37 }
 0x3b2   :  { %7821 = vmatpush.bf16.msrb.mxu2 %v10956_v19  ;;  %v10761_v19 = vld [vmem:[%s19731_s1 + $0x1538] sm:$0xf0]  ;;  %v12851_v45 = vld [vmem:[%s19731_s1 + $0x162c] sm:$0xf] }
 0x3b3   :  { %7834 = vmatpush.bf16.msrb.mxu3 %v11084_v49  ;;  %v12883_v21 = vld [vmem:[%s19731_s1 + $0x172c] sm:$0xf]  ;;  %v11017_v49 = vld [vmem:[%s19731_s1 + $0x1738] sm:$0xf0]  ;;  %v10764_v20 = vor.u32 %v12819_v42, %v10761_v19  ;;  %v10892_v59 = vor.u32 %v12851_v45, %v10889_v46 }
 0x3b4   :  { %7796 = vmatpush.bf16.msrb.mxu0 %v10684_v51  ;;  %v12783_v62 = vld [vmem:[%s19731_s1 + $0x140c] sm:$0xf]  ;;  %v10617_v56 = vld [vmem:[%s19731_s1 + $0x1418] sm:$0xf0]  ;;  %v11020_v36 = vor.u32 %v12883_v21, %v11017_v49 }
 0x3b5   :  { %7809 = vmatpush.bf16.msrb.mxu1 %v10812_v44  ;;  %v12815_v51 = vld [vmem:[%s19731_s1 + $0x150c] sm:$0xf]  ;;  %v10745_v0 = vld [vmem:[%s19731_s1 + $0x1518] sm:$0xf0]  ;;  %v10620_v61 = vor.u32 %v12783_v62, %v10617_v56 }
 0x3b6   :  { %7822 = vmatpush.bf16.msrb.mxu2 %v10940_v17  ;;  %v12847_v44 = vld [vmem:[%s19731_s1 + $0x160c] sm:$0xf]  ;;  %v7570_v17 = vpop.f32.mrf.mxu2  ;;  %v10873_v1 = vld [vmem:[%s19731_s1 + $0x1618] sm:$0xf0] }
 0x3b7   :  { %7835 = vmatpush.bf16.msrb.mxu3 %v11068_v63  ;;  %v12879_v14 = vld [vmem:[%s19731_s1 + $0x170c] sm:$0xf]  ;;  %v11001_v5 = vld [vmem:[%s19731_s1 + $0x1718] sm:$0xf0]  ;;  %v7583_v63 = vpop.f32.mrf.mxu3 }
 0x3b8   :  { %7797 = vmatpush.bf16.msrb.mxu0 %v10668_v58  ;;  %v12939_v26 = vld [vmem:[%s19731_s1 + $0x18ec] sm:$0xf]  ;;  %v11241_v34 = vld [vmem:[%s19731_s1 + $0x18f8] sm:$0xf0]  ;;  %v11004_v11 = vor.u32 %v12879_v14, %v11001_v5 }
 0x3b9   :  { %7810 = vmatpush.bf16.msrb.mxu1 %v10796_v7  ;;  %v12971_v54 = vld [vmem:[%s19731_s1 + $0x19ec] sm:$0xf]  ;;  %v11369_v43 = vld [vmem:[%s19731_s1 + $0x19f8] sm:$0xf0]  ;;  %v10748_v7 = vor.u32 %v12815_v51, %v10745_v0  ;;  %v11244_v57 = vor.u32 %v12939_v26, %v11241_v34 }
 0x3ba   :  { %7823 = vmatpush.bf16.msrb.mxu2 %v10924_v47  ;;  %v13003_v48 = vld [vmem:[%s19731_s1 + $0x1aec] sm:$0xf]  ;;  %v11497_v58 = vld [vmem:[%s19731_s1 + $0x1af8] sm:$0xf0]  ;;  %v10876_v47 = vor.u32 %v12847_v44, %v10873_v1 }
 0x3bb   :  { %7836 = vmatpush.bf16.msrb.mxu3 %v11052_v55  ;;  %v13035_v3 = vld [vmem:[%s19731_s1 + $0x1bec] sm:$0xf]  ;;  %v11625_v23 = vld [vmem:[%s19731_s1 + $0x1bf8] sm:$0xf0]  ;;  %v11372_v55 = vor.u32 %v12971_v54, %v11369_v43  ;;  %v11500_v4 = vor.u32 %v13003_v48, %v11497_v58 }
 0x3bc   :  { %7798 = vmatpush.bf16.msrb.mxu0 %v10652_v6  ;;  %v12935_v28 = vld [vmem:[%s19731_s1 + $0x18cc] sm:$0xf]  ;;  %v11225_v31 = vld [vmem:[%s19731_s1 + $0x18d8] sm:$0xf0]  ;;  %v11628_v35 = vor.u32 %v13035_v3, %v11625_v23 }
 0x3bd   :  { %7811 = vmatpush.bf16.msrb.mxu1 %v10780_v30  ;;  %v12967_v40 = vld [vmem:[%s19731_s1 + $0x19cc] sm:$0xf]  ;;  %v11353_v25 = vld [vmem:[%s19731_s1 + $0x19d8] sm:$0xf0] }
 0x3be   :  { %7824 = vmatpush.bf16.msrb.mxu2 %v10908_v41  ;;  %v12999_v38 = vld [vmem:[%s19731_s1 + $0x1acc] sm:$0xf]  ;;  %v11481_v6 = vld [vmem:[%s19731_s1 + $0x1ad8] sm:$0xf0]  ;;  %v11228_v41 = vor.u32 %v12935_v28, %v11225_v31  ;;  %v11356_v33 = vor.u32 %v12967_v40, %v11353_v25 }
 0x3bf   :  { %7837 = vmatpush.bf16.msrb.mxu3 %v11036_v60  ;;  %v13031_v29 = vld [vmem:[%s19731_s1 + $0x1bcc] sm:$0xf]  ;;  %v11609_v30 = vld [vmem:[%s19731_s1 + $0x1bd8] sm:$0xf0]  ;;  %v11484_v37 = vor.u32 %v12999_v38, %v11481_v6 }
 0x3c0   :  { %7799 = vmatpush.bf16.msrb.mxu0 %v10636_v24  ;;  %v12931_v42 = vld [vmem:[%s19731_s1 + $0x18ac] sm:$0xf]  ;;  %v11209_v15 = vld [vmem:[%s19731_s1 + $0x18b8] sm:$0xf0]  ;;  %v11612_v19 = vor.u32 %v13031_v29, %v11609_v30 }
 0x3c1   :  { %7812 = vmatpush.bf16.msrb.mxu1 %v10764_v20  ;;  %v12963_v60 = vld [vmem:[%s19731_s1 + $0x19ac] sm:$0xf]  ;;  %v11337_v45 = vld [vmem:[%s19731_s1 + $0x19b8] sm:$0xf0]  ;;  %v11212_v24 = vor.u32 %v12931_v42, %v11209_v15 }
 0x3c2   :  { %7825 = vmatpush.bf16.msrb.mxu2 %v10892_v59  ;;  %v12995_v46 = vld [vmem:[%s19731_s1 + $0x1aac] sm:$0xf]  ;;  %v11465_v21 = vld [vmem:[%s19731_s1 + $0x1ab8] sm:$0xf0]  ;;  %v11340_v62 = vor.u32 %v12963_v60, %v11337_v45 }
 0x3c3   :  { %7838 = vmatpush.bf16.msrb.mxu3 %v11020_v36  ;;  %v11593_v49 = vld [vmem:[%s19731_s1 + $0x1bb8] sm:$0xf0]  ;;  %v11468_v56 = vor.u32 %v12995_v46, %v11465_v21  ;;  %v12959_v20 = vld [vmem:[%s19731_s1 + $0x198c] sm:$0xf] }
 0x3c4   :  { %7800 = vmatpush.bf16.msrb.mxu0 %v10620_v61  ;;  %v11321_v59 = vld [vmem:[%s19731_s1 + $0x1998] sm:$0xf0]  ;;  %v12991_v51 = vld [vmem:[%s19731_s1 + $0x1a8c] sm:$0xf]  ;;  %v7594_v1 = vpop.f32.mrf.mxu0 }
 0x3c5   :  { %7813 = vmatpush.bf16.msrb.mxu1 %v10748_v7  ;;  %v11449_v0 = vld [vmem:[%s19731_s1 + $0x1a98] sm:$0xf0]  ;;  %v13023_v44 = vld [vmem:[%s19731_s1 + $0x1b8c] sm:$0xf]  ;;  %v11324_v14 = vor.u32 %v12959_v20, %v11321_v59  ;;  %v7595_v54 = vadd.f32 %v7594_v1, %v19267_v52  ;;  %v7607_v61 = vpop.f32.mrf.mxu1 }
 0x3c6   :  { %7826 = vmatpush.bf16.msrb.mxu2 %v10876_v47  ;;  %v11577_v17 = vld [vmem:[%s19731_s1 + $0x1b98] sm:$0xf0]  ;;  %v11452_v5 = vor.u32 %v12991_v51, %v11449_v0  ;;  %v12923_v63 = vld [vmem:[%s19731_s1 + $0x186c] sm:$0xf] }
 0x3c7   :  { %7839 = vmatpush.bf16.msrb.mxu3 %v11004_v11  ;;  %7801 = vmatmul.bf16.vlgmr.msrb.gmra.mxu0 %v14471_v8  ;;  %v13027_v8 = vld [vmem:[%s19731_s1 + $0x1bac] sm:$0xf]  ;;  %v11177_v26 = vld [vmem:[%s19731_s1 + $0x1878] sm:$0xf0]  ;;  %v11580_v43 = vor.u32 %v13023_v44, %v11577_v17  ;;  %v7608_v3 = vadd.f32 %v7607_v61, %v7595_v54 }
 0x3c8   :  { %7845 = vmatpush.bf16.msra.mxu0 %v11244_v57  ;;  %7814 = vmatmul.bf16.vlgmr.msrb.gmra.mxu1 %v14484_v13  ;;  %v11193_v13 = vld [vmem:[%s19731_s1 + $0x1898] sm:$0xf0]  ;;  %v12955_v34 = vld [vmem:[%s19731_s1 + $0x196c] sm:$0xf]  ;;  %v11180_v23 = vor.u32 %v12923_v63, %v11177_v26 }
 0x3c9   :  { %7858 = vmatpush.bf16.msra.mxu1 %v11372_v55  ;;  %7827 = vmatmul.bf16.vlgmr.msrb.gmra.mxu2 %v14482_v12  ;;  %v12927_v12 = vld [vmem:[%s19731_s1 + $0x188c] sm:$0xf]  ;;  %v11305_v48 = vld [vmem:[%s19731_s1 + $0x1978] sm:$0xf0] }
 0x3ca   :  { %7871 = vmatpush.bf16.msra.mxu2 %v11500_v4  ;;  %7840 = vmatmul.bf16.vlgmr.msrb.gmra.mxu3 %v14492_v16  ;;  %v11596_v16 = vor.u32 %v13027_v8, %v11593_v49  ;;  %v11196_v36 = vor.u32 %v12927_v12, %v11193_v13  ;;  %v12987_v58 = vld [vmem:[%s19731_s1 + $0x1a6c] sm:$0xf]  ;;  %v11433_v7 = vld [vmem:[%s19731_s1 + $0x1a78] sm:$0xf0]  ;;  %v11308_v11 = vor.u32 %v12955_v34, %v11305_v48 }
 0x3cb   :  { %7884 = vmatpush.bf16.msra.mxu3 %v11628_v35  ;;  %v13019_v47 = vld [vmem:[%s19731_s1 + $0x1b6c] sm:$0xf]  ;;  %v11561_v52 = vld [vmem:[%s19731_s1 + $0x1b78] sm:$0xf0]  ;;  %v11436_v57 = vor.u32 %v12987_v58, %v11433_v7 }
 0x3cc   :  { %7846 = vmatpush.bf16.msra.mxu0 %v11228_v41  ;;  %v12919_v55 = vld [vmem:[%s19731_s1 + $0x184c] sm:$0xf]  ;;  %v11161_v4 = vld [vmem:[%s19731_s1 + $0x1858] sm:$0xf0]  ;;  %v7620_v31 = vpop.f32.mrf.mxu2  ;;  %v11564_v40 = vor.u32 %v13019_v47, %v11561_v52  ;;  %v7596_v42 = vpop.f32.mrf.mxu0 }
 0x3cd   :  { %7859 = vmatpush.bf16.msra.mxu1 %v11356_v33  ;;  %v12951_v28 = vld [vmem:[%s19731_s1 + $0x194c] sm:$0xf]  ;;  %v11289_v35 = vld [vmem:[%s19731_s1 + $0x1958] sm:$0xf0]  ;;  %v7621_v6 = vadd.f32 %v7620_v31, %v7608_v3  ;;  %v7633_v29 = vpop.f32.mrf.mxu3  ;;  %v11164_v33 = vor.u32 %v12919_v55, %v11161_v4  ;;  %v7609_v21 = vpop.f32.mrf.mxu1 }
 0x3ce   :  { %7872 = vmatpush.bf16.msra.mxu2 %v11484_v37  ;;  %v12983_v25 = vld [vmem:[%s19731_s1 + $0x1a4c] sm:$0xf]  ;;  %v11417_v38 = vld [vmem:[%s19731_s1 + $0x1a58] sm:$0xf0]  ;;  %v11292_v15 = vor.u32 %v12951_v28, %v11289_v35 }
 0x3cf   :  { %7885 = vmatpush.bf16.msra.mxu3 %v11612_v19  ;;  %v13015_v30 = vld [vmem:[%s19731_s1 + $0x1b4c] sm:$0xf]  ;;  %v11545_v41 = vld [vmem:[%s19731_s1 + $0x1b58] sm:$0xf0]  ;;  %v19466_v37 = vadd.f32 %v7633_v29, %v7621_v6  ;;  %v11420_v60 = vor.u32 %v12983_v25, %v11417_v38 }
 0x3d0   :  { %7847 = vmatpush.bf16.msra.mxu0 %v11212_v24  ;;  %v12915_v19 = vld [vmem:[%s19731_s1 + $0x182c] sm:$0xf]  ;;  %v11145_v45 = vld [vmem:[%s19731_s1 + $0x1838] sm:$0xf0]  ;;  %v11548_v8 = vor.u32 %v13015_v30, %v11545_v41 }
 0x3d1   :  { %7860 = vmatpush.bf16.msra.mxu1 %v11340_v62  ;;  %v12947_v46 = vld [vmem:[%s19731_s1 + $0x192c] sm:$0xf]  ;;  %v11273_v49 = vld [vmem:[%s19731_s1 + $0x1938] sm:$0xf0]  ;;  %v11148_v13 = vor.u32 %v12915_v19, %v11145_v45 }
 0x3d2   :  { %7873 = vmatpush.bf16.msra.mxu2 %v11468_v56  ;;  %v12979_v24 = vld [vmem:[%s19731_s1 + $0x1a2c] sm:$0xf]  ;;  %v11401_v62 = vld [vmem:[%s19731_s1 + $0x1a38] sm:$0xf0]  ;;  %v11276_v59 = vor.u32 %v12947_v46, %v11273_v49 }
 0x3d3   :  { %7886 = vmatpush.bf16.msra.mxu3 %v11596_v16  ;;  %v13011_v56 = vld [vmem:[%s19731_s1 + $0x1b2c] sm:$0xf]  ;;  %v11529_v12 = vld [vmem:[%s19731_s1 + $0x1b38] sm:$0xf0]  ;;  %v11404_v51 = vor.u32 %v12979_v24, %v11401_v62 }
 0x3d4   :  { %7848 = vmatpush.bf16.msra.mxu0 %v11196_v36  ;;  %v12911_v20 = vld [vmem:[%s19731_s1 + $0x180c] sm:$0xf]  ;;  %v11129_v16 = vld [vmem:[%s19731_s1 + $0x1818] sm:$0xf0]  ;;  %v7622_v36 = vpop.f32.mrf.mxu2  ;;  %v11532_v1 = vor.u32 %v13011_v56, %v11529_v12 }
 0x3d5   :  { %7861 = vmatpush.bf16.msra.mxu1 %v11324_v14  ;;  %v12943_v0 = vld [vmem:[%s19731_s1 + $0x190c] sm:$0xf]  ;;  %v11257_v44 = vld [vmem:[%s19731_s1 + $0x1918] sm:$0xf0]  ;;  %v7635_v26 = vpop.f32.mrf.mxu3 }
 0x3d6   :  { %7874 = vmatpush.bf16.msra.mxu2 %v11452_v5  ;;  %v12975_v17 = vld [vmem:[%s19731_s1 + $0x1a0c] sm:$0xf]  ;;  %v11385_v14 = vld [vmem:[%s19731_s1 + $0x1a18] sm:$0xf0]  ;;  %v11260_v47 = vor.u32 %v12943_v0, %v11257_v44 }
 0x3d7   :  { %7887 = vmatpush.bf16.msra.mxu3 %v11580_v43  ;;  %v13007_v5 = vld [vmem:[%s19731_s1 + $0x1b0c] sm:$0xf]  ;;  %v11513_v63 = vld [vmem:[%s19731_s1 + $0x1b18] sm:$0xf0]  ;;  %v11132_v43 = vor.u32 %v12911_v20, %v11129_v16  ;;  %v11388_v52 = vor.u32 %v12975_v17, %v11385_v14 }
 0x3d8   :  { %7849 = vmatpush.bf16.msra.mxu0 %v11180_v23  ;;  %v13067_v34 = vld [vmem:[%s19731_s1 + $0x1cec] sm:$0xf]  ;;  %v11753_v54 = vld [vmem:[%s19731_s1 + $0x1cf8] sm:$0xf0] }
 0x3d9   :  { %7862 = vmatpush.bf16.msra.mxu1 %v11308_v11  ;;  %v13099_v61 = vld [vmem:[%s19731_s1 + $0x1dec] sm:$0xf]  ;;  %v11881_v48 = vld [vmem:[%s19731_s1 + $0x1df8] sm:$0xf0]  ;;  %v11516_v11 = vor.u32 %v13007_v5, %v11513_v63 }
 0x3da   :  { %7875 = vmatpush.bf16.msra.mxu2 %v11436_v57  ;;  %v13131_v58 = vld [vmem:[%s19731_s1 + $0x1eec] sm:$0xf]  ;;  %v12009_v7 = vld [vmem:[%s19731_s1 + $0x1ef8] sm:$0xf0]  ;;  %v11756_v57 = vor.u32 %v13067_v34, %v11753_v54  ;;  %v11884_v55 = vor.u32 %v13099_v61, %v11881_v48 }
 0x3db   :  { %7888 = vmatpush.bf16.msra.mxu3 %v11564_v40  ;;  %v13163_v3 = vld [vmem:[%s19731_s1 + $0x1fec] sm:$0xf]  ;;  %v12137_v23 = vld [vmem:[%s19731_s1 + $0x1ff8] sm:$0xf0]  ;;  %v12012_v4 = vor.u32 %v13131_v58, %v12009_v7 }
 0x3dc   :  { %7850 = vmatpush.bf16.msra.mxu0 %v11164_v33  ;;  %v13063_v28 = vld [vmem:[%s19731_s1 + $0x1ccc] sm:$0xf]  ;;  %v11737_v31 = vld [vmem:[%s19731_s1 + $0x1cd8] sm:$0xf0]  ;;  %v12140_v35 = vor.u32 %v13163_v3, %v12137_v23 }
 0x3dd   :  { %7863 = vmatpush.bf16.msra.mxu1 %v11292_v15  ;;  %v13095_v40 = vld [vmem:[%s19731_s1 + $0x1dcc] sm:$0xf]  ;;  %v11865_v25 = vld [vmem:[%s19731_s1 + $0x1dd8] sm:$0xf0]  ;;  %v11740_v41 = vor.u32 %v13063_v28, %v11737_v31 }
 0x3de   :  { %7876 = vmatpush.bf16.msra.mxu2 %v11420_v60  ;;  %v13127_v38 = vld [vmem:[%s19731_s1 + $0x1ecc] sm:$0xf]  ;;  %v11993_v6 = vld [vmem:[%s19731_s1 + $0x1ed8] sm:$0xf0]  ;;  %v11868_v33 = vor.u32 %v13095_v40, %v11865_v25 }
 0x3df   :  { %7889 = vmatpush.bf16.msra.mxu3 %v11548_v8  ;;  %v13159_v29 = vld [vmem:[%s19731_s1 + $0x1fcc] sm:$0xf]  ;;  %v12121_v30 = vld [vmem:[%s19731_s1 + $0x1fd8] sm:$0xf0]  ;;  %v11996_v42 = vor.u32 %v13127_v38, %v11993_v6 }
 0x3e0   :  { %7851 = vmatpush.bf16.msra.mxu0 %v11148_v13  ;;  %v13059_v15 = vld [vmem:[%s19731_s1 + $0x1cac] sm:$0xf]  ;;  %v11721_v60 = vld [vmem:[%s19731_s1 + $0x1cb8] sm:$0xf0]  ;;  %v12124_v45 = vor.u32 %v13159_v29, %v12121_v30 }
 0x3e1   :  { %7864 = vmatpush.bf16.msra.mxu1 %v11276_v59  ;;  %v13091_v19 = vld [vmem:[%s19731_s1 + $0x1dac] sm:$0xf]  ;;  %v11849_v46 = vld [vmem:[%s19731_s1 + $0x1db8] sm:$0xf0]  ;;  %v11724_v24 = vor.u32 %v13059_v15, %v11721_v60 }
 0x3e2   :  { %7877 = vmatpush.bf16.msra.mxu2 %v11404_v51  ;;  %v13123_v21 = vld [vmem:[%s19731_s1 + $0x1eac] sm:$0xf]  ;;  %v11977_v8 = vld [vmem:[%s19731_s1 + $0x1eb8] sm:$0xf0]  ;;  %v11852_v62 = vor.u32 %v13091_v19, %v11849_v46 }
 0x3e3   :  { %7890 = vmatpush.bf16.msra.mxu3 %v11532_v1  ;;  %v12105_v49 = vld [vmem:[%s19731_s1 + $0x1fb8] sm:$0xf0]  ;;  %v11980_v56 = vor.u32 %v13123_v21, %v11977_v8  ;;  %v13087_v12 = vld [vmem:[%s19731_s1 + $0x1d8c] sm:$0xf] }
 0x3e4   :  { %7852 = vmatpush.bf16.msra.mxu0 %v11132_v43  ;;  %v11833_v13 = vld [vmem:[%s19731_s1 + $0x1d98] sm:$0xf0]  ;;  %v13119_v20 = vld [vmem:[%s19731_s1 + $0x1e8c] sm:$0xf]  ;;  %v7646_v59 = vpop.f32.mrf.mxu0 }
 0x3e5   :  { %7865 = vmatpush.bf16.msra.mxu1 %v11260_v47  ;;  %v11961_v16 = vld [vmem:[%s19731_s1 + $0x1e98] sm:$0xf0]  ;;  %v13151_v51 = vld [vmem:[%s19731_s1 + $0x1f8c] sm:$0xf]  ;;  %v7647_v44 = vadd.f32 %v7646_v59, %v19466_v37  ;;  %v7659_v36 = vpop.f32.mrf.mxu1  ;;  %v11836_v1 = vor.u32 %v13087_v12, %v11833_v13 }
 0x3e6   :  { %7878 = vmatpush.bf16.msra.mxu2 %v11388_v52  ;;  %v12089_v0 = vld [vmem:[%s19731_s1 + $0x1f98] sm:$0xf0]  ;;  %v11964_v14 = vor.u32 %v13119_v20, %v11961_v16  ;;  %v13051_v5 = vld [vmem:[%s19731_s1 + $0x1c6c] sm:$0xf] }
 0x3e7   :  { %7891 = vmatpush.bf16.msra.mxu3 %v11516_v11  ;;  %7853 = vmatmul.bf16.vlgmr.msra.gmra.mxu0 %v14684_v2  ;;  %v13155_v2 = vld [vmem:[%s19731_s1 + $0x1fac] sm:$0xf]  ;;  %v11689_v63 = vld [vmem:[%s19731_s1 + $0x1c78] sm:$0xf0]  ;;  %v12092_v37 = vor.u32 %v13151_v51, %v12089_v0  ;;  %v7660_v34 = vadd.f32 %v7659_v36, %v7647_v44 }
 0x3e8   :  { %7897 = vmatpush.bf16.msrb.mxu0 %v11756_v57  ;;  %7866 = vmatmul.bf16.vlgmr.msra.gmra.mxu1 %v14697_v10  ;;  %v11705_v10 = vld [vmem:[%s19731_s1 + $0x1c98] sm:$0xf0]  ;;  %v13083_v26 = vld [vmem:[%s19731_s1 + $0x1d6c] sm:$0xf]  ;;  %v11692_v7 = vor.u32 %v13051_v5, %v11689_v63 }
 0x3e9   :  { %7910 = vmatpush.bf16.msrb.mxu1 %v11884_v55  ;;  %7879 = vmatmul.bf16.vlgmr.msra.gmra.mxu2 %v14695_v9  ;;  %v13055_v9 = vld [vmem:[%s19731_s1 + $0x1c8c] sm:$0xf]  ;;  %v11817_v54 = vld [vmem:[%s19731_s1 + $0x1d78] sm:$0xf0] }
 0x3ea   :  { %7923 = vmatpush.bf16.msrb.mxu2 %v12012_v4  ;;  %7892 = vmatmul.bf16.vlgmr.msra.gmra.mxu3 %v14705_v22  ;;  %v12108_v22 = vor.u32 %v13155_v2, %v12105_v49  ;;  %v11708_v17 = vor.u32 %v13055_v9, %v11705_v10  ;;  %v13115_v61 = vld [vmem:[%s19731_s1 + $0x1e6c] sm:$0xf]  ;;  %v11945_v43 = vld [vmem:[%s19731_s1 + $0x1e78] sm:$0xf0]  ;;  %v11820_v47 = vor.u32 %v13083_v26, %v11817_v54 }
 0x3eb   :  { %7936 = vmatpush.bf16.msrb.mxu3 %v12140_v35  ;;  %v13147_v48 = vld [vmem:[%s19731_s1 + $0x1f6c] sm:$0xf]  ;;  %v12073_v58 = vld [vmem:[%s19731_s1 + $0x1f78] sm:$0xf0]  ;;  %v11948_v52 = vor.u32 %v13115_v61, %v11945_v43 }
 0x3ec   :  { %7898 = vmatpush.bf16.msrb.mxu0 %v11740_v41  ;;  %v13047_v3 = vld [vmem:[%s19731_s1 + $0x1c4c] sm:$0xf]  ;;  %v11673_v23 = vld [vmem:[%s19731_s1 + $0x1c58] sm:$0xf0]  ;;  %v12076_v57 = vor.u32 %v13147_v48, %v12073_v58  ;;  %v7672_v55 = vpop.f32.mrf.mxu2  ;;  %v7648_v6 = vpop.f32.mrf.mxu0 }
 0x3ed   :  { %7911 = vmatpush.bf16.msrb.mxu1 %v11868_v33  ;;  %v13079_v11 = vld [vmem:[%s19731_s1 + $0x1d4c] sm:$0xf]  ;;  %v11801_v4 = vld [vmem:[%s19731_s1 + $0x1d58] sm:$0xf0]  ;;  %v7673_v40 = vadd.f32 %v7672_v55, %v7660_v34  ;;  %v7685_v35 = vpop.f32.mrf.mxu3  ;;  %v11676_v29 = vor.u32 %v13047_v3, %v11673_v23  ;;  %v7661_v30 = vpop.f32.mrf.mxu1 }
 0x3ee   :  { %7924 = vmatpush.bf16.msrb.mxu2 %v11996_v42  ;;  %v13111_v28 = vld [vmem:[%s19731_s1 + $0x1e4c] sm:$0xf]  ;;  %v11929_v31 = vld [vmem:[%s19731_s1 + $0x1e58] sm:$0xf0]  ;;  %v11804_v33 = vor.u32 %v13079_v11, %v11801_v4 }
 0x3ef   :  { %7937 = vmatpush.bf16.msrb.mxu3 %v12124_v45  ;;  %v13143_v25 = vld [vmem:[%s19731_s1 + $0x1f4c] sm:$0xf]  ;;  %v12057_v38 = vld [vmem:[%s19731_s1 + $0x1f58] sm:$0xf0]  ;;  %v7686_v41 = vadd.f32 %v7685_v35, %v7673_v40  ;;  %v11932_v42 = vor.u32 %v13111_v28, %v11929_v31 }
 0x3f0   :  { %7899 = vmatpush.bf16.msrb.mxu0 %v11724_v24  ;;  %v13043_v15 = vld [vmem:[%s19731_s1 + $0x1c2c] sm:$0xf]  ;;  %v11657_v60 = vld [vmem:[%s19731_s1 + $0x1c38] sm:$0xf0]  ;;  %v12060_v45 = vor.u32 %v13143_v25, %v12057_v38 }
 0x3f1   :  { %7912 = vmatpush.bf16.msrb.mxu1 %v11852_v62  ;;  %v13075_v19 = vld [vmem:[%s19731_s1 + $0x1d2c] sm:$0xf]  ;;  %v11785_v46 = vld [vmem:[%s19731_s1 + $0x1d38] sm:$0xf0]  ;;  %v11660_v24 = vor.u32 %v13043_v15, %v11657_v60 }
 0x3f2   :  { %7925 = vmatpush.bf16.msrb.mxu2 %v11980_v56  ;;  %v13107_v21 = vld [vmem:[%s19731_s1 + $0x1e2c] sm:$0xf]  ;;  %v11913_v8 = vld [vmem:[%s19731_s1 + $0x1e38] sm:$0xf0]  ;;  %v11788_v62 = vor.u32 %v13075_v19, %v11785_v46 }
 0x3f3   :  { %7938 = vmatpush.bf16.msrb.mxu3 %v12108_v22  ;;  %v13139_v2 = vld [vmem:[%s19731_s1 + $0x1f2c] sm:$0xf]  ;;  %v12041_v49 = vld [vmem:[%s19731_s1 + $0x1f38] sm:$0xf0]  ;;  %v11916_v56 = vor.u32 %v13107_v21, %v11913_v8 }
 0x3f4   :  { %7900 = vmatpush.bf16.msrb.mxu0 %v11708_v17  ;;  %v13039_v9 = vld [vmem:[%s19731_s1 + $0x1c0c] sm:$0xf]  ;;  %v11641_v10 = vld [vmem:[%s19731_s1 + $0x1c18] sm:$0xf0]  ;;  %v12044_v22 = vor.u32 %v13139_v2, %v12041_v49  ;;  %v7674_v59 = vpop.f32.mrf.mxu2 }
 0x3f5   :  { %7913 = vmatpush.bf16.msrb.mxu1 %v11836_v1  ;;  %v13071_v12 = vld [vmem:[%s19731_s1 + $0x1d0c] sm:$0xf]  ;;  %v11769_v13 = vld [vmem:[%s19731_s1 + $0x1d18] sm:$0xf0]  ;;  %v7687_v44 = vpop.f32.mrf.mxu3  ;;  %v11644_v17 = vor.u32 %v13039_v9, %v11641_v10  ;;  %v13167_v9 = vld [vmem:[%s19733_s2 + $0x10] sm:$0xff] }
 0x3f6   :  { %7926 = vmatpush.bf16.msrb.mxu2 %v11964_v14  ;;  %v13103_v20 = vld [vmem:[%s19731_s1 + $0x1e0c] sm:$0xf]  ;;  %v11897_v16 = vld [vmem:[%s19731_s1 + $0x1e18] sm:$0xf0]  ;;  %v11772_v36 = vor.u32 %v13071_v12, %v11769_v13  ;;  %v7998_v10 = vmul.f32 %v13167_v9, %v13167_v9  ;;  %v7965_v12 = vrot.slane %v13167_v9, 4 }
 0x3f7   :  { %7939 = vmatpush.bf16.msrb.mxu3 %v12092_v37  ;;  %v13135_v51 = vld [vmem:[%s19731_s1 + $0x1f0c] sm:$0xf]  ;;  %v12025_v0 = vld [vmem:[%s19731_s1 + $0x1f18] sm:$0xf0]  ;;  %v11900_v1 = vor.u32 %v13103_v20, %v11897_v16 }
 0x3f8   :  { %7901 = vmatpush.bf16.msrb.mxu0 %v11692_v7  ;;  %v12028_v14 = vor.u32 %v13135_v51, %v12025_v0  ;;  %v8012_v16 = vrot.slane %v7998_v10, 4  ;;  %v7966_v51 = vadd.f32 %v13167_v9, %v7965_v12 }
 0x3f9   :  { %7914 = vmatpush.bf16.msrb.mxu1 %v11820_v47 }
 0x3fa   :  { %7927 = vmatpush.bf16.msrb.mxu2 %v11948_v52  ;;  %v8013_v0 = vadd.f32 %v8012_v16, %v7998_v10 }
 0x3fb   :  { %7940 = vmatpush.bf16.msrb.mxu3 %v12076_v57 }
 0x3fc   :  { %7902 = vmatpush.bf16.msrb.mxu0 %v11676_v29 }
 0x3fd   :  { %7915 = vmatpush.bf16.msrb.mxu1 %v11804_v33 }
 0x3fe   :  { %7928 = vmatpush.bf16.msrb.mxu2 %v11932_v42 }
 0x3ff   :  { %7941 = vmatpush.bf16.msrb.mxu3 %v12060_v45 }
 0x400   :  { %7903 = vmatpush.bf16.msrb.mxu0 %v11660_v24 }
 0x401   :  { %7916 = vmatpush.bf16.msrb.mxu1 %v11788_v62 }
 0x402   :  { %7929 = vmatpush.bf16.msrb.mxu2 %v11916_v56 }
 0x403   :  { %7942 = vmatpush.bf16.msrb.mxu3 %v12044_v22 }
 0x404   :  { %7904 = vmatpush.bf16.msrb.mxu0 %v11644_v17  ;;  %v7698_v5 = vpop.f32.mrf.mxu0 }
 0x405   :  { %7917 = vmatpush.bf16.msrb.mxu1 %v11772_v36  ;;  %v7699_v63 = vadd.f32 %v7698_v5, %v7686_v41  ;;  %v7711_v26 = vpop.f32.mrf.mxu1  ;;  %v7967_v36 = vrot.slane %v7966_v51, 2 }
 0x406   :  { %7930 = vmatpush.bf16.msrb.mxu2 %v11900_v1 }
 0x407   :  { %7943 = vmatpush.bf16.msrb.mxu3 %v12028_v14  ;;  %7905 = vmatmul.bf16.vlgmr.msrb.gmra.mxu0 %v14897_v18  ;;  %v7712_v37 = vadd.f32 %v7711_v26, %v7699_v63  ;;  %v8014_v26 = vrot.slane %v8013_v0, 2 }
 0x408   :  { %7918 = vmatmul.bf16.vlgmr.msrb.gmra.mxu1 %v14910_v32 }
 0x409   :  { %7931 = vmatmul.bf16.vlgmr.msrb.gmra.mxu2 %v14908_v27 }
 0x40a   :  { %7944 = vmatmul.bf16.vlgmr.msrb.gmra.mxu3 %v14918_v39 }
 0x40c   :  { %v7724_v34 = vpop.f32.mrf.mxu2  ;;  %v7700_v43 = vpop.f32.mrf.mxu0 }
 0x40d   :  { %v7725_v54 = vadd.f32 %v7724_v34, %v7712_v37  ;;  %v7737_v61 = vpop.f32.mrf.mxu3  ;;  %v7713_v48 = vpop.f32.mrf.mxu1  ;;  %v7968_v34 = vadd.f32 %v7967_v36, %v7966_v51  ;;  %v8015_v43 = vadd.f32 %v8014_v26, %v8013_v0 }
 0x40f   :  { %v7738_v58 = vadd.f32 %v7737_v61, %v7725_v54 }
 0x414   :  { %v7726_v7 = vpop.f32.mrf.mxu2 }
 0x415   :  { %v7739_v47 = vpop.f32.mrf.mxu3 }
 0x416   :  { %v7969_v47 = vrot.slane %v7968_v34, 1 }
 0x424   :  { %v7750_v52 = vpop.f32.mrf.mxu0 }
 0x425   :  { %v7751_v18 = vadd.f32 %v7750_v52, %v7738_v58  ;;  %v7763_v3 = vpop.f32.mrf.mxu1 }
 0x427   :  { %v7764_v32 = vadd.f32 %v7763_v3, %v7751_v18 }
 0x42c   :  { %v7776_v23 = vpop.f32.mrf.mxu2  ;;  %v7752_v39 = vpop.f32.mrf.mxu0 }
 0x42d   :  { %v7777_v27 = vadd.f32 %v7776_v23, %v7764_v32  ;;  %v7789_v11 = vpop.f32.mrf.mxu3  ;;  %v7765_v57 = vpop.f32.mrf.mxu1  ;;  %v8016_v32 = vrot.slane %v8015_v43, 1 }
 0x42f   :  { %v7790_v55 = vadd.f32 %v7789_v11, %v7777_v27  ;;  %v7970_v11 = vadd.f32 %v7969_v47, %v7968_v34 }
 0x434   :  { %v7778_v4 = vpop.f32.mrf.mxu2 }
 0x435   :  { %v7791_v28 = vpop.f32.mrf.mxu3  ;;  %v8017_v4 = vadd.f32 %v8016_v32, %v8015_v43 }
 0x444   :  { %v7802_v31 = vpop.f32.mrf.mxu0 }
 0x445   :  { %v7815_v40 = vpop.f32.mrf.mxu1  ;;  %v7803_v42 = vadd.f32 %v7802_v31, %v7790_v55  ;;  %v7991_v55 = vlaneseq }
 0x447   :  { %v7816_v46 = vadd.f32 %v7815_v40, %v7803_v42  ;;  %v7982_v40 = vrot.slane %v7970_v11, 6  ;;  %vm7993_vm3 = vcmp.lt.s32.totalorder %v7991_v55, 512 }
 0x44c   :  { %v7828_v35 = vpop.f32.mrf.mxu2  ;;  %v7804_v38 = vpop.f32.mrf.mxu0 }
 0x44d   :  { %v7841_v25 = vpop.f32.mrf.mxu3  ;;  %v7817_v6 = vpop.f32.mrf.mxu1  ;;  %v7829_v21 = vadd.f32 %v7828_v35, %v7816_v46  ;;  %v8029_v38 = vrot.slane %v8017_v4, 6 }
 0x44f   :  { %v7842_v49 = vadd.f32 %v7841_v25, %v7829_v21 }
 0x454   :  { %v7830_v29 = vpop.f32.mrf.mxu2 }
 0x455   :  { %v7843_v30 = vpop.f32.mrf.mxu3 }
 0x464   :  { %v7854_v41 = vpop.f32.mrf.mxu0 }
 0x465   :  { %v7867_v33 = vpop.f32.mrf.mxu1  ;;  %v7855_v24 = vadd.f32 %v7854_v41, %v7842_v49 }
 0x467   :  { %v7868_v62 = vadd.f32 %v7867_v33, %v7855_v24 }
 0x46c   :  { %v7880_v15 = vpop.f32.mrf.mxu2  ;;  %v7856_v19 = vpop.f32.mrf.mxu0 }
 0x46d   :  { %v7893_v60 = vpop.f32.mrf.mxu3  ;;  %v7869_v45 = vpop.f32.mrf.mxu1  ;;  %v7881_v56 = vadd.f32 %v7880_v15, %v7868_v62 }
 0x46f   :  { %v7894_v22 = vadd.f32 %v7893_v60, %v7881_v56 }
 0x474   :  { %v7882_v8 = vpop.f32.mrf.mxu2 }
 0x475   :  { %v7895_v2 = vpop.f32.mrf.mxu3 }
 0x484   :  { %v7906_v13 = vpop.f32.mrf.mxu0 }
 0x485   :  { %v7919_v20 = vpop.f32.mrf.mxu1  ;;  %v7907_v59 = vadd.f32 %v7906_v13, %v7894_v22 }
 0x487   :  { %v7920_v44 = vadd.f32 %v7919_v20, %v7907_v59 }
 0x48c   :  { %v7932_v17 = vpop.f32.mrf.mxu2  ;;  %v7908_v5 = vpop.f32.mrf.mxu0 }
 0x48d   :  { %v7933_v1 = vadd.f32 %v7932_v17, %v7920_v44  ;;  %v7945_v14 = vpop.f32.mrf.mxu3  ;;  %v7921_v63 = vpop.f32.mrf.mxu1 }
 0x48f   :  { %v7946_v37 = vadd.f32 %v7945_v14, %v7933_v1 }
 0x491   :  { %7952 = vst [vmem:[%s19733_s2 + $0x18] sm:$0xff] %v7946_v37  ;;  %v7971_v54 = vrot.slane %v7946_v37, 4  ;;  %v7999_v61 = vmul.f32 %v7946_v37, %v7946_v37 }
 0x493   :  { %v7972_v48 = vadd.f32 %v7971_v54, %v7946_v37  ;;  %v8018_v58 = vrot.slane %v7999_v61, 4 }
 0x494   :  { %v7934_v7 = vpop.f32.mrf.mxu2 }
 0x495   :  { %v7973_v52 = vrot.slane %v7972_v48, 2  ;;  %v8019_v18 = vadd.f32 %v8018_v58, %v7999_v61  ;;  %v7947_v3 = vpop.f32.mrf.mxu3 }
 0x497   :  { %v7974_v23 = vadd.f32 %v7973_v52, %v7972_v48  ;;  %v8020_v27 = vrot.slane %v8019_v18, 2 }
 0x499   :  { %v7975_v39 = vrot.slane %v7974_v23, 1  ;;  %v8021_v57 = vadd.f32 %v8020_v27, %v8019_v18 }
 0x49b   :  { %v7976_v28 = vadd.f32 %v7975_v39, %v7974_v23  ;;  %v8022_v31 = vrot.slane %v8021_v57, 1 }
 0x49d   :  { %v7983_v35 = vrot.slane %v7976_v28, 5  ;;  %v8023_v25 = vadd.f32 %v8022_v31, %v8021_v57 }
 0x49f   :  { %v7987_v6 = vsel %vm7986_vm1, %v7982_v40, %v7983_v35  ;;  %v8030_v29 = vrot.slane %v8023_v25, 5 }
 0x4a0   :  { %v7989_v30 = vsel %vm7988_vm2, %v17571_v53, %v7987_v6 }
 0x4a1   :  { %7995 = vst.msk [vmem:[%s19734_s3] ss:$2 sm:$0xf] %vm7993_vm3, %v7989_v30  ;;  %v8032_v41 = vsel %vm7986_vm1, %v8029_v38, %v8030_v29 }
 0x4a2   :  { %v8033_v33 = vsel %vm7988_vm2, %v17583_v50, %v8032_v41 }
 0x4a3   :  { %12141 = vst.msk [vmem:[%s19734_s3 + $0x1] ss:$2 sm:$0xf] %vm7993_vm3, %v8033_v33 }

</bundles_post_ra>
